<compile_context>
chip_gen: v6e
topology: v6e:2x2x1
jax: 0.10.0
libtpu: 0.0.40
codegen_flags: <defaults>
</compile_context>

<pallas_src>
import functools
import math

import jax
import jax.numpy as jnp
from jax.experimental import pallas as pl
from jax.experimental.pallas import tpu as pltpu

_LN_EPS = 1e-5


# ----------------------------- in-kernel math helpers (pure jnp on values) ------------------

def _layer_norm(z, g, b):
    mu = jnp.mean(z, axis=-1, keepdims=True)
    var = jnp.mean(jnp.square(z - mu), axis=-1, keepdims=True)
    return (z - mu) * jax.lax.rsqrt(var + _LN_EPS) * g + b


def _attention_core(q, k, v, o_w, o_b, *, batch, s_q, s_k, num_heads):
    """Multi-head attention core over batch-flattened (B*S, D) activations.

    q is pre-scaled (1/sqrt(hd) folded into its projection).  Per-(batch, head) score and
    P@V matmuls run in a static loop; head outputs are lane-concatenated and a single
    (B*s_q, D) @ (D, D) output-projection GEMM follows.
    """
    d = q.shape[-1]
    hd = d // num_heads
    q16 = q.astype(jnp.bfloat16)
    k16 = k.astype(jnp.bfloat16)
    v16 = v.astype(jnp.bfloat16)

    batch_outs = []
    for b in range(batch):                                  # static loop over batch
        rq = slice(b * s_q, (b + 1) * s_q)
        rk = slice(b * s_k, (b + 1) * s_k)
        head_outs = []
        for h in range(num_heads):                          # static loop over heads
            cs = slice(h * hd, (h + 1) * hd)
            qh = q16[rq, cs]
            kh = k16[rk, cs]
            vh = v16[rk, cs]
            # q @ k^T via dot_general contracting ((1,),(1,)) — no materialized transpose.
            s = jax.lax.dot_general(qh, kh, (((1,), (1,)), ((), ())),
                                    preferred_element_type=jnp.float32)   # (s_q, s_k) f32
            s = s - jnp.max(s, axis=-1, keepdims=True)
            p = jnp.exp(s)
            p = p * pl.reciprocal(jnp.sum(p, axis=-1, keepdims=True), approx=True)
            oh = jnp.dot(p.astype(jnp.bfloat16), vh,
                         preferred_element_type=jnp.float32)              # (s_q, hd)
            head_outs.append(oh)
        batch_outs.append(jnp.concatenate(head_outs, axis=-1))            # (s_q, D)
    attn = jnp.concatenate(batch_outs, axis=0)                            # (B*s_q, D)
    out = jnp.dot(attn.astype(jnp.bfloat16), o_w,
                  preferred_element_type=jnp.float32) + o_b               # one output GEMM
    return out


def _self_attention(x, qkv_w, qkv_b, o_w, o_b, *, batch, seq, num_heads):
    d = x.shape[-1]
    qkv = jnp.dot(x.astype(jnp.bfloat16), qkv_w,
                  preferred_element_type=jnp.float32) + qkv_b             # (B*S, 3D), 1 GEMM
    return _attention_core(qkv[:, :d], qkv[:, d:2 * d], qkv[:, 2 * d:], o_w, o_b,
                           batch=batch, s_q=seq, s_k=seq, num_heads=num_heads)


def _cross_attention(y, memory_bf, q_w, q_b, kv_w, kv_b, o_w, o_b,
                     *, batch, s_q, s_k, num_heads):
    d = y.shape[-1]
    q = jnp.dot(y.astype(jnp.bfloat16), q_w,
                preferred_element_type=jnp.float32) + q_b                 # (B*Sq, D)
    kv = jnp.dot(memory_bf, kv_w,
                 preferred_element_type=jnp.float32) + kv_b               # (B*Sk, 2D), 1 GEMM
    return _attention_core(q, kv[:, :d], kv[:, d:], o_w, o_b,
                           batch=batch, s_q=s_q, s_k=s_k, num_heads=num_heads)


def _ffn(x, w1, b1, w2, b2):
    h = jnp.maximum(jnp.dot(x.astype(jnp.bfloat16), w1,
                            preferred_element_type=jnp.float32) + b1, 0.0)
    return jnp.dot(h.astype(jnp.bfloat16), w2, preferred_element_type=jnp.float32) + b2


# ----------------------------- the fused kernel ---------------------------------------------

def _transformer_kernel(src_ref, tgt_ref, pos_ref,
                        enc_qkv_w, enc_o_w, enc_w1, enc_w2, enc_vec,
                        dec_sa_qkv_w, dec_sa_o_w, dec_ca_q_w, dec_ca_kv_w, dec_ca_o_w,
                        dec_w1, dec_w2, dec_vec, final_norm,
                        out_ref, *, batch, s_src, s_tgt, num_layers, num_heads):
    d = src_ref.shape[-1]
    pos = pos_ref[...]                                     # (max_seq, D) f32, resident

    def add_pos(flat, s):
        return (flat.reshape(batch, s, d) + pos[:s, :]).reshape(batch * s, d)

    # ---------------- encoder ----------------
    x = add_pos(src_ref[...], s_src)                       # (B*S_src, D) f32
    for l in range(num_layers):                            # static unrolled loop
        ev = enc_vec[l]                                    # (8, 4D) f32 bias/LN slab
        a = _self_attention(x, enc_qkv_w[l], ev[0:1, :3 * d],
                            enc_o_w[l], ev[1:2, :d],
                            batch=batch, seq=s_src, num_heads=num_heads)
        x = _layer_norm(x + a, ev[2:3, :d], ev[3:4, :d])
        f = _ffn(x, enc_w1[l], ev[4:5, :], enc_w2[l], ev[5:6, :d])
        x = _layer_norm(x + f, ev[6:7, :d], ev[7:8, :d])
    fn = final_norm[...]                                   # (4, D) f32
    memory = _layer_norm(x, fn[0:1, :], fn[1:2, :])        # (B*S_src, D) f32
    memory_bf = memory.astype(jnp.bfloat16)                # cast once, reused per layer

    # ---------------- decoder ----------------
    y = add_pos(tgt_ref[...], s_tgt)                       # (B*S_tgt, D) f32
    for l in range(num_layers):
        dv = dec_vec[l]                                    # (13, 4D) f32 bias/LN slab
        a = _self_attention(y, dec_sa_qkv_w[l], dv[0:1, :3 * d],
                            dec_sa_o_w[l], dv[1:2, :d],
                            batch=batch, seq=s_tgt, num_heads=num_heads)
        y = _layer_norm(y + a, dv[2:3, :d], dv[3:4, :d])
        a = _cross_attention(y, memory_bf, dec_ca_q_w[l], dv[4:5, :d],
                             dec_ca_kv_w[l], dv[5:6, :2 * d],
                             dec_ca_o_w[l], dv[6:7, :d],
                             batch=batch, s_q=s_tgt, s_k=s_src, num_heads=num_heads)
        y = _layer_norm(y + a, dv[7:8, :d], dv[8:9, :d])
        f = _ffn(y, dec_w1[l], dv[9:10, :], dec_w2[l], dv[10:11, :d])
        y = _layer_norm(y + f, dv[11:12, :d], dv[12:13, :d])
    y = _layer_norm(y, fn[2:3, :], fn[3:4, :])

    out_ref[...] = y.astype(out_ref.dtype)


# ----------------------------- wrapper -------------------------------------------------------

_WEIGHT_ORDER = (
    "pos",
    "enc_qkv_w", "enc_o_w", "enc_w1", "enc_w2", "enc_vec",
    "dec_sa_qkv_w", "dec_sa_o_w", "dec_ca_q_w", "dec_ca_kv_w", "dec_ca_o_w",
    "dec_w1", "dec_w2", "dec_vec",
    "final_norm",
)


@functools.partial(jax.jit, static_argnames=("num_heads", "num_layers"))
def transformer_tsp_forward(src, tgt, packed, *, num_heads, num_layers):
    B, s_src, d = src.shape
    s_tgt = tgt.shape[1]
    # Batch-flatten wrapper-side (layout plumbing) so every projection / FFN GEMM in the
    # kernel runs over all B*S rows at once.
    src2 = src.reshape(B * s_src, d)
    tgt2 = tgt.reshape(B * s_tgt, d)
    weights = [packed[k] for k in _WEIGHT_ORDER]

    kernel = functools.partial(_transformer_kernel, batch=B, s_src=s_src, s_tgt=s_tgt,
                               num_layers=num_layers, num_heads=num_heads)

    # No grid: single kernel invocation, all inputs resident as full-array VMEM blocks.
    out = pl.pallas_call(
        kernel,
        out_shape=jax.ShapeDtypeStruct((B * s_tgt, d), src.dtype),
        compiler_params=pltpu.CompilerParams(vmem_limit_bytes=32 * 1024 * 1024),
    )(src2, tgt2, *weights)
    return out.reshape(B, s_tgt, d)


# ----------------------------- parameter init (PyTorch layout) & host-side packing ----------

def init_params(key, hidden_dim, num_layers, max_seq_length):
    """Parameters in PyTorch convention: Linear weights (out_features, in_features)."""
    d = hidden_dim
    s = 0.02

    def attn(k):
        ks = jax.random.split(k, 4)
        return {
            "wq": s * jax.random.normal(ks[0], (d, d), jnp.float32),
            "wk": s * jax.random.normal(ks[1], (d, d), jnp.float32),
            "wv": s * jax.random.normal(ks[2], (d, d), jnp.float32),
            "wo": s * jax.random.normal(ks[3], (d, d), jnp.float32),
            "bq": jnp.zeros((1, d), jnp.float32),
            "bk": jnp.zeros((1, d), jnp.float32),
            "bv": jnp.zeros((1, d), jnp.float32),
            "bo": jnp.zeros((1, d), jnp.float32),
        }

    def ffn(k):
        k1, k2 = jax.random.split(k)
        return {
            "w1": s * jax.random.normal(k1, (4 * d, d), jnp.float32),
            "b1": jnp.zeros((1, 4 * d), jnp.float32),
            "w2": s * jax.random.normal(k2, (d, 4 * d), jnp.float32),
            "b2": jnp.zeros((1, d), jnp.float32),
        }

    keys = jax.random.split(key, 3 * num_layers + 1)
    params = {
        "pos": jnp.zeros((1, max_seq_length, d), jnp.float32),  # nn.Parameter(torch.zeros(...))
        "enc_norm_g": jnp.ones((1, d), jnp.float32),
        "enc_norm_b": jnp.zeros((1, d), jnp.float32),
        "dec_norm_g": jnp.ones((1, d), jnp.float32),
        "dec_norm_b": jnp.zeros((1, d), jnp.float32),
        "enc_layers": [],
        "dec_layers": [],
    }
    ki = 1
    for _ in range(num_layers):
        lp = {"self_attn": attn(keys[ki])}
        lp.update(ffn(jax.random.fold_in(keys[ki], 7)))
        for i in (1, 2):
            lp[f"ln{i}_g"] = jnp.ones((1, d), jnp.float32)
            lp[f"ln{i}_b"] = jnp.zeros((1, d), jnp.float32)
        params["enc_layers"].append(lp)
        ki += 1
    for _ in range(num_layers):
        lp = {"self_attn": attn(keys[ki]), "cross_attn": attn(keys[ki + 1])}
        lp.update(ffn(jax.random.fold_in(keys[ki], 11)))
        for i in (1, 2, 3):
            lp[f"ln{i}_g"] = jnp.ones((1, d), jnp.float32)
            lp[f"ln{i}_b"] = jnp.zeros((1, d), jnp.float32)
        params["dec_layers"].append(lp)
        ki += 2
    return params


def pack_params(params, num_heads):
    """One-time host-side repacking:
       * Linear weights pre-transposed to (in, out) and cast to bf16 (MXU-native).
       * Q/K/V (and cross-attn K/V) packed into single GEMM weights; 1/sqrt(head_dim)
         folded into the Q projection (weight and bias).
       * Per-layer weights stacked along a leading layer axis, one array per weight class.
       * All per-layer biases / LayerNorm vectors packed into one (L, n_vec, 4D) f32 slab
         per stack (4D = 128 lanes at D=32, lane-dense), final norms into a (4, D) array.
    """
    d = params["pos"].shape[-1]
    hd = d // num_heads
    inv = 1.0 / math.sqrt(hd)
    w4 = 4 * d

    def row(v):
        v = jnp.asarray(v, jnp.float32).reshape(-1)
        return jnp.pad(v, (0, w4 - v.shape[0]))

    def enc_layer(lp):
        a = lp["self_attn"]
        qkv_w = jnp.concatenate([a["wq"].T * inv, a["wk"].T, a["wv"].T], axis=1)   # (D, 3D)
        vec = jnp.stack([
            row(jnp.concatenate([a["bq"] * inv, a["bk"], a["bv"]], axis=1)),       # 0: qkv_b
            row(a["bo"]),                                                          # 1: o_b
            row(lp["ln1_g"]), row(lp["ln1_b"]),                                    # 2,3
            row(lp["b1"]),                                                         # 4
            row(lp["b2"]),                                                         # 5
            row(lp["ln2_g"]), row(lp["ln2_b"]),                                    # 6,7
        ])
        return qkv_w, a["wo"].T, lp["w1"].T, lp["w2"].T, vec

    def dec_layer(lp):
        sa, ca = lp["self_attn"], lp["cross_attn"]
        sa_qkv_w = jnp.concatenate([sa["wq"].T * inv, sa["wk"].T, sa["wv"].T], axis=1)
        ca_kv_w = jnp.concatenate([ca["wk"].T, ca["wv"].T], axis=1)                # (D, 2D)
        vec = jnp.stack([
            row(jnp.concatenate([sa["bq"] * inv, sa["bk"], sa["bv"]], axis=1)),    # 0: sa qkv_b
            row(sa["bo"]),                                                         # 1: sa o_b
            row(lp["ln1_g"]), row(lp["ln1_b"]),                                    # 2,3
            row(ca["bq"] * inv),                                                   # 4: ca q_b
            row(jnp.concatenate([ca["bk"], ca["bv"]], axis=1)),                    # 5: ca kv_b
            row(ca["bo"]),                                                         # 6: ca o_b
            row(lp["ln2_g"]), row(lp["ln2_b"]),                                    # 7,8
            row(lp["b1"]),                                                         # 9
            row(lp["b2"]),                                                         # 10
            row(lp["ln3_g"]), row(lp["ln3_b"]),                                    # 11,12
        ])
        return (sa_qkv_w, sa["wo"].T, ca["wq"].T * inv, ca_kv_w, ca["wo"].T,
                lp["w1"].T, lp["w2"].T, vec)

    bf16 = lambda xs: jnp.stack(xs, axis=0).astype(jnp.bfloat16)
    f32s = lambda xs: jnp.stack(xs, axis=0).astype(jnp.float32)

    enc = [enc_layer(lp) for lp in params["enc_layers"]]
    dec = [dec_layer(lp) for lp in params["dec_layers"]]

    packed = {
        "pos": params["pos"][0],                                        # (max_seq, D) f32
        "enc_qkv_w": bf16([t[0] for t in enc]),
        "enc_o_w":   bf16([t[1] for t in enc]),
        "enc_w1":    bf16([t[2] for t in enc]),
        "enc_w2":    bf16([t[3] for t in enc]),
        "enc_vec":   f32s([t[4] for t in enc]),
        "dec_sa_qkv_w": bf16([t[0] for t in dec]),
        "dec_sa_o_w":   bf16([t[1] for t in dec]),
        "dec_ca_q_w":   bf16([t[2] for t in dec]),
        "dec_ca_kv_w":  bf16([t[3] for t in dec]),
        "dec_ca_o_w":   bf16([t[4] for t in dec]),
        "dec_w1":       bf16([t[5] for t in dec]),
        "dec_w2":       bf16([t[6] for t in dec]),
        "dec_vec":      f32s([t[7] for t in dec]),
        "final_norm": jnp.concatenate([params["enc_norm_g"], params["enc_norm_b"],
                                       params["dec_norm_g"], params["dec_norm_b"]],
                                      axis=0),                          # (4, D) f32
    }
    return packed


# ----------------------------- main ----------------------------------------------------------

if __name__ == "__main__":
    hidden_dim = 32
    num_heads = 4
    num_layers = 2
    max_seq_length = 16
    batch = 2
    src_len = 8
    tgt_len = 8

    key = jax.random.PRNGKey(0)
    k_src, k_tgt, k_par = jax.random.split(key, 3)
    src = jax.random.normal(k_src, (batch, src_len, hidden_dim), jnp.float32)
    tgt = jax.random.normal(k_tgt, (batch, tgt_len, hidden_dim), jnp.float32)

    params = init_params(k_par, hidden_dim, num_layers, max_seq_length)
    packed = pack_params(params, num_heads)

    out = transformer_tsp_forward(src, tgt, packed,
                                  num_heads=num_heads, num_layers=num_layers)
    out = jax.block_until_ready(out)
    assert out.shape == (batch, tgt_len, hidden_dim)
    assert bool(jnp.all(jnp.isfinite(out)))
    print("KERNEL_OK")
</pallas_src>

<mosaic_0001>
module attributes {stable_mosaic.version = 11 : i64} {
  func.func @_transformer_kernel(%arg0: memref<16x32xf32, #tpu.memory_space<vmem>>, %arg1: memref<16x32xf32, #tpu.memory_space<vmem>>, %arg2: memref<16x32xf32, #tpu.memory_space<vmem>>, %arg3: memref<2x32x96xbf16, #tpu.memory_space<vmem>>, %arg4: memref<2x32x32xbf16, #tpu.memory_space<vmem>>, %arg5: memref<2x32x128xbf16, #tpu.memory_space<vmem>>, %arg6: memref<2x128x32xbf16, #tpu.memory_space<vmem>>, %arg7: memref<2x8x128xf32, #tpu.memory_space<vmem>>, %arg8: memref<2x32x96xbf16, #tpu.memory_space<vmem>>, %arg9: memref<2x32x32xbf16, #tpu.memory_space<vmem>>, %arg10: memref<2x32x32xbf16, #tpu.memory_space<vmem>>, %arg11: memref<2x32x64xbf16, #tpu.memory_space<vmem>>, %arg12: memref<2x32x32xbf16, #tpu.memory_space<vmem>>, %arg13: memref<2x32x128xbf16, #tpu.memory_space<vmem>>, %arg14: memref<2x128x32xbf16, #tpu.memory_space<vmem>>, %arg15: memref<2x13x128xf32, #tpu.memory_space<vmem>>, %arg16: memref<4x32xf32, #tpu.memory_space<vmem>>, %arg17: memref<16x32xf32, #tpu.memory_space<vmem>>) attributes {dimension_semantics = [], scalar_prefetch = 0 : i64, scratch_operands = 0 : i64, tpu.core_type = #tpu.core_type<tc>} {
    %c0 = arith.constant 0 : index
    %c0_0 = arith.constant 0 : index
    %0 = vector.load %arg2[%c0, %c0_0] : memref<16x32xf32, #tpu.memory_space<vmem>>, vector<16x32xf32>
    %c0_1 = arith.constant 0 : index
    %c0_2 = arith.constant 0 : index
    %1 = vector.load %arg0[%c0_1, %c0_2] : memref<16x32xf32, #tpu.memory_space<vmem>>, vector<16x32xf32>
    %2 = vector.shape_cast %1 : vector<16x32xf32> to vector<2x8x32xf32>
    %3 = vector.extract_strided_slice %0 {offsets = [0, 0], sizes = [8, 32], strides = [1, 1]} : vector<16x32xf32> to vector<8x32xf32>
    %4 = vector.shape_cast %3 : vector<8x32xf32> to vector<1x8x32xf32>
    %5 = vector.broadcast %4 : vector<1x8x32xf32> to vector<2x8x32xf32>
    %6 = arith.addf %2, %5 : vector<2x8x32xf32>
    %7 = vector.shape_cast %6 : vector<2x8x32xf32> to vector<16x32xf32>
    %c0_3 = arith.constant 0 : index
    %c0_4 = arith.constant 0 : index
    %c0_5 = arith.constant 0 : index
    %8 = vector.load %arg7[%c0_3, %c0_4, %c0_5] : memref<2x8x128xf32, #tpu.memory_space<vmem>>, vector<1x8x128xf32>
    %9 = vector.shape_cast %8 : vector<1x8x128xf32> to vector<8x128xf32>
    %c0_6 = arith.constant 0 : index
    %c0_7 = arith.constant 0 : index
    %c0_8 = arith.constant 0 : index
    %10 = vector.load %arg3[%c0_6, %c0_7, %c0_8] : memref<2x32x96xbf16, #tpu.memory_space<vmem>>, vector<1x32x96xbf16>
    %11 = vector.shape_cast %10 : vector<1x32x96xbf16> to vector<32x96xbf16>
    %12 = vector.extract_strided_slice %9 {offsets = [0, 0], sizes = [1, 96], strides = [1, 1]} : vector<8x128xf32> to vector<1x96xf32>
    %c0_9 = arith.constant 0 : index
    %c0_10 = arith.constant 0 : index
    %c0_11 = arith.constant 0 : index
    %13 = vector.load %arg4[%c0_9, %c0_10, %c0_11] : memref<2x32x32xbf16, #tpu.memory_space<vmem>>, vector<1x32x32xbf16>
    %14 = vector.shape_cast %13 : vector<1x32x32xbf16> to vector<32x32xbf16>
    %15 = vector.extract_strided_slice %9 {offsets = [1, 0], sizes = [1, 32], strides = [1, 1]} : vector<8x128xf32> to vector<1x32xf32>
    %16 = arith.truncf %7 : vector<16x32xf32> to vector<16x32xbf16>
    %cst = arith.constant dense<0.000000e+00> : vector<16x96xf32>
    %17 = tpu.matmul %16, %11, %cst {dimension_numbers = #tpu.dot_dimension_numbers<[1], [0], [0], [1], [0, 0, 1, 1], [], []>} : vector<16x32xbf16>, vector<32x96xbf16>, vector<16x96xf32> -> vector<16x96xf32>
    %18 = vector.broadcast %12 : vector<1x96xf32> to vector<16x96xf32>
    %19 = arith.addf %17, %18 : vector<16x96xf32>
    %20 = vector.extract_strided_slice %19 {offsets = [0, 0], sizes = [16, 32], strides = [1, 1]} : vector<16x96xf32> to vector<16x32xf32>
    %21 = vector.extract_strided_slice %19 {offsets = [0, 32], sizes = [16, 32], strides = [1, 1]} : vector<16x96xf32> to vector<16x32xf32>
    %22 = vector.extract_strided_slice %19 {offsets = [0, 64], sizes = [16, 32], strides = [1, 1]} : vector<16x96xf32> to vector<16x32xf32>
    %23 = arith.truncf %20 : vector<16x32xf32> to vector<16x32xbf16>
    %24 = arith.truncf %21 : vector<16x32xf32> to vector<16x32xbf16>
    %25 = arith.truncf %22 : vector<16x32xf32> to vector<16x32xbf16>
    %26 = vector.extract_strided_slice %23 {offsets = [0, 0], sizes = [8, 8], strides = [1, 1]} : vector<16x32xbf16> to vector<8x8xbf16>
    %27 = vector.extract_strided_slice %24 {offsets = [0, 0], sizes = [8, 8], strides = [1, 1]} : vector<16x32xbf16> to vector<8x8xbf16>
    %28 = vector.extract_strided_slice %25 {offsets = [0, 0], sizes = [8, 8], strides = [1, 1]} : vector<16x32xbf16> to vector<8x8xbf16>
    %cst_12 = arith.constant dense<0.000000e+00> : vector<8x8xf32>
    %29 = tpu.matmul %26, %27, %cst_12 {dimension_numbers = #tpu.dot_dimension_numbers<[1], [1], [0], [0], [0, 0, 1, 0], [], []>} : vector<8x8xbf16>, vector<8x8xbf16>, vector<8x8xf32> -> vector<8x8xf32>
    %cst_13 = arith.constant dense<0xFF800000> : vector<8xf32>
    %30 = vector.multi_reduction <maximumf>, %29, %cst_13 [1] : vector<8x8xf32> to vector<8xf32>
    %31 = vector.shape_cast %30 : vector<8xf32> to vector<8x1xf32>
    %32 = vector.broadcast %31 : vector<8x1xf32> to vector<8x8xf32>
    %33 = arith.subf %29, %32 : vector<8x8xf32>
    %34 = math.exp %33 : vector<8x8xf32>
    %cst_14 = arith.constant dense<0.000000e+00> : vector<8xf32>
    %35 = vector.multi_reduction <add>, %34, %cst_14 [1] : vector<8x8xf32> to vector<8xf32>
    %36 = vector.shape_cast %35 : vector<8xf32> to vector<8x1xf32>
    %37 = tpu.reciprocal %36 {approx = true} : vector<8x1xf32> -> vector<8x1xf32>
    %38 = vector.broadcast %37 : vector<8x1xf32> to vector<8x8xf32>
    %39 = arith.mulf %34, %38 : vector<8x8xf32>
    %40 = arith.truncf %39 : vector<8x8xf32> to vector<8x8xbf16>
    %cst_15 = arith.constant dense<0.000000e+00> : vector<8x8xf32>
    %41 = tpu.matmul %40, %28, %cst_15 {dimension_numbers = #tpu.dot_dimension_numbers<[1], [0], [0], [1], [0, 0, 1, 1], [], []>} : vector<8x8xbf16>, vector<8x8xbf16>, vector<8x8xf32> -> vector<8x8xf32>
    %42 = vector.extract_strided_slice %23 {offsets = [0, 8], sizes = [8, 8], strides = [1, 1]} : vector<16x32xbf16> to vector<8x8xbf16>
    %43 = vector.extract_strided_slice %24 {offsets = [0, 8], sizes = [8, 8], strides = [1, 1]} : vector<16x32xbf16> to vector<8x8xbf16>
    %44 = vector.extract_strided_slice %25 {offsets = [0, 8], sizes = [8, 8], strides = [1, 1]} : vector<16x32xbf16> to vector<8x8xbf16>
    %cst_16 = arith.constant dense<0.000000e+00> : vector<8x8xf32>
    %45 = tpu.matmul %42, %43, %cst_16 {dimension_numbers = #tpu.dot_dimension_numbers<[1], [1], [0], [0], [0, 0, 1, 0], [], []>} : vector<8x8xbf16>, vector<8x8xbf16>, vector<8x8xf32> -> vector<8x8xf32>
    %cst_17 = arith.constant dense<0xFF800000> : vector<8xf32>
    %46 = vector.multi_reduction <maximumf>, %45, %cst_17 [1] : vector<8x8xf32> to vector<8xf32>
    %47 = vector.shape_cast %46 : vector<8xf32> to vector<8x1xf32>
    %48 = vector.broadcast %47 : vector<8x1xf32> to vector<8x8xf32>
    %49 = arith.subf %45, %48 : vector<8x8xf32>
    %50 = math.exp %49 : vector<8x8xf32>
    %cst_18 = arith.constant dense<0.000000e+00> : vector<8xf32>
    %51 = vector.multi_reduction <add>, %50, %cst_18 [1] : vector<8x8xf32> to vector<8xf32>
    %52 = vector.shape_cast %51 : vector<8xf32> to vector<8x1xf32>
    %53 = tpu.reciprocal %52 {approx = true} : vector<8x1xf32> -> vector<8x1xf32>
    %54 = vector.broadcast %53 : vector<8x1xf32> to vector<8x8xf32>
    %55 = arith.mulf %50, %54 : vector<8x8xf32>
    %56 = arith.truncf %55 : vector<8x8xf32> to vector<8x8xbf16>
    %cst_19 = arith.constant dense<0.000000e+00> : vector<8x8xf32>
    %57 = tpu.matmul %56, %44, %cst_19 {dimension_numbers = #tpu.dot_dimension_numbers<[1], [0], [0], [1], [0, 0, 1, 1], [], []>} : vector<8x8xbf16>, vector<8x8xbf16>, vector<8x8xf32> -> vector<8x8xf32>
    %58 = vector.extract_strided_slice %23 {offsets = [0, 16], sizes = [8, 8], strides = [1, 1]} : vector<16x32xbf16> to vector<8x8xbf16>
    %59 = vector.extract_strided_slice %24 {offsets = [0, 16], sizes = [8, 8], strides = [1, 1]} : vector<16x32xbf16> to vector<8x8xbf16>
    %60 = vector.extract_strided_slice %25 {offsets = [0, 16], sizes = [8, 8], strides = [1, 1]} : vector<16x32xbf16> to vector<8x8xbf16>
    %cst_20 = arith.constant dense<0.000000e+00> : vector<8x8xf32>
    %61 = tpu.matmul %58, %59, %cst_20 {dimension_numbers = #tpu.dot_dimension_numbers<[1], [1], [0], [0], [0, 0, 1, 0], [], []>} : vector<8x8xbf16>, vector<8x8xbf16>, vector<8x8xf32> -> vector<8x8xf32>
    %cst_21 = arith.constant dense<0xFF800000> : vector<8xf32>
    %62 = vector.multi_reduction <maximumf>, %61, %cst_21 [1] : vector<8x8xf32> to vector<8xf32>
    %63 = vector.shape_cast %62 : vector<8xf32> to vector<8x1xf32>
    %64 = vector.broadcast %63 : vector<8x1xf32> to vector<8x8xf32>
    %65 = arith.subf %61, %64 : vector<8x8xf32>
    %66 = math.exp %65 : vector<8x8xf32>
    %cst_22 = arith.constant dense<0.000000e+00> : vector<8xf32>
    %67 = vector.multi_reduction <add>, %66, %cst_22 [1] : vector<8x8xf32> to vector<8xf32>
    %68 = vector.shape_cast %67 : vector<8xf32> to vector<8x1xf32>
    %69 = tpu.reciprocal %68 {approx = true} : vector<8x1xf32> -> vector<8x1xf32>
    %70 = vector.broadcast %69 : vector<8x1xf32> to vector<8x8xf32>
    %71 = arith.mulf %66, %70 : vector<8x8xf32>
    %72 = arith.truncf %71 : vector<8x8xf32> to vector<8x8xbf16>
    %cst_23 = arith.constant dense<0.000000e+00> : vector<8x8xf32>
    %73 = tpu.matmul %72, %60, %cst_23 {dimension_numbers = #tpu.dot_dimension_numbers<[1], [0], [0], [1], [0, 0, 1, 1], [], []>} : vector<8x8xbf16>, vector<8x8xbf16>, vector<8x8xf32> -> vector<8x8xf32>
    %74 = vector.extract_strided_slice %23 {offsets = [0, 24], sizes = [8, 8], strides = [1, 1]} : vector<16x32xbf16> to vector<8x8xbf16>
    %75 = vector.extract_strided_slice %24 {offsets = [0, 24], sizes = [8, 8], strides = [1, 1]} : vector<16x32xbf16> to vector<8x8xbf16>
    %76 = vector.extract_strided_slice %25 {offsets = [0, 24], sizes = [8, 8], strides = [1, 1]} : vector<16x32xbf16> to vector<8x8xbf16>
    %cst_24 = arith.constant dense<0.000000e+00> : vector<8x8xf32>
    %77 = tpu.matmul %74, %75, %cst_24 {dimension_numbers = #tpu.dot_dimension_numbers<[1], [1], [0], [0], [0, 0, 1, 0], [], []>} : vector<8x8xbf16>, vector<8x8xbf16>, vector<8x8xf32> -> vector<8x8xf32>
    %cst_25 = arith.constant dense<0xFF800000> : vector<8xf32>
    %78 = vector.multi_reduction <maximumf>, %77, %cst_25 [1] : vector<8x8xf32> to vector<8xf32>
    %79 = vector.shape_cast %78 : vector<8xf32> to vector<8x1xf32>
    %80 = vector.broadcast %79 : vector<8x1xf32> to vector<8x8xf32>
    %81 = arith.subf %77, %80 : vector<8x8xf32>
    %82 = math.exp %81 : vector<8x8xf32>
    %cst_26 = arith.constant dense<0.000000e+00> : vector<8xf32>
    %83 = vector.multi_reduction <add>, %82, %cst_26 [1] : vector<8x8xf32> to vector<8xf32>
    %84 = vector.shape_cast %83 : vector<8xf32> to vector<8x1xf32>
    %85 = tpu.reciprocal %84 {approx = true} : vector<8x1xf32> -> vector<8x1xf32>
    %86 = vector.broadcast %85 : vector<8x1xf32> to vector<8x8xf32>
    %87 = arith.mulf %82, %86 : vector<8x8xf32>
    %88 = arith.truncf %87 : vector<8x8xf32> to vector<8x8xbf16>
    %cst_27 = arith.constant dense<0.000000e+00> : vector<8x8xf32>
    %89 = tpu.matmul %88, %76, %cst_27 {dimension_numbers = #tpu.dot_dimension_numbers<[1], [0], [0], [1], [0, 0, 1, 1], [], []>} : vector<8x8xbf16>, vector<8x8xbf16>, vector<8x8xf32> -> vector<8x8xf32>
    %90 = tpu.concatenate %41, %57, %73, %89 in 1 : vector<8x8xf32>, vector<8x8xf32>, vector<8x8xf32>, vector<8x8xf32> -> vector<8x32xf32>
    %91 = vector.extract_strided_slice %23 {offsets = [8, 0], sizes = [8, 8], strides = [1, 1]} : vector<16x32xbf16> to vector<8x8xbf16>
    %92 = vector.extract_strided_slice %24 {offsets = [8, 0], sizes = [8, 8], strides = [1, 1]} : vector<16x32xbf16> to vector<8x8xbf16>
    %93 = vector.extract_strided_slice %25 {offsets = [8, 0], sizes = [8, 8], strides = [1, 1]} : vector<16x32xbf16> to vector<8x8xbf16>
    %cst_28 = arith.constant dense<0.000000e+00> : vector<8x8xf32>
    %94 = tpu.matmul %91, %92, %cst_28 {dimension_numbers = #tpu.dot_dimension_numbers<[1], [1], [0], [0], [0, 0, 1, 0], [], []>} : vector<8x8xbf16>, vector<8x8xbf16>, vector<8x8xf32> -> vector<8x8xf32>
    %cst_29 = arith.constant dense<0xFF800000> : vector<8xf32>
    %95 = vector.multi_reduction <maximumf>, %94, %cst_29 [1] : vector<8x8xf32> to vector<8xf32>
    %96 = vector.shape_cast %95 : vector<8xf32> to vector<8x1xf32>
    %97 = vector.broadcast %96 : vector<8x1xf32> to vector<8x8xf32>
    %98 = arith.subf %94, %97 : vector<8x8xf32>
    %99 = math.exp %98 : vector<8x8xf32>
    %cst_30 = arith.constant dense<0.000000e+00> : vector<8xf32>
    %100 = vector.multi_reduction <add>, %99, %cst_30 [1] : vector<8x8xf32> to vector<8xf32>
    %101 = vector.shape_cast %100 : vector<8xf32> to vector<8x1xf32>
    %102 = tpu.reciprocal %101 {approx = true} : vector<8x1xf32> -> vector<8x1xf32>
    %103 = vector.broadcast %102 : vector<8x1xf32> to vector<8x8xf32>
    %104 = arith.mulf %99, %103 : vector<8x8xf32>
    %105 = arith.truncf %104 : vector<8x8xf32> to vector<8x8xbf16>
    %cst_31 = arith.constant dense<0.000000e+00> : vector<8x8xf32>
    %106 = tpu.matmul %105, %93, %cst_31 {dimension_numbers = #tpu.dot_dimension_numbers<[1], [0], [0], [1], [0, 0, 1, 1], [], []>} : vector<8x8xbf16>, vector<8x8xbf16>, vector<8x8xf32> -> vector<8x8xf32>
    %107 = vector.extract_strided_slice %23 {offsets = [8, 8], sizes = [8, 8], strides = [1, 1]} : vector<16x32xbf16> to vector<8x8xbf16>
    %108 = vector.extract_strided_slice %24 {offsets = [8, 8], sizes = [8, 8], strides = [1, 1]} : vector<16x32xbf16> to vector<8x8xbf16>
    %109 = vector.extract_strided_slice %25 {offsets = [8, 8], sizes = [8, 8], strides = [1, 1]} : vector<16x32xbf16> to vector<8x8xbf16>
    %cst_32 = arith.constant dense<0.000000e+00> : vector<8x8xf32>
    %110 = tpu.matmul %107, %108, %cst_32 {dimension_numbers = #tpu.dot_dimension_numbers<[1], [1], [0], [0], [0, 0, 1, 0], [], []>} : vector<8x8xbf16>, vector<8x8xbf16>, vector<8x8xf32> -> vector<8x8xf32>
    %cst_33 = arith.constant dense<0xFF800000> : vector<8xf32>
    %111 = vector.multi_reduction <maximumf>, %110, %cst_33 [1] : vector<8x8xf32> to vector<8xf32>
    %112 = vector.shape_cast %111 : vector<8xf32> to vector<8x1xf32>
    %113 = vector.broadcast %112 : vector<8x1xf32> to vector<8x8xf32>
    %114 = arith.subf %110, %113 : vector<8x8xf32>
    %115 = math.exp %114 : vector<8x8xf32>
    %cst_34 = arith.constant dense<0.000000e+00> : vector<8xf32>
    %116 = vector.multi_reduction <add>, %115, %cst_34 [1] : vector<8x8xf32> to vector<8xf32>
    %117 = vector.shape_cast %116 : vector<8xf32> to vector<8x1xf32>
    %118 = tpu.reciprocal %117 {approx = true} : vector<8x1xf32> -> vector<8x1xf32>
    %119 = vector.broadcast %118 : vector<8x1xf32> to vector<8x8xf32>
    %120 = arith.mulf %115, %119 : vector<8x8xf32>
    %121 = arith.truncf %120 : vector<8x8xf32> to vector<8x8xbf16>
    %cst_35 = arith.constant dense<0.000000e+00> : vector<8x8xf32>
    %122 = tpu.matmul %121, %109, %cst_35 {dimension_numbers = #tpu.dot_dimension_numbers<[1], [0], [0], [1], [0, 0, 1, 1], [], []>} : vector<8x8xbf16>, vector<8x8xbf16>, vector<8x8xf32> -> vector<8x8xf32>
    %123 = vector.extract_strided_slice %23 {offsets = [8, 16], sizes = [8, 8], strides = [1, 1]} : vector<16x32xbf16> to vector<8x8xbf16>
    %124 = vector.extract_strided_slice %24 {offsets = [8, 16], sizes = [8, 8], strides = [1, 1]} : vector<16x32xbf16> to vector<8x8xbf16>
    %125 = vector.extract_strided_slice %25 {offsets = [8, 16], sizes = [8, 8], strides = [1, 1]} : vector<16x32xbf16> to vector<8x8xbf16>
    %cst_36 = arith.constant dense<0.000000e+00> : vector<8x8xf32>
    %126 = tpu.matmul %123, %124, %cst_36 {dimension_numbers = #tpu.dot_dimension_numbers<[1], [1], [0], [0], [0, 0, 1, 0], [], []>} : vector<8x8xbf16>, vector<8x8xbf16>, vector<8x8xf32> -> vector<8x8xf32>
    %cst_37 = arith.constant dense<0xFF800000> : vector<8xf32>
    %127 = vector.multi_reduction <maximumf>, %126, %cst_37 [1] : vector<8x8xf32> to vector<8xf32>
    %128 = vector.shape_cast %127 : vector<8xf32> to vector<8x1xf32>
    %129 = vector.broadcast %128 : vector<8x1xf32> to vector<8x8xf32>
    %130 = arith.subf %126, %129 : vector<8x8xf32>
    %131 = math.exp %130 : vector<8x8xf32>
    %cst_38 = arith.constant dense<0.000000e+00> : vector<8xf32>
    %132 = vector.multi_reduction <add>, %131, %cst_38 [1] : vector<8x8xf32> to vector<8xf32>
    %133 = vector.shape_cast %132 : vector<8xf32> to vector<8x1xf32>
    %134 = tpu.reciprocal %133 {approx = true} : vector<8x1xf32> -> vector<8x1xf32>
    %135 = vector.broadcast %134 : vector<8x1xf32> to vector<8x8xf32>
    %136 = arith.mulf %131, %135 : vector<8x8xf32>
    %137 = arith.truncf %136 : vector<8x8xf32> to vector<8x8xbf16>
    %cst_39 = arith.constant dense<0.000000e+00> : vector<8x8xf32>
    %138 = tpu.matmul %137, %125, %cst_39 {dimension_numbers = #tpu.dot_dimension_numbers<[1], [0], [0], [1], [0, 0, 1, 1], [], []>} : vector<8x8xbf16>, vector<8x8xbf16>, vector<8x8xf32> -> vector<8x8xf32>
    %139 = vector.extract_strided_slice %23 {offsets = [8, 24], sizes = [8, 8], strides = [1, 1]} : vector<16x32xbf16> to vector<8x8xbf16>
    %140 = vector.extract_strided_slice %24 {offsets = [8, 24], sizes = [8, 8], strides = [1, 1]} : vector<16x32xbf16> to vector<8x8xbf16>
    %141 = vector.extract_strided_slice %25 {offsets = [8, 24], sizes = [8, 8], strides = [1, 1]} : vector<16x32xbf16> to vector<8x8xbf16>
    %cst_40 = arith.constant dense<0.000000e+00> : vector<8x8xf32>
    %142 = tpu.matmul %139, %140, %cst_40 {dimension_numbers = #tpu.dot_dimension_numbers<[1], [1], [0], [0], [0, 0, 1, 0], [], []>} : vector<8x8xbf16>, vector<8x8xbf16>, vector<8x8xf32> -> vector<8x8xf32>
    %cst_41 = arith.constant dense<0xFF800000> : vector<8xf32>
    %143 = vector.multi_reduction <maximumf>, %142, %cst_41 [1] : vector<8x8xf32> to vector<8xf32>
    %144 = vector.shape_cast %143 : vector<8xf32> to vector<8x1xf32>
    %145 = vector.broadcast %144 : vector<8x1xf32> to vector<8x8xf32>
    %146 = arith.subf %142, %145 : vector<8x8xf32>
    %147 = math.exp %146 : vector<8x8xf32>
    %cst_42 = arith.constant dense<0.000000e+00> : vector<8xf32>
    %148 = vector.multi_reduction <add>, %147, %cst_42 [1] : vector<8x8xf32> to vector<8xf32>
    %149 = vector.shape_cast %148 : vector<8xf32> to vector<8x1xf32>
    %150 = tpu.reciprocal %149 {approx = true} : vector<8x1xf32> -> vector<8x1xf32>
    %151 = vector.broadcast %150 : vector<8x1xf32> to vector<8x8xf32>
    %152 = arith.mulf %147, %151 : vector<8x8xf32>
    %153 = arith.truncf %152 : vector<8x8xf32> to vector<8x8xbf16>
    %cst_43 = arith.constant dense<0.000000e+00> : vector<8x8xf32>
    %154 = tpu.matmul %153, %141, %cst_43 {dimension_numbers = #tpu.dot_dimension_numbers<[1], [0], [0], [1], [0, 0, 1, 1], [], []>} : vector<8x8xbf16>, vector<8x8xbf16>, vector<8x8xf32> -> vector<8x8xf32>
    %155 = tpu.concatenate %106, %122, %138, %154 in 1 : vector<8x8xf32>, vector<8x8xf32>, vector<8x8xf32>, vector<8x8xf32> -> vector<8x32xf32>
    %156 = tpu.concatenate %90, %155 in 0 : vector<8x32xf32>, vector<8x32xf32> -> vector<16x32xf32>
    %157 = arith.truncf %156 : vector<16x32xf32> to vector<16x32xbf16>
    %cst_44 = arith.constant dense<0.000000e+00> : vector<16x32xf32>
    %158 = tpu.matmul %157, %14, %cst_44 {dimension_numbers = #tpu.dot_dimension_numbers<[1], [0], [0], [1], [0, 0, 1, 1], [], []>} : vector<16x32xbf16>, vector<32x32xbf16>, vector<16x32xf32> -> vector<16x32xf32>
    %159 = vector.broadcast %15 : vector<1x32xf32> to vector<16x32xf32>
    %160 = arith.addf %158, %159 : vector<16x32xf32>
    %161 = arith.addf %7, %160 : vector<16x32xf32>
    %162 = vector.extract_strided_slice %9 {offsets = [2, 0], sizes = [1, 32], strides = [1, 1]} : vector<8x128xf32> to vector<1x32xf32>
    %163 = vector.extract_strided_slice %9 {offsets = [3, 0], sizes = [1, 32], strides = [1, 1]} : vector<8x128xf32> to vector<1x32xf32>
    %cst_45 = arith.constant dense<0.000000e+00> : vector<16xf32>
    %164 = vector.multi_reduction <add>, %161, %cst_45 [1] : vector<16x32xf32> to vector<16xf32>
    %165 = vector.shape_cast %164 : vector<16xf32> to vector<16x1xf32>
    %cst_46 = arith.constant 3.200000e+01 : f32
    %166 = vector.broadcast %cst_46 : f32 to vector<16x1xf32>
    %167 = arith.divf %165, %166 : vector<16x1xf32>
    %168 = vector.broadcast %167 : vector<16x1xf32> to vector<16x32xf32>
    %169 = arith.subf %161, %168 : vector<16x32xf32>
    %170 = arith.mulf %169, %169 : vector<16x32xf32>
    %cst_47 = arith.constant dense<0.000000e+00> : vector<16xf32>
    %171 = vector.multi_reduction <add>, %170, %cst_47 [1] : vector<16x32xf32> to vector<16xf32>
    %172 = vector.shape_cast %171 : vector<16xf32> to vector<16x1xf32>
    %cst_48 = arith.constant 3.200000e+01 : f32
    %173 = vector.broadcast %cst_48 : f32 to vector<16x1xf32>
    %174 = arith.divf %172, %173 : vector<16x1xf32>
    %175 = vector.broadcast %167 : vector<16x1xf32> to vector<16x32xf32>
    %176 = arith.subf %161, %175 : vector<16x32xf32>
    %cst_49 = arith.constant 9.99999974E-6 : f32
    %177 = vector.broadcast %cst_49 : f32 to vector<16x1xf32>
    %178 = arith.addf %174, %177 : vector<16x1xf32>
    %179 = math.rsqrt %178 : vector<16x1xf32>
    %180 = vector.broadcast %179 : vector<16x1xf32> to vector<16x32xf32>
    %181 = arith.mulf %176, %180 : vector<16x32xf32>
    %182 = vector.broadcast %162 : vector<1x32xf32> to vector<16x32xf32>
    %183 = arith.mulf %181, %182 : vector<16x32xf32>
    %184 = vector.broadcast %163 : vector<1x32xf32> to vector<16x32xf32>
    %185 = arith.addf %183, %184 : vector<16x32xf32>
    %c0_50 = arith.constant 0 : index
    %c0_51 = arith.constant 0 : index
    %c0_52 = arith.constant 0 : index
    %186 = vector.load %arg5[%c0_50, %c0_51, %c0_52] : memref<2x32x128xbf16, #tpu.memory_space<vmem>>, vector<1x32x128xbf16>
    %187 = vector.shape_cast %186 : vector<1x32x128xbf16> to vector<32x128xbf16>
    %188 = vector.extract_strided_slice %9 {offsets = [4, 0], sizes = [1, 128], strides = [1, 1]} : vector<8x128xf32> to vector<1x128xf32>
    %c0_53 = arith.constant 0 : index
    %c0_54 = arith.constant 0 : index
    %c0_55 = arith.constant 0 : index
    %189 = vector.load %arg6[%c0_53, %c0_54, %c0_55] : memref<2x128x32xbf16, #tpu.memory_space<vmem>>, vector<1x128x32xbf16>
    %190 = vector.shape_cast %189 : vector<1x128x32xbf16> to vector<128x32xbf16>
    %191 = vector.extract_strided_slice %9 {offsets = [5, 0], sizes = [1, 32], strides = [1, 1]} : vector<8x128xf32> to vector<1x32xf32>
    %192 = arith.truncf %185 : vector<16x32xf32> to vector<16x32xbf16>
    %cst_56 = arith.constant dense<0.000000e+00> : vector<16x128xf32>
    %193 = tpu.matmul %192, %187, %cst_56 {dimension_numbers = #tpu.dot_dimension_numbers<[1], [0], [0], [1], [0, 0, 1, 1], [], []>} : vector<16x32xbf16>, vector<32x128xbf16>, vector<16x128xf32> -> vector<16x128xf32>
    %194 = vector.broadcast %188 : vector<1x128xf32> to vector<16x128xf32>
    %195 = arith.addf %193, %194 : vector<16x128xf32>
    %cst_57 = arith.constant 0.000000e+00 : f32
    %196 = vector.broadcast %cst_57 : f32 to vector<16x128xf32>
    %197 = arith.maximumf %195, %196 : vector<16x128xf32>
    %198 = arith.truncf %197 : vector<16x128xf32> to vector<16x128xbf16>
    %cst_58 = arith.constant dense<0.000000e+00> : vector<16x32xf32>
    %199 = tpu.matmul %198, %190, %cst_58 {dimension_numbers = #tpu.dot_dimension_numbers<[1], [0], [0], [1], [0, 0, 1, 1], [], []>} : vector<16x128xbf16>, vector<128x32xbf16>, vector<16x32xf32> -> vector<16x32xf32>
    %200 = vector.broadcast %191 : vector<1x32xf32> to vector<16x32xf32>
    %201 = arith.addf %199, %200 : vector<16x32xf32>
    %202 = arith.addf %185, %201 : vector<16x32xf32>
    %203 = vector.extract_strided_slice %9 {offsets = [6, 0], sizes = [1, 32], strides = [1, 1]} : vector<8x128xf32> to vector<1x32xf32>
    %204 = vector.extract_strided_slice %9 {offsets = [7, 0], sizes = [1, 32], strides = [1, 1]} : vector<8x128xf32> to vector<1x32xf32>
    %cst_59 = arith.constant dense<0.000000e+00> : vector<16xf32>
    %205 = vector.multi_reduction <add>, %202, %cst_59 [1] : vector<16x32xf32> to vector<16xf32>
    %206 = vector.shape_cast %205 : vector<16xf32> to vector<16x1xf32>
    %cst_60 = arith.constant 3.200000e+01 : f32
    %207 = vector.broadcast %cst_60 : f32 to vector<16x1xf32>
    %208 = arith.divf %206, %207 : vector<16x1xf32>
    %209 = vector.broadcast %208 : vector<16x1xf32> to vector<16x32xf32>
    %210 = arith.subf %202, %209 : vector<16x32xf32>
    %211 = arith.mulf %210, %210 : vector<16x32xf32>
    %cst_61 = arith.constant dense<0.000000e+00> : vector<16xf32>
    %212 = vector.multi_reduction <add>, %211, %cst_61 [1] : vector<16x32xf32> to vector<16xf32>
    %213 = vector.shape_cast %212 : vector<16xf32> to vector<16x1xf32>
    %cst_62 = arith.constant 3.200000e+01 : f32
    %214 = vector.broadcast %cst_62 : f32 to vector<16x1xf32>
    %215 = arith.divf %213, %214 : vector<16x1xf32>
    %216 = vector.broadcast %208 : vector<16x1xf32> to vector<16x32xf32>
    %217 = arith.subf %202, %216 : vector<16x32xf32>
    %cst_63 = arith.constant 9.99999974E-6 : f32
    %218 = vector.broadcast %cst_63 : f32 to vector<16x1xf32>
    %219 = arith.addf %215, %218 : vector<16x1xf32>
    %220 = math.rsqrt %219 : vector<16x1xf32>
    %221 = vector.broadcast %220 : vector<16x1xf32> to vector<16x32xf32>
    %222 = arith.mulf %217, %221 : vector<16x32xf32>
    %223 = vector.broadcast %203 : vector<1x32xf32> to vector<16x32xf32>
    %224 = arith.mulf %222, %223 : vector<16x32xf32>
    %225 = vector.broadcast %204 : vector<1x32xf32> to vector<16x32xf32>
    %226 = arith.addf %224, %225 : vector<16x32xf32>
    %c1 = arith.constant 1 : index
    %c0_64 = arith.constant 0 : index
    %c0_65 = arith.constant 0 : index
    %227 = vector.load %arg7[%c1, %c0_64, %c0_65] : memref<2x8x128xf32, #tpu.memory_space<vmem>>, vector<1x8x128xf32>
    %228 = vector.shape_cast %227 : vector<1x8x128xf32> to vector<8x128xf32>
    %c1_66 = arith.constant 1 : index
    %c0_67 = arith.constant 0 : index
    %c0_68 = arith.constant 0 : index
    %229 = vector.load %arg3[%c1_66, %c0_67, %c0_68] : memref<2x32x96xbf16, #tpu.memory_space<vmem>>, vector<1x32x96xbf16>
    %230 = vector.shape_cast %229 : vector<1x32x96xbf16> to vector<32x96xbf16>
    %231 = vector.extract_strided_slice %228 {offsets = [0, 0], sizes = [1, 96], strides = [1, 1]} : vector<8x128xf32> to vector<1x96xf32>
    %c1_69 = arith.constant 1 : index
    %c0_70 = arith.constant 0 : index
    %c0_71 = arith.constant 0 : index
    %232 = vector.load %arg4[%c1_69, %c0_70, %c0_71] : memref<2x32x32xbf16, #tpu.memory_space<vmem>>, vector<1x32x32xbf16>
    %233 = vector.shape_cast %232 : vector<1x32x32xbf16> to vector<32x32xbf16>
    %234 = vector.extract_strided_slice %228 {offsets = [1, 0], sizes = [1, 32], strides = [1, 1]} : vector<8x128xf32> to vector<1x32xf32>
    %235 = arith.truncf %226 : vector<16x32xf32> to vector<16x32xbf16>
    %cst_72 = arith.constant dense<0.000000e+00> : vector<16x96xf32>
    %236 = tpu.matmul %235, %230, %cst_72 {dimension_numbers = #tpu.dot_dimension_numbers<[1], [0], [0], [1], [0, 0, 1, 1], [], []>} : vector<16x32xbf16>, vector<32x96xbf16>, vector<16x96xf32> -> vector<16x96xf32>
    %237 = vector.broadcast %231 : vector<1x96xf32> to vector<16x96xf32>
    %238 = arith.addf %236, %237 : vector<16x96xf32>
    %239 = vector.extract_strided_slice %238 {offsets = [0, 0], sizes = [16, 32], strides = [1, 1]} : vector<16x96xf32> to vector<16x32xf32>
    %240 = vector.extract_strided_slice %238 {offsets = [0, 32], sizes = [16, 32], strides = [1, 1]} : vector<16x96xf32> to vector<16x32xf32>
    %241 = vector.extract_strided_slice %238 {offsets = [0, 64], sizes = [16, 32], strides = [1, 1]} : vector<16x96xf32> to vector<16x32xf32>
    %242 = arith.truncf %239 : vector<16x32xf32> to vector<16x32xbf16>
    %243 = arith.truncf %240 : vector<16x32xf32> to vector<16x32xbf16>
    %244 = arith.truncf %241 : vector<16x32xf32> to vector<16x32xbf16>
    %245 = vector.extract_strided_slice %242 {offsets = [0, 0], sizes = [8, 8], strides = [1, 1]} : vector<16x32xbf16> to vector<8x8xbf16>
    %246 = vector.extract_strided_slice %243 {offsets = [0, 0], sizes = [8, 8], strides = [1, 1]} : vector<16x32xbf16> to vector<8x8xbf16>
    %247 = vector.extract_strided_slice %244 {offsets = [0, 0], sizes = [8, 8], strides = [1, 1]} : vector<16x32xbf16> to vector<8x8xbf16>
    %cst_73 = arith.constant dense<0.000000e+00> : vector<8x8xf32>
    %248 = tpu.matmul %245, %246, %cst_73 {dimension_numbers = #tpu.dot_dimension_numbers<[1], [1], [0], [0], [0, 0, 1, 0], [], []>} : vector<8x8xbf16>, vector<8x8xbf16>, vector<8x8xf32> -> vector<8x8xf32>
    %cst_74 = arith.constant dense<0xFF800000> : vector<8xf32>
    %249 = vector.multi_reduction <maximumf>, %248, %cst_74 [1] : vector<8x8xf32> to vector<8xf32>
    %250 = vector.shape_cast %249 : vector<8xf32> to vector<8x1xf32>
    %251 = vector.broadcast %250 : vector<8x1xf32> to vector<8x8xf32>
    %252 = arith.subf %248, %251 : vector<8x8xf32>
    %253 = math.exp %252 : vector<8x8xf32>
    %cst_75 = arith.constant dense<0.000000e+00> : vector<8xf32>
    %254 = vector.multi_reduction <add>, %253, %cst_75 [1] : vector<8x8xf32> to vector<8xf32>
    %255 = vector.shape_cast %254 : vector<8xf32> to vector<8x1xf32>
    %256 = tpu.reciprocal %255 {approx = true} : vector<8x1xf32> -> vector<8x1xf32>
    %257 = vector.broadcast %256 : vector<8x1xf32> to vector<8x8xf32>
    %258 = arith.mulf %253, %257 : vector<8x8xf32>
    %259 = arith.truncf %258 : vector<8x8xf32> to vector<8x8xbf16>
    %cst_76 = arith.constant dense<0.000000e+00> : vector<8x8xf32>
    %260 = tpu.matmul %259, %247, %cst_76 {dimension_numbers = #tpu.dot_dimension_numbers<[1], [0], [0], [1], [0, 0, 1, 1], [], []>} : vector<8x8xbf16>, vector<8x8xbf16>, vector<8x8xf32> -> vector<8x8xf32>
    %261 = vector.extract_strided_slice %242 {offsets = [0, 8], sizes = [8, 8], strides = [1, 1]} : vector<16x32xbf16> to vector<8x8xbf16>
    %262 = vector.extract_strided_slice %243 {offsets = [0, 8], sizes = [8, 8], strides = [1, 1]} : vector<16x32xbf16> to vector<8x8xbf16>
    %263 = vector.extract_strided_slice %244 {offsets = [0, 8], sizes = [8, 8], strides = [1, 1]} : vector<16x32xbf16> to vector<8x8xbf16>
    %cst_77 = arith.constant dense<0.000000e+00> : vector<8x8xf32>
    %264 = tpu.matmul %261, %262, %cst_77 {dimension_numbers = #tpu.dot_dimension_numbers<[1], [1], [0], [0], [0, 0, 1, 0], [], []>} : vector<8x8xbf16>, vector<8x8xbf16>, vector<8x8xf32> -> vector<8x8xf32>
    %cst_78 = arith.constant dense<0xFF800000> : vector<8xf32>
    %265 = vector.multi_reduction <maximumf>, %264, %cst_78 [1] : vector<8x8xf32> to vector<8xf32>
    %266 = vector.shape_cast %265 : vector<8xf32> to vector<8x1xf32>
    %267 = vector.broadcast %266 : vector<8x1xf32> to vector<8x8xf32>
    %268 = arith.subf %264, %267 : vector<8x8xf32>
    %269 = math.exp %268 : vector<8x8xf32>
    %cst_79 = arith.constant dense<0.000000e+00> : vector<8xf32>
    %270 = vector.multi_reduction <add>, %269, %cst_79 [1] : vector<8x8xf32> to vector<8xf32>
    %271 = vector.shape_cast %270 : vector<8xf32> to vector<8x1xf32>
    %272 = tpu.reciprocal %271 {approx = true} : vector<8x1xf32> -> vector<8x1xf32>
    %273 = vector.broadcast %272 : vector<8x1xf32> to vector<8x8xf32>
    %274 = arith.mulf %269, %273 : vector<8x8xf32>
    %275 = arith.truncf %274 : vector<8x8xf32> to vector<8x8xbf16>
    %cst_80 = arith.constant dense<0.000000e+00> : vector<8x8xf32>
    %276 = tpu.matmul %275, %263, %cst_80 {dimension_numbers = #tpu.dot_dimension_numbers<[1], [0], [0], [1], [0, 0, 1, 1], [], []>} : vector<8x8xbf16>, vector<8x8xbf16>, vector<8x8xf32> -> vector<8x8xf32>
    %277 = vector.extract_strided_slice %242 {offsets = [0, 16], sizes = [8, 8], strides = [1, 1]} : vector<16x32xbf16> to vector<8x8xbf16>
    %278 = vector.extract_strided_slice %243 {offsets = [0, 16], sizes = [8, 8], strides = [1, 1]} : vector<16x32xbf16> to vector<8x8xbf16>
    %279 = vector.extract_strided_slice %244 {offsets = [0, 16], sizes = [8, 8], strides = [1, 1]} : vector<16x32xbf16> to vector<8x8xbf16>
    %cst_81 = arith.constant dense<0.000000e+00> : vector<8x8xf32>
    %280 = tpu.matmul %277, %278, %cst_81 {dimension_numbers = #tpu.dot_dimension_numbers<[1], [1], [0], [0], [0, 0, 1, 0], [], []>} : vector<8x8xbf16>, vector<8x8xbf16>, vector<8x8xf32> -> vector<8x8xf32>
    %cst_82 = arith.constant dense<0xFF800000> : vector<8xf32>
    %281 = vector.multi_reduction <maximumf>, %280, %cst_82 [1] : vector<8x8xf32> to vector<8xf32>
    %282 = vector.shape_cast %281 : vector<8xf32> to vector<8x1xf32>
    %283 = vector.broadcast %282 : vector<8x1xf32> to vector<8x8xf32>
    %284 = arith.subf %280, %283 : vector<8x8xf32>
    %285 = math.exp %284 : vector<8x8xf32>
    %cst_83 = arith.constant dense<0.000000e+00> : vector<8xf32>
    %286 = vector.multi_reduction <add>, %285, %cst_83 [1] : vector<8x8xf32> to vector<8xf32>
    %287 = vector.shape_cast %286 : vector<8xf32> to vector<8x1xf32>
    %288 = tpu.reciprocal %287 {approx = true} : vector<8x1xf32> -> vector<8x1xf32>
    %289 = vector.broadcast %288 : vector<8x1xf32> to vector<8x8xf32>
    %290 = arith.mulf %285, %289 : vector<8x8xf32>
    %291 = arith.truncf %290 : vector<8x8xf32> to vector<8x8xbf16>
    %cst_84 = arith.constant dense<0.000000e+00> : vector<8x8xf32>
    %292 = tpu.matmul %291, %279, %cst_84 {dimension_numbers = #tpu.dot_dimension_numbers<[1], [0], [0], [1], [0, 0, 1, 1], [], []>} : vector<8x8xbf16>, vector<8x8xbf16>, vector<8x8xf32> -> vector<8x8xf32>
    %293 = vector.extract_strided_slice %242 {offsets = [0, 24], sizes = [8, 8], strides = [1, 1]} : vector<16x32xbf16> to vector<8x8xbf16>
    %294 = vector.extract_strided_slice %243 {offsets = [0, 24], sizes = [8, 8], strides = [1, 1]} : vector<16x32xbf16> to vector<8x8xbf16>
    %295 = vector.extract_strided_slice %244 {offsets = [0, 24], sizes = [8, 8], strides = [1, 1]} : vector<16x32xbf16> to vector<8x8xbf16>
    %cst_85 = arith.constant dense<0.000000e+00> : vector<8x8xf32>
    %296 = tpu.matmul %293, %294, %cst_85 {dimension_numbers = #tpu.dot_dimension_numbers<[1], [1], [0], [0], [0, 0, 1, 0], [], []>} : vector<8x8xbf16>, vector<8x8xbf16>, vector<8x8xf32> -> vector<8x8xf32>
    %cst_86 = arith.constant dense<0xFF800000> : vector<8xf32>
    %297 = vector.multi_reduction <maximumf>, %296, %cst_86 [1] : vector<8x8xf32> to vector<8xf32>
    %298 = vector.shape_cast %297 : vector<8xf32> to vector<8x1xf32>
    %299 = vector.broadcast %298 : vector<8x1xf32> to vector<8x8xf32>
    %300 = arith.subf %296, %299 : vector<8x8xf32>
    %301 = math.exp %300 : vector<8x8xf32>
    %cst_87 = arith.constant dense<0.000000e+00> : vector<8xf32>
    %302 = vector.multi_reduction <add>, %301, %cst_87 [1] : vector<8x8xf32> to vector<8xf32>
    %303 = vector.shape_cast %302 : vector<8xf32> to vector<8x1xf32>
    %304 = tpu.reciprocal %303 {approx = true} : vector<8x1xf32> -> vector<8x1xf32>
    %305 = vector.broadcast %304 : vector<8x1xf32> to vector<8x8xf32>
    %306 = arith.mulf %301, %305 : vector<8x8xf32>
    %307 = arith.truncf %306 : vector<8x8xf32> to vector<8x8xbf16>
    %cst_88 = arith.constant dense<0.000000e+00> : vector<8x8xf32>
    %308 = tpu.matmul %307, %295, %cst_88 {dimension_numbers = #tpu.dot_dimension_numbers<[1], [0], [0], [1], [0, 0, 1, 1], [], []>} : vector<8x8xbf16>, vector<8x8xbf16>, vector<8x8xf32> -> vector<8x8xf32>
    %309 = tpu.concatenate %260, %276, %292, %308 in 1 : vector<8x8xf32>, vector<8x8xf32>, vector<8x8xf32>, vector<8x8xf32> -> vector<8x32xf32>
    %310 = vector.extract_strided_slice %242 {offsets = [8, 0], sizes = [8, 8], strides = [1, 1]} : vector<16x32xbf16> to vector<8x8xbf16>
    %311 = vector.extract_strided_slice %243 {offsets = [8, 0], sizes = [8, 8], strides = [1, 1]} : vector<16x32xbf16> to vector<8x8xbf16>
    %312 = vector.extract_strided_slice %244 {offsets = [8, 0], sizes = [8, 8], strides = [1, 1]} : vector<16x32xbf16> to vector<8x8xbf16>
    %cst_89 = arith.constant dense<0.000000e+00> : vector<8x8xf32>
    %313 = tpu.matmul %310, %311, %cst_89 {dimension_numbers = #tpu.dot_dimension_numbers<[1], [1], [0], [0], [0, 0, 1, 0], [], []>} : vector<8x8xbf16>, vector<8x8xbf16>, vector<8x8xf32> -> vector<8x8xf32>
    %cst_90 = arith.constant dense<0xFF800000> : vector<8xf32>
    %314 = vector.multi_reduction <maximumf>, %313, %cst_90 [1] : vector<8x8xf32> to vector<8xf32>
    %315 = vector.shape_cast %314 : vector<8xf32> to vector<8x1xf32>
    %316 = vector.broadcast %315 : vector<8x1xf32> to vector<8x8xf32>
    %317 = arith.subf %313, %316 : vector<8x8xf32>
    %318 = math.exp %317 : vector<8x8xf32>
    %cst_91 = arith.constant dense<0.000000e+00> : vector<8xf32>
    %319 = vector.multi_reduction <add>, %318, %cst_91 [1] : vector<8x8xf32> to vector<8xf32>
    %320 = vector.shape_cast %319 : vector<8xf32> to vector<8x1xf32>
    %321 = tpu.reciprocal %320 {approx = true} : vector<8x1xf32> -> vector<8x1xf32>
    %322 = vector.broadcast %321 : vector<8x1xf32> to vector<8x8xf32>
    %323 = arith.mulf %318, %322 : vector<8x8xf32>
    %324 = arith.truncf %323 : vector<8x8xf32> to vector<8x8xbf16>
    %cst_92 = arith.constant dense<0.000000e+00> : vector<8x8xf32>
    %325 = tpu.matmul %324, %312, %cst_92 {dimension_numbers = #tpu.dot_dimension_numbers<[1], [0], [0], [1], [0, 0, 1, 1], [], []>} : vector<8x8xbf16>, vector<8x8xbf16>, vector<8x8xf32> -> vector<8x8xf32>
    %326 = vector.extract_strided_slice %242 {offsets = [8, 8], sizes = [8, 8], strides = [1, 1]} : vector<16x32xbf16> to vector<8x8xbf16>
    %327 = vector.extract_strided_slice %243 {offsets = [8, 8], sizes = [8, 8], strides = [1, 1]} : vector<16x32xbf16> to vector<8x8xbf16>
    %328 = vector.extract_strided_slice %244 {offsets = [8, 8], sizes = [8, 8], strides = [1, 1]} : vector<16x32xbf16> to vector<8x8xbf16>
    %cst_93 = arith.constant dense<0.000000e+00> : vector<8x8xf32>
    %329 = tpu.matmul %326, %327, %cst_93 {dimension_numbers = #tpu.dot_dimension_numbers<[1], [1], [0], [0], [0, 0, 1, 0], [], []>} : vector<8x8xbf16>, vector<8x8xbf16>, vector<8x8xf32> -> vector<8x8xf32>
    %cst_94 = arith.constant dense<0xFF800000> : vector<8xf32>
    %330 = vector.multi_reduction <maximumf>, %329, %cst_94 [1] : vector<8x8xf32> to vector<8xf32>
    %331 = vector.shape_cast %330 : vector<8xf32> to vector<8x1xf32>
    %332 = vector.broadcast %331 : vector<8x1xf32> to vector<8x8xf32>
    %333 = arith.subf %329, %332 : vector<8x8xf32>
    %334 = math.exp %333 : vector<8x8xf32>
    %cst_95 = arith.constant dense<0.000000e+00> : vector<8xf32>
    %335 = vector.multi_reduction <add>, %334, %cst_95 [1] : vector<8x8xf32> to vector<8xf32>
    %336 = vector.shape_cast %335 : vector<8xf32> to vector<8x1xf32>
    %337 = tpu.reciprocal %336 {approx = true} : vector<8x1xf32> -> vector<8x1xf32>
    %338 = vector.broadcast %337 : vector<8x1xf32> to vector<8x8xf32>
    %339 = arith.mulf %334, %338 : vector<8x8xf32>
    %340 = arith.truncf %339 : vector<8x8xf32> to vector<8x8xbf16>
    %cst_96 = arith.constant dense<0.000000e+00> : vector<8x8xf32>
    %341 = tpu.matmul %340, %328, %cst_96 {dimension_numbers = #tpu.dot_dimension_numbers<[1], [0], [0], [1], [0, 0, 1, 1], [], []>} : vector<8x8xbf16>, vector<8x8xbf16>, vector<8x8xf32> -> vector<8x8xf32>
    %342 = vector.extract_strided_slice %242 {offsets = [8, 16], sizes = [8, 8], strides = [1, 1]} : vector<16x32xbf16> to vector<8x8xbf16>
    %343 = vector.extract_strided_slice %243 {offsets = [8, 16], sizes = [8, 8], strides = [1, 1]} : vector<16x32xbf16> to vector<8x8xbf16>
    %344 = vector.extract_strided_slice %244 {offsets = [8, 16], sizes = [8, 8], strides = [1, 1]} : vector<16x32xbf16> to vector<8x8xbf16>
    %cst_97 = arith.constant dense<0.000000e+00> : vector<8x8xf32>
    %345 = tpu.matmul %342, %343, %cst_97 {dimension_numbers = #tpu.dot_dimension_numbers<[1], [1], [0], [0], [0, 0, 1, 0], [], []>} : vector<8x8xbf16>, vector<8x8xbf16>, vector<8x8xf32> -> vector<8x8xf32>
    %cst_98 = arith.constant dense<0xFF800000> : vector<8xf32>
    %346 = vector.multi_reduction <maximumf>, %345, %cst_98 [1] : vector<8x8xf32> to vector<8xf32>
    %347 = vector.shape_cast %346 : vector<8xf32> to vector<8x1xf32>
    %348 = vector.broadcast %347 : vector<8x1xf32> to vector<8x8xf32>
    %349 = arith.subf %345, %348 : vector<8x8xf32>
    %350 = math.exp %349 : vector<8x8xf32>
    %cst_99 = arith.constant dense<0.000000e+00> : vector<8xf32>
    %351 = vector.multi_reduction <add>, %350, %cst_99 [1] : vector<8x8xf32> to vector<8xf32>
    %352 = vector.shape_cast %351 : vector<8xf32> to vector<8x1xf32>
    %353 = tpu.reciprocal %352 {approx = true} : vector<8x1xf32> -> vector<8x1xf32>
    %354 = vector.broadcast %353 : vector<8x1xf32> to vector<8x8xf32>
    %355 = arith.mulf %350, %354 : vector<8x8xf32>
    %356 = arith.truncf %355 : vector<8x8xf32> to vector<8x8xbf16>
    %cst_100 = arith.constant dense<0.000000e+00> : vector<8x8xf32>
    %357 = tpu.matmul %356, %344, %cst_100 {dimension_numbers = #tpu.dot_dimension_numbers<[1], [0], [0], [1], [0, 0, 1, 1], [], []>} : vector<8x8xbf16>, vector<8x8xbf16>, vector<8x8xf32> -> vector<8x8xf32>
    %358 = vector.extract_strided_slice %242 {offsets = [8, 24], sizes = [8, 8], strides = [1, 1]} : vector<16x32xbf16> to vector<8x8xbf16>
    %359 = vector.extract_strided_slice %243 {offsets = [8, 24], sizes = [8, 8], strides = [1, 1]} : vector<16x32xbf16> to vector<8x8xbf16>
    %360 = vector.extract_strided_slice %244 {offsets = [8, 24], sizes = [8, 8], strides = [1, 1]} : vector<16x32xbf16> to vector<8x8xbf16>
    %cst_101 = arith.constant dense<0.000000e+00> : vector<8x8xf32>
    %361 = tpu.matmul %358, %359, %cst_101 {dimension_numbers = #tpu.dot_dimension_numbers<[1], [1], [0], [0], [0, 0, 1, 0], [], []>} : vector<8x8xbf16>, vector<8x8xbf16>, vector<8x8xf32> -> vector<8x8xf32>
    %cst_102 = arith.constant dense<0xFF800000> : vector<8xf32>
    %362 = vector.multi_reduction <maximumf>, %361, %cst_102 [1] : vector<8x8xf32> to vector<8xf32>
    %363 = vector.shape_cast %362 : vector<8xf32> to vector<8x1xf32>
    %364 = vector.broadcast %363 : vector<8x1xf32> to vector<8x8xf32>
    %365 = arith.subf %361, %364 : vector<8x8xf32>
    %366 = math.exp %365 : vector<8x8xf32>
    %cst_103 = arith.constant dense<0.000000e+00> : vector<8xf32>
    %367 = vector.multi_reduction <add>, %366, %cst_103 [1] : vector<8x8xf32> to vector<8xf32>
    %368 = vector.shape_cast %367 : vector<8xf32> to vector<8x1xf32>
    %369 = tpu.reciprocal %368 {approx = true} : vector<8x1xf32> -> vector<8x1xf32>
    %370 = vector.broadcast %369 : vector<8x1xf32> to vector<8x8xf32>
    %371 = arith.mulf %366, %370 : vector<8x8xf32>
    %372 = arith.truncf %371 : vector<8x8xf32> to vector<8x8xbf16>
    %cst_104 = arith.constant dense<0.000000e+00> : vector<8x8xf32>
    %373 = tpu.matmul %372, %360, %cst_104 {dimension_numbers = #tpu.dot_dimension_numbers<[1], [0], [0], [1], [0, 0, 1, 1], [], []>} : vector<8x8xbf16>, vector<8x8xbf16>, vector<8x8xf32> -> vector<8x8xf32>
    %374 = tpu.concatenate %325, %341, %357, %373 in 1 : vector<8x8xf32>, vector<8x8xf32>, vector<8x8xf32>, vector<8x8xf32> -> vector<8x32xf32>
    %375 = tpu.concatenate %309, %374 in 0 : vector<8x32xf32>, vector<8x32xf32> -> vector<16x32xf32>
    %376 = arith.truncf %375 : vector<16x32xf32> to vector<16x32xbf16>
    %cst_105 = arith.constant dense<0.000000e+00> : vector<16x32xf32>
    %377 = tpu.matmul %376, %233, %cst_105 {dimension_numbers = #tpu.dot_dimension_numbers<[1], [0], [0], [1], [0, 0, 1, 1], [], []>} : vector<16x32xbf16>, vector<32x32xbf16>, vector<16x32xf32> -> vector<16x32xf32>
    %378 = vector.broadcast %234 : vector<1x32xf32> to vector<16x32xf32>
    %379 = arith.addf %377, %378 : vector<16x32xf32>
    %380 = arith.addf %226, %379 : vector<16x32xf32>
    %381 = vector.extract_strided_slice %228 {offsets = [2, 0], sizes = [1, 32], strides = [1, 1]} : vector<8x128xf32> to vector<1x32xf32>
    %382 = vector.extract_strided_slice %228 {offsets = [3, 0], sizes = [1, 32], strides = [1, 1]} : vector<8x128xf32> to vector<1x32xf32>
    %cst_106 = arith.constant dense<0.000000e+00> : vector<16xf32>
    %383 = vector.multi_reduction <add>, %380, %cst_106 [1] : vector<16x32xf32> to vector<16xf32>
    %384 = vector.shape_cast %383 : vector<16xf32> to vector<16x1xf32>
    %cst_107 = arith.constant 3.200000e+01 : f32
    %385 = vector.broadcast %cst_107 : f32 to vector<16x1xf32>
    %386 = arith.divf %384, %385 : vector<16x1xf32>
    %387 = vector.broadcast %386 : vector<16x1xf32> to vector<16x32xf32>
    %388 = arith.subf %380, %387 : vector<16x32xf32>
    %389 = arith.mulf %388, %388 : vector<16x32xf32>
    %cst_108 = arith.constant dense<0.000000e+00> : vector<16xf32>
    %390 = vector.multi_reduction <add>, %389, %cst_108 [1] : vector<16x32xf32> to vector<16xf32>
    %391 = vector.shape_cast %390 : vector<16xf32> to vector<16x1xf32>
    %cst_109 = arith.constant 3.200000e+01 : f32
    %392 = vector.broadcast %cst_109 : f32 to vector<16x1xf32>
    %393 = arith.divf %391, %392 : vector<16x1xf32>
    %394 = vector.broadcast %386 : vector<16x1xf32> to vector<16x32xf32>
    %395 = arith.subf %380, %394 : vector<16x32xf32>
    %cst_110 = arith.constant 9.99999974E-6 : f32
    %396 = vector.broadcast %cst_110 : f32 to vector<16x1xf32>
    %397 = arith.addf %393, %396 : vector<16x1xf32>
    %398 = math.rsqrt %397 : vector<16x1xf32>
    %399 = vector.broadcast %398 : vector<16x1xf32> to vector<16x32xf32>
    %400 = arith.mulf %395, %399 : vector<16x32xf32>
    %401 = vector.broadcast %381 : vector<1x32xf32> to vector<16x32xf32>
    %402 = arith.mulf %400, %401 : vector<16x32xf32>
    %403 = vector.broadcast %382 : vector<1x32xf32> to vector<16x32xf32>
    %404 = arith.addf %402, %403 : vector<16x32xf32>
    %c1_111 = arith.constant 1 : index
    %c0_112 = arith.constant 0 : index
    %c0_113 = arith.constant 0 : index
    %405 = vector.load %arg5[%c1_111, %c0_112, %c0_113] : memref<2x32x128xbf16, #tpu.memory_space<vmem>>, vector<1x32x128xbf16>
    %406 = vector.shape_cast %405 : vector<1x32x128xbf16> to vector<32x128xbf16>
    %407 = vector.extract_strided_slice %228 {offsets = [4, 0], sizes = [1, 128], strides = [1, 1]} : vector<8x128xf32> to vector<1x128xf32>
    %c1_114 = arith.constant 1 : index
    %c0_115 = arith.constant 0 : index
    %c0_116 = arith.constant 0 : index
    %408 = vector.load %arg6[%c1_114, %c0_115, %c0_116] : memref<2x128x32xbf16, #tpu.memory_space<vmem>>, vector<1x128x32xbf16>
    %409 = vector.shape_cast %408 : vector<1x128x32xbf16> to vector<128x32xbf16>
    %410 = vector.extract_strided_slice %228 {offsets = [5, 0], sizes = [1, 32], strides = [1, 1]} : vector<8x128xf32> to vector<1x32xf32>
    %411 = arith.truncf %404 : vector<16x32xf32> to vector<16x32xbf16>
    %cst_117 = arith.constant dense<0.000000e+00> : vector<16x128xf32>
    %412 = tpu.matmul %411, %406, %cst_117 {dimension_numbers = #tpu.dot_dimension_numbers<[1], [0], [0], [1], [0, 0, 1, 1], [], []>} : vector<16x32xbf16>, vector<32x128xbf16>, vector<16x128xf32> -> vector<16x128xf32>
    %413 = vector.broadcast %407 : vector<1x128xf32> to vector<16x128xf32>
    %414 = arith.addf %412, %413 : vector<16x128xf32>
    %cst_118 = arith.constant 0.000000e+00 : f32
    %415 = vector.broadcast %cst_118 : f32 to vector<16x128xf32>
    %416 = arith.maximumf %414, %415 : vector<16x128xf32>
    %417 = arith.truncf %416 : vector<16x128xf32> to vector<16x128xbf16>
    %cst_119 = arith.constant dense<0.000000e+00> : vector<16x32xf32>
    %418 = tpu.matmul %417, %409, %cst_119 {dimension_numbers = #tpu.dot_dimension_numbers<[1], [0], [0], [1], [0, 0, 1, 1], [], []>} : vector<16x128xbf16>, vector<128x32xbf16>, vector<16x32xf32> -> vector<16x32xf32>
    %419 = vector.broadcast %410 : vector<1x32xf32> to vector<16x32xf32>
    %420 = arith.addf %418, %419 : vector<16x32xf32>
    %421 = arith.addf %404, %420 : vector<16x32xf32>
    %422 = vector.extract_strided_slice %228 {offsets = [6, 0], sizes = [1, 32], strides = [1, 1]} : vector<8x128xf32> to vector<1x32xf32>
    %423 = vector.extract_strided_slice %228 {offsets = [7, 0], sizes = [1, 32], strides = [1, 1]} : vector<8x128xf32> to vector<1x32xf32>
    %cst_120 = arith.constant dense<0.000000e+00> : vector<16xf32>
    %424 = vector.multi_reduction <add>, %421, %cst_120 [1] : vector<16x32xf32> to vector<16xf32>
    %425 = vector.shape_cast %424 : vector<16xf32> to vector<16x1xf32>
    %cst_121 = arith.constant 3.200000e+01 : f32
    %426 = vector.broadcast %cst_121 : f32 to vector<16x1xf32>
    %427 = arith.divf %425, %426 : vector<16x1xf32>
    %428 = vector.broadcast %427 : vector<16x1xf32> to vector<16x32xf32>
    %429 = arith.subf %421, %428 : vector<16x32xf32>
    %430 = arith.mulf %429, %429 : vector<16x32xf32>
    %cst_122 = arith.constant dense<0.000000e+00> : vector<16xf32>
    %431 = vector.multi_reduction <add>, %430, %cst_122 [1] : vector<16x32xf32> to vector<16xf32>
    %432 = vector.shape_cast %431 : vector<16xf32> to vector<16x1xf32>
    %cst_123 = arith.constant 3.200000e+01 : f32
    %433 = vector.broadcast %cst_123 : f32 to vector<16x1xf32>
    %434 = arith.divf %432, %433 : vector<16x1xf32>
    %435 = vector.broadcast %427 : vector<16x1xf32> to vector<16x32xf32>
    %436 = arith.subf %421, %435 : vector<16x32xf32>
    %cst_124 = arith.constant 9.99999974E-6 : f32
    %437 = vector.broadcast %cst_124 : f32 to vector<16x1xf32>
    %438 = arith.addf %434, %437 : vector<16x1xf32>
    %439 = math.rsqrt %438 : vector<16x1xf32>
    %440 = vector.broadcast %439 : vector<16x1xf32> to vector<16x32xf32>
    %441 = arith.mulf %436, %440 : vector<16x32xf32>
    %442 = vector.broadcast %422 : vector<1x32xf32> to vector<16x32xf32>
    %443 = arith.mulf %441, %442 : vector<16x32xf32>
    %444 = vector.broadcast %423 : vector<1x32xf32> to vector<16x32xf32>
    %445 = arith.addf %443, %444 : vector<16x32xf32>
    %c0_125 = arith.constant 0 : index
    %c0_126 = arith.constant 0 : index
    %446 = vector.load %arg16[%c0_125, %c0_126] : memref<4x32xf32, #tpu.memory_space<vmem>>, vector<4x32xf32>
    %447 = vector.extract_strided_slice %446 {offsets = [0, 0], sizes = [1, 32], strides = [1, 1]} : vector<4x32xf32> to vector<1x32xf32>
    %448 = vector.extract_strided_slice %446 {offsets = [1, 0], sizes = [1, 32], strides = [1, 1]} : vector<4x32xf32> to vector<1x32xf32>
    %cst_127 = arith.constant dense<0.000000e+00> : vector<16xf32>
    %449 = vector.multi_reduction <add>, %445, %cst_127 [1] : vector<16x32xf32> to vector<16xf32>
    %450 = vector.shape_cast %449 : vector<16xf32> to vector<16x1xf32>
    %cst_128 = arith.constant 3.200000e+01 : f32
    %451 = vector.broadcast %cst_128 : f32 to vector<16x1xf32>
    %452 = arith.divf %450, %451 : vector<16x1xf32>
    %453 = vector.broadcast %452 : vector<16x1xf32> to vector<16x32xf32>
    %454 = arith.subf %445, %453 : vector<16x32xf32>
    %455 = arith.mulf %454, %454 : vector<16x32xf32>
    %cst_129 = arith.constant dense<0.000000e+00> : vector<16xf32>
    %456 = vector.multi_reduction <add>, %455, %cst_129 [1] : vector<16x32xf32> to vector<16xf32>
    %457 = vector.shape_cast %456 : vector<16xf32> to vector<16x1xf32>
    %cst_130 = arith.constant 3.200000e+01 : f32
    %458 = vector.broadcast %cst_130 : f32 to vector<16x1xf32>
    %459 = arith.divf %457, %458 : vector<16x1xf32>
    %460 = vector.broadcast %452 : vector<16x1xf32> to vector<16x32xf32>
    %461 = arith.subf %445, %460 : vector<16x32xf32>
    %cst_131 = arith.constant 9.99999974E-6 : f32
    %462 = vector.broadcast %cst_131 : f32 to vector<16x1xf32>
    %463 = arith.addf %459, %462 : vector<16x1xf32>
    %464 = math.rsqrt %463 : vector<16x1xf32>
    %465 = vector.broadcast %464 : vector<16x1xf32> to vector<16x32xf32>
    %466 = arith.mulf %461, %465 : vector<16x32xf32>
    %467 = vector.broadcast %447 : vector<1x32xf32> to vector<16x32xf32>
    %468 = arith.mulf %466, %467 : vector<16x32xf32>
    %469 = vector.broadcast %448 : vector<1x32xf32> to vector<16x32xf32>
    %470 = arith.addf %468, %469 : vector<16x32xf32>
    %471 = arith.truncf %470 : vector<16x32xf32> to vector<16x32xbf16>
    %c0_132 = arith.constant 0 : index
    %c0_133 = arith.constant 0 : index
    %472 = vector.load %arg1[%c0_132, %c0_133] : memref<16x32xf32, #tpu.memory_space<vmem>>, vector<16x32xf32>
    %473 = vector.shape_cast %472 : vector<16x32xf32> to vector<2x8x32xf32>
    %474 = vector.extract_strided_slice %0 {offsets = [0, 0], sizes = [8, 32], strides = [1, 1]} : vector<16x32xf32> to vector<8x32xf32>
    %475 = vector.shape_cast %474 : vector<8x32xf32> to vector<1x8x32xf32>
    %476 = vector.broadcast %475 : vector<1x8x32xf32> to vector<2x8x32xf32>
    %477 = arith.addf %473, %476 : vector<2x8x32xf32>
    %478 = vector.shape_cast %477 : vector<2x8x32xf32> to vector<16x32xf32>
    %c0_134 = arith.constant 0 : index
    %c0_135 = arith.constant 0 : index
    %c0_136 = arith.constant 0 : index
    %479 = vector.load %arg15[%c0_134, %c0_135, %c0_136] : memref<2x13x128xf32, #tpu.memory_space<vmem>>, vector<1x13x128xf32>
    %480 = vector.shape_cast %479 : vector<1x13x128xf32> to vector<13x128xf32>
    %c0_137 = arith.constant 0 : index
    %c0_138 = arith.constant 0 : index
    %c0_139 = arith.constant 0 : index
    %481 = vector.load %arg8[%c0_137, %c0_138, %c0_139] : memref<2x32x96xbf16, #tpu.memory_space<vmem>>, vector<1x32x96xbf16>
    %482 = vector.shape_cast %481 : vector<1x32x96xbf16> to vector<32x96xbf16>
    %483 = vector.extract_strided_slice %480 {offsets = [0, 0], sizes = [1, 96], strides = [1, 1]} : vector<13x128xf32> to vector<1x96xf32>
    %c0_140 = arith.constant 0 : index
    %c0_141 = arith.constant 0 : index
    %c0_142 = arith.constant 0 : index
    %484 = vector.load %arg9[%c0_140, %c0_141, %c0_142] : memref<2x32x32xbf16, #tpu.memory_space<vmem>>, vector<1x32x32xbf16>
    %485 = vector.shape_cast %484 : vector<1x32x32xbf16> to vector<32x32xbf16>
    %486 = vector.extract_strided_slice %480 {offsets = [1, 0], sizes = [1, 32], strides = [1, 1]} : vector<13x128xf32> to vector<1x32xf32>
    %487 = arith.truncf %478 : vector<16x32xf32> to vector<16x32xbf16>
    %cst_143 = arith.constant dense<0.000000e+00> : vector<16x96xf32>
    %488 = tpu.matmul %487, %482, %cst_143 {dimension_numbers = #tpu.dot_dimension_numbers<[1], [0], [0], [1], [0, 0, 1, 1], [], []>} : vector<16x32xbf16>, vector<32x96xbf16>, vector<16x96xf32> -> vector<16x96xf32>
    %489 = vector.broadcast %483 : vector<1x96xf32> to vector<16x96xf32>
    %490 = arith.addf %488, %489 : vector<16x96xf32>
    %491 = vector.extract_strided_slice %490 {offsets = [0, 0], sizes = [16, 32], strides = [1, 1]} : vector<16x96xf32> to vector<16x32xf32>
    %492 = vector.extract_strided_slice %490 {offsets = [0, 32], sizes = [16, 32], strides = [1, 1]} : vector<16x96xf32> to vector<16x32xf32>
    %493 = vector.extract_strided_slice %490 {offsets = [0, 64], sizes = [16, 32], strides = [1, 1]} : vector<16x96xf32> to vector<16x32xf32>
    %494 = arith.truncf %491 : vector<16x32xf32> to vector<16x32xbf16>
    %495 = arith.truncf %492 : vector<16x32xf32> to vector<16x32xbf16>
    %496 = arith.truncf %493 : vector<16x32xf32> to vector<16x32xbf16>
    %497 = vector.extract_strided_slice %494 {offsets = [0, 0], sizes = [8, 8], strides = [1, 1]} : vector<16x32xbf16> to vector<8x8xbf16>
    %498 = vector.extract_strided_slice %495 {offsets = [0, 0], sizes = [8, 8], strides = [1, 1]} : vector<16x32xbf16> to vector<8x8xbf16>
    %499 = vector.extract_strided_slice %496 {offsets = [0, 0], sizes = [8, 8], strides = [1, 1]} : vector<16x32xbf16> to vector<8x8xbf16>
    %cst_144 = arith.constant dense<0.000000e+00> : vector<8x8xf32>
    %500 = tpu.matmul %497, %498, %cst_144 {dimension_numbers = #tpu.dot_dimension_numbers<[1], [1], [0], [0], [0, 0, 1, 0], [], []>} : vector<8x8xbf16>, vector<8x8xbf16>, vector<8x8xf32> -> vector<8x8xf32>
    %cst_145 = arith.constant dense<0xFF800000> : vector<8xf32>
    %501 = vector.multi_reduction <maximumf>, %500, %cst_145 [1] : vector<8x8xf32> to vector<8xf32>
    %502 = vector.shape_cast %501 : vector<8xf32> to vector<8x1xf32>
    %503 = vector.broadcast %502 : vector<8x1xf32> to vector<8x8xf32>
    %504 = arith.subf %500, %503 : vector<8x8xf32>
    %505 = math.exp %504 : vector<8x8xf32>
    %cst_146 = arith.constant dense<0.000000e+00> : vector<8xf32>
    %506 = vector.multi_reduction <add>, %505, %cst_146 [1] : vector<8x8xf32> to vector<8xf32>
    %507 = vector.shape_cast %506 : vector<8xf32> to vector<8x1xf32>
    %508 = tpu.reciprocal %507 {approx = true} : vector<8x1xf32> -> vector<8x1xf32>
    %509 = vector.broadcast %508 : vector<8x1xf32> to vector<8x8xf32>
    %510 = arith.mulf %505, %509 : vector<8x8xf32>
    %511 = arith.truncf %510 : vector<8x8xf32> to vector<8x8xbf16>
    %cst_147 = arith.constant dense<0.000000e+00> : vector<8x8xf32>
    %512 = tpu.matmul %511, %499, %cst_147 {dimension_numbers = #tpu.dot_dimension_numbers<[1], [0], [0], [1], [0, 0, 1, 1], [], []>} : vector<8x8xbf16>, vector<8x8xbf16>, vector<8x8xf32> -> vector<8x8xf32>
    %513 = vector.extract_strided_slice %494 {offsets = [0, 8], sizes = [8, 8], strides = [1, 1]} : vector<16x32xbf16> to vector<8x8xbf16>
    %514 = vector.extract_strided_slice %495 {offsets = [0, 8], sizes = [8, 8], strides = [1, 1]} : vector<16x32xbf16> to vector<8x8xbf16>
    %515 = vector.extract_strided_slice %496 {offsets = [0, 8], sizes = [8, 8], strides = [1, 1]} : vector<16x32xbf16> to vector<8x8xbf16>
    %cst_148 = arith.constant dense<0.000000e+00> : vector<8x8xf32>
    %516 = tpu.matmul %513, %514, %cst_148 {dimension_numbers = #tpu.dot_dimension_numbers<[1], [1], [0], [0], [0, 0, 1, 0], [], []>} : vector<8x8xbf16>, vector<8x8xbf16>, vector<8x8xf32> -> vector<8x8xf32>
    %cst_149 = arith.constant dense<0xFF800000> : vector<8xf32>
    %517 = vector.multi_reduction <maximumf>, %516, %cst_149 [1] : vector<8x8xf32> to vector<8xf32>
    %518 = vector.shape_cast %517 : vector<8xf32> to vector<8x1xf32>
    %519 = vector.broadcast %518 : vector<8x1xf32> to vector<8x8xf32>
    %520 = arith.subf %516, %519 : vector<8x8xf32>
    %521 = math.exp %520 : vector<8x8xf32>
    %cst_150 = arith.constant dense<0.000000e+00> : vector<8xf32>
    %522 = vector.multi_reduction <add>, %521, %cst_150 [1] : vector<8x8xf32> to vector<8xf32>
    %523 = vector.shape_cast %522 : vector<8xf32> to vector<8x1xf32>
    %524 = tpu.reciprocal %523 {approx = true} : vector<8x1xf32> -> vector<8x1xf32>
    %525 = vector.broadcast %524 : vector<8x1xf32> to vector<8x8xf32>
    %526 = arith.mulf %521, %525 : vector<8x8xf32>
    %527 = arith.truncf %526 : vector<8x8xf32> to vector<8x8xbf16>
    %cst_151 = arith.constant dense<0.000000e+00> : vector<8x8xf32>
    %528 = tpu.matmul %527, %515, %cst_151 {dimension_numbers = #tpu.dot_dimension_numbers<[1], [0], [0], [1], [0, 0, 1, 1], [], []>} : vector<8x8xbf16>, vector<8x8xbf16>, vector<8x8xf32> -> vector<8x8xf32>
    %529 = vector.extract_strided_slice %494 {offsets = [0, 16], sizes = [8, 8], strides = [1, 1]} : vector<16x32xbf16> to vector<8x8xbf16>
    %530 = vector.extract_strided_slice %495 {offsets = [0, 16], sizes = [8, 8], strides = [1, 1]} : vector<16x32xbf16> to vector<8x8xbf16>
    %531 = vector.extract_strided_slice %496 {offsets = [0, 16], sizes = [8, 8], strides = [1, 1]} : vector<16x32xbf16> to vector<8x8xbf16>
    %cst_152 = arith.constant dense<0.000000e+00> : vector<8x8xf32>
    %532 = tpu.matmul %529, %530, %cst_152 {dimension_numbers = #tpu.dot_dimension_numbers<[1], [1], [0], [0], [0, 0, 1, 0], [], []>} : vector<8x8xbf16>, vector<8x8xbf16>, vector<8x8xf32> -> vector<8x8xf32>
    %cst_153 = arith.constant dense<0xFF800000> : vector<8xf32>
    %533 = vector.multi_reduction <maximumf>, %532, %cst_153 [1] : vector<8x8xf32> to vector<8xf32>
    %534 = vector.shape_cast %533 : vector<8xf32> to vector<8x1xf32>
    %535 = vector.broadcast %534 : vector<8x1xf32> to vector<8x8xf32>
    %536 = arith.subf %532, %535 : vector<8x8xf32>
    %537 = math.exp %536 : vector<8x8xf32>
    %cst_154 = arith.constant dense<0.000000e+00> : vector<8xf32>
    %538 = vector.multi_reduction <add>, %537, %cst_154 [1] : vector<8x8xf32> to vector<8xf32>
    %539 = vector.shape_cast %538 : vector<8xf32> to vector<8x1xf32>
    %540 = tpu.reciprocal %539 {approx = true} : vector<8x1xf32> -> vector<8x1xf32>
    %541 = vector.broadcast %540 : vector<8x1xf32> to vector<8x8xf32>
    %542 = arith.mulf %537, %541 : vector<8x8xf32>
    %543 = arith.truncf %542 : vector<8x8xf32> to vector<8x8xbf16>
    %cst_155 = arith.constant dense<0.000000e+00> : vector<8x8xf32>
    %544 = tpu.matmul %543, %531, %cst_155 {dimension_numbers = #tpu.dot_dimension_numbers<[1], [0], [0], [1], [0, 0, 1, 1], [], []>} : vector<8x8xbf16>, vector<8x8xbf16>, vector<8x8xf32> -> vector<8x8xf32>
    %545 = vector.extract_strided_slice %494 {offsets = [0, 24], sizes = [8, 8], strides = [1, 1]} : vector<16x32xbf16> to vector<8x8xbf16>
    %546 = vector.extract_strided_slice %495 {offsets = [0, 24], sizes = [8, 8], strides = [1, 1]} : vector<16x32xbf16> to vector<8x8xbf16>
    %547 = vector.extract_strided_slice %496 {offsets = [0, 24], sizes = [8, 8], strides = [1, 1]} : vector<16x32xbf16> to vector<8x8xbf16>
    %cst_156 = arith.constant dense<0.000000e+00> : vector<8x8xf32>
    %548 = tpu.matmul %545, %546, %cst_156 {dimension_numbers = #tpu.dot_dimension_numbers<[1], [1], [0], [0], [0, 0, 1, 0], [], []>} : vector<8x8xbf16>, vector<8x8xbf16>, vector<8x8xf32> -> vector<8x8xf32>
    %cst_157 = arith.constant dense<0xFF800000> : vector<8xf32>
    %549 = vector.multi_reduction <maximumf>, %548, %cst_157 [1] : vector<8x8xf32> to vector<8xf32>
    %550 = vector.shape_cast %549 : vector<8xf32> to vector<8x1xf32>
    %551 = vector.broadcast %550 : vector<8x1xf32> to vector<8x8xf32>
    %552 = arith.subf %548, %551 : vector<8x8xf32>
    %553 = math.exp %552 : vector<8x8xf32>
    %cst_158 = arith.constant dense<0.000000e+00> : vector<8xf32>
    %554 = vector.multi_reduction <add>, %553, %cst_158 [1] : vector<8x8xf32> to vector<8xf32>
    %555 = vector.shape_cast %554 : vector<8xf32> to vector<8x1xf32>
    %556 = tpu.reciprocal %555 {approx = true} : vector<8x1xf32> -> vector<8x1xf32>
    %557 = vector.broadcast %556 : vector<8x1xf32> to vector<8x8xf32>
    %558 = arith.mulf %553, %557 : vector<8x8xf32>
    %559 = arith.truncf %558 : vector<8x8xf32> to vector<8x8xbf16>
    %cst_159 = arith.constant dense<0.000000e+00> : vector<8x8xf32>
    %560 = tpu.matmul %559, %547, %cst_159 {dimension_numbers = #tpu.dot_dimension_numbers<[1], [0], [0], [1], [0, 0, 1, 1], [], []>} : vector<8x8xbf16>, vector<8x8xbf16>, vector<8x8xf32> -> vector<8x8xf32>
    %561 = tpu.concatenate %512, %528, %544, %560 in 1 : vector<8x8xf32>, vector<8x8xf32>, vector<8x8xf32>, vector<8x8xf32> -> vector<8x32xf32>
    %562 = vector.extract_strided_slice %494 {offsets = [8, 0], sizes = [8, 8], strides = [1, 1]} : vector<16x32xbf16> to vector<8x8xbf16>
    %563 = vector.extract_strided_slice %495 {offsets = [8, 0], sizes = [8, 8], strides = [1, 1]} : vector<16x32xbf16> to vector<8x8xbf16>
    %564 = vector.extract_strided_slice %496 {offsets = [8, 0], sizes = [8, 8], strides = [1, 1]} : vector<16x32xbf16> to vector<8x8xbf16>
    %cst_160 = arith.constant dense<0.000000e+00> : vector<8x8xf32>
    %565 = tpu.matmul %562, %563, %cst_160 {dimension_numbers = #tpu.dot_dimension_numbers<[1], [1], [0], [0], [0, 0, 1, 0], [], []>} : vector<8x8xbf16>, vector<8x8xbf16>, vector<8x8xf32> -> vector<8x8xf32>
    %cst_161 = arith.constant dense<0xFF800000> : vector<8xf32>
    %566 = vector.multi_reduction <maximumf>, %565, %cst_161 [1] : vector<8x8xf32> to vector<8xf32>
    %567 = vector.shape_cast %566 : vector<8xf32> to vector<8x1xf32>
    %568 = vector.broadcast %567 : vector<8x1xf32> to vector<8x8xf32>
    %569 = arith.subf %565, %568 : vector<8x8xf32>
    %570 = math.exp %569 : vector<8x8xf32>
    %cst_162 = arith.constant dense<0.000000e+00> : vector<8xf32>
    %571 = vector.multi_reduction <add>, %570, %cst_162 [1] : vector<8x8xf32> to vector<8xf32>
    %572 = vector.shape_cast %571 : vector<8xf32> to vector<8x1xf32>
    %573 = tpu.reciprocal %572 {approx = true} : vector<8x1xf32> -> vector<8x1xf32>
    %574 = vector.broadcast %573 : vector<8x1xf32> to vector<8x8xf32>
    %575 = arith.mulf %570, %574 : vector<8x8xf32>
    %576 = arith.truncf %575 : vector<8x8xf32> to vector<8x8xbf16>
    %cst_163 = arith.constant dense<0.000000e+00> : vector<8x8xf32>
    %577 = tpu.matmul %576, %564, %cst_163 {dimension_numbers = #tpu.dot_dimension_numbers<[1], [0], [0], [1], [0, 0, 1, 1], [], []>} : vector<8x8xbf16>, vector<8x8xbf16>, vector<8x8xf32> -> vector<8x8xf32>
    %578 = vector.extract_strided_slice %494 {offsets = [8, 8], sizes = [8, 8], strides = [1, 1]} : vector<16x32xbf16> to vector<8x8xbf16>
    %579 = vector.extract_strided_slice %495 {offsets = [8, 8], sizes = [8, 8], strides = [1, 1]} : vector<16x32xbf16> to vector<8x8xbf16>
    %580 = vector.extract_strided_slice %496 {offsets = [8, 8], sizes = [8, 8], strides = [1, 1]} : vector<16x32xbf16> to vector<8x8xbf16>
    %cst_164 = arith.constant dense<0.000000e+00> : vector<8x8xf32>
    %581 = tpu.matmul %578, %579, %cst_164 {dimension_numbers = #tpu.dot_dimension_numbers<[1], [1], [0], [0], [0, 0, 1, 0], [], []>} : vector<8x8xbf16>, vector<8x8xbf16>, vector<8x8xf32> -> vector<8x8xf32>
    %cst_165 = arith.constant dense<0xFF800000> : vector<8xf32>
    %582 = vector.multi_reduction <maximumf>, %581, %cst_165 [1] : vector<8x8xf32> to vector<8xf32>
    %583 = vector.shape_cast %582 : vector<8xf32> to vector<8x1xf32>
    %584 = vector.broadcast %583 : vector<8x1xf32> to vector<8x8xf32>
    %585 = arith.subf %581, %584 : vector<8x8xf32>
    %586 = math.exp %585 : vector<8x8xf32>
    %cst_166 = arith.constant dense<0.000000e+00> : vector<8xf32>
    %587 = vector.multi_reduction <add>, %586, %cst_166 [1] : vector<8x8xf32> to vector<8xf32>
    %588 = vector.shape_cast %587 : vector<8xf32> to vector<8x1xf32>
    %589 = tpu.reciprocal %588 {approx = true} : vector<8x1xf32> -> vector<8x1xf32>
    %590 = vector.broadcast %589 : vector<8x1xf32> to vector<8x8xf32>
    %591 = arith.mulf %586, %590 : vector<8x8xf32>
    %592 = arith.truncf %591 : vector<8x8xf32> to vector<8x8xbf16>
    %cst_167 = arith.constant dense<0.000000e+00> : vector<8x8xf32>
    %593 = tpu.matmul %592, %580, %cst_167 {dimension_numbers = #tpu.dot_dimension_numbers<[1], [0], [0], [1], [0, 0, 1, 1], [], []>} : vector<8x8xbf16>, vector<8x8xbf16>, vector<8x8xf32> -> vector<8x8xf32>
    %594 = vector.extract_strided_slice %494 {offsets = [8, 16], sizes = [8, 8], strides = [1, 1]} : vector<16x32xbf16> to vector<8x8xbf16>
    %595 = vector.extract_strided_slice %495 {offsets = [8, 16], sizes = [8, 8], strides = [1, 1]} : vector<16x32xbf16> to vector<8x8xbf16>
    %596 = vector.extract_strided_slice %496 {offsets = [8, 16], sizes = [8, 8], strides = [1, 1]} : vector<16x32xbf16> to vector<8x8xbf16>
    %cst_168 = arith.constant dense<0.000000e+00> : vector<8x8xf32>
    %597 = tpu.matmul %594, %595, %cst_168 {dimension_numbers = #tpu.dot_dimension_numbers<[1], [1], [0], [0], [0, 0, 1, 0], [], []>} : vector<8x8xbf16>, vector<8x8xbf16>, vector<8x8xf32> -> vector<8x8xf32>
    %cst_169 = arith.constant dense<0xFF800000> : vector<8xf32>
    %598 = vector.multi_reduction <maximumf>, %597, %cst_169 [1] : vector<8x8xf32> to vector<8xf32>
    %599 = vector.shape_cast %598 : vector<8xf32> to vector<8x1xf32>
    %600 = vector.broadcast %599 : vector<8x1xf32> to vector<8x8xf32>
    %601 = arith.subf %597, %600 : vector<8x8xf32>
    %602 = math.exp %601 : vector<8x8xf32>
    %cst_170 = arith.constant dense<0.000000e+00> : vector<8xf32>
    %603 = vector.multi_reduction <add>, %602, %cst_170 [1] : vector<8x8xf32> to vector<8xf32>
    %604 = vector.shape_cast %603 : vector<8xf32> to vector<8x1xf32>
    %605 = tpu.reciprocal %604 {approx = true} : vector<8x1xf32> -> vector<8x1xf32>
    %606 = vector.broadcast %605 : vector<8x1xf32> to vector<8x8xf32>
    %607 = arith.mulf %602, %606 : vector<8x8xf32>
    %608 = arith.truncf %607 : vector<8x8xf32> to vector<8x8xbf16>
    %cst_171 = arith.constant dense<0.000000e+00> : vector<8x8xf32>
    %609 = tpu.matmul %608, %596, %cst_171 {dimension_numbers = #tpu.dot_dimension_numbers<[1], [0], [0], [1], [0, 0, 1, 1], [], []>} : vector<8x8xbf16>, vector<8x8xbf16>, vector<8x8xf32> -> vector<8x8xf32>
    %610 = vector.extract_strided_slice %494 {offsets = [8, 24], sizes = [8, 8], strides = [1, 1]} : vector<16x32xbf16> to vector<8x8xbf16>
    %611 = vector.extract_strided_slice %495 {offsets = [8, 24], sizes = [8, 8], strides = [1, 1]} : vector<16x32xbf16> to vector<8x8xbf16>
    %612 = vector.extract_strided_slice %496 {offsets = [8, 24], sizes = [8, 8], strides = [1, 1]} : vector<16x32xbf16> to vector<8x8xbf16>
    %cst_172 = arith.constant dense<0.000000e+00> : vector<8x8xf32>
    %613 = tpu.matmul %610, %611, %cst_172 {dimension_numbers = #tpu.dot_dimension_numbers<[1], [1], [0], [0], [0, 0, 1, 0], [], []>} : vector<8x8xbf16>, vector<8x8xbf16>, vector<8x8xf32> -> vector<8x8xf32>
    %cst_173 = arith.constant dense<0xFF800000> : vector<8xf32>
    %614 = vector.multi_reduction <maximumf>, %613, %cst_173 [1] : vector<8x8xf32> to vector<8xf32>
    %615 = vector.shape_cast %614 : vector<8xf32> to vector<8x1xf32>
    %616 = vector.broadcast %615 : vector<8x1xf32> to vector<8x8xf32>
    %617 = arith.subf %613, %616 : vector<8x8xf32>
    %618 = math.exp %617 : vector<8x8xf32>
    %cst_174 = arith.constant dense<0.000000e+00> : vector<8xf32>
    %619 = vector.multi_reduction <add>, %618, %cst_174 [1] : vector<8x8xf32> to vector<8xf32>
    %620 = vector.shape_cast %619 : vector<8xf32> to vector<8x1xf32>
    %621 = tpu.reciprocal %620 {approx = true} : vector<8x1xf32> -> vector<8x1xf32>
    %622 = vector.broadcast %621 : vector<8x1xf32> to vector<8x8xf32>
    %623 = arith.mulf %618, %622 : vector<8x8xf32>
    %624 = arith.truncf %623 : vector<8x8xf32> to vector<8x8xbf16>
    %cst_175 = arith.constant dense<0.000000e+00> : vector<8x8xf32>
    %625 = tpu.matmul %624, %612, %cst_175 {dimension_numbers = #tpu.dot_dimension_numbers<[1], [0], [0], [1], [0, 0, 1, 1], [], []>} : vector<8x8xbf16>, vector<8x8xbf16>, vector<8x8xf32> -> vector<8x8xf32>
    %626 = tpu.concatenate %577, %593, %609, %625 in 1 : vector<8x8xf32>, vector<8x8xf32>, vector<8x8xf32>, vector<8x8xf32> -> vector<8x32xf32>
    %627 = tpu.concatenate %561, %626 in 0 : vector<8x32xf32>, vector<8x32xf32> -> vector<16x32xf32>
    %628 = arith.truncf %627 : vector<16x32xf32> to vector<16x32xbf16>
    %cst_176 = arith.constant dense<0.000000e+00> : vector<16x32xf32>
    %629 = tpu.matmul %628, %485, %cst_176 {dimension_numbers = #tpu.dot_dimension_numbers<[1], [0], [0], [1], [0, 0, 1, 1], [], []>} : vector<16x32xbf16>, vector<32x32xbf16>, vector<16x32xf32> -> vector<16x32xf32>
    %630 = vector.broadcast %486 : vector<1x32xf32> to vector<16x32xf32>
    %631 = arith.addf %629, %630 : vector<16x32xf32>
    %632 = arith.addf %478, %631 : vector<16x32xf32>
    %633 = vector.extract_strided_slice %480 {offsets = [2, 0], sizes = [1, 32], strides = [1, 1]} : vector<13x128xf32> to vector<1x32xf32>
    %634 = vector.extract_strided_slice %480 {offsets = [3, 0], sizes = [1, 32], strides = [1, 1]} : vector<13x128xf32> to vector<1x32xf32>
    %cst_177 = arith.constant dense<0.000000e+00> : vector<16xf32>
    %635 = vector.multi_reduction <add>, %632, %cst_177 [1] : vector<16x32xf32> to vector<16xf32>
    %636 = vector.shape_cast %635 : vector<16xf32> to vector<16x1xf32>
    %cst_178 = arith.constant 3.200000e+01 : f32
    %637 = vector.broadcast %cst_178 : f32 to vector<16x1xf32>
    %638 = arith.divf %636, %637 : vector<16x1xf32>
    %639 = vector.broadcast %638 : vector<16x1xf32> to vector<16x32xf32>
    %640 = arith.subf %632, %639 : vector<16x32xf32>
    %641 = arith.mulf %640, %640 : vector<16x32xf32>
    %cst_179 = arith.constant dense<0.000000e+00> : vector<16xf32>
    %642 = vector.multi_reduction <add>, %641, %cst_179 [1] : vector<16x32xf32> to vector<16xf32>
    %643 = vector.shape_cast %642 : vector<16xf32> to vector<16x1xf32>
    %cst_180 = arith.constant 3.200000e+01 : f32
    %644 = vector.broadcast %cst_180 : f32 to vector<16x1xf32>
    %645 = arith.divf %643, %644 : vector<16x1xf32>
    %646 = vector.broadcast %638 : vector<16x1xf32> to vector<16x32xf32>
    %647 = arith.subf %632, %646 : vector<16x32xf32>
    %cst_181 = arith.constant 9.99999974E-6 : f32
    %648 = vector.broadcast %cst_181 : f32 to vector<16x1xf32>
    %649 = arith.addf %645, %648 : vector<16x1xf32>
    %650 = math.rsqrt %649 : vector<16x1xf32>
    %651 = vector.broadcast %650 : vector<16x1xf32> to vector<16x32xf32>
    %652 = arith.mulf %647, %651 : vector<16x32xf32>
    %653 = vector.broadcast %633 : vector<1x32xf32> to vector<16x32xf32>
    %654 = arith.mulf %652, %653 : vector<16x32xf32>
    %655 = vector.broadcast %634 : vector<1x32xf32> to vector<16x32xf32>
    %656 = arith.addf %654, %655 : vector<16x32xf32>
    %c0_182 = arith.constant 0 : index
    %c0_183 = arith.constant 0 : index
    %c0_184 = arith.constant 0 : index
    %657 = vector.load %arg10[%c0_182, %c0_183, %c0_184] : memref<2x32x32xbf16, #tpu.memory_space<vmem>>, vector<1x32x32xbf16>
    %658 = vector.shape_cast %657 : vector<1x32x32xbf16> to vector<32x32xbf16>
    %659 = vector.extract_strided_slice %480 {offsets = [4, 0], sizes = [1, 32], strides = [1, 1]} : vector<13x128xf32> to vector<1x32xf32>
    %c0_185 = arith.constant 0 : index
    %c0_186 = arith.constant 0 : index
    %c0_187 = arith.constant 0 : index
    %660 = vector.load %arg11[%c0_185, %c0_186, %c0_187] : memref<2x32x64xbf16, #tpu.memory_space<vmem>>, vector<1x32x64xbf16>
    %661 = vector.shape_cast %660 : vector<1x32x64xbf16> to vector<32x64xbf16>
    %662 = vector.extract_strided_slice %480 {offsets = [5, 0], sizes = [1, 64], strides = [1, 1]} : vector<13x128xf32> to vector<1x64xf32>
    %c0_188 = arith.constant 0 : index
    %c0_189 = arith.constant 0 : index
    %c0_190 = arith.constant 0 : index
    %663 = vector.load %arg12[%c0_188, %c0_189, %c0_190] : memref<2x32x32xbf16, #tpu.memory_space<vmem>>, vector<1x32x32xbf16>
    %664 = vector.shape_cast %663 : vector<1x32x32xbf16> to vector<32x32xbf16>
    %665 = vector.extract_strided_slice %480 {offsets = [6, 0], sizes = [1, 32], strides = [1, 1]} : vector<13x128xf32> to vector<1x32xf32>
    %666 = arith.truncf %656 : vector<16x32xf32> to vector<16x32xbf16>
    %cst_191 = arith.constant dense<0.000000e+00> : vector<16x32xf32>
    %667 = tpu.matmul %666, %658, %cst_191 {dimension_numbers = #tpu.dot_dimension_numbers<[1], [0], [0], [1], [0, 0, 1, 1], [], []>} : vector<16x32xbf16>, vector<32x32xbf16>, vector<16x32xf32> -> vector<16x32xf32>
    %668 = vector.broadcast %659 : vector<1x32xf32> to vector<16x32xf32>
    %669 = arith.addf %667, %668 : vector<16x32xf32>
    %cst_192 = arith.constant dense<0.000000e+00> : vector<16x64xf32>
    %670 = tpu.matmul %471, %661, %cst_192 {dimension_numbers = #tpu.dot_dimension_numbers<[1], [0], [0], [1], [0, 0, 1, 1], [], []>} : vector<16x32xbf16>, vector<32x64xbf16>, vector<16x64xf32> -> vector<16x64xf32>
    %671 = vector.broadcast %662 : vector<1x64xf32> to vector<16x64xf32>
    %672 = arith.addf %670, %671 : vector<16x64xf32>
    %673 = vector.extract_strided_slice %672 {offsets = [0, 0], sizes = [16, 32], strides = [1, 1]} : vector<16x64xf32> to vector<16x32xf32>
    %674 = vector.extract_strided_slice %672 {offsets = [0, 32], sizes = [16, 32], strides = [1, 1]} : vector<16x64xf32> to vector<16x32xf32>
    %675 = arith.truncf %669 : vector<16x32xf32> to vector<16x32xbf16>
    %676 = arith.truncf %673 : vector<16x32xf32> to vector<16x32xbf16>
    %677 = arith.truncf %674 : vector<16x32xf32> to vector<16x32xbf16>
    %678 = vector.extract_strided_slice %675 {offsets = [0, 0], sizes = [8, 8], strides = [1, 1]} : vector<16x32xbf16> to vector<8x8xbf16>
    %679 = vector.extract_strided_slice %676 {offsets = [0, 0], sizes = [8, 8], strides = [1, 1]} : vector<16x32xbf16> to vector<8x8xbf16>
    %680 = vector.extract_strided_slice %677 {offsets = [0, 0], sizes = [8, 8], strides = [1, 1]} : vector<16x32xbf16> to vector<8x8xbf16>
    %cst_193 = arith.constant dense<0.000000e+00> : vector<8x8xf32>
    %681 = tpu.matmul %678, %679, %cst_193 {dimension_numbers = #tpu.dot_dimension_numbers<[1], [1], [0], [0], [0, 0, 1, 0], [], []>} : vector<8x8xbf16>, vector<8x8xbf16>, vector<8x8xf32> -> vector<8x8xf32>
    %cst_194 = arith.constant dense<0xFF800000> : vector<8xf32>
    %682 = vector.multi_reduction <maximumf>, %681, %cst_194 [1] : vector<8x8xf32> to vector<8xf32>
    %683 = vector.shape_cast %682 : vector<8xf32> to vector<8x1xf32>
    %684 = vector.broadcast %683 : vector<8x1xf32> to vector<8x8xf32>
    %685 = arith.subf %681, %684 : vector<8x8xf32>
    %686 = math.exp %685 : vector<8x8xf32>
    %cst_195 = arith.constant dense<0.000000e+00> : vector<8xf32>
    %687 = vector.multi_reduction <add>, %686, %cst_195 [1] : vector<8x8xf32> to vector<8xf32>
    %688 = vector.shape_cast %687 : vector<8xf32> to vector<8x1xf32>
    %689 = tpu.reciprocal %688 {approx = true} : vector<8x1xf32> -> vector<8x1xf32>
    %690 = vector.broadcast %689 : vector<8x1xf32> to vector<8x8xf32>
    %691 = arith.mulf %686, %690 : vector<8x8xf32>
    %692 = arith.truncf %691 : vector<8x8xf32> to vector<8x8xbf16>
    %cst_196 = arith.constant dense<0.000000e+00> : vector<8x8xf32>
    %693 = tpu.matmul %692, %680, %cst_196 {dimension_numbers = #tpu.dot_dimension_numbers<[1], [0], [0], [1], [0, 0, 1, 1], [], []>} : vector<8x8xbf16>, vector<8x8xbf16>, vector<8x8xf32> -> vector<8x8xf32>
    %694 = vector.extract_strided_slice %675 {offsets = [0, 8], sizes = [8, 8], strides = [1, 1]} : vector<16x32xbf16> to vector<8x8xbf16>
    %695 = vector.extract_strided_slice %676 {offsets = [0, 8], sizes = [8, 8], strides = [1, 1]} : vector<16x32xbf16> to vector<8x8xbf16>
    %696 = vector.extract_strided_slice %677 {offsets = [0, 8], sizes = [8, 8], strides = [1, 1]} : vector<16x32xbf16> to vector<8x8xbf16>
    %cst_197 = arith.constant dense<0.000000e+00> : vector<8x8xf32>
    %697 = tpu.matmul %694, %695, %cst_197 {dimension_numbers = #tpu.dot_dimension_numbers<[1], [1], [0], [0], [0, 0, 1, 0], [], []>} : vector<8x8xbf16>, vector<8x8xbf16>, vector<8x8xf32> -> vector<8x8xf32>
    %cst_198 = arith.constant dense<0xFF800000> : vector<8xf32>
    %698 = vector.multi_reduction <maximumf>, %697, %cst_198 [1] : vector<8x8xf32> to vector<8xf32>
    %699 = vector.shape_cast %698 : vector<8xf32> to vector<8x1xf32>
    %700 = vector.broadcast %699 : vector<8x1xf32> to vector<8x8xf32>
    %701 = arith.subf %697, %700 : vector<8x8xf32>
    %702 = math.exp %701 : vector<8x8xf32>
    %cst_199 = arith.constant dense<0.000000e+00> : vector<8xf32>
    %703 = vector.multi_reduction <add>, %702, %cst_199 [1] : vector<8x8xf32> to vector<8xf32>
    %704 = vector.shape_cast %703 : vector<8xf32> to vector<8x1xf32>
    %705 = tpu.reciprocal %704 {approx = true} : vector<8x1xf32> -> vector<8x1xf32>
    %706 = vector.broadcast %705 : vector<8x1xf32> to vector<8x8xf32>
    %707 = arith.mulf %702, %706 : vector<8x8xf32>
    %708 = arith.truncf %707 : vector<8x8xf32> to vector<8x8xbf16>
    %cst_200 = arith.constant dense<0.000000e+00> : vector<8x8xf32>
    %709 = tpu.matmul %708, %696, %cst_200 {dimension_numbers = #tpu.dot_dimension_numbers<[1], [0], [0], [1], [0, 0, 1, 1], [], []>} : vector<8x8xbf16>, vector<8x8xbf16>, vector<8x8xf32> -> vector<8x8xf32>
    %710 = vector.extract_strided_slice %675 {offsets = [0, 16], sizes = [8, 8], strides = [1, 1]} : vector<16x32xbf16> to vector<8x8xbf16>
    %711 = vector.extract_strided_slice %676 {offsets = [0, 16], sizes = [8, 8], strides = [1, 1]} : vector<16x32xbf16> to vector<8x8xbf16>
    %712 = vector.extract_strided_slice %677 {offsets = [0, 16], sizes = [8, 8], strides = [1, 1]} : vector<16x32xbf16> to vector<8x8xbf16>
    %cst_201 = arith.constant dense<0.000000e+00> : vector<8x8xf32>
    %713 = tpu.matmul %710, %711, %cst_201 {dimension_numbers = #tpu.dot_dimension_numbers<[1], [1], [0], [0], [0, 0, 1, 0], [], []>} : vector<8x8xbf16>, vector<8x8xbf16>, vector<8x8xf32> -> vector<8x8xf32>
    %cst_202 = arith.constant dense<0xFF800000> : vector<8xf32>
    %714 = vector.multi_reduction <maximumf>, %713, %cst_202 [1] : vector<8x8xf32> to vector<8xf32>
    %715 = vector.shape_cast %714 : vector<8xf32> to vector<8x1xf32>
    %716 = vector.broadcast %715 : vector<8x1xf32> to vector<8x8xf32>
    %717 = arith.subf %713, %716 : vector<8x8xf32>
    %718 = math.exp %717 : vector<8x8xf32>
    %cst_203 = arith.constant dense<0.000000e+00> : vector<8xf32>
    %719 = vector.multi_reduction <add>, %718, %cst_203 [1] : vector<8x8xf32> to vector<8xf32>
    %720 = vector.shape_cast %719 : vector<8xf32> to vector<8x1xf32>
    %721 = tpu.reciprocal %720 {approx = true} : vector<8x1xf32> -> vector<8x1xf32>
    %722 = vector.broadcast %721 : vector<8x1xf32> to vector<8x8xf32>
    %723 = arith.mulf %718, %722 : vector<8x8xf32>
    %724 = arith.truncf %723 : vector<8x8xf32> to vector<8x8xbf16>
    %cst_204 = arith.constant dense<0.000000e+00> : vector<8x8xf32>
    %725 = tpu.matmul %724, %712, %cst_204 {dimension_numbers = #tpu.dot_dimension_numbers<[1], [0], [0], [1], [0, 0, 1, 1], [], []>} : vector<8x8xbf16>, vector<8x8xbf16>, vector<8x8xf32> -> vector<8x8xf32>
    %726 = vector.extract_strided_slice %675 {offsets = [0, 24], sizes = [8, 8], strides = [1, 1]} : vector<16x32xbf16> to vector<8x8xbf16>
    %727 = vector.extract_strided_slice %676 {offsets = [0, 24], sizes = [8, 8], strides = [1, 1]} : vector<16x32xbf16> to vector<8x8xbf16>
    %728 = vector.extract_strided_slice %677 {offsets = [0, 24], sizes = [8, 8], strides = [1, 1]} : vector<16x32xbf16> to vector<8x8xbf16>
    %cst_205 = arith.constant dense<0.000000e+00> : vector<8x8xf32>
    %729 = tpu.matmul %726, %727, %cst_205 {dimension_numbers = #tpu.dot_dimension_numbers<[1], [1], [0], [0], [0, 0, 1, 0], [], []>} : vector<8x8xbf16>, vector<8x8xbf16>, vector<8x8xf32> -> vector<8x8xf32>
    %cst_206 = arith.constant dense<0xFF800000> : vector<8xf32>
    %730 = vector.multi_reduction <maximumf>, %729, %cst_206 [1] : vector<8x8xf32> to vector<8xf32>
    %731 = vector.shape_cast %730 : vector<8xf32> to vector<8x1xf32>
    %732 = vector.broadcast %731 : vector<8x1xf32> to vector<8x8xf32>
    %733 = arith.subf %729, %732 : vector<8x8xf32>
    %734 = math.exp %733 : vector<8x8xf32>
    %cst_207 = arith.constant dense<0.000000e+00> : vector<8xf32>
    %735 = vector.multi_reduction <add>, %734, %cst_207 [1] : vector<8x8xf32> to vector<8xf32>
    %736 = vector.shape_cast %735 : vector<8xf32> to vector<8x1xf32>
    %737 = tpu.reciprocal %736 {approx = true} : vector<8x1xf32> -> vector<8x1xf32>
    %738 = vector.broadcast %737 : vector<8x1xf32> to vector<8x8xf32>
    %739 = arith.mulf %734, %738 : vector<8x8xf32>
    %740 = arith.truncf %739 : vector<8x8xf32> to vector<8x8xbf16>
    %cst_208 = arith.constant dense<0.000000e+00> : vector<8x8xf32>
    %741 = tpu.matmul %740, %728, %cst_208 {dimension_numbers = #tpu.dot_dimension_numbers<[1], [0], [0], [1], [0, 0, 1, 1], [], []>} : vector<8x8xbf16>, vector<8x8xbf16>, vector<8x8xf32> -> vector<8x8xf32>
    %742 = tpu.concatenate %693, %709, %725, %741 in 1 : vector<8x8xf32>, vector<8x8xf32>, vector<8x8xf32>, vector<8x8xf32> -> vector<8x32xf32>
    %743 = vector.extract_strided_slice %675 {offsets = [8, 0], sizes = [8, 8], strides = [1, 1]} : vector<16x32xbf16> to vector<8x8xbf16>
    %744 = vector.extract_strided_slice %676 {offsets = [8, 0], sizes = [8, 8], strides = [1, 1]} : vector<16x32xbf16> to vector<8x8xbf16>
    %745 = vector.extract_strided_slice %677 {offsets = [8, 0], sizes = [8, 8], strides = [1, 1]} : vector<16x32xbf16> to vector<8x8xbf16>
    %cst_209 = arith.constant dense<0.000000e+00> : vector<8x8xf32>
    %746 = tpu.matmul %743, %744, %cst_209 {dimension_numbers = #tpu.dot_dimension_numbers<[1], [1], [0], [0], [0, 0, 1, 0], [], []>} : vector<8x8xbf16>, vector<8x8xbf16>, vector<8x8xf32> -> vector<8x8xf32>
    %cst_210 = arith.constant dense<0xFF800000> : vector<8xf32>
    %747 = vector.multi_reduction <maximumf>, %746, %cst_210 [1] : vector<8x8xf32> to vector<8xf32>
    %748 = vector.shape_cast %747 : vector<8xf32> to vector<8x1xf32>
    %749 = vector.broadcast %748 : vector<8x1xf32> to vector<8x8xf32>
    %750 = arith.subf %746, %749 : vector<8x8xf32>
    %751 = math.exp %750 : vector<8x8xf32>
    %cst_211 = arith.constant dense<0.000000e+00> : vector<8xf32>
    %752 = vector.multi_reduction <add>, %751, %cst_211 [1] : vector<8x8xf32> to vector<8xf32>
    %753 = vector.shape_cast %752 : vector<8xf32> to vector<8x1xf32>
    %754 = tpu.reciprocal %753 {approx = true} : vector<8x1xf32> -> vector<8x1xf32>
    %755 = vector.broadcast %754 : vector<8x1xf32> to vector<8x8xf32>
    %756 = arith.mulf %751, %755 : vector<8x8xf32>
    %757 = arith.truncf %756 : vector<8x8xf32> to vector<8x8xbf16>
    %cst_212 = arith.constant dense<0.000000e+00> : vector<8x8xf32>
    %758 = tpu.matmul %757, %745, %cst_212 {dimension_numbers = #tpu.dot_dimension_numbers<[1], [0], [0], [1], [0, 0, 1, 1], [], []>} : vector<8x8xbf16>, vector<8x8xbf16>, vector<8x8xf32> -> vector<8x8xf32>
    %759 = vector.extract_strided_slice %675 {offsets = [8, 8], sizes = [8, 8], strides = [1, 1]} : vector<16x32xbf16> to vector<8x8xbf16>
    %760 = vector.extract_strided_slice %676 {offsets = [8, 8], sizes = [8, 8], strides = [1, 1]} : vector<16x32xbf16> to vector<8x8xbf16>
    %761 = vector.extract_strided_slice %677 {offsets = [8, 8], sizes = [8, 8], strides = [1, 1]} : vector<16x32xbf16> to vector<8x8xbf16>
    %cst_213 = arith.constant dense<0.000000e+00> : vector<8x8xf32>
    %762 = tpu.matmul %759, %760, %cst_213 {dimension_numbers = #tpu.dot_dimension_numbers<[1], [1], [0], [0], [0, 0, 1, 0], [], []>} : vector<8x8xbf16>, vector<8x8xbf16>, vector<8x8xf32> -> vector<8x8xf32>
    %cst_214 = arith.constant dense<0xFF800000> : vector<8xf32>
    %763 = vector.multi_reduction <maximumf>, %762, %cst_214 [1] : vector<8x8xf32> to vector<8xf32>
    %764 = vector.shape_cast %763 : vector<8xf32> to vector<8x1xf32>
    %765 = vector.broadcast %764 : vector<8x1xf32> to vector<8x8xf32>
    %766 = arith.subf %762, %765 : vector<8x8xf32>
    %767 = math.exp %766 : vector<8x8xf32>
    %cst_215 = arith.constant dense<0.000000e+00> : vector<8xf32>
    %768 = vector.multi_reduction <add>, %767, %cst_215 [1] : vector<8x8xf32> to vector<8xf32>
    %769 = vector.shape_cast %768 : vector<8xf32> to vector<8x1xf32>
    %770 = tpu.reciprocal %769 {approx = true} : vector<8x1xf32> -> vector<8x1xf32>
    %771 = vector.broadcast %770 : vector<8x1xf32> to vector<8x8xf32>
    %772 = arith.mulf %767, %771 : vector<8x8xf32>
    %773 = arith.truncf %772 : vector<8x8xf32> to vector<8x8xbf16>
    %cst_216 = arith.constant dense<0.000000e+00> : vector<8x8xf32>
    %774 = tpu.matmul %773, %761, %cst_216 {dimension_numbers = #tpu.dot_dimension_numbers<[1], [0], [0], [1], [0, 0, 1, 1], [], []>} : vector<8x8xbf16>, vector<8x8xbf16>, vector<8x8xf32> -> vector<8x8xf32>
    %775 = vector.extract_strided_slice %675 {offsets = [8, 16], sizes = [8, 8], strides = [1, 1]} : vector<16x32xbf16> to vector<8x8xbf16>
    %776 = vector.extract_strided_slice %676 {offsets = [8, 16], sizes = [8, 8], strides = [1, 1]} : vector<16x32xbf16> to vector<8x8xbf16>
    %777 = vector.extract_strided_slice %677 {offsets = [8, 16], sizes = [8, 8], strides = [1, 1]} : vector<16x32xbf16> to vector<8x8xbf16>
    %cst_217 = arith.constant dense<0.000000e+00> : vector<8x8xf32>
    %778 = tpu.matmul %775, %776, %cst_217 {dimension_numbers = #tpu.dot_dimension_numbers<[1], [1], [0], [0], [0, 0, 1, 0], [], []>} : vector<8x8xbf16>, vector<8x8xbf16>, vector<8x8xf32> -> vector<8x8xf32>
    %cst_218 = arith.constant dense<0xFF800000> : vector<8xf32>
    %779 = vector.multi_reduction <maximumf>, %778, %cst_218 [1] : vector<8x8xf32> to vector<8xf32>
    %780 = vector.shape_cast %779 : vector<8xf32> to vector<8x1xf32>
    %781 = vector.broadcast %780 : vector<8x1xf32> to vector<8x8xf32>
    %782 = arith.subf %778, %781 : vector<8x8xf32>
    %783 = math.exp %782 : vector<8x8xf32>
    %cst_219 = arith.constant dense<0.000000e+00> : vector<8xf32>
    %784 = vector.multi_reduction <add>, %783, %cst_219 [1] : vector<8x8xf32> to vector<8xf32>
    %785 = vector.shape_cast %784 : vector<8xf32> to vector<8x1xf32>
    %786 = tpu.reciprocal %785 {approx = true} : vector<8x1xf32> -> vector<8x1xf32>
    %787 = vector.broadcast %786 : vector<8x1xf32> to vector<8x8xf32>
    %788 = arith.mulf %783, %787 : vector<8x8xf32>
    %789 = arith.truncf %788 : vector<8x8xf32> to vector<8x8xbf16>
    %cst_220 = arith.constant dense<0.000000e+00> : vector<8x8xf32>
    %790 = tpu.matmul %789, %777, %cst_220 {dimension_numbers = #tpu.dot_dimension_numbers<[1], [0], [0], [1], [0, 0, 1, 1], [], []>} : vector<8x8xbf16>, vector<8x8xbf16>, vector<8x8xf32> -> vector<8x8xf32>
    %791 = vector.extract_strided_slice %675 {offsets = [8, 24], sizes = [8, 8], strides = [1, 1]} : vector<16x32xbf16> to vector<8x8xbf16>
    %792 = vector.extract_strided_slice %676 {offsets = [8, 24], sizes = [8, 8], strides = [1, 1]} : vector<16x32xbf16> to vector<8x8xbf16>
    %793 = vector.extract_strided_slice %677 {offsets = [8, 24], sizes = [8, 8], strides = [1, 1]} : vector<16x32xbf16> to vector<8x8xbf16>
    %cst_221 = arith.constant dense<0.000000e+00> : vector<8x8xf32>
    %794 = tpu.matmul %791, %792, %cst_221 {dimension_numbers = #tpu.dot_dimension_numbers<[1], [1], [0], [0], [0, 0, 1, 0], [], []>} : vector<8x8xbf16>, vector<8x8xbf16>, vector<8x8xf32> -> vector<8x8xf32>
    %cst_222 = arith.constant dense<0xFF800000> : vector<8xf32>
    %795 = vector.multi_reduction <maximumf>, %794, %cst_222 [1] : vector<8x8xf32> to vector<8xf32>
    %796 = vector.shape_cast %795 : vector<8xf32> to vector<8x1xf32>
    %797 = vector.broadcast %796 : vector<8x1xf32> to vector<8x8xf32>
    %798 = arith.subf %794, %797 : vector<8x8xf32>
    %799 = math.exp %798 : vector<8x8xf32>
    %cst_223 = arith.constant dense<0.000000e+00> : vector<8xf32>
    %800 = vector.multi_reduction <add>, %799, %cst_223 [1] : vector<8x8xf32> to vector<8xf32>
    %801 = vector.shape_cast %800 : vector<8xf32> to vector<8x1xf32>
    %802 = tpu.reciprocal %801 {approx = true} : vector<8x1xf32> -> vector<8x1xf32>
    %803 = vector.broadcast %802 : vector<8x1xf32> to vector<8x8xf32>
    %804 = arith.mulf %799, %803 : vector<8x8xf32>
    %805 = arith.truncf %804 : vector<8x8xf32> to vector<8x8xbf16>
    %cst_224 = arith.constant dense<0.000000e+00> : vector<8x8xf32>
    %806 = tpu.matmul %805, %793, %cst_224 {dimension_numbers = #tpu.dot_dimension_numbers<[1], [0], [0], [1], [0, 0, 1, 1], [], []>} : vector<8x8xbf16>, vector<8x8xbf16>, vector<8x8xf32> -> vector<8x8xf32>
    %807 = tpu.concatenate %758, %774, %790, %806 in 1 : vector<8x8xf32>, vector<8x8xf32>, vector<8x8xf32>, vector<8x8xf32> -> vector<8x32xf32>
    %808 = tpu.concatenate %742, %807 in 0 : vector<8x32xf32>, vector<8x32xf32> -> vector<16x32xf32>
    %809 = arith.truncf %808 : vector<16x32xf32> to vector<16x32xbf16>
    %cst_225 = arith.constant dense<0.000000e+00> : vector<16x32xf32>
    %810 = tpu.matmul %809, %664, %cst_225 {dimension_numbers = #tpu.dot_dimension_numbers<[1], [0], [0], [1], [0, 0, 1, 1], [], []>} : vector<16x32xbf16>, vector<32x32xbf16>, vector<16x32xf32> -> vector<16x32xf32>
    %811 = vector.broadcast %665 : vector<1x32xf32> to vector<16x32xf32>
    %812 = arith.addf %810, %811 : vector<16x32xf32>
    %813 = arith.addf %656, %812 : vector<16x32xf32>
    %814 = vector.extract_strided_slice %480 {offsets = [7, 0], sizes = [1, 32], strides = [1, 1]} : vector<13x128xf32> to vector<1x32xf32>
    %815 = vector.extract_strided_slice %480 {offsets = [8, 0], sizes = [1, 32], strides = [1, 1]} : vector<13x128xf32> to vector<1x32xf32>
    %cst_226 = arith.constant dense<0.000000e+00> : vector<16xf32>
    %816 = vector.multi_reduction <add>, %813, %cst_226 [1] : vector<16x32xf32> to vector<16xf32>
    %817 = vector.shape_cast %816 : vector<16xf32> to vector<16x1xf32>
    %cst_227 = arith.constant 3.200000e+01 : f32
    %818 = vector.broadcast %cst_227 : f32 to vector<16x1xf32>
    %819 = arith.divf %817, %818 : vector<16x1xf32>
    %820 = vector.broadcast %819 : vector<16x1xf32> to vector<16x32xf32>
    %821 = arith.subf %813, %820 : vector<16x32xf32>
    %822 = arith.mulf %821, %821 : vector<16x32xf32>
    %cst_228 = arith.constant dense<0.000000e+00> : vector<16xf32>
    %823 = vector.multi_reduction <add>, %822, %cst_228 [1] : vector<16x32xf32> to vector<16xf32>
    %824 = vector.shape_cast %823 : vector<16xf32> to vector<16x1xf32>
    %cst_229 = arith.constant 3.200000e+01 : f32
    %825 = vector.broadcast %cst_229 : f32 to vector<16x1xf32>
    %826 = arith.divf %824, %825 : vector<16x1xf32>
    %827 = vector.broadcast %819 : vector<16x1xf32> to vector<16x32xf32>
    %828 = arith.subf %813, %827 : vector<16x32xf32>
    %cst_230 = arith.constant 9.99999974E-6 : f32
    %829 = vector.broadcast %cst_230 : f32 to vector<16x1xf32>
    %830 = arith.addf %826, %829 : vector<16x1xf32>
    %831 = math.rsqrt %830 : vector<16x1xf32>
    %832 = vector.broadcast %831 : vector<16x1xf32> to vector<16x32xf32>
    %833 = arith.mulf %828, %832 : vector<16x32xf32>
    %834 = vector.broadcast %814 : vector<1x32xf32> to vector<16x32xf32>
    %835 = arith.mulf %833, %834 : vector<16x32xf32>
    %836 = vector.broadcast %815 : vector<1x32xf32> to vector<16x32xf32>
    %837 = arith.addf %835, %836 : vector<16x32xf32>
    %c0_231 = arith.constant 0 : index
    %c0_232 = arith.constant 0 : index
    %c0_233 = arith.constant 0 : index
    %838 = vector.load %arg13[%c0_231, %c0_232, %c0_233] : memref<2x32x128xbf16, #tpu.memory_space<vmem>>, vector<1x32x128xbf16>
    %839 = vector.shape_cast %838 : vector<1x32x128xbf16> to vector<32x128xbf16>
    %840 = vector.extract_strided_slice %480 {offsets = [9, 0], sizes = [1, 128], strides = [1, 1]} : vector<13x128xf32> to vector<1x128xf32>
    %c0_234 = arith.constant 0 : index
    %c0_235 = arith.constant 0 : index
    %c0_236 = arith.constant 0 : index
    %841 = vector.load %arg14[%c0_234, %c0_235, %c0_236] : memref<2x128x32xbf16, #tpu.memory_space<vmem>>, vector<1x128x32xbf16>
    %842 = vector.shape_cast %841 : vector<1x128x32xbf16> to vector<128x32xbf16>
    %843 = vector.extract_strided_slice %480 {offsets = [10, 0], sizes = [1, 32], strides = [1, 1]} : vector<13x128xf32> to vector<1x32xf32>
    %844 = arith.truncf %837 : vector<16x32xf32> to vector<16x32xbf16>
    %cst_237 = arith.constant dense<0.000000e+00> : vector<16x128xf32>
    %845 = tpu.matmul %844, %839, %cst_237 {dimension_numbers = #tpu.dot_dimension_numbers<[1], [0], [0], [1], [0, 0, 1, 1], [], []>} : vector<16x32xbf16>, vector<32x128xbf16>, vector<16x128xf32> -> vector<16x128xf32>
    %846 = vector.broadcast %840 : vector<1x128xf32> to vector<16x128xf32>
    %847 = arith.addf %845, %846 : vector<16x128xf32>
    %cst_238 = arith.constant 0.000000e+00 : f32
    %848 = vector.broadcast %cst_238 : f32 to vector<16x128xf32>
    %849 = arith.maximumf %847, %848 : vector<16x128xf32>
    %850 = arith.truncf %849 : vector<16x128xf32> to vector<16x128xbf16>
    %cst_239 = arith.constant dense<0.000000e+00> : vector<16x32xf32>
    %851 = tpu.matmul %850, %842, %cst_239 {dimension_numbers = #tpu.dot_dimension_numbers<[1], [0], [0], [1], [0, 0, 1, 1], [], []>} : vector<16x128xbf16>, vector<128x32xbf16>, vector<16x32xf32> -> vector<16x32xf32>
    %852 = vector.broadcast %843 : vector<1x32xf32> to vector<16x32xf32>
    %853 = arith.addf %851, %852 : vector<16x32xf32>
    %854 = arith.addf %837, %853 : vector<16x32xf32>
    %855 = vector.extract_strided_slice %480 {offsets = [11, 0], sizes = [1, 32], strides = [1, 1]} : vector<13x128xf32> to vector<1x32xf32>
    %856 = vector.extract_strided_slice %480 {offsets = [12, 0], sizes = [1, 32], strides = [1, 1]} : vector<13x128xf32> to vector<1x32xf32>
    %cst_240 = arith.constant dense<0.000000e+00> : vector<16xf32>
    %857 = vector.multi_reduction <add>, %854, %cst_240 [1] : vector<16x32xf32> to vector<16xf32>
    %858 = vector.shape_cast %857 : vector<16xf32> to vector<16x1xf32>
    %cst_241 = arith.constant 3.200000e+01 : f32
    %859 = vector.broadcast %cst_241 : f32 to vector<16x1xf32>
    %860 = arith.divf %858, %859 : vector<16x1xf32>
    %861 = vector.broadcast %860 : vector<16x1xf32> to vector<16x32xf32>
    %862 = arith.subf %854, %861 : vector<16x32xf32>
    %863 = arith.mulf %862, %862 : vector<16x32xf32>
    %cst_242 = arith.constant dense<0.000000e+00> : vector<16xf32>
    %864 = vector.multi_reduction <add>, %863, %cst_242 [1] : vector<16x32xf32> to vector<16xf32>
    %865 = vector.shape_cast %864 : vector<16xf32> to vector<16x1xf32>
    %cst_243 = arith.constant 3.200000e+01 : f32
    %866 = vector.broadcast %cst_243 : f32 to vector<16x1xf32>
    %867 = arith.divf %865, %866 : vector<16x1xf32>
    %868 = vector.broadcast %860 : vector<16x1xf32> to vector<16x32xf32>
    %869 = arith.subf %854, %868 : vector<16x32xf32>
    %cst_244 = arith.constant 9.99999974E-6 : f32
    %870 = vector.broadcast %cst_244 : f32 to vector<16x1xf32>
    %871 = arith.addf %867, %870 : vector<16x1xf32>
    %872 = math.rsqrt %871 : vector<16x1xf32>
    %873 = vector.broadcast %872 : vector<16x1xf32> to vector<16x32xf32>
    %874 = arith.mulf %869, %873 : vector<16x32xf32>
    %875 = vector.broadcast %855 : vector<1x32xf32> to vector<16x32xf32>
    %876 = arith.mulf %874, %875 : vector<16x32xf32>
    %877 = vector.broadcast %856 : vector<1x32xf32> to vector<16x32xf32>
    %878 = arith.addf %876, %877 : vector<16x32xf32>
    %c1_245 = arith.constant 1 : index
    %c0_246 = arith.constant 0 : index
    %c0_247 = arith.constant 0 : index
    %879 = vector.load %arg15[%c1_245, %c0_246, %c0_247] : memref<2x13x128xf32, #tpu.memory_space<vmem>>, vector<1x13x128xf32>
    %880 = vector.shape_cast %879 : vector<1x13x128xf32> to vector<13x128xf32>
    %c1_248 = arith.constant 1 : index
    %c0_249 = arith.constant 0 : index
    %c0_250 = arith.constant 0 : index
    %881 = vector.load %arg8[%c1_248, %c0_249, %c0_250] : memref<2x32x96xbf16, #tpu.memory_space<vmem>>, vector<1x32x96xbf16>
    %882 = vector.shape_cast %881 : vector<1x32x96xbf16> to vector<32x96xbf16>
    %883 = vector.extract_strided_slice %880 {offsets = [0, 0], sizes = [1, 96], strides = [1, 1]} : vector<13x128xf32> to vector<1x96xf32>
    %c1_251 = arith.constant 1 : index
    %c0_252 = arith.constant 0 : index
    %c0_253 = arith.constant 0 : index
    %884 = vector.load %arg9[%c1_251, %c0_252, %c0_253] : memref<2x32x32xbf16, #tpu.memory_space<vmem>>, vector<1x32x32xbf16>
    %885 = vector.shape_cast %884 : vector<1x32x32xbf16> to vector<32x32xbf16>
    %886 = vector.extract_strided_slice %880 {offsets = [1, 0], sizes = [1, 32], strides = [1, 1]} : vector<13x128xf32> to vector<1x32xf32>
    %887 = arith.truncf %878 : vector<16x32xf32> to vector<16x32xbf16>
    %cst_254 = arith.constant dense<0.000000e+00> : vector<16x96xf32>
    %888 = tpu.matmul %887, %882, %cst_254 {dimension_numbers = #tpu.dot_dimension_numbers<[1], [0], [0], [1], [0, 0, 1, 1], [], []>} : vector<16x32xbf16>, vector<32x96xbf16>, vector<16x96xf32> -> vector<16x96xf32>
    %889 = vector.broadcast %883 : vector<1x96xf32> to vector<16x96xf32>
    %890 = arith.addf %888, %889 : vector<16x96xf32>
    %891 = vector.extract_strided_slice %890 {offsets = [0, 0], sizes = [16, 32], strides = [1, 1]} : vector<16x96xf32> to vector<16x32xf32>
    %892 = vector.extract_strided_slice %890 {offsets = [0, 32], sizes = [16, 32], strides = [1, 1]} : vector<16x96xf32> to vector<16x32xf32>
    %893 = vector.extract_strided_slice %890 {offsets = [0, 64], sizes = [16, 32], strides = [1, 1]} : vector<16x96xf32> to vector<16x32xf32>
    %894 = arith.truncf %891 : vector<16x32xf32> to vector<16x32xbf16>
    %895 = arith.truncf %892 : vector<16x32xf32> to vector<16x32xbf16>
    %896 = arith.truncf %893 : vector<16x32xf32> to vector<16x32xbf16>
    %897 = vector.extract_strided_slice %894 {offsets = [0, 0], sizes = [8, 8], strides = [1, 1]} : vector<16x32xbf16> to vector<8x8xbf16>
    %898 = vector.extract_strided_slice %895 {offsets = [0, 0], sizes = [8, 8], strides = [1, 1]} : vector<16x32xbf16> to vector<8x8xbf16>
    %899 = vector.extract_strided_slice %896 {offsets = [0, 0], sizes = [8, 8], strides = [1, 1]} : vector<16x32xbf16> to vector<8x8xbf16>
    %cst_255 = arith.constant dense<0.000000e+00> : vector<8x8xf32>
    %900 = tpu.matmul %897, %898, %cst_255 {dimension_numbers = #tpu.dot_dimension_numbers<[1], [1], [0], [0], [0, 0, 1, 0], [], []>} : vector<8x8xbf16>, vector<8x8xbf16>, vector<8x8xf32> -> vector<8x8xf32>
    %cst_256 = arith.constant dense<0xFF800000> : vector<8xf32>
    %901 = vector.multi_reduction <maximumf>, %900, %cst_256 [1] : vector<8x8xf32> to vector<8xf32>
    %902 = vector.shape_cast %901 : vector<8xf32> to vector<8x1xf32>
    %903 = vector.broadcast %902 : vector<8x1xf32> to vector<8x8xf32>
    %904 = arith.subf %900, %903 : vector<8x8xf32>
    %905 = math.exp %904 : vector<8x8xf32>
    %cst_257 = arith.constant dense<0.000000e+00> : vector<8xf32>
    %906 = vector.multi_reduction <add>, %905, %cst_257 [1] : vector<8x8xf32> to vector<8xf32>
    %907 = vector.shape_cast %906 : vector<8xf32> to vector<8x1xf32>
    %908 = tpu.reciprocal %907 {approx = true} : vector<8x1xf32> -> vector<8x1xf32>
    %909 = vector.broadcast %908 : vector<8x1xf32> to vector<8x8xf32>
    %910 = arith.mulf %905, %909 : vector<8x8xf32>
    %911 = arith.truncf %910 : vector<8x8xf32> to vector<8x8xbf16>
    %cst_258 = arith.constant dense<0.000000e+00> : vector<8x8xf32>
    %912 = tpu.matmul %911, %899, %cst_258 {dimension_numbers = #tpu.dot_dimension_numbers<[1], [0], [0], [1], [0, 0, 1, 1], [], []>} : vector<8x8xbf16>, vector<8x8xbf16>, vector<8x8xf32> -> vector<8x8xf32>
    %913 = vector.extract_strided_slice %894 {offsets = [0, 8], sizes = [8, 8], strides = [1, 1]} : vector<16x32xbf16> to vector<8x8xbf16>
    %914 = vector.extract_strided_slice %895 {offsets = [0, 8], sizes = [8, 8], strides = [1, 1]} : vector<16x32xbf16> to vector<8x8xbf16>
    %915 = vector.extract_strided_slice %896 {offsets = [0, 8], sizes = [8, 8], strides = [1, 1]} : vector<16x32xbf16> to vector<8x8xbf16>
    %cst_259 = arith.constant dense<0.000000e+00> : vector<8x8xf32>
    %916 = tpu.matmul %913, %914, %cst_259 {dimension_numbers = #tpu.dot_dimension_numbers<[1], [1], [0], [0], [0, 0, 1, 0], [], []>} : vector<8x8xbf16>, vector<8x8xbf16>, vector<8x8xf32> -> vector<8x8xf32>
    %cst_260 = arith.constant dense<0xFF800000> : vector<8xf32>
    %917 = vector.multi_reduction <maximumf>, %916, %cst_260 [1] : vector<8x8xf32> to vector<8xf32>
    %918 = vector.shape_cast %917 : vector<8xf32> to vector<8x1xf32>
    %919 = vector.broadcast %918 : vector<8x1xf32> to vector<8x8xf32>
    %920 = arith.subf %916, %919 : vector<8x8xf32>
    %921 = math.exp %920 : vector<8x8xf32>
    %cst_261 = arith.constant dense<0.000000e+00> : vector<8xf32>
    %922 = vector.multi_reduction <add>, %921, %cst_261 [1] : vector<8x8xf32> to vector<8xf32>
    %923 = vector.shape_cast %922 : vector<8xf32> to vector<8x1xf32>
    %924 = tpu.reciprocal %923 {approx = true} : vector<8x1xf32> -> vector<8x1xf32>
    %925 = vector.broadcast %924 : vector<8x1xf32> to vector<8x8xf32>
    %926 = arith.mulf %921, %925 : vector<8x8xf32>
    %927 = arith.truncf %926 : vector<8x8xf32> to vector<8x8xbf16>
    %cst_262 = arith.constant dense<0.000000e+00> : vector<8x8xf32>
    %928 = tpu.matmul %927, %915, %cst_262 {dimension_numbers = #tpu.dot_dimension_numbers<[1], [0], [0], [1], [0, 0, 1, 1], [], []>} : vector<8x8xbf16>, vector<8x8xbf16>, vector<8x8xf32> -> vector<8x8xf32>
    %929 = vector.extract_strided_slice %894 {offsets = [0, 16], sizes = [8, 8], strides = [1, 1]} : vector<16x32xbf16> to vector<8x8xbf16>
    %930 = vector.extract_strided_slice %895 {offsets = [0, 16], sizes = [8, 8], strides = [1, 1]} : vector<16x32xbf16> to vector<8x8xbf16>
    %931 = vector.extract_strided_slice %896 {offsets = [0, 16], sizes = [8, 8], strides = [1, 1]} : vector<16x32xbf16> to vector<8x8xbf16>
    %cst_263 = arith.constant dense<0.000000e+00> : vector<8x8xf32>
    %932 = tpu.matmul %929, %930, %cst_263 {dimension_numbers = #tpu.dot_dimension_numbers<[1], [1], [0], [0], [0, 0, 1, 0], [], []>} : vector<8x8xbf16>, vector<8x8xbf16>, vector<8x8xf32> -> vector<8x8xf32>
    %cst_264 = arith.constant dense<0xFF800000> : vector<8xf32>
    %933 = vector.multi_reduction <maximumf>, %932, %cst_264 [1] : vector<8x8xf32> to vector<8xf32>
    %934 = vector.shape_cast %933 : vector<8xf32> to vector<8x1xf32>
    %935 = vector.broadcast %934 : vector<8x1xf32> to vector<8x8xf32>
    %936 = arith.subf %932, %935 : vector<8x8xf32>
    %937 = math.exp %936 : vector<8x8xf32>
    %cst_265 = arith.constant dense<0.000000e+00> : vector<8xf32>
    %938 = vector.multi_reduction <add>, %937, %cst_265 [1] : vector<8x8xf32> to vector<8xf32>
    %939 = vector.shape_cast %938 : vector<8xf32> to vector<8x1xf32>
    %940 = tpu.reciprocal %939 {approx = true} : vector<8x1xf32> -> vector<8x1xf32>
    %941 = vector.broadcast %940 : vector<8x1xf32> to vector<8x8xf32>
    %942 = arith.mulf %937, %941 : vector<8x8xf32>
    %943 = arith.truncf %942 : vector<8x8xf32> to vector<8x8xbf16>
    %cst_266 = arith.constant dense<0.000000e+00> : vector<8x8xf32>
    %944 = tpu.matmul %943, %931, %cst_266 {dimension_numbers = #tpu.dot_dimension_numbers<[1], [0], [0], [1], [0, 0, 1, 1], [], []>} : vector<8x8xbf16>, vector<8x8xbf16>, vector<8x8xf32> -> vector<8x8xf32>
    %945 = vector.extract_strided_slice %894 {offsets = [0, 24], sizes = [8, 8], strides = [1, 1]} : vector<16x32xbf16> to vector<8x8xbf16>
    %946 = vector.extract_strided_slice %895 {offsets = [0, 24], sizes = [8, 8], strides = [1, 1]} : vector<16x32xbf16> to vector<8x8xbf16>
    %947 = vector.extract_strided_slice %896 {offsets = [0, 24], sizes = [8, 8], strides = [1, 1]} : vector<16x32xbf16> to vector<8x8xbf16>
    %cst_267 = arith.constant dense<0.000000e+00> : vector<8x8xf32>
    %948 = tpu.matmul %945, %946, %cst_267 {dimension_numbers = #tpu.dot_dimension_numbers<[1], [1], [0], [0], [0, 0, 1, 0], [], []>} : vector<8x8xbf16>, vector<8x8xbf16>, vector<8x8xf32> -> vector<8x8xf32>
    %cst_268 = arith.constant dense<0xFF800000> : vector<8xf32>
    %949 = vector.multi_reduction <maximumf>, %948, %cst_268 [1] : vector<8x8xf32> to vector<8xf32>
    %950 = vector.shape_cast %949 : vector<8xf32> to vector<8x1xf32>
    %951 = vector.broadcast %950 : vector<8x1xf32> to vector<8x8xf32>
    %952 = arith.subf %948, %951 : vector<8x8xf32>
    %953 = math.exp %952 : vector<8x8xf32>
    %cst_269 = arith.constant dense<0.000000e+00> : vector<8xf32>
    %954 = vector.multi_reduction <add>, %953, %cst_269 [1] : vector<8x8xf32> to vector<8xf32>
    %955 = vector.shape_cast %954 : vector<8xf32> to vector<8x1xf32>
    %956 = tpu.reciprocal %955 {approx = true} : vector<8x1xf32> -> vector<8x1xf32>
    %957 = vector.broadcast %956 : vector<8x1xf32> to vector<8x8xf32>
    %958 = arith.mulf %953, %957 : vector<8x8xf32>
    %959 = arith.truncf %958 : vector<8x8xf32> to vector<8x8xbf16>
    %cst_270 = arith.constant dense<0.000000e+00> : vector<8x8xf32>
    %960 = tpu.matmul %959, %947, %cst_270 {dimension_numbers = #tpu.dot_dimension_numbers<[1], [0], [0], [1], [0, 0, 1, 1], [], []>} : vector<8x8xbf16>, vector<8x8xbf16>, vector<8x8xf32> -> vector<8x8xf32>
    %961 = tpu.concatenate %912, %928, %944, %960 in 1 : vector<8x8xf32>, vector<8x8xf32>, vector<8x8xf32>, vector<8x8xf32> -> vector<8x32xf32>
    %962 = vector.extract_strided_slice %894 {offsets = [8, 0], sizes = [8, 8], strides = [1, 1]} : vector<16x32xbf16> to vector<8x8xbf16>
    %963 = vector.extract_strided_slice %895 {offsets = [8, 0], sizes = [8, 8], strides = [1, 1]} : vector<16x32xbf16> to vector<8x8xbf16>
    %964 = vector.extract_strided_slice %896 {offsets = [8, 0], sizes = [8, 8], strides = [1, 1]} : vector<16x32xbf16> to vector<8x8xbf16>
    %cst_271 = arith.constant dense<0.000000e+00> : vector<8x8xf32>
    %965 = tpu.matmul %962, %963, %cst_271 {dimension_numbers = #tpu.dot_dimension_numbers<[1], [1], [0], [0], [0, 0, 1, 0], [], []>} : vector<8x8xbf16>, vector<8x8xbf16>, vector<8x8xf32> -> vector<8x8xf32>
    %cst_272 = arith.constant dense<0xFF800000> : vector<8xf32>
    %966 = vector.multi_reduction <maximumf>, %965, %cst_272 [1] : vector<8x8xf32> to vector<8xf32>
    %967 = vector.shape_cast %966 : vector<8xf32> to vector<8x1xf32>
    %968 = vector.broadcast %967 : vector<8x1xf32> to vector<8x8xf32>
    %969 = arith.subf %965, %968 : vector<8x8xf32>
    %970 = math.exp %969 : vector<8x8xf32>
    %cst_273 = arith.constant dense<0.000000e+00> : vector<8xf32>
    %971 = vector.multi_reduction <add>, %970, %cst_273 [1] : vector<8x8xf32> to vector<8xf32>
    %972 = vector.shape_cast %971 : vector<8xf32> to vector<8x1xf32>
    %973 = tpu.reciprocal %972 {approx = true} : vector<8x1xf32> -> vector<8x1xf32>
    %974 = vector.broadcast %973 : vector<8x1xf32> to vector<8x8xf32>
    %975 = arith.mulf %970, %974 : vector<8x8xf32>
    %976 = arith.truncf %975 : vector<8x8xf32> to vector<8x8xbf16>
    %cst_274 = arith.constant dense<0.000000e+00> : vector<8x8xf32>
    %977 = tpu.matmul %976, %964, %cst_274 {dimension_numbers = #tpu.dot_dimension_numbers<[1], [0], [0], [1], [0, 0, 1, 1], [], []>} : vector<8x8xbf16>, vector<8x8xbf16>, vector<8x8xf32> -> vector<8x8xf32>
    %978 = vector.extract_strided_slice %894 {offsets = [8, 8], sizes = [8, 8], strides = [1, 1]} : vector<16x32xbf16> to vector<8x8xbf16>
    %979 = vector.extract_strided_slice %895 {offsets = [8, 8], sizes = [8, 8], strides = [1, 1]} : vector<16x32xbf16> to vector<8x8xbf16>
    %980 = vector.extract_strided_slice %896 {offsets = [8, 8], sizes = [8, 8], strides = [1, 1]} : vector<16x32xbf16> to vector<8x8xbf16>
    %cst_275 = arith.constant dense<0.000000e+00> : vector<8x8xf32>
    %981 = tpu.matmul %978, %979, %cst_275 {dimension_numbers = #tpu.dot_dimension_numbers<[1], [1], [0], [0], [0, 0, 1, 0], [], []>} : vector<8x8xbf16>, vector<8x8xbf16>, vector<8x8xf32> -> vector<8x8xf32>
    %cst_276 = arith.constant dense<0xFF800000> : vector<8xf32>
    %982 = vector.multi_reduction <maximumf>, %981, %cst_276 [1] : vector<8x8xf32> to vector<8xf32>
    %983 = vector.shape_cast %982 : vector<8xf32> to vector<8x1xf32>
    %984 = vector.broadcast %983 : vector<8x1xf32> to vector<8x8xf32>
    %985 = arith.subf %981, %984 : vector<8x8xf32>
    %986 = math.exp %985 : vector<8x8xf32>
    %cst_277 = arith.constant dense<0.000000e+00> : vector<8xf32>
    %987 = vector.multi_reduction <add>, %986, %cst_277 [1] : vector<8x8xf32> to vector<8xf32>
    %988 = vector.shape_cast %987 : vector<8xf32> to vector<8x1xf32>
    %989 = tpu.reciprocal %988 {approx = true} : vector<8x1xf32> -> vector<8x1xf32>
    %990 = vector.broadcast %989 : vector<8x1xf32> to vector<8x8xf32>
    %991 = arith.mulf %986, %990 : vector<8x8xf32>
    %992 = arith.truncf %991 : vector<8x8xf32> to vector<8x8xbf16>
    %cst_278 = arith.constant dense<0.000000e+00> : vector<8x8xf32>
    %993 = tpu.matmul %992, %980, %cst_278 {dimension_numbers = #tpu.dot_dimension_numbers<[1], [0], [0], [1], [0, 0, 1, 1], [], []>} : vector<8x8xbf16>, vector<8x8xbf16>, vector<8x8xf32> -> vector<8x8xf32>
    %994 = vector.extract_strided_slice %894 {offsets = [8, 16], sizes = [8, 8], strides = [1, 1]} : vector<16x32xbf16> to vector<8x8xbf16>
    %995 = vector.extract_strided_slice %895 {offsets = [8, 16], sizes = [8, 8], strides = [1, 1]} : vector<16x32xbf16> to vector<8x8xbf16>
    %996 = vector.extract_strided_slice %896 {offsets = [8, 16], sizes = [8, 8], strides = [1, 1]} : vector<16x32xbf16> to vector<8x8xbf16>
    %cst_279 = arith.constant dense<0.000000e+00> : vector<8x8xf32>
    %997 = tpu.matmul %994, %995, %cst_279 {dimension_numbers = #tpu.dot_dimension_numbers<[1], [1], [0], [0], [0, 0, 1, 0], [], []>} : vector<8x8xbf16>, vector<8x8xbf16>, vector<8x8xf32> -> vector<8x8xf32>
    %cst_280 = arith.constant dense<0xFF800000> : vector<8xf32>
    %998 = vector.multi_reduction <maximumf>, %997, %cst_280 [1] : vector<8x8xf32> to vector<8xf32>
    %999 = vector.shape_cast %998 : vector<8xf32> to vector<8x1xf32>
    %1000 = vector.broadcast %999 : vector<8x1xf32> to vector<8x8xf32>
    %1001 = arith.subf %997, %1000 : vector<8x8xf32>
    %1002 = math.exp %1001 : vector<8x8xf32>
    %cst_281 = arith.constant dense<0.000000e+00> : vector<8xf32>
    %1003 = vector.multi_reduction <add>, %1002, %cst_281 [1] : vector<8x8xf32> to vector<8xf32>
    %1004 = vector.shape_cast %1003 : vector<8xf32> to vector<8x1xf32>
    %1005 = tpu.reciprocal %1004 {approx = true} : vector<8x1xf32> -> vector<8x1xf32>
    %1006 = vector.broadcast %1005 : vector<8x1xf32> to vector<8x8xf32>
    %1007 = arith.mulf %1002, %1006 : vector<8x8xf32>
    %1008 = arith.truncf %1007 : vector<8x8xf32> to vector<8x8xbf16>
    %cst_282 = arith.constant dense<0.000000e+00> : vector<8x8xf32>
    %1009 = tpu.matmul %1008, %996, %cst_282 {dimension_numbers = #tpu.dot_dimension_numbers<[1], [0], [0], [1], [0, 0, 1, 1], [], []>} : vector<8x8xbf16>, vector<8x8xbf16>, vector<8x8xf32> -> vector<8x8xf32>
    %1010 = vector.extract_strided_slice %894 {offsets = [8, 24], sizes = [8, 8], strides = [1, 1]} : vector<16x32xbf16> to vector<8x8xbf16>
    %1011 = vector.extract_strided_slice %895 {offsets = [8, 24], sizes = [8, 8], strides = [1, 1]} : vector<16x32xbf16> to vector<8x8xbf16>
    %1012 = vector.extract_strided_slice %896 {offsets = [8, 24], sizes = [8, 8], strides = [1, 1]} : vector<16x32xbf16> to vector<8x8xbf16>
    %cst_283 = arith.constant dense<0.000000e+00> : vector<8x8xf32>
    %1013 = tpu.matmul %1010, %1011, %cst_283 {dimension_numbers = #tpu.dot_dimension_numbers<[1], [1], [0], [0], [0, 0, 1, 0], [], []>} : vector<8x8xbf16>, vector<8x8xbf16>, vector<8x8xf32> -> vector<8x8xf32>
    %cst_284 = arith.constant dense<0xFF800000> : vector<8xf32>
    %1014 = vector.multi_reduction <maximumf>, %1013, %cst_284 [1] : vector<8x8xf32> to vector<8xf32>
    %1015 = vector.shape_cast %1014 : vector<8xf32> to vector<8x1xf32>
    %1016 = vector.broadcast %1015 : vector<8x1xf32> to vector<8x8xf32>
    %1017 = arith.subf %1013, %1016 : vector<8x8xf32>
    %1018 = math.exp %1017 : vector<8x8xf32>
    %cst_285 = arith.constant dense<0.000000e+00> : vector<8xf32>
    %1019 = vector.multi_reduction <add>, %1018, %cst_285 [1] : vector<8x8xf32> to vector<8xf32>
    %1020 = vector.shape_cast %1019 : vector<8xf32> to vector<8x1xf32>
    %1021 = tpu.reciprocal %1020 {approx = true} : vector<8x1xf32> -> vector<8x1xf32>
    %1022 = vector.broadcast %1021 : vector<8x1xf32> to vector<8x8xf32>
    %1023 = arith.mulf %1018, %1022 : vector<8x8xf32>
    %1024 = arith.truncf %1023 : vector<8x8xf32> to vector<8x8xbf16>
    %cst_286 = arith.constant dense<0.000000e+00> : vector<8x8xf32>
    %1025 = tpu.matmul %1024, %1012, %cst_286 {dimension_numbers = #tpu.dot_dimension_numbers<[1], [0], [0], [1], [0, 0, 1, 1], [], []>} : vector<8x8xbf16>, vector<8x8xbf16>, vector<8x8xf32> -> vector<8x8xf32>
    %1026 = tpu.concatenate %977, %993, %1009, %1025 in 1 : vector<8x8xf32>, vector<8x8xf32>, vector<8x8xf32>, vector<8x8xf32> -> vector<8x32xf32>
    %1027 = tpu.concatenate %961, %1026 in 0 : vector<8x32xf32>, vector<8x32xf32> -> vector<16x32xf32>
    %1028 = arith.truncf %1027 : vector<16x32xf32> to vector<16x32xbf16>
    %cst_287 = arith.constant dense<0.000000e+00> : vector<16x32xf32>
    %1029 = tpu.matmul %1028, %885, %cst_287 {dimension_numbers = #tpu.dot_dimension_numbers<[1], [0], [0], [1], [0, 0, 1, 1], [], []>} : vector<16x32xbf16>, vector<32x32xbf16>, vector<16x32xf32> -> vector<16x32xf32>
    %1030 = vector.broadcast %886 : vector<1x32xf32> to vector<16x32xf32>
    %1031 = arith.addf %1029, %1030 : vector<16x32xf32>
    %1032 = arith.addf %878, %1031 : vector<16x32xf32>
    %1033 = vector.extract_strided_slice %880 {offsets = [2, 0], sizes = [1, 32], strides = [1, 1]} : vector<13x128xf32> to vector<1x32xf32>
    %1034 = vector.extract_strided_slice %880 {offsets = [3, 0], sizes = [1, 32], strides = [1, 1]} : vector<13x128xf32> to vector<1x32xf32>
    %cst_288 = arith.constant dense<0.000000e+00> : vector<16xf32>
    %1035 = vector.multi_reduction <add>, %1032, %cst_288 [1] : vector<16x32xf32> to vector<16xf32>
    %1036 = vector.shape_cast %1035 : vector<16xf32> to vector<16x1xf32>
    %cst_289 = arith.constant 3.200000e+01 : f32
    %1037 = vector.broadcast %cst_289 : f32 to vector<16x1xf32>
    %1038 = arith.divf %1036, %1037 : vector<16x1xf32>
    %1039 = vector.broadcast %1038 : vector<16x1xf32> to vector<16x32xf32>
    %1040 = arith.subf %1032, %1039 : vector<16x32xf32>
    %1041 = arith.mulf %1040, %1040 : vector<16x32xf32>
    %cst_290 = arith.constant dense<0.000000e+00> : vector<16xf32>
    %1042 = vector.multi_reduction <add>, %1041, %cst_290 [1] : vector<16x32xf32> to vector<16xf32>
    %1043 = vector.shape_cast %1042 : vector<16xf32> to vector<16x1xf32>
    %cst_291 = arith.constant 3.200000e+01 : f32
    %1044 = vector.broadcast %cst_291 : f32 to vector<16x1xf32>
    %1045 = arith.divf %1043, %1044 : vector<16x1xf32>
    %1046 = vector.broadcast %1038 : vector<16x1xf32> to vector<16x32xf32>
    %1047 = arith.subf %1032, %1046 : vector<16x32xf32>
    %cst_292 = arith.constant 9.99999974E-6 : f32
    %1048 = vector.broadcast %cst_292 : f32 to vector<16x1xf32>
    %1049 = arith.addf %1045, %1048 : vector<16x1xf32>
    %1050 = math.rsqrt %1049 : vector<16x1xf32>
    %1051 = vector.broadcast %1050 : vector<16x1xf32> to vector<16x32xf32>
    %1052 = arith.mulf %1047, %1051 : vector<16x32xf32>
    %1053 = vector.broadcast %1033 : vector<1x32xf32> to vector<16x32xf32>
    %1054 = arith.mulf %1052, %1053 : vector<16x32xf32>
    %1055 = vector.broadcast %1034 : vector<1x32xf32> to vector<16x32xf32>
    %1056 = arith.addf %1054, %1055 : vector<16x32xf32>
    %c1_293 = arith.constant 1 : index
    %c0_294 = arith.constant 0 : index
    %c0_295 = arith.constant 0 : index
    %1057 = vector.load %arg10[%c1_293, %c0_294, %c0_295] : memref<2x32x32xbf16, #tpu.memory_space<vmem>>, vector<1x32x32xbf16>
    %1058 = vector.shape_cast %1057 : vector<1x32x32xbf16> to vector<32x32xbf16>
    %1059 = vector.extract_strided_slice %880 {offsets = [4, 0], sizes = [1, 32], strides = [1, 1]} : vector<13x128xf32> to vector<1x32xf32>
    %c1_296 = arith.constant 1 : index
    %c0_297 = arith.constant 0 : index
    %c0_298 = arith.constant 0 : index
    %1060 = vector.load %arg11[%c1_296, %c0_297, %c0_298] : memref<2x32x64xbf16, #tpu.memory_space<vmem>>, vector<1x32x64xbf16>
    %1061 = vector.shape_cast %1060 : vector<1x32x64xbf16> to vector<32x64xbf16>
    %1062 = vector.extract_strided_slice %880 {offsets = [5, 0], sizes = [1, 64], strides = [1, 1]} : vector<13x128xf32> to vector<1x64xf32>
    %c1_299 = arith.constant 1 : index
    %c0_300 = arith.constant 0 : index
    %c0_301 = arith.constant 0 : index
    %1063 = vector.load %arg12[%c1_299, %c0_300, %c0_301] : memref<2x32x32xbf16, #tpu.memory_space<vmem>>, vector<1x32x32xbf16>
    %1064 = vector.shape_cast %1063 : vector<1x32x32xbf16> to vector<32x32xbf16>
    %1065 = vector.extract_strided_slice %880 {offsets = [6, 0], sizes = [1, 32], strides = [1, 1]} : vector<13x128xf32> to vector<1x32xf32>
    %1066 = arith.truncf %1056 : vector<16x32xf32> to vector<16x32xbf16>
    %cst_302 = arith.constant dense<0.000000e+00> : vector<16x32xf32>
    %1067 = tpu.matmul %1066, %1058, %cst_302 {dimension_numbers = #tpu.dot_dimension_numbers<[1], [0], [0], [1], [0, 0, 1, 1], [], []>} : vector<16x32xbf16>, vector<32x32xbf16>, vector<16x32xf32> -> vector<16x32xf32>
    %1068 = vector.broadcast %1059 : vector<1x32xf32> to vector<16x32xf32>
    %1069 = arith.addf %1067, %1068 : vector<16x32xf32>
    %cst_303 = arith.constant dense<0.000000e+00> : vector<16x64xf32>
    %1070 = tpu.matmul %471, %1061, %cst_303 {dimension_numbers = #tpu.dot_dimension_numbers<[1], [0], [0], [1], [0, 0, 1, 1], [], []>} : vector<16x32xbf16>, vector<32x64xbf16>, vector<16x64xf32> -> vector<16x64xf32>
    %1071 = vector.broadcast %1062 : vector<1x64xf32> to vector<16x64xf32>
    %1072 = arith.addf %1070, %1071 : vector<16x64xf32>
    %1073 = vector.extract_strided_slice %1072 {offsets = [0, 0], sizes = [16, 32], strides = [1, 1]} : vector<16x64xf32> to vector<16x32xf32>
    %1074 = vector.extract_strided_slice %1072 {offsets = [0, 32], sizes = [16, 32], strides = [1, 1]} : vector<16x64xf32> to vector<16x32xf32>
    %1075 = arith.truncf %1069 : vector<16x32xf32> to vector<16x32xbf16>
    %1076 = arith.truncf %1073 : vector<16x32xf32> to vector<16x32xbf16>
    %1077 = arith.truncf %1074 : vector<16x32xf32> to vector<16x32xbf16>
    %1078 = vector.extract_strided_slice %1075 {offsets = [0, 0], sizes = [8, 8], strides = [1, 1]} : vector<16x32xbf16> to vector<8x8xbf16>
    %1079 = vector.extract_strided_slice %1076 {offsets = [0, 0], sizes = [8, 8], strides = [1, 1]} : vector<16x32xbf16> to vector<8x8xbf16>
    %1080 = vector.extract_strided_slice %1077 {offsets = [0, 0], sizes = [8, 8], strides = [1, 1]} : vector<16x32xbf16> to vector<8x8xbf16>
    %cst_304 = arith.constant dense<0.000000e+00> : vector<8x8xf32>
    %1081 = tpu.matmul %1078, %1079, %cst_304 {dimension_numbers = #tpu.dot_dimension_numbers<[1], [1], [0], [0], [0, 0, 1, 0], [], []>} : vector<8x8xbf16>, vector<8x8xbf16>, vector<8x8xf32> -> vector<8x8xf32>
    %cst_305 = arith.constant dense<0xFF800000> : vector<8xf32>
    %1082 = vector.multi_reduction <maximumf>, %1081, %cst_305 [1] : vector<8x8xf32> to vector<8xf32>
    %1083 = vector.shape_cast %1082 : vector<8xf32> to vector<8x1xf32>
    %1084 = vector.broadcast %1083 : vector<8x1xf32> to vector<8x8xf32>
    %1085 = arith.subf %1081, %1084 : vector<8x8xf32>
    %1086 = math.exp %1085 : vector<8x8xf32>
    %cst_306 = arith.constant dense<0.000000e+00> : vector<8xf32>
    %1087 = vector.multi_reduction <add>, %1086, %cst_306 [1] : vector<8x8xf32> to vector<8xf32>
    %1088 = vector.shape_cast %1087 : vector<8xf32> to vector<8x1xf32>
    %1089 = tpu.reciprocal %1088 {approx = true} : vector<8x1xf32> -> vector<8x1xf32>
    %1090 = vector.broadcast %1089 : vector<8x1xf32> to vector<8x8xf32>
    %1091 = arith.mulf %1086, %1090 : vector<8x8xf32>
    %1092 = arith.truncf %1091 : vector<8x8xf32> to vector<8x8xbf16>
    %cst_307 = arith.constant dense<0.000000e+00> : vector<8x8xf32>
    %1093 = tpu.matmul %1092, %1080, %cst_307 {dimension_numbers = #tpu.dot_dimension_numbers<[1], [0], [0], [1], [0, 0, 1, 1], [], []>} : vector<8x8xbf16>, vector<8x8xbf16>, vector<8x8xf32> -> vector<8x8xf32>
    %1094 = vector.extract_strided_slice %1075 {offsets = [0, 8], sizes = [8, 8], strides = [1, 1]} : vector<16x32xbf16> to vector<8x8xbf16>
    %1095 = vector.extract_strided_slice %1076 {offsets = [0, 8], sizes = [8, 8], strides = [1, 1]} : vector<16x32xbf16> to vector<8x8xbf16>
    %1096 = vector.extract_strided_slice %1077 {offsets = [0, 8], sizes = [8, 8], strides = [1, 1]} : vector<16x32xbf16> to vector<8x8xbf16>
    %cst_308 = arith.constant dense<0.000000e+00> : vector<8x8xf32>
    %1097 = tpu.matmul %1094, %1095, %cst_308 {dimension_numbers = #tpu.dot_dimension_numbers<[1], [1], [0], [0], [0, 0, 1, 0], [], []>} : vector<8x8xbf16>, vector<8x8xbf16>, vector<8x8xf32> -> vector<8x8xf32>
    %cst_309 = arith.constant dense<0xFF800000> : vector<8xf32>
    %1098 = vector.multi_reduction <maximumf>, %1097, %cst_309 [1] : vector<8x8xf32> to vector<8xf32>
    %1099 = vector.shape_cast %1098 : vector<8xf32> to vector<8x1xf32>
    %1100 = vector.broadcast %1099 : vector<8x1xf32> to vector<8x8xf32>
    %1101 = arith.subf %1097, %1100 : vector<8x8xf32>
    %1102 = math.exp %1101 : vector<8x8xf32>
    %cst_310 = arith.constant dense<0.000000e+00> : vector<8xf32>
    %1103 = vector.multi_reduction <add>, %1102, %cst_310 [1] : vector<8x8xf32> to vector<8xf32>
    %1104 = vector.shape_cast %1103 : vector<8xf32> to vector<8x1xf32>
    %1105 = tpu.reciprocal %1104 {approx = true} : vector<8x1xf32> -> vector<8x1xf32>
    %1106 = vector.broadcast %1105 : vector<8x1xf32> to vector<8x8xf32>
    %1107 = arith.mulf %1102, %1106 : vector<8x8xf32>
    %1108 = arith.truncf %1107 : vector<8x8xf32> to vector<8x8xbf16>
    %cst_311 = arith.constant dense<0.000000e+00> : vector<8x8xf32>
    %1109 = tpu.matmul %1108, %1096, %cst_311 {dimension_numbers = #tpu.dot_dimension_numbers<[1], [0], [0], [1], [0, 0, 1, 1], [], []>} : vector<8x8xbf16>, vector<8x8xbf16>, vector<8x8xf32> -> vector<8x8xf32>
    %1110 = vector.extract_strided_slice %1075 {offsets = [0, 16], sizes = [8, 8], strides = [1, 1]} : vector<16x32xbf16> to vector<8x8xbf16>
    %1111 = vector.extract_strided_slice %1076 {offsets = [0, 16], sizes = [8, 8], strides = [1, 1]} : vector<16x32xbf16> to vector<8x8xbf16>
    %1112 = vector.extract_strided_slice %1077 {offsets = [0, 16], sizes = [8, 8], strides = [1, 1]} : vector<16x32xbf16> to vector<8x8xbf16>
    %cst_312 = arith.constant dense<0.000000e+00> : vector<8x8xf32>
    %1113 = tpu.matmul %1110, %1111, %cst_312 {dimension_numbers = #tpu.dot_dimension_numbers<[1], [1], [0], [0], [0, 0, 1, 0], [], []>} : vector<8x8xbf16>, vector<8x8xbf16>, vector<8x8xf32> -> vector<8x8xf32>
    %cst_313 = arith.constant dense<0xFF800000> : vector<8xf32>
    %1114 = vector.multi_reduction <maximumf>, %1113, %cst_313 [1] : vector<8x8xf32> to vector<8xf32>
    %1115 = vector.shape_cast %1114 : vector<8xf32> to vector<8x1xf32>
    %1116 = vector.broadcast %1115 : vector<8x1xf32> to vector<8x8xf32>
    %1117 = arith.subf %1113, %1116 : vector<8x8xf32>
    %1118 = math.exp %1117 : vector<8x8xf32>
    %cst_314 = arith.constant dense<0.000000e+00> : vector<8xf32>
    %1119 = vector.multi_reduction <add>, %1118, %cst_314 [1] : vector<8x8xf32> to vector<8xf32>
    %1120 = vector.shape_cast %1119 : vector<8xf32> to vector<8x1xf32>
    %1121 = tpu.reciprocal %1120 {approx = true} : vector<8x1xf32> -> vector<8x1xf32>
    %1122 = vector.broadcast %1121 : vector<8x1xf32> to vector<8x8xf32>
    %1123 = arith.mulf %1118, %1122 : vector<8x8xf32>
    %1124 = arith.truncf %1123 : vector<8x8xf32> to vector<8x8xbf16>
    %cst_315 = arith.constant dense<0.000000e+00> : vector<8x8xf32>
    %1125 = tpu.matmul %1124, %1112, %cst_315 {dimension_numbers = #tpu.dot_dimension_numbers<[1], [0], [0], [1], [0, 0, 1, 1], [], []>} : vector<8x8xbf16>, vector<8x8xbf16>, vector<8x8xf32> -> vector<8x8xf32>
    %1126 = vector.extract_strided_slice %1075 {offsets = [0, 24], sizes = [8, 8], strides = [1, 1]} : vector<16x32xbf16> to vector<8x8xbf16>
    %1127 = vector.extract_strided_slice %1076 {offsets = [0, 24], sizes = [8, 8], strides = [1, 1]} : vector<16x32xbf16> to vector<8x8xbf16>
    %1128 = vector.extract_strided_slice %1077 {offsets = [0, 24], sizes = [8, 8], strides = [1, 1]} : vector<16x32xbf16> to vector<8x8xbf16>
    %cst_316 = arith.constant dense<0.000000e+00> : vector<8x8xf32>
    %1129 = tpu.matmul %1126, %1127, %cst_316 {dimension_numbers = #tpu.dot_dimension_numbers<[1], [1], [0], [0], [0, 0, 1, 0], [], []>} : vector<8x8xbf16>, vector<8x8xbf16>, vector<8x8xf32> -> vector<8x8xf32>
    %cst_317 = arith.constant dense<0xFF800000> : vector<8xf32>
    %1130 = vector.multi_reduction <maximumf>, %1129, %cst_317 [1] : vector<8x8xf32> to vector<8xf32>
    %1131 = vector.shape_cast %1130 : vector<8xf32> to vector<8x1xf32>
    %1132 = vector.broadcast %1131 : vector<8x1xf32> to vector<8x8xf32>
    %1133 = arith.subf %1129, %1132 : vector<8x8xf32>
    %1134 = math.exp %1133 : vector<8x8xf32>
    %cst_318 = arith.constant dense<0.000000e+00> : vector<8xf32>
    %1135 = vector.multi_reduction <add>, %1134, %cst_318 [1] : vector<8x8xf32> to vector<8xf32>
    %1136 = vector.shape_cast %1135 : vector<8xf32> to vector<8x1xf32>
    %1137 = tpu.reciprocal %1136 {approx = true} : vector<8x1xf32> -> vector<8x1xf32>
    %1138 = vector.broadcast %1137 : vector<8x1xf32> to vector<8x8xf32>
    %1139 = arith.mulf %1134, %1138 : vector<8x8xf32>
    %1140 = arith.truncf %1139 : vector<8x8xf32> to vector<8x8xbf16>
    %cst_319 = arith.constant dense<0.000000e+00> : vector<8x8xf32>
    %1141 = tpu.matmul %1140, %1128, %cst_319 {dimension_numbers = #tpu.dot_dimension_numbers<[1], [0], [0], [1], [0, 0, 1, 1], [], []>} : vector<8x8xbf16>, vector<8x8xbf16>, vector<8x8xf32> -> vector<8x8xf32>
    %1142 = tpu.concatenate %1093, %1109, %1125, %1141 in 1 : vector<8x8xf32>, vector<8x8xf32>, vector<8x8xf32>, vector<8x8xf32> -> vector<8x32xf32>
    %1143 = vector.extract_strided_slice %1075 {offsets = [8, 0], sizes = [8, 8], strides = [1, 1]} : vector<16x32xbf16> to vector<8x8xbf16>
    %1144 = vector.extract_strided_slice %1076 {offsets = [8, 0], sizes = [8, 8], strides = [1, 1]} : vector<16x32xbf16> to vector<8x8xbf16>
    %1145 = vector.extract_strided_slice %1077 {offsets = [8, 0], sizes = [8, 8], strides = [1, 1]} : vector<16x32xbf16> to vector<8x8xbf16>
    %cst_320 = arith.constant dense<0.000000e+00> : vector<8x8xf32>
    %1146 = tpu.matmul %1143, %1144, %cst_320 {dimension_numbers = #tpu.dot_dimension_numbers<[1], [1], [0], [0], [0, 0, 1, 0], [], []>} : vector<8x8xbf16>, vector<8x8xbf16>, vector<8x8xf32> -> vector<8x8xf32>
    %cst_321 = arith.constant dense<0xFF800000> : vector<8xf32>
    %1147 = vector.multi_reduction <maximumf>, %1146, %cst_321 [1] : vector<8x8xf32> to vector<8xf32>
    %1148 = vector.shape_cast %1147 : vector<8xf32> to vector<8x1xf32>
    %1149 = vector.broadcast %1148 : vector<8x1xf32> to vector<8x8xf32>
    %1150 = arith.subf %1146, %1149 : vector<8x8xf32>
    %1151 = math.exp %1150 : vector<8x8xf32>
    %cst_322 = arith.constant dense<0.000000e+00> : vector<8xf32>
    %1152 = vector.multi_reduction <add>, %1151, %cst_322 [1] : vector<8x8xf32> to vector<8xf32>
    %1153 = vector.shape_cast %1152 : vector<8xf32> to vector<8x1xf32>
    %1154 = tpu.reciprocal %1153 {approx = true} : vector<8x1xf32> -> vector<8x1xf32>
    %1155 = vector.broadcast %1154 : vector<8x1xf32> to vector<8x8xf32>
    %1156 = arith.mulf %1151, %1155 : vector<8x8xf32>
    %1157 = arith.truncf %1156 : vector<8x8xf32> to vector<8x8xbf16>
    %cst_323 = arith.constant dense<0.000000e+00> : vector<8x8xf32>
    %1158 = tpu.matmul %1157, %1145, %cst_323 {dimension_numbers = #tpu.dot_dimension_numbers<[1], [0], [0], [1], [0, 0, 1, 1], [], []>} : vector<8x8xbf16>, vector<8x8xbf16>, vector<8x8xf32> -> vector<8x8xf32>
    %1159 = vector.extract_strided_slice %1075 {offsets = [8, 8], sizes = [8, 8], strides = [1, 1]} : vector<16x32xbf16> to vector<8x8xbf16>
    %1160 = vector.extract_strided_slice %1076 {offsets = [8, 8], sizes = [8, 8], strides = [1, 1]} : vector<16x32xbf16> to vector<8x8xbf16>
    %1161 = vector.extract_strided_slice %1077 {offsets = [8, 8], sizes = [8, 8], strides = [1, 1]} : vector<16x32xbf16> to vector<8x8xbf16>
    %cst_324 = arith.constant dense<0.000000e+00> : vector<8x8xf32>
    %1162 = tpu.matmul %1159, %1160, %cst_324 {dimension_numbers = #tpu.dot_dimension_numbers<[1], [1], [0], [0], [0, 0, 1, 0], [], []>} : vector<8x8xbf16>, vector<8x8xbf16>, vector<8x8xf32> -> vector<8x8xf32>
    %cst_325 = arith.constant dense<0xFF800000> : vector<8xf32>
    %1163 = vector.multi_reduction <maximumf>, %1162, %cst_325 [1] : vector<8x8xf32> to vector<8xf32>
    %1164 = vector.shape_cast %1163 : vector<8xf32> to vector<8x1xf32>
    %1165 = vector.broadcast %1164 : vector<8x1xf32> to vector<8x8xf32>
    %1166 = arith.subf %1162, %1165 : vector<8x8xf32>
    %1167 = math.exp %1166 : vector<8x8xf32>
    %cst_326 = arith.constant dense<0.000000e+00> : vector<8xf32>
    %1168 = vector.multi_reduction <add>, %1167, %cst_326 [1] : vector<8x8xf32> to vector<8xf32>
    %1169 = vector.shape_cast %1168 : vector<8xf32> to vector<8x1xf32>
    %1170 = tpu.reciprocal %1169 {approx = true} : vector<8x1xf32> -> vector<8x1xf32>
    %1171 = vector.broadcast %1170 : vector<8x1xf32> to vector<8x8xf32>
    %1172 = arith.mulf %1167, %1171 : vector<8x8xf32>
    %1173 = arith.truncf %1172 : vector<8x8xf32> to vector<8x8xbf16>
    %cst_327 = arith.constant dense<0.000000e+00> : vector<8x8xf32>
    %1174 = tpu.matmul %1173, %1161, %cst_327 {dimension_numbers = #tpu.dot_dimension_numbers<[1], [0], [0], [1], [0, 0, 1, 1], [], []>} : vector<8x8xbf16>, vector<8x8xbf16>, vector<8x8xf32> -> vector<8x8xf32>
    %1175 = vector.extract_strided_slice %1075 {offsets = [8, 16], sizes = [8, 8], strides = [1, 1]} : vector<16x32xbf16> to vector<8x8xbf16>
    %1176 = vector.extract_strided_slice %1076 {offsets = [8, 16], sizes = [8, 8], strides = [1, 1]} : vector<16x32xbf16> to vector<8x8xbf16>
    %1177 = vector.extract_strided_slice %1077 {offsets = [8, 16], sizes = [8, 8], strides = [1, 1]} : vector<16x32xbf16> to vector<8x8xbf16>
    %cst_328 = arith.constant dense<0.000000e+00> : vector<8x8xf32>
    %1178 = tpu.matmul %1175, %1176, %cst_328 {dimension_numbers = #tpu.dot_dimension_numbers<[1], [1], [0], [0], [0, 0, 1, 0], [], []>} : vector<8x8xbf16>, vector<8x8xbf16>, vector<8x8xf32> -> vector<8x8xf32>
    %cst_329 = arith.constant dense<0xFF800000> : vector<8xf32>
    %1179 = vector.multi_reduction <maximumf>, %1178, %cst_329 [1] : vector<8x8xf32> to vector<8xf32>
    %1180 = vector.shape_cast %1179 : vector<8xf32> to vector<8x1xf32>
    %1181 = vector.broadcast %1180 : vector<8x1xf32> to vector<8x8xf32>
    %1182 = arith.subf %1178, %1181 : vector<8x8xf32>
    %1183 = math.exp %1182 : vector<8x8xf32>
    %cst_330 = arith.constant dense<0.000000e+00> : vector<8xf32>
    %1184 = vector.multi_reduction <add>, %1183, %cst_330 [1] : vector<8x8xf32> to vector<8xf32>
    %1185 = vector.shape_cast %1184 : vector<8xf32> to vector<8x1xf32>
    %1186 = tpu.reciprocal %1185 {approx = true} : vector<8x1xf32> -> vector<8x1xf32>
    %1187 = vector.broadcast %1186 : vector<8x1xf32> to vector<8x8xf32>
    %1188 = arith.mulf %1183, %1187 : vector<8x8xf32>
    %1189 = arith.truncf %1188 : vector<8x8xf32> to vector<8x8xbf16>
    %cst_331 = arith.constant dense<0.000000e+00> : vector<8x8xf32>
    %1190 = tpu.matmul %1189, %1177, %cst_331 {dimension_numbers = #tpu.dot_dimension_numbers<[1], [0], [0], [1], [0, 0, 1, 1], [], []>} : vector<8x8xbf16>, vector<8x8xbf16>, vector<8x8xf32> -> vector<8x8xf32>
    %1191 = vector.extract_strided_slice %1075 {offsets = [8, 24], sizes = [8, 8], strides = [1, 1]} : vector<16x32xbf16> to vector<8x8xbf16>
    %1192 = vector.extract_strided_slice %1076 {offsets = [8, 24], sizes = [8, 8], strides = [1, 1]} : vector<16x32xbf16> to vector<8x8xbf16>
    %1193 = vector.extract_strided_slice %1077 {offsets = [8, 24], sizes = [8, 8], strides = [1, 1]} : vector<16x32xbf16> to vector<8x8xbf16>
    %cst_332 = arith.constant dense<0.000000e+00> : vector<8x8xf32>
    %1194 = tpu.matmul %1191, %1192, %cst_332 {dimension_numbers = #tpu.dot_dimension_numbers<[1], [1], [0], [0], [0, 0, 1, 0], [], []>} : vector<8x8xbf16>, vector<8x8xbf16>, vector<8x8xf32> -> vector<8x8xf32>
    %cst_333 = arith.constant dense<0xFF800000> : vector<8xf32>
    %1195 = vector.multi_reduction <maximumf>, %1194, %cst_333 [1] : vector<8x8xf32> to vector<8xf32>
    %1196 = vector.shape_cast %1195 : vector<8xf32> to vector<8x1xf32>
    %1197 = vector.broadcast %1196 : vector<8x1xf32> to vector<8x8xf32>
    %1198 = arith.subf %1194, %1197 : vector<8x8xf32>
    %1199 = math.exp %1198 : vector<8x8xf32>
    %cst_334 = arith.constant dense<0.000000e+00> : vector<8xf32>
    %1200 = vector.multi_reduction <add>, %1199, %cst_334 [1] : vector<8x8xf32> to vector<8xf32>
    %1201 = vector.shape_cast %1200 : vector<8xf32> to vector<8x1xf32>
    %1202 = tpu.reciprocal %1201 {approx = true} : vector<8x1xf32> -> vector<8x1xf32>
    %1203 = vector.broadcast %1202 : vector<8x1xf32> to vector<8x8xf32>
    %1204 = arith.mulf %1199, %1203 : vector<8x8xf32>
    %1205 = arith.truncf %1204 : vector<8x8xf32> to vector<8x8xbf16>
    %cst_335 = arith.constant dense<0.000000e+00> : vector<8x8xf32>
    %1206 = tpu.matmul %1205, %1193, %cst_335 {dimension_numbers = #tpu.dot_dimension_numbers<[1], [0], [0], [1], [0, 0, 1, 1], [], []>} : vector<8x8xbf16>, vector<8x8xbf16>, vector<8x8xf32> -> vector<8x8xf32>
    %1207 = tpu.concatenate %1158, %1174, %1190, %1206 in 1 : vector<8x8xf32>, vector<8x8xf32>, vector<8x8xf32>, vector<8x8xf32> -> vector<8x32xf32>
    %1208 = tpu.concatenate %1142, %1207 in 0 : vector<8x32xf32>, vector<8x32xf32> -> vector<16x32xf32>
    %1209 = arith.truncf %1208 : vector<16x32xf32> to vector<16x32xbf16>
    %cst_336 = arith.constant dense<0.000000e+00> : vector<16x32xf32>
    %1210 = tpu.matmul %1209, %1064, %cst_336 {dimension_numbers = #tpu.dot_dimension_numbers<[1], [0], [0], [1], [0, 0, 1, 1], [], []>} : vector<16x32xbf16>, vector<32x32xbf16>, vector<16x32xf32> -> vector<16x32xf32>
    %1211 = vector.broadcast %1065 : vector<1x32xf32> to vector<16x32xf32>
    %1212 = arith.addf %1210, %1211 : vector<16x32xf32>
    %1213 = arith.addf %1056, %1212 : vector<16x32xf32>
    %1214 = vector.extract_strided_slice %880 {offsets = [7, 0], sizes = [1, 32], strides = [1, 1]} : vector<13x128xf32> to vector<1x32xf32>
    %1215 = vector.extract_strided_slice %880 {offsets = [8, 0], sizes = [1, 32], strides = [1, 1]} : vector<13x128xf32> to vector<1x32xf32>
    %cst_337 = arith.constant dense<0.000000e+00> : vector<16xf32>
    %1216 = vector.multi_reduction <add>, %1213, %cst_337 [1] : vector<16x32xf32> to vector<16xf32>
    %1217 = vector.shape_cast %1216 : vector<16xf32> to vector<16x1xf32>
    %cst_338 = arith.constant 3.200000e+01 : f32
    %1218 = vector.broadcast %cst_338 : f32 to vector<16x1xf32>
    %1219 = arith.divf %1217, %1218 : vector<16x1xf32>
    %1220 = vector.broadcast %1219 : vector<16x1xf32> to vector<16x32xf32>
    %1221 = arith.subf %1213, %1220 : vector<16x32xf32>
    %1222 = arith.mulf %1221, %1221 : vector<16x32xf32>
    %cst_339 = arith.constant dense<0.000000e+00> : vector<16xf32>
    %1223 = vector.multi_reduction <add>, %1222, %cst_339 [1] : vector<16x32xf32> to vector<16xf32>
    %1224 = vector.shape_cast %1223 : vector<16xf32> to vector<16x1xf32>
    %cst_340 = arith.constant 3.200000e+01 : f32
    %1225 = vector.broadcast %cst_340 : f32 to vector<16x1xf32>
    %1226 = arith.divf %1224, %1225 : vector<16x1xf32>
    %1227 = vector.broadcast %1219 : vector<16x1xf32> to vector<16x32xf32>
    %1228 = arith.subf %1213, %1227 : vector<16x32xf32>
    %cst_341 = arith.constant 9.99999974E-6 : f32
    %1229 = vector.broadcast %cst_341 : f32 to vector<16x1xf32>
    %1230 = arith.addf %1226, %1229 : vector<16x1xf32>
    %1231 = math.rsqrt %1230 : vector<16x1xf32>
    %1232 = vector.broadcast %1231 : vector<16x1xf32> to vector<16x32xf32>
    %1233 = arith.mulf %1228, %1232 : vector<16x32xf32>
    %1234 = vector.broadcast %1214 : vector<1x32xf32> to vector<16x32xf32>
    %1235 = arith.mulf %1233, %1234 : vector<16x32xf32>
    %1236 = vector.broadcast %1215 : vector<1x32xf32> to vector<16x32xf32>
    %1237 = arith.addf %1235, %1236 : vector<16x32xf32>
    %c1_342 = arith.constant 1 : index
    %c0_343 = arith.constant 0 : index
    %c0_344 = arith.constant 0 : index
    %1238 = vector.load %arg13[%c1_342, %c0_343, %c0_344] : memref<2x32x128xbf16, #tpu.memory_space<vmem>>, vector<1x32x128xbf16>
    %1239 = vector.shape_cast %1238 : vector<1x32x128xbf16> to vector<32x128xbf16>
    %1240 = vector.extract_strided_slice %880 {offsets = [9, 0], sizes = [1, 128], strides = [1, 1]} : vector<13x128xf32> to vector<1x128xf32>
    %c1_345 = arith.constant 1 : index
    %c0_346 = arith.constant 0 : index
    %c0_347 = arith.constant 0 : index
    %1241 = vector.load %arg14[%c1_345, %c0_346, %c0_347] : memref<2x128x32xbf16, #tpu.memory_space<vmem>>, vector<1x128x32xbf16>
    %1242 = vector.shape_cast %1241 : vector<1x128x32xbf16> to vector<128x32xbf16>
    %1243 = vector.extract_strided_slice %880 {offsets = [10, 0], sizes = [1, 32], strides = [1, 1]} : vector<13x128xf32> to vector<1x32xf32>
    %1244 = arith.truncf %1237 : vector<16x32xf32> to vector<16x32xbf16>
    %cst_348 = arith.constant dense<0.000000e+00> : vector<16x128xf32>
    %1245 = tpu.matmul %1244, %1239, %cst_348 {dimension_numbers = #tpu.dot_dimension_numbers<[1], [0], [0], [1], [0, 0, 1, 1], [], []>} : vector<16x32xbf16>, vector<32x128xbf16>, vector<16x128xf32> -> vector<16x128xf32>
    %1246 = vector.broadcast %1240 : vector<1x128xf32> to vector<16x128xf32>
    %1247 = arith.addf %1245, %1246 : vector<16x128xf32>
    %cst_349 = arith.constant 0.000000e+00 : f32
    %1248 = vector.broadcast %cst_349 : f32 to vector<16x128xf32>
    %1249 = arith.maximumf %1247, %1248 : vector<16x128xf32>
    %1250 = arith.truncf %1249 : vector<16x128xf32> to vector<16x128xbf16>
    %cst_350 = arith.constant dense<0.000000e+00> : vector<16x32xf32>
    %1251 = tpu.matmul %1250, %1242, %cst_350 {dimension_numbers = #tpu.dot_dimension_numbers<[1], [0], [0], [1], [0, 0, 1, 1], [], []>} : vector<16x128xbf16>, vector<128x32xbf16>, vector<16x32xf32> -> vector<16x32xf32>
    %1252 = vector.broadcast %1243 : vector<1x32xf32> to vector<16x32xf32>
    %1253 = arith.addf %1251, %1252 : vector<16x32xf32>
    %1254 = arith.addf %1237, %1253 : vector<16x32xf32>
    %1255 = vector.extract_strided_slice %880 {offsets = [11, 0], sizes = [1, 32], strides = [1, 1]} : vector<13x128xf32> to vector<1x32xf32>
    %1256 = vector.extract_strided_slice %880 {offsets = [12, 0], sizes = [1, 32], strides = [1, 1]} : vector<13x128xf32> to vector<1x32xf32>
    %cst_351 = arith.constant dense<0.000000e+00> : vector<16xf32>
    %1257 = vector.multi_reduction <add>, %1254, %cst_351 [1] : vector<16x32xf32> to vector<16xf32>
    %1258 = vector.shape_cast %1257 : vector<16xf32> to vector<16x1xf32>
    %cst_352 = arith.constant 3.200000e+01 : f32
    %1259 = vector.broadcast %cst_352 : f32 to vector<16x1xf32>
    %1260 = arith.divf %1258, %1259 : vector<16x1xf32>
    %1261 = vector.broadcast %1260 : vector<16x1xf32> to vector<16x32xf32>
    %1262 = arith.subf %1254, %1261 : vector<16x32xf32>
    %1263 = arith.mulf %1262, %1262 : vector<16x32xf32>
    %cst_353 = arith.constant dense<0.000000e+00> : vector<16xf32>
    %1264 = vector.multi_reduction <add>, %1263, %cst_353 [1] : vector<16x32xf32> to vector<16xf32>
    %1265 = vector.shape_cast %1264 : vector<16xf32> to vector<16x1xf32>
    %cst_354 = arith.constant 3.200000e+01 : f32
    %1266 = vector.broadcast %cst_354 : f32 to vector<16x1xf32>
    %1267 = arith.divf %1265, %1266 : vector<16x1xf32>
    %1268 = vector.broadcast %1260 : vector<16x1xf32> to vector<16x32xf32>
    %1269 = arith.subf %1254, %1268 : vector<16x32xf32>
    %cst_355 = arith.constant 9.99999974E-6 : f32
    %1270 = vector.broadcast %cst_355 : f32 to vector<16x1xf32>
    %1271 = arith.addf %1267, %1270 : vector<16x1xf32>
    %1272 = math.rsqrt %1271 : vector<16x1xf32>
    %1273 = vector.broadcast %1272 : vector<16x1xf32> to vector<16x32xf32>
    %1274 = arith.mulf %1269, %1273 : vector<16x32xf32>
    %1275 = vector.broadcast %1255 : vector<1x32xf32> to vector<16x32xf32>
    %1276 = arith.mulf %1274, %1275 : vector<16x32xf32>
    %1277 = vector.broadcast %1256 : vector<1x32xf32> to vector<16x32xf32>
    %1278 = arith.addf %1276, %1277 : vector<16x32xf32>
    %1279 = vector.extract_strided_slice %446 {offsets = [2, 0], sizes = [1, 32], strides = [1, 1]} : vector<4x32xf32> to vector<1x32xf32>
    %1280 = vector.extract_strided_slice %446 {offsets = [3, 0], sizes = [1, 32], strides = [1, 1]} : vector<4x32xf32> to vector<1x32xf32>
    %cst_356 = arith.constant dense<0.000000e+00> : vector<16xf32>
    %1281 = vector.multi_reduction <add>, %1278, %cst_356 [1] : vector<16x32xf32> to vector<16xf32>
    %1282 = vector.shape_cast %1281 : vector<16xf32> to vector<16x1xf32>
    %cst_357 = arith.constant 3.200000e+01 : f32
    %1283 = vector.broadcast %cst_357 : f32 to vector<16x1xf32>
    %1284 = arith.divf %1282, %1283 : vector<16x1xf32>
    %1285 = vector.broadcast %1284 : vector<16x1xf32> to vector<16x32xf32>
    %1286 = arith.subf %1278, %1285 : vector<16x32xf32>
    %1287 = arith.mulf %1286, %1286 : vector<16x32xf32>
    %cst_358 = arith.constant dense<0.000000e+00> : vector<16xf32>
    %1288 = vector.multi_reduction <add>, %1287, %cst_358 [1] : vector<16x32xf32> to vector<16xf32>
    %1289 = vector.shape_cast %1288 : vector<16xf32> to vector<16x1xf32>
    %cst_359 = arith.constant 3.200000e+01 : f32
    %1290 = vector.broadcast %cst_359 : f32 to vector<16x1xf32>
    %1291 = arith.divf %1289, %1290 : vector<16x1xf32>
    %1292 = vector.broadcast %1284 : vector<16x1xf32> to vector<16x32xf32>
    %1293 = arith.subf %1278, %1292 : vector<16x32xf32>
    %cst_360 = arith.constant 9.99999974E-6 : f32
    %1294 = vector.broadcast %cst_360 : f32 to vector<16x1xf32>
    %1295 = arith.addf %1291, %1294 : vector<16x1xf32>
    %1296 = math.rsqrt %1295 : vector<16x1xf32>
    %1297 = vector.broadcast %1296 : vector<16x1xf32> to vector<16x32xf32>
    %1298 = arith.mulf %1293, %1297 : vector<16x32xf32>
    %1299 = vector.broadcast %1279 : vector<1x32xf32> to vector<16x32xf32>
    %1300 = arith.mulf %1298, %1299 : vector<16x32xf32>
    %1301 = vector.broadcast %1280 : vector<1x32xf32> to vector<16x32xf32>
    %1302 = arith.addf %1300, %1301 : vector<16x32xf32>
    %c0_361 = arith.constant 0 : index
    %c0_362 = arith.constant 0 : index
    %1303 = vector.load %arg17[%c0_361, %c0_362] : memref<16x32xf32, #tpu.memory_space<vmem>>, vector<16x32xf32>
    tpu.vector_store %arg17[%c0_361, %c0_362], %1302 {strides = array<i32>} : memref<16x32xf32, #tpu.memory_space<vmem>>, vector<16x32xf32>,
    return
  }
}

</mosaic_0001>

<bundles_post_ra>
// kernel: transformer_tsp_forward.1
= control target key start
LH: loop header
LB: loop body
LE: loop exit
PB: predicated region body
PF: predicated region fallthrough
CT: control target
= control target key end

     0   :  { %s11307_s0 = inlined_call_operand.vmem [shape: f32[16,32], index: 0, kind: input, shape index: {}]   ;;  %s11308_s1 = inlined_call_operand.hbm [shape: f32[16,32], index: 1, kind: input, shape index: {}]   ;;  %s11309_s2 = inlined_call_operand.vmem [shape: f32[16,32], index: 2, kind: input, shape index: {}]   ;;  %s11310_s3 = inlined_call_operand.vmem [shape: bf16[2,32,96], index: 3, kind: input, shape index: {}]   ;;  %s11311_s4 = inlined_call_operand.vmem [shape: bf16[2,32,32], index: 4, kind: input, shape index: {}]   ;;  %s11312_s5 = inlined_call_operand.vmem [shape: bf16[2,32,128], index: 5, kind: input, shape index: {}]   ;;  %s11313_s6 = inlined_call_operand.vmem [shape: bf16[2,128,32], index: 6, kind: input, shape index: {}]   ;;  %s11314_s7 = inlined_call_operand.hbm [shape: f32[2,8,128], index: 7, kind: input, shape index: {}]   ;;  %s11315_s8 = inlined_call_operand.vmem [shape: bf16[2,32,96], index: 8, kind: input, shape index: {}]   ;;  %s11316_s9 = inlined_call_operand.vmem [shape: bf16[2,32,32], index: 9, kind: input, shape index: {}]   ;;  %s11317_s10 = inlined_call_operand.vmem [shape: bf16[2,32,32], index: 10, kind: input, shape index: {}]   ;;  %s11318_s11 = inlined_call_operand.vmem [shape: bf16[2,32,64], index: 11, kind: input, shape index: {}]   ;;  %s11319_s12 = inlined_call_operand.vmem [shape: bf16[2,32,32], index: 12, kind: input, shape index: {}]   ;;  %s11320_s13 = inlined_call_operand.vmem [shape: bf16[2,32,128], index: 13, kind: input, shape index: {}]   ;;  %s11321_s14 = inlined_call_operand.vmem [shape: bf16[2,128,32], index: 14, kind: input, shape index: {}]   ;;  %s11322_s15 = inlined_call_operand.vmem [shape: f32[2,13,128], index: 15, kind: input, shape index: {}]   ;;  %s11323_s16 = inlined_call_operand.vmem [shape: f32[4,32], index: 16, kind: input, shape index: {}]   ;;  %s11324_s17 = inlined_call_operand.hbm [shape: f32[16,32], index: 17, kind: output, shape index: {}]  }
   0x1   :  { %11349 = sst [smem:[#allocation11_spill]] %s11307_s0 }
   0x2   :  { %11350 = sst [smem:[#allocation12_spill]] %s11308_s1 }
   0x3   :  { %22 = vsyncpa [#allocation3], 0 }
   0x4   :  { %23 = vsyncpa [#allocation6], 0 }
   0x5   :  { %24 = vsyncpa [#allocation4], 0  ;;  %s9506_s24 = smov [#allocation2]  }
   0x6   :  { %s32_s25 = sshll.u32 %s9506_s24, 4  ;;  %s33_s25 = int_to_ptr.vmem [resolvable:$true] %s32_s25 }
   0x7   :  { %s9448_s26 = scalar_lea.vmem %s33_s25, 256  ;;  %p9453_p1 = scmp.lt.s32.totalorder %s33_s25, %s33_s25 }
   0x8   :  { %p9449_p0 = scmp.ne.s32.totalorder %s33_s25, %s9448_s26  ;;  %p9454_p2 = scmp.lt.s32.totalorder %s9448_s26, %s9448_s26 }
   0xa   :  { %p9455_p3 = por %p9454_p2, %p9453_p1 }
   0xc   :  { %p9456_p4 = pnand %p9455_p3, %p9449_p0 }
   0xe   :  { %9459 = shalt.err (!%p9456_p4)
}
   0xf   :  { %s11326_s27 = smov 128   ;;  %s11331_s28 = smov 8  }
  0x10   :  { %s11351_s30 = sld [smem:[#allocation12_spill]]  ;;  %s9509_s18 = smov [#allocation5]  }
  0x11   :  { %s54_s19 = sshll.u32 %s9509_s18, 4  ;;  %s55_s19 = int_to_ptr.vmem [resolvable:$true] %s54_s19 }
  0x12   :  { %s9468_s1 = scalar_lea.vmem %s55_s19, 256  ;;  %p9473_p6 = scmp.lt.s32.totalorder %s55_s19, %s55_s19 }
  0x13   :  { %p9469_p5 = scmp.ne.s32.totalorder %s55_s19, %s9468_s1  ;;  %p9474_p7 = scmp.lt.s32.totalorder %s9468_s1, %s9468_s1 }
  0x15   :  { %p9475_p8 = por %p9474_p7, %p9473_p6 }
  0x16   :  { %38 = dma.hbm_to_vmem [thread:$0]  %s11351_s30, 256, %s33_s25, [#allocation3], %s11326_s27, %s11326_s27, %s11331_s28  }
  0x17   :  { %p9476_p9 = pnand %p9475_p8, %p9469_p5 }
  0x19   :  { %9479 = shalt.err (!%p9476_p9)
}
  0x1a   :  { %60 = dma.hbm_to_vmem [thread:$0]  %s11314_s7, 256, %s55_s19, [#allocation6], %s11326_s27, %s11326_s27, %s11331_s28  }
  0x1b   :  { %9500 = dma.done.wait [#allocation3], 256  }
  0x1c   :  { %9501 = vsyncadd [#allocation3], 4294967040 }
  0x1d   :  { %9502 = dma.done.wait [#allocation6], 256  }
  0x1e   :  { %9503 = vsyncadd [#allocation6], 4294967040  ;;  %v9510_v0 = vmov 0.0   ;;  %vm9511_vm0 = vmmov 0   ;;  %v9127_v1 = vld [vmem:[%s11310_s3 + $0x8] sm:$0xff]   ;;  %v9128_v2 = vld [vmem:[%s11310_s3] sm:$0xff]   ;;  %v101_v9 = vlaneseq }
  0x1f   :  { %8217 = vmatprep.subr.bf16.mxu1 %v9510_v0  ;;  %8221 = vmatprep.mubr.msk.bf16.mxu1 %vm9511_vm0, %v9510_v0  ;;  %v86_v3 = vld [vmem:[%s11309_s2] sm:$0xff]  ;;  %s11352_s30 = sld [smem:[#allocation11_spill]]  ;;  %vm117_vm1 = vcmask 261120   ;;  %v9665_v12 = vld [vmem:[#allocation5] sm:$0xff]  ;;  %s11339_s1 = smov 64   ;;  %vm166_vm2 = vcmask 64512  }
  0x20   :  { %8243 = vmatprep.subr.bf16.mxu0 %v9510_v0  ;;  %8245 = vmatprep.mubr.msk.bf16.mxu0 %vm9511_vm0, %v9510_v0  ;;  %v9660_v10 = vshrl.u32 %v101_v9, 7  ;;  %s9513_s20 = smov 96   ;;  %s9514_s21 = smov 88   ;;  %vm230_vm3 = vcmask 1043456   ;;  %vm617_vm4 = vcmask 130048   ;;  %vm619_vm5 = vcmask 195584  }
  0x21   :  { %8218 = vmatpush3.bf16.msra.mxu1 %v9127_v1  ;;  %s11341_s22 = smov 72   ;;  %s11345_s23 = smov 112  }
  0x22   :  { %8219 = vmatprep.subr.bf16.mxu1 %v9510_v0  ;;  %v9663_v11 = vsub.s32 0, %v9660_v10  ;;  %s11343_s7 = smov 104   ;;  %s9518_s24 = smov 120  }
  0x23   :  { %s11347_s25 = smov 80   ;;  %s11335_s26 = smov 56  }
  0x24   :  { %v104_v14 = vrot.slane %v9665_v12, %v9663_v11  ;;  %s11337_s29 = smov 48   ;;  %s11333_s0 = smov 40  }
  0x25   :  { %v87_v4 = vld [vmem:[%s11352_s30] sm:$0xff]  ;;  %v88_v5 = vld [vmem:[%s11352_s30 + $0x8] sm:$0xff]  ;;  %8220 = vmatpush3.bf16.msra.mxu1 %v9128_v2  ;;  %s11329_s30 = smov 16   ;;  %s11327_s18 = smov 24  }
  0x26   :  { %v9650_v6 = vadd.f32 %v87_v4, %v86_v3  ;;  %v9652_v7 = vadd.f32 %v88_v5, %v86_v3  ;;  %8225 = vmatprep.subr.bf16.mxu1 %v9510_v0  ;;  %s11354_s27 = smov 56   ;;  %s11360_s19 = smov 104  }
  0x28   :  { %v100_v8 = vpack.c.bf16 %v9652_v7, %v9650_v6 }
  0x2a   :  { %8222 = vmatmul.mubr.msk.bf16.vlgmr.msra.gmra.mxu1 %vm117_vm1, %v100_v8 }
  0x2b   :  { %8227 = vmatprep.mubr.msk.bf16.mxu1 %vm9511_vm0, %v9510_v0 }
  0xea   :  { %v155_v13 = vpop.f32.mrf.mxu1 }
  0xeb   :  { %v156_v17 = vadd.f32 %v155_v13, %v104_v14 }
  0xec   :  { %v8223_v15 = vpop.f32.mrf.mxu1 }
  0xee   :  { %v158_v16 = vpop.f32.mrf.mxu1 }
  0xef   :  { %v159_v18 = vadd.f32 %v158_v16, %v104_v14 }
  0xf0   :  { %v8224_v19 = vpop.f32.mrf.mxu1 }
  0xf1   :  { %v9669_v20 = vpack.c.bf16 %v159_v18, %v156_v17 }
  0xf3   :  { %225 = vrot.lane.b32.xlu1 %v9669_v20, %s11339_s1  ;;  %164 = vrot.lane.b32.xlu0 %v9669_v20, %s9513_s20  ;;  %v9689_v30 = vrot.slane %v9669_v20, 4 }
  0xf7   :  { %276 = vrot.lane.b32.xlu1 %v9669_v20, %s9514_s21 }
 0x165   :  { %v165_v21 = vpop.permute.xlu0 %164  ;;  %v226_v23 = vpop.permute.xlu1 %225 }
 0x166   :  { %v171_v22 = vsel %vm166_vm2, %v165_v21, 0  ;;  %v232_v24 = vsel %vm230_vm3, %v226_v23, 0 }
 0x167   :  { %8226 = vmatpush3.bf16.xpose.msra.mxu1 %v171_v22 }
 0x168   :  { %8231 = vmatprep.subr.bf16.mxu1 %v9510_v0 }
 0x169   :  { %v277_v36 = vpop.permute.xlu1 %276 }
 0x16a   :  { %v282_v42 = vsel %vm166_vm2, %v277_v36, 0 }
 0x16e   :  { %8228 = vmatmul.mubr.msk.bf16.vlgmr.msra.gmra.mxu1 %vm166_vm2, %v9669_v20 }
 0x16f   :  { %8232 = vmatpush3.bf16.msra.mxu1 %v232_v24  ;;  %8233 = vmatprep.mubr.msk.bf16.mxu1 %vm9511_vm0, %v9510_v0 }
 0x170   :  { %8237 = vmatprep.subr.bf16.mxu1 %v9510_v0 }
 0x22e   :  { %v207_v25 = vpop.f32.mrf.mxu1 }
 0x22f   :  { %v213_v26 = vsel %vm166_vm2, %v207_v25, -inf }
 0x230   :  { %214 = vmax.xlane.f32.xlu0 %v213_v26  ;;  %v8229_v27 = vpop.f32.mrf.mxu1 }
 0x232   :  { %v210_v28 = vpop.f32.mrf.mxu1 }
 0x234   :  { %v8230_v29 = vpop.f32.mrf.mxu1 }
 0x246   :  { %496 = vrot.lane.b32.xlu0 %v9669_v20, %s11341_s22 }
 0x24a   :  { %840 = vrot.lane.b32.xlu0 %v9689_v30, %s11345_s23 }
 0x24e   :  { %950 = vrot.lane.b32.xlu0 %v9689_v30, %s11343_s7 }
 0x2b9   :  { %v215_v31 = vpop.xlane.xlu0 %214 }
 0x2ba   :  { %v216_v32 = vsub.f32 %v207_v25, %v215_v31 }
 0x2bc   :  { %v217_v33 = vmul.f32 1.442695, %v216_v32 }
 0x2bd   :  { %v497_v46 = vpop.permute.xlu0 %496 }
 0x2be   :  { %9195 = vpow2.f32 %v217_v33  ;;  %v502_v48 = vsel %vm166_vm2, %v497_v46, 0 }
 0x2c1   :  { %v841_v57 = vpop.permute.xlu0 %840 }
 0x2c5   :  { %v951_v59 = vpop.permute.xlu0 %950 }
 0x2cb   :  { %v9196_v34 = vpop.eup %9195 }
 0x2cc   :  { %v219_v35 = vsel %vm166_vm2, %v9196_v34, 0.0 }
 0x2cd   :  { %220 = vadd.xlane.f32.xlu1 %v219_v35 }
 0x2de   :  { %274 = vrot.lane.b32.xlu1 %v9669_v20, %s9518_s24 }
 0x2e2   :  { %386 = vrot.lane.b32.xlu1 %v9669_v20, %s11347_s25 }
 0x2e6   :  { %384 = vrot.lane.b32.xlu1 %v9669_v20, %s11345_s23 }
 0x2ea   :  { %494 = vrot.lane.b32.xlu1 %v9669_v20, %s11343_s7 }
 0x2ee   :  { %622 = vrot.lane.b32.xlu1 %v9689_v30, %s9513_s20 }
 0x2f2   :  { %732 = vrot.lane.b32.xlu1 %v9689_v30, %s9514_s21 }
 0x2f6   :  { %730 = vrot.lane.b32.xlu1 %v9689_v30, %s9518_s24 }
 0x2fa   :  { %842 = vrot.lane.b32.xlu1 %v9689_v30, %s11347_s25 }
 0x2fe   :  { %952 = vrot.lane.b32.xlu1 %v9689_v30, %s11341_s22 }
 0x356   :  { %v221_v37 = vpop.xlane.xlu1 %220 }
 0x357   :  { %9197 = vrcp.f32 %v221_v37 }
 0x35a   :  { %v275_v39 = vpop.permute.xlu1 %274 }
 0x35e   :  { %v387_v43 = vpop.permute.xlu1 %386 }
 0x35f   :  { %v392_v45 = vsel %vm166_vm2, %v387_v43, 0 }
 0x362   :  { %v385_v44 = vpop.permute.xlu1 %384 }
 0x364   :  { %v9198_v38 = vpop.eup %9197 }
 0x365   :  { %v223_v40 = vmul.f32 %v9198_v38, %v9196_v34 }
 0x366   :  { %v495_v47 = vpop.permute.xlu1 %494 }
 0x367   :  { %v224_v41 = vpack.c.bf16 %v223_v40, %v223_v40 }
 0x369   :  { %8234 = vmatmul.mubr.msk.bf16.vlgmr.msra.gmra.mxu1 %vm166_vm2, %v224_v41 }
 0x36a   :  { %8238 = vmatpush3.bf16.xpose.msra.mxu1 %v282_v42  ;;  %8239 = vmatprep.mubr.msk.bf16.mxu1 %vm9511_vm0, %v9510_v0  ;;  %v623_v49 = vpop.permute.xlu1 %622 }
 0x36b   :  { %8249 = vmatprep.subr.bf16.mxu1 %v9510_v0  ;;  %v628_v50 = vsel %vm166_vm2, %v623_v49, 0 }
 0x36e   :  { %v733_v51 = vpop.permute.xlu1 %732 }
 0x36f   :  { %v738_v53 = vsel %vm166_vm2, %v733_v51, 0 }
 0x371   :  { %8240 = vmatmul.mubr.msk.bf16.vlgmr.msra.gmra.mxu1 %vm166_vm2, %v275_v39 }
 0x372   :  { %8250 = vmatpush3.bf16.xpose.msra.mxu1 %v392_v45  ;;  %8251 = vmatprep.mubr.msk.bf16.mxu1 %vm9511_vm0, %v9510_v0  ;;  %v731_v52 = vpop.permute.xlu1 %730 }
 0x373   :  { %8261 = vmatprep.subr.bf16.mxu1 %v9510_v0 }
 0x376   :  { %v843_v54 = vpop.permute.xlu1 %842 }
 0x377   :  { %v848_v55 = vsel %vm166_vm2, %v843_v54, 0 }
 0x379   :  { %8252 = vmatmul.mubr.msk.bf16.vlgmr.msra.gmra.mxu1 %vm166_vm2, %v385_v44 }
 0x37a   :  { %8262 = vmatpush3.bf16.xpose.msra.mxu1 %v502_v48  ;;  %8263 = vmatprep.mubr.msk.bf16.mxu1 %vm9511_vm0, %v9510_v0  ;;  %v953_v56 = vpop.permute.xlu1 %952 }
 0x37b   :  { %8273 = vmatprep.subr.bf16.mxu1 %v9510_v0  ;;  %v958_v58 = vsel %vm166_vm2, %v953_v56, 0 }
 0x381   :  { %8264 = vmatmul.mubr.msk.bf16.vlgmr.msra.gmra.mxu1 %vm166_vm2, %v495_v47 }
 0x382   :  { %8274 = vmatpush3.bf16.xpose.msra.mxu1 %v628_v50  ;;  %8275 = vmatprep.mubr.msk.bf16.mxu1 %vm9511_vm0, %v9510_v0 }
 0x383   :  { %8285 = vmatprep.subr.bf16.mxu1 %v9510_v0 }
 0x389   :  { %8276 = vmatmul.mubr.msk.bf16.vlgmr.msra.gmra.mxu1 %vm166_vm2, %v9689_v30 }
 0x38a   :  { %8286 = vmatpush3.bf16.xpose.msra.mxu1 %v738_v53  ;;  %8287 = vmatprep.mubr.msk.bf16.mxu1 %vm9511_vm0, %v9510_v0 }
 0x38b   :  { %8297 = vmatprep.subr.bf16.mxu1 %v9510_v0 }
 0x391   :  { %8288 = vmatmul.mubr.msk.bf16.vlgmr.msra.gmra.mxu1 %vm166_vm2, %v731_v52 }
 0x392   :  { %8298 = vmatpush3.bf16.xpose.msra.mxu1 %v848_v55  ;;  %8299 = vmatprep.mubr.msk.bf16.mxu1 %vm9511_vm0, %v9510_v0 }
 0x393   :  { %8309 = vmatprep.subr.bf16.mxu1 %v9510_v0 }
 0x399   :  { %8300 = vmatmul.mubr.msk.bf16.vlgmr.msra.gmra.mxu1 %vm166_vm2, %v841_v57 }
 0x39a   :  { %8310 = vmatpush3.bf16.xpose.msra.mxu1 %v958_v58  ;;  %8311 = vmatprep.mubr.msk.bf16.mxu1 %vm9511_vm0, %v9510_v0 }
 0x39b   :  { %8321 = vmatprep.subr.bf16.mxu1 %v9510_v0 }
 0x3a1   :  { %8312 = vmatmul.mubr.msk.bf16.vlgmr.msra.gmra.mxu1 %vm166_vm2, %v951_v59 }
 0x3a2   :  { %8325 = vmatprep.mubr.msk.bf16.mxu1 %vm9511_vm0, %v9510_v0 }
 0x429   :  { %v9753_v60 = vpop.f32.mrf.mxu1 }
 0x42b   :  { %v8235_v61 = vpop.f32.mrf.mxu1 }
 0x42d   :  { %v271_v62 = vpop.f32.mrf.mxu1 }
 0x42f   :  { %v8236_v63 = vpop.f32.mrf.mxu1 }
 0x431   :  { %v318_v1 = vpop.f32.mrf.mxu1 }
 0x432   :  { %v324_v2 = vsel %vm166_vm2, %v318_v1, -inf }
 0x433   :  { %325 = vmax.xlane.f32.xlu1 %v324_v2  ;;  %v8241_v3 = vpop.f32.mrf.mxu1 }
 0x435   :  { %v321_v4 = vpop.f32.mrf.mxu1 }
 0x437   :  { %v8242_v5 = vpop.f32.mrf.mxu1 }
 0x439   :  { %v428_v8 = vpop.f32.mrf.mxu1 }
 0x43a   :  { %v434_v9 = vsel %vm166_vm2, %v428_v8, -inf }
 0x43b   :  { %435 = vmax.xlane.f32.xlu0 %v434_v9  ;;  %v8253_v13 = vpop.f32.mrf.mxu1 }
 0x43d   :  { %v431_v14 = vpop.f32.mrf.mxu1 }
 0x43f   :  { %v8254_v15 = vpop.f32.mrf.mxu1 }
 0x441   :  { %v538_v16 = vpop.f32.mrf.mxu1 }
 0x442   :  { %v544_v17 = vsel %vm166_vm2, %v538_v16, -inf }
 0x443   :  { %545 = vmax.xlane.f32.xlu0 %v544_v17  ;;  %v8265_v18 = vpop.f32.mrf.mxu1 }
 0x445   :  { %v541_v19 = vpop.f32.mrf.mxu1 }
 0x447   :  { %v8266_v21 = vpop.f32.mrf.mxu1 }
 0x449   :  { %v664_v22 = vpop.f32.mrf.mxu1 }
 0x44a   :  { %v670_v23 = vsel %vm166_vm2, %v664_v22, -inf }
 0x44b   :  { %671 = vmax.xlane.f32.xlu1 %v670_v23  ;;  %v8277_v24 = vpop.f32.mrf.mxu1 }
 0x44d   :  { %v667_v25 = vpop.f32.mrf.mxu1 }
 0x44f   :  { %v8278_v26 = vpop.f32.mrf.mxu1 }
 0x451   :  { %v774_v27 = vpop.f32.mrf.mxu1 }
 0x452   :  { %v780_v28 = vsel %vm166_vm2, %v774_v27, -inf }
 0x453   :  { %781 = vmax.xlane.f32.xlu0 %v780_v28  ;;  %v8289_v29 = vpop.f32.mrf.mxu1 }
 0x455   :  { %v777_v31 = vpop.f32.mrf.mxu1 }
 0x457   :  { %v8290_v32 = vpop.f32.mrf.mxu1 }
 0x459   :  { %v884_v33 = vpop.f32.mrf.mxu1 }
 0x45a   :  { %v890_v34 = vsel %vm166_vm2, %v884_v33, -inf }
 0x45b   :  { %891 = vmax.xlane.f32.xlu1 %v890_v34  ;;  %v8301_v35 = vpop.f32.mrf.mxu1 }
 0x45d   :  { %v887_v36 = vpop.f32.mrf.mxu1 }
 0x45f   :  { %v8302_v37 = vpop.f32.mrf.mxu1 }
 0x461   :  { %v994_v38 = vpop.f32.mrf.mxu1 }
 0x462   :  { %v1000_v39 = vsel %vm166_vm2, %v994_v38, -inf }
 0x463   :  { %1001 = vmax.xlane.f32.xlu0 %v1000_v39  ;;  %v8313_v40 = vpop.f32.mrf.mxu1 }
 0x465   :  { %v997_v41 = vpop.f32.mrf.mxu1 }
 0x467   :  { %v8314_v42 = vpop.f32.mrf.mxu1 }
 0x46c   :  { %336 = vrot.lane.b32.xlu1 %v9669_v20, %s11335_s26 }
 0x479   :  { %446 = vrot.lane.b32.xlu0 %v9669_v20, %s11337_s29 }
 0x4bc   :  { %v326_v43 = vpop.xlane.xlu1 %325 }
 0x4bd   :  { %v327_v44 = vsub.f32 %v318_v1, %v326_v43 }
 0x4bf   :  { %v328_v45 = vmul.f32 1.442695, %v327_v44 }
 0x4c1   :  { %9199 = vpow2.f32 %v328_v45 }
 0x4c4   :  { %v436_v46 = vpop.xlane.xlu0 %435 }
 0x4c5   :  { %v437_v47 = vsub.f32 %v428_v8, %v436_v46 }
 0x4c7   :  { %v438_v48 = vmul.f32 1.442695, %v437_v47 }
 0x4c9   :  { %9201 = vpow2.f32 %v438_v48 }
 0x4cc   :  { %v546_v49 = vpop.xlane.xlu0 %545 }
 0x4cd   :  { %v547_v50 = vsub.f32 %v538_v16, %v546_v49 }
 0x4ce   :  { %v9200_v51 = vpop.eup %9199 }
 0x4cf   :  { %v548_v52 = vmul.f32 1.442695, %v547_v50  ;;  %v330_v53 = vsel %vm166_vm2, %v9200_v51, 0.0 }
 0x4d0   :  { %331 = vadd.xlane.f32.xlu1 %v330_v53 }
 0x4d1   :  { %9203 = vpow2.f32 %v548_v52 }
 0x4d4   :  { %v672_v58 = vpop.xlane.xlu1 %671 }
 0x4d5   :  { %v673_v63 = vsub.f32 %v664_v22, %v672_v58 }
 0x4d6   :  { %v9202_v54 = vpop.eup %9201 }
 0x4d7   :  { %v440_v55 = vsel %vm166_vm2, %v9202_v54, 0.0  ;;  %v674_v2 = vmul.f32 1.442695, %v673_v63 }
 0x4d8   :  { %441 = vadd.xlane.f32.xlu0 %v440_v55 }
 0x4d9   :  { %9205 = vpow2.f32 %v674_v2 }
 0x4dc   :  { %v782_v1 = vpop.xlane.xlu0 %781 }
 0x4dd   :  { %v783_v3 = vsub.f32 %v774_v27, %v782_v1 }
 0x4de   :  { %v9768_v56 = vpop.eup %9203 }
 0x4df   :  { %v550_v57 = vsel %vm166_vm2, %v9768_v56, 0.0  ;;  %v784_v8 = vmul.f32 1.442695, %v783_v3 }
 0x4e0   :  { %551 = vadd.xlane.f32.xlu1 %v550_v57 }
 0x4e1   :  { %9207 = vpow2.f32 %v784_v8 }
 0x4e4   :  { %v892_v59 = vpop.xlane.xlu1 %891 }
 0x4e5   :  { %v893_v5 = vsub.f32 %v884_v33, %v892_v59 }
 0x4e6   :  { %v9206_v15 = vpop.eup %9205 }
 0x4e7   :  { %v894_v13 = vmul.f32 1.442695, %v893_v5 }
 0x4e8   :  { %v337_v61 = vpop.permute.xlu1 %336 }
 0x4e9   :  { %v342_v62 = vsel %vm230_vm3, %v337_v61, 0  ;;  %9209 = vpow2.f32 %v894_v13 }
 0x4ea   :  { %8244 = vmatpush3.bf16.msra.mxu0 %v342_v62 }
 0x4eb   :  { %8255 = vmatprep.subr.bf16.mxu0 %v9510_v0 }
 0x4ec   :  { %v1002_v4 = vpop.xlane.xlu0 %1001 }
 0x4ed   :  { %v1003_v9 = vsub.f32 %v994_v38, %v1002_v4 }
 0x4ee   :  { %556 = vrot.lane.b32.xlu0 %v9669_v20, %s11333_s0  ;;  %v676_v20 = vsel %vm166_vm2, %v9206_v15, 0.0  ;;  %v9779_v16 = vpop.eup %9207 }
 0x4ef   :  { %v1004_v14 = vmul.f32 1.442695, %v1003_v9  ;;  %v786_v18 = vsel %vm166_vm2, %v9779_v16, 0.0 }
 0x4f0   :  { %v447_v24 = vpop.permute.xlu0 %446 }
 0x4f1   :  { %682 = vrot.lane.b32.xlu1 %v9689_v30, %s11339_s1  ;;  %9211 = vpow2.f32 %v1004_v14  ;;  %v452_v31 = vsel %vm230_vm3, %v447_v24, 0 }
 0x4f6   :  { %v9781_v17 = vpop.eup %9209 }
 0x4f7   :  { %v896_v21 = vsel %vm166_vm2, %v9781_v17, 0.0 }
 0x4fe   :  { %v9785_v19 = vpop.eup %9211 }
 0x4ff   :  { %v1006_v22 = vsel %vm166_vm2, %v9785_v19, 0.0 }
 0x50d   :  { %677 = vadd.xlane.f32.xlu0 %v676_v20 }
 0x511   :  { %787 = vadd.xlane.f32.xlu0 %v786_v18 }
 0x515   :  { %897 = vadd.xlane.f32.xlu1 %v896_v21  ;;  %1007 = vadd.xlane.f32.xlu0 %v1006_v22 }
 0x526   :  { %902 = vrot.lane.b32.xlu1 %v9689_v30, %s11337_s29 }
 0x52a   :  { %1012 = vrot.lane.b32.xlu1 %v9689_v30, %s11333_s0  ;;  %s11357_s0 = smov 16  }
 0x52b   :  { %792 = vrot.lane.b32.xlu0 %v9689_v30, %s11335_s26 }
 0x559   :  { %v332_v23 = vpop.xlane.xlu1 %331 }
 0x55a   :  { %9213 = vrcp.f32 %v332_v23  ;;  %v9129_v23 = vld [vmem:[%s11311_s4 + $0x8] sm:$0xff]  }
 0x55b   :  { %8322 = vmatpush3.bf16.msra.mxu1 %v9129_v23  ;;  %v9137_v23 = vld [vmem:[%s11313_s6 + $0x18] sm:$0xff]  }
 0x55c   :  { %8323 = vmatprep.subr.bf16.mxu1 %v9510_v0 }
 0x561   :  { %v442_v25 = vpop.xlane.xlu0 %441 }
 0x562   :  { %9215 = vrcp.f32 %v442_v25 }
 0x565   :  { %v557_v33 = vpop.permute.xlu0 %556 }
 0x566   :  { %v562_v35 = vsel %vm230_vm3, %v557_v33, 0 }
 0x567   :  { %v9214_v26 = vpop.eup %9213 }
 0x568   :  { %v334_v27 = vmul.f32 %v9214_v26, %v9200_v51 }
 0x569   :  { %v552_v28 = vpop.xlane.xlu1 %551 }
 0x56a   :  { %9217 = vrcp.f32 %v552_v28  ;;  %v335_v29 = vpack.c.bf16 %v334_v27, %v334_v27  ;;  %v9130_v28 = vld [vmem:[%s11311_s4] sm:$0xff]  }
 0x56b   :  { %8324 = vmatpush3.bf16.msra.mxu1 %v9130_v28 }
 0x56c   :  { %8246 = vmatmul.mubr.msk.bf16.vlgmr.msra.gmra.mxu0 %vm166_vm2, %v335_v29  ;;  %8337 = vmatprep.subr.bf16.mxu1 %v9510_v0 }
 0x56d   :  { %8256 = vmatpush3.bf16.msra.mxu0 %v452_v31  ;;  %8257 = vmatprep.mubr.msk.bf16.mxu0 %vm9511_vm0, %v9510_v0  ;;  %v683_v38 = vpop.permute.xlu1 %682 }
 0x56e   :  { %8267 = vmatprep.subr.bf16.mxu0 %v9510_v0  ;;  %v688_v40 = vsel %vm230_vm3, %v683_v38, 0 }
 0x56f   :  { %v9216_v30 = vpop.eup %9215 }
 0x570   :  { %v444_v32 = vmul.f32 %v9216_v30, %v9202_v54 }
 0x572   :  { %v445_v34 = vpack.c.bf16 %v444_v32, %v444_v32 }
 0x574   :  { %8258 = vmatmul.mubr.msk.bf16.vlgmr.msra.gmra.mxu0 %vm166_vm2, %v445_v34 }
 0x575   :  { %8268 = vmatpush3.bf16.msra.mxu0 %v562_v35  ;;  %8269 = vmatprep.mubr.msk.bf16.mxu0 %vm9511_vm0, %v9510_v0 }
 0x576   :  { %8279 = vmatprep.subr.bf16.mxu0 %v9510_v0 }
 0x577   :  { %v9218_v36 = vpop.eup %9217 }
 0x578   :  { %v554_v37 = vmul.f32 %v9218_v36, %v9768_v56 }
 0x57a   :  { %v555_v39 = vpack.c.bf16 %v554_v37, %v554_v37 }
 0x57c   :  { %8270 = vmatmul.mubr.msk.bf16.vlgmr.msra.gmra.mxu0 %vm166_vm2, %v555_v39 }
 0x57d   :  { %8280 = vmatpush3.bf16.msra.mxu0 %v688_v40  ;;  %8281 = vmatprep.mubr.msk.bf16.mxu0 %vm9511_vm0, %v9510_v0 }
 0x57e   :  { %8291 = vmatprep.subr.bf16.mxu0 %v9510_v0 }
 0x596   :  { %v678_v41 = vpop.xlane.xlu0 %677 }
 0x597   :  { %9219 = vrcp.f32 %v678_v41 }
 0x59a   :  { %v788_v42 = vpop.xlane.xlu0 %787 }
 0x59b   :  { %9221 = vrcp.f32 %v788_v42 }
 0x59e   :  { %v898_v43 = vpop.xlane.xlu1 %897  ;;  %v1008_v44 = vpop.xlane.xlu0 %1007 }
 0x59f   :  { %9223 = vrcp.f32 %v898_v43 }
 0x5a0   :  { %9225 = vrcp.f32 %v1008_v44 }
 0x5a2   :  { %v793_v47 = vpop.permute.xlu0 %792  ;;  %v903_v52 = vpop.permute.xlu1 %902 }
 0x5a3   :  { %v798_v50 = vsel %vm230_vm3, %v793_v47, 0  ;;  %v908_v55 = vsel %vm230_vm3, %v903_v52, 0 }
 0x5a4   :  { %v9220_v45 = vpop.eup %9219 }
 0x5a5   :  { %v680_v46 = vmul.f32 %v9220_v45, %v9206_v15 }
 0x5a6   :  { %v1013_v57 = vpop.permute.xlu1 %1012 }
 0x5a7   :  { %v681_v48 = vpack.c.bf16 %v680_v46, %v680_v46  ;;  %v1018_v61 = vsel %vm230_vm3, %v1013_v57, 0 }
 0x5a8   :  { %v9222_v49 = vpop.eup %9221 }
 0x5a9   :  { %8282 = vmatmul.mubr.msk.bf16.vlgmr.msra.gmra.mxu0 %vm166_vm2, %v681_v48  ;;  %v790_v51 = vmul.f32 %v9222_v49, %v9779_v16 }
 0x5aa   :  { %8292 = vmatpush3.bf16.msra.mxu0 %v798_v50  ;;  %8293 = vmatprep.mubr.msk.bf16.mxu0 %vm9511_vm0, %v9510_v0 }
 0x5ab   :  { %8303 = vmatprep.subr.bf16.mxu0 %v9510_v0  ;;  %v791_v53 = vpack.c.bf16 %v790_v51, %v790_v51 }
 0x5ac   :  { %v9224_v54 = vpop.eup %9223 }
 0x5ad   :  { %v900_v56 = vmul.f32 %v9224_v54, %v9781_v17  ;;  %v9226_v59 = vpop.eup %9225 }
 0x5ae   :  { %v1010_v62 = vmul.f32 %v9226_v59, %v9785_v19 }
 0x5af   :  { %v901_v58 = vpack.c.bf16 %v900_v56, %v900_v56 }
 0x5b0   :  { %v1011_v63 = vpack.c.bf16 %v1010_v62, %v1010_v62 }
 0x5b1   :  { %8294 = vmatmul.mubr.msk.bf16.vlgmr.msra.gmra.mxu0 %vm166_vm2, %v791_v53 }
 0x5b2   :  { %8304 = vmatpush3.bf16.msra.mxu0 %v908_v55  ;;  %8305 = vmatprep.mubr.msk.bf16.mxu0 %vm9511_vm0, %v9510_v0  ;;  %v9856_v55 = vsub.s32 1, %v9660_v10 }
 0x5b3   :  { %8315 = vmatprep.subr.bf16.mxu0 %v9510_v0 }
 0x5b9   :  { %8306 = vmatmul.mubr.msk.bf16.vlgmr.msra.gmra.mxu0 %vm166_vm2, %v901_v58 }
 0x5ba   :  { %8316 = vmatpush3.bf16.msra.mxu0 %v1018_v61  ;;  %8317 = vmatprep.mubr.msk.bf16.mxu0 %vm9511_vm0, %v9510_v0 }
 0x5bb   :  { %8329 = vmatprep.subr.bf16.mxu0 %v9510_v0 }
 0x5c1   :  { %8318 = vmatmul.mubr.msk.bf16.vlgmr.msra.gmra.mxu0 %vm166_vm2, %v1011_v63 }
 0x5c2   :  { %8333 = vmatprep.mubr.msk.bf16.mxu0 %vm9511_vm0, %v9510_v0 }
 0x62c   :  { %v378_v1 = vpop.f32.mrf.mxu0 }
 0x62e   :  { %v8247_v2 = vpop.f32.mrf.mxu0 }
 0x630   :  { %v381_v3 = vpop.f32.mrf.mxu0 }
 0x632   :  { %v8248_v4 = vpop.f32.mrf.mxu0 }
 0x634   :  { %v488_v5 = vpop.f32.mrf.mxu0 }
 0x636   :  { %v8259_v8 = vpop.f32.mrf.mxu0 }
 0x638   :  { %v491_v9 = vpop.f32.mrf.mxu0 }
 0x63a   :  { %v8260_v13 = vpop.f32.mrf.mxu0 }
 0x63c   :  { %v598_v14 = vpop.f32.mrf.mxu0 }
 0x63e   :  { %v8271_v15 = vpop.f32.mrf.mxu0 }
 0x640   :  { %v601_v20 = vpop.f32.mrf.mxu0 }
 0x642   :  { %v8272_v16 = vpop.f32.mrf.mxu0 }
 0x669   :  { %v724_v17 = vpop.f32.mrf.mxu0 }
 0x66b   :  { %v8283_v18 = vpop.f32.mrf.mxu0 }
 0x66c   :  { %v9133_v18 = vld [vmem:[%s11313_s6 + $0x38] sm:$0xff]  }
 0x66d   :  { %v727_v19 = vpop.f32.mrf.mxu0 }
 0x66e   :  { %v9134_v19 = vld [vmem:[%s11313_s6 + $0x30] sm:$0xff]  }
 0x66f   :  { %v8284_v21 = vpop.f32.mrf.mxu0 }
 0x670   :  { %v9135_v21 = vld [vmem:[%s11313_s6 + $0x28] sm:$0xff]  }
 0x671   :  { %v834_v22 = vpop.f32.mrf.mxu0 }
 0x672   :  { %v9037_v24 = vpack.i.bf16 %v834_v22, %v378_v1  ;;  %v9136_v22 = vld [vmem:[%s11313_s6 + $0x20] sm:$0xff]  }
 0x673   :  { %v8295_v25 = vpop.f32.mrf.mxu0 }
 0x674   :  { %9038 = vrot.lane.b32.xlu1 %v9037_v24, %s11331_s28  ;;  %s11356_s28 = smov 8  }
 0x675   :  { %v837_v26 = vpop.f32.mrf.mxu0 }
 0x677   :  { %v8296_v27 = vpop.f32.mrf.mxu0 }
 0x679   :  { %v944_v29 = vpop.f32.mrf.mxu0 }
 0x67a   :  { %v9042_v31 = vpack.i.bf16 %v944_v29, %v488_v5 }
 0x67b   :  { %v8307_v30 = vpop.f32.mrf.mxu0 }
 0x67c   :  { %9043 = vrot.lane.b32.xlu1 %v9042_v31, %s11329_s30  ;;  %v9895_v31 = vsub.s32 2, %v9660_v10  ;;  %s11355_s30 = smov 40  }
 0x67d   :  { %v947_v32 = vpop.f32.mrf.mxu0 }
 0x67f   :  { %v8308_v33 = vpop.f32.mrf.mxu0 }
 0x680   :  { %v1168_v33 = vrot.slane %v9665_v12, %v9895_v31 }
 0x681   :  { %v1054_v34 = vpop.f32.mrf.mxu0 }
 0x682   :  { %v9047_v35 = vpack.i.bf16 %v1054_v34, %v598_v14  ;;  %v9900_v34 = vsub.s32 3, %v9660_v10 }
 0x683   :  { %v8319_v36 = vpop.f32.mrf.mxu0 }
 0x684   :  { %9048 = vrot.lane.b32.xlu0 %v9047_v35, %s11327_s18  ;;  %s11358_s18 = smov 24  }
 0x685   :  { %v1057_v37 = vpop.f32.mrf.mxu0 }
 0x687   :  { %v8320_v38 = vpop.f32.mrf.mxu0 }
 0x688   :  { %v1174_v38 = vrot.slane %v9665_v12, %v9900_v34 }
 0x6e6   :  { %v9039_v39 = vpop.permute.xlu1 %9038 }
 0x6e7   :  { %v9041_v41 = vunpack.i.h.bf16 %v9039_v39  ;;  %v9040_v42 = vunpack.i.l.bf16 %v9039_v39 }
 0x6e9   :  { %v1072_v46 = vsel %vm166_vm2, %v724_v17, %v9041_v41  ;;  %v616_v47 = vsel %vm166_vm2, %v9753_v60, %v9040_v42  ;;  %v1079_v60 = vrot.slane %v9665_v12, %v9856_v55  ;;  %v9132_v17 = vld [vmem:[%s11312_s5] sm:$0xff]  }
 0x6ee   :  { %v9044_v40 = vpop.permute.xlu1 %9043 }
 0x6ef   :  { %v9046_v43 = vunpack.i.h.bf16 %v9044_v40  ;;  %v9045_v44 = vunpack.i.l.bf16 %v9044_v40 }
 0x6f1   :  { %v1073_v50 = vsel %vm617_vm4, %v1072_v46, %v9046_v43  ;;  %v618_v51 = vsel %vm617_vm4, %v616_v47, %v9045_v44  ;;  %v9138_v43 = vld [vmem:[%s11313_s6 + $0x10] sm:$0xff]   ;;  %v9139_v44 = vld [vmem:[%s11313_s6 + $0x8] sm:$0xff]   ;;  %v9920_v46 = vsub.s32 4, %v9660_v10 }
 0x6f3   :  { %v1201_v47 = vrot.slane %v9665_v12, %v9920_v46 }
 0x6f6   :  { %v9049_v45 = vpop.permute.xlu0 %9048 }
 0x6f7   :  { %v9051_v48 = vunpack.i.h.bf16 %v9049_v45  ;;  %v9050_v49 = vunpack.i.l.bf16 %v9049_v45  ;;  %v9140_v45 = vld [vmem:[%s11313_s6] sm:$0xff]  }
 0x6f9   :  { %v1074_v52 = vsel %vm619_vm5, %v1073_v50, %v9051_v48  ;;  %v620_v53 = vsel %vm619_vm5, %v618_v51, %v9050_v49 }
 0x6fa   :  { %v1075_v54 = vpack.c.bf16 %v1074_v52, %v620_v53 }
 0x6fc   :  { %8326 = vmatmul.mubr.msk.bf16.vlgmr.msra.gmra.mxu1 %vm117_vm1, %v1075_v54 }
 0x6fd   :  { %8353 = vmatprep.mubr.msk.bf16.mxu1 %vm9511_vm0, %v9510_v0  ;;  %8338 = vmatpush3.bf16.msra.mxu1 %v9133_v18 }
 0x6fe   :  { %8339 = vmatprep.subr.bf16.mxu1 %v9510_v0 }
 0x701   :  { %8340 = vmatpush3.bf16.msra.mxu1 %v9134_v19  ;;  %v9141_v19 = vld [vmem:[%s11310_s3 + $0x18] sm:$0xff]  }
 0x702   :  { %8341 = vmatprep.subr.bf16.mxu1 %v9510_v0 }
 0x705   :  { %8342 = vmatpush3.bf16.msra.mxu1 %v9135_v21  ;;  %v9142_v21 = vld [vmem:[%s11310_s3 + $0x10] sm:$0xff]   ;;  %s11353_s3 = smov 48  }
 0x706   :  { %8343 = vmatprep.subr.bf16.mxu1 %v9510_v0 }
 0x709   :  { %8344 = vmatpush3.bf16.msra.mxu1 %v9136_v22 }
 0x70a   :  { %8345 = vmatprep.subr.bf16.mxu1 %v9510_v0 }
 0x70d   :  { %8346 = vmatpush3.bf16.msra.mxu1 %v9137_v23 }
 0x70e   :  { %8347 = vmatprep.subr.bf16.mxu1 %v9510_v0 }
 0x711   :  { %8348 = vmatpush3.bf16.msra.mxu1 %v9138_v43 }
 0x712   :  { %8349 = vmatprep.subr.bf16.mxu1 %v9510_v0 }
 0x715   :  { %8350 = vmatpush3.bf16.msra.mxu1 %v9139_v44 }
 0x716   :  { %8351 = vmatprep.subr.bf16.mxu1 %v9510_v0 }
 0x719   :  { %8352 = vmatpush3.bf16.msra.mxu1 %v9140_v45 }
 0x71a   :  { %8383 = vmatprep.subr.bf16.mxu1 %v9510_v0 }
 0x7bc   :  { %v1129_v56 = vpop.f32.mrf.mxu1 }
 0x7bd   :  { %v1130_v57 = vadd.f32 %v1129_v56, %v1079_v60 }
 0x7be   :  { %v8327_v58 = vpop.f32.mrf.mxu1 }
 0x7bf   :  { %v1136_v59 = vadd.f32 %v1130_v57, %v9650_v6  ;;  %v9927_v57 = vsub.s32 5, %v9660_v10 }
 0x7c0   :  { %v1132_v61 = vpop.f32.mrf.mxu1 }
 0x7c1   :  { %v1133_v62 = vadd.f32 %v1132_v61, %v1079_v60  ;;  %v1138_v63 = vsel %vm117_vm1, %v1136_v59, 0.0  ;;  %v1264_v58 = vrot.slane %v9665_v12, %v9927_v57 }
 0x7c2   :  { %1139 = vadd.xlane.f32.xlu1 %v1138_v63  ;;  %v8328_v1 = vpop.f32.mrf.mxu1 }
 0x7c3   :  { %v1137_v2 = vadd.f32 %v1133_v62, %v9652_v7  ;;  %v9131_v7 = vld [vmem:[%s11312_s5 + $0x8] sm:$0xff]  }
 0x7c4   :  { %8330 = vmatpush3.bf16.msra.mxu0 %v9131_v7 }
 0x7c5   :  { %v1141_v3 = vsel %vm117_vm1, %v1137_v2, 0.0  ;;  %8331 = vmatprep.subr.bf16.mxu0 %v9510_v0 }
 0x7c6   :  { %1142 = vadd.xlane.f32.xlu0 %v1141_v3 }
 0x7c8   :  { %8332 = vmatpush3.bf16.msra.mxu0 %v9132_v17 }
 0x7c9   :  { %8357 = vmatprep.subr.bf16.mxu0 %v9510_v0 }
 0x84b   :  { %v1140_v4 = vpop.xlane.xlu1 %1139 }
 0x84c   :  { %v1145_v5 = vmul.f32 0.03125, %v1140_v4 }
 0x84e   :  { %v1147_v8 = vsub.f32 %v1136_v59, %v1145_v5 }
 0x84f   :  { %v1143_v9 = vpop.xlane.xlu0 %1142 }
 0x850   :  { %v1146_v13 = vmul.f32 0.03125, %v1143_v9  ;;  %v1149_v14 = vmul.f32 %v1147_v8, %v1147_v8 }
 0x852   :  { %v1148_v15 = vsub.f32 %v1137_v2, %v1146_v13  ;;  %v1151_v6 = vsel %vm117_vm1, %v1149_v14, 0.0 }
 0x853   :  { %1152 = vadd.xlane.f32.xlu0 %v1151_v6 }
 0x854   :  { %v1150_v20 = vmul.f32 %v1148_v15, %v1148_v15 }
 0x856   :  { %v1154_v16 = vsel %vm117_vm1, %v1150_v20, 0.0 }
 0x857   :  { %1155 = vadd.xlane.f32.xlu1 %v1154_v16 }
 0x8dc   :  { %v1153_v24 = vpop.xlane.xlu0 %1152 }
 0x8dd   :  { %v1157_v25 = vmul.f32 0.03125, %v1153_v24 }
 0x8df   :  { %v1159_v26 = vadd.f32 1e-05, %v1157_v25 }
 0x8e0   :  { %v1156_v27 = vpop.xlane.xlu1 %1155 }
 0x8e1   :  { %9227 = vrsqrt.f32 %v1159_v26  ;;  %v1158_v28 = vmul.f32 0.03125, %v1156_v27 }
 0x8e3   :  { %v1160_v29 = vadd.f32 1e-05, %v1158_v28  ;;  %v9944_v28 = vsub.s32 6, %v9660_v10 }
 0x8e5   :  { %9229 = vrsqrt.f32 %v1160_v29 }
 0x8ee   :  { %v9228_v30 = vpop.eup %9227 }
 0x8ef   :  { %v1163_v32 = vmul.f32 %v9228_v30, %v1147_v8 }
 0x8f1   :  { %v1169_v37 = vmul.f32 %v1168_v33, %v1163_v32  ;;  %v1385_v32 = vrot.slane %v9665_v12, %v9944_v28 }
 0x8f2   :  { %v9230_v35 = vpop.eup %9229 }
 0x8f3   :  { %v1164_v36 = vmul.f32 %v9230_v35, %v1148_v15  ;;  %v1175_v40 = vadd.f32 %v1174_v38, %v1169_v37 }
 0x8f5   :  { %v1170_v39 = vmul.f32 %v1168_v33, %v1164_v36  ;;  %v9949_v33 = vsub.s32 7, %v9660_v10  ;;  %v9962_v10 = vld [vmem:[#allocation5 + $0x8] sm:$0xff] }
 0x8f6   :  { %v1410_v44 = vrot.slane %v9962_v10, %v9663_v11 }
 0x8f7   :  { %v1176_v41 = vadd.f32 %v1174_v38, %v1170_v39  ;;  %v1391_v38 = vrot.slane %v9665_v12, %v9949_v33 }
 0x8f9   :  { %v1197_v42 = vpack.c.bf16 %v1176_v41, %v1175_v40 }
 0x8fb   :  { %8334 = vmatmul.mubr.msk.bf16.vlgmr.msra.gmra.mxu0 %vm117_vm1, %v1197_v42 }
 0x8fc   :  { %8361 = vmatprep.mubr.msk.bf16.mxu0 %vm9511_vm0, %v9510_v0  ;;  %8358 = vmatpush3.bf16.msra.mxu0 %v9141_v19 }
 0x8fd   :  { %8359 = vmatprep.subr.bf16.mxu0 %v9510_v0 }
 0x900   :  { %8360 = vmatpush3.bf16.msra.mxu0 %v9142_v21 }
 0x901   :  { %8365 = vmatprep.subr.bf16.mxu0 %v9510_v0 }
 0x9bb   :  { %v1251_v48 = vpop.f32.mrf.mxu0 }
 0x9bc   :  { %v1252_v50 = vadd.f32 %v1251_v48, %v1201_v47 }
 0x9bd   :  { %v8335_v49 = vpop.f32.mrf.mxu0 }
 0x9be   :  { %v1258_v54 = vmax.f32 %v1252_v50, 0.0 }
 0x9bf   :  { %v1254_v51 = vpop.f32.mrf.mxu0 }
 0x9c0   :  { %v1255_v52 = vadd.f32 %v1254_v51, %v1201_v47 }
 0x9c1   :  { %v8336_v53 = vpop.f32.mrf.mxu0 }
 0x9c2   :  { %v1259_v60 = vmax.f32 %v1255_v52, 0.0 }
 0x9c4   :  { %v1260_v56 = vpack.c.bf16 %v1259_v60, %v1258_v54 }
 0x9c6   :  { %8354 = vmatmul.mubr.bf16.vlgmr.msra.gmra.mxu1 %v1260_v56 }
 0x9c7   :  { %8385 = vmatprep.mubr.msk.bf16.mxu1 %vm9511_vm0, %v9510_v0 }
 0xa86   :  { %v1347_v59 = vpop.f32.mrf.mxu1 }
 0xa87   :  { %v1348_v61 = vadd.f32 %v1347_v59, %v1264_v58 }
 0xa88   :  { %v8355_v62 = vpop.f32.mrf.mxu1 }
 0xa89   :  { %v1354_v63 = vadd.f32 %v1348_v61, %v1175_v40 }
 0xa8a   :  { %v1350_v1 = vpop.f32.mrf.mxu1 }
 0xa8b   :  { %v1351_v2 = vadd.f32 %v1350_v1, %v1264_v58  ;;  %v1356_v3 = vsel %vm117_vm1, %v1354_v63, 0.0 }
 0xa8c   :  { %1357 = vadd.xlane.f32.xlu0 %v1356_v3  ;;  %v8356_v4 = vpop.f32.mrf.mxu1 }
 0xa8d   :  { %v1355_v5 = vadd.f32 %v1351_v2, %v1176_v41 }
 0xa8f   :  { %v1359_v8 = vsel %vm117_vm1, %v1355_v5, 0.0 }
 0xa90   :  { %1360 = vadd.xlane.f32.xlu1 %v1359_v8 }
 0xb15   :  { %v1358_v9 = vpop.xlane.xlu0 %1357 }
 0xb16   :  { %v1362_v13 = vmul.f32 0.03125, %v1358_v9 }
 0xb18   :  { %v1364_v14 = vsub.f32 %v1354_v63, %v1362_v13 }
 0xb19   :  { %v1361_v15 = vpop.xlane.xlu1 %1360 }
 0xb1a   :  { %v1363_v6 = vmul.f32 0.03125, %v1361_v15  ;;  %v1366_v20 = vmul.f32 %v1364_v14, %v1364_v14 }
 0xb1c   :  { %v1365_v16 = vsub.f32 %v1355_v5, %v1363_v6  ;;  %v1368_v7 = vsel %vm117_vm1, %v1366_v20, 0.0 }
 0xb1d   :  { %1369 = vadd.xlane.f32.xlu0 %v1368_v7 }
 0xb1e   :  { %v1367_v17 = vmul.f32 %v1365_v16, %v1365_v16 }
 0xb20   :  { %v1371_v18 = vsel %vm117_vm1, %v1367_v17, 0.0 }
 0xb21   :  { %1372 = vadd.xlane.f32.xlu1 %v1371_v18 }
 0xba6   :  { %v1370_v22 = vpop.xlane.xlu0 %1369 }
 0xba7   :  { %v1374_v23 = vmul.f32 0.03125, %v1370_v22 }
 0xba9   :  { %v1376_v24 = vadd.f32 1e-05, %v1374_v23 }
 0xbaa   :  { %v1373_v25 = vpop.xlane.xlu1 %1372 }
 0xbab   :  { %9231 = vrsqrt.f32 %v1376_v24  ;;  %v1375_v26 = vmul.f32 0.03125, %v1373_v25 }
 0xbad   :  { %v1377_v27 = vadd.f32 1e-05, %v1375_v26 }
 0xbaf   :  { %9233 = vrsqrt.f32 %v1377_v27 }
 0xbb8   :  { %v9232_v29 = vpop.eup %9231 }
 0xbb9   :  { %v1380_v30 = vmul.f32 %v9232_v29, %v1364_v14 }
 0xbbb   :  { %v1386_v37 = vmul.f32 %v1385_v32, %v1380_v30 }
 0xbbc   :  { %v9234_v35 = vpop.eup %9233 }
 0xbbd   :  { %v1381_v36 = vmul.f32 %v9234_v35, %v1365_v16  ;;  %v9953_v40 = vadd.f32 %v1391_v38, %v1386_v37 }
 0xbbf   :  { %v1387_v39 = vmul.f32 %v1385_v32, %v1381_v36 }
 0xbc1   :  { %v9955_v41 = vadd.f32 %v1391_v38, %v1387_v39 }
 0xbc3   :  { %v1406_v42 = vpack.c.bf16 %v9955_v41, %v9953_v40 }
 0xbc5   :  { %8362 = vmatmul.mubr.msk.bf16.vlgmr.msra.gmra.mxu0 %vm117_vm1, %v1406_v42 }
 0xbc6   :  { %8367 = vmatprep.mubr.msk.bf16.mxu0 %vm9511_vm0, %v9510_v0 }
 0xc85   :  { %v1460_v43 = vpop.f32.mrf.mxu0 }
 0xc86   :  { %v1461_v47 = vadd.f32 %v1460_v43, %v1410_v44 }
 0xc87   :  { %v8363_v12 = vpop.f32.mrf.mxu0 }
 0xc89   :  { %v1463_v45 = vpop.f32.mrf.mxu0 }
 0xc8a   :  { %v1464_v48 = vadd.f32 %v1463_v45, %v1410_v44 }
 0xc8b   :  { %v8364_v49 = vpop.f32.mrf.mxu0 }
 0xc8c   :  { %v9966_v50 = vpack.c.bf16 %v1464_v48, %v1461_v47 }
 0xc8e   :  { %1469 = vrot.lane.b32.xlu0 %v9966_v50, %s9513_s20  ;;  %v9979_v51 = vrot.slane %v9966_v50, 4 }
 0xc92   :  { %1579 = vrot.lane.b32.xlu0 %v9966_v50, %s9514_s21 }
 0xc96   :  { %1577 = vrot.lane.b32.xlu0 %v9966_v50, %s9518_s24 }
 0xc9a   :  { %1687 = vrot.lane.b32.xlu0 %v9966_v50, %s11345_s23 }
 0xc9e   :  { %1797 = vrot.lane.b32.xlu0 %v9966_v50, %s11343_s7 }
 0xca2   :  { %2033 = vrot.lane.b32.xlu0 %v9979_v51, %s9514_s21 }
 0xca6   :  { %2143 = vrot.lane.b32.xlu0 %v9979_v51, %s11347_s25 }
 0xcaa   :  { %2253 = vrot.lane.b32.xlu0 %v9979_v51, %s11341_s22 }
 0xd00   :  { %v1470_v52 = vpop.permute.xlu0 %1469 }
 0xd01   :  { %v1475_v53 = vsel %vm166_vm2, %v1470_v52, 0 }
 0xd02   :  { %8366 = vmatpush3.bf16.xpose.msra.mxu0 %v1475_v53 }
 0xd03   :  { %8371 = vmatprep.subr.bf16.mxu0 %v9510_v0 }
 0xd04   :  { %v1580_v13 = vpop.permute.xlu0 %1579 }
 0xd05   :  { %v1585_v15 = vsel %vm166_vm2, %v1580_v13, 0 }
 0xd08   :  { %v1578_v20 = vpop.permute.xlu0 %1577 }
 0xd09   :  { %8368 = vmatmul.mubr.msk.bf16.vlgmr.msra.gmra.mxu0 %vm166_vm2, %v9966_v50 }
 0xd0a   :  { %8373 = vmatprep.mubr.msk.bf16.mxu0 %vm9511_vm0, %v9510_v0 }
 0xd0c   :  { %v1688_v17 = vpop.permute.xlu0 %1687 }
 0xd10   :  { %v1798_v21 = vpop.permute.xlu0 %1797 }
 0xd14   :  { %v2034_v23 = vpop.permute.xlu0 %2033 }
 0xd15   :  { %v2039_v24 = vsel %vm166_vm2, %v2034_v23, 0 }
 0xd18   :  { %v2144_v25 = vpop.permute.xlu0 %2143 }
 0xd19   :  { %v2149_v27 = vsel %vm166_vm2, %v2144_v25, 0 }
 0xd1c   :  { %v2254_v29 = vpop.permute.xlu0 %2253 }
 0xd1d   :  { %v2259_v32 = vsel %vm166_vm2, %v2254_v29, 0 }
 0xdc9   :  { %v1511_v54 = vpop.f32.mrf.mxu0 }
 0xdca   :  { %v1517_v60 = vsel %vm166_vm2, %v1511_v54, -inf }
 0xdcb   :  { %1518 = vmax.xlane.f32.xlu1 %v1517_v60  ;;  %v8369_v56 = vpop.f32.mrf.mxu0 }
 0xdcd   :  { %v1514_v58 = vpop.f32.mrf.mxu0 }
 0xdcf   :  { %v8370_v59 = vpop.f32.mrf.mxu0 }
 0xe54   :  { %v1519_v61 = vpop.xlane.xlu1 %1518 }
 0xe55   :  { %v1520_v62 = vsub.f32 %v1511_v54, %v1519_v61 }
 0xe57   :  { %v1521_v63 = vmul.f32 1.442695, %v1520_v62 }
 0xe59   :  { %9235 = vpow2.f32 %v1521_v63 }
 0xe66   :  { %v9236_v1 = vpop.eup %9235 }
 0xe67   :  { %v1523_v2 = vsel %vm166_vm2, %v9236_v1, 0.0 }
 0xe68   :  { %1524 = vadd.xlane.f32.xlu1 %v1523_v2 }
 0xe79   :  { %1529 = vrot.lane.b32.xlu1 %v9966_v50, %s11339_s1 }
 0xe7d   :  { %1689 = vrot.lane.b32.xlu1 %v9966_v50, %s11347_s25 }
 0xe81   :  { %1799 = vrot.lane.b32.xlu1 %v9966_v50, %s11341_s22  ;;  %s11363_s22 = smov 80  }
 0xe85   :  { %1923 = vrot.lane.b32.xlu1 %v9979_v51, %s9513_s20 }
 0xe89   :  { %2031 = vrot.lane.b32.xlu1 %v9979_v51, %s9518_s24 }
 0xe8d   :  { %2141 = vrot.lane.b32.xlu1 %v9979_v51, %s11345_s23 }
 0xe91   :  { %2251 = vrot.lane.b32.xlu1 %v9979_v51, %s11343_s7 }
 0xef1   :  { %v1525_v3 = vpop.xlane.xlu1 %1524 }
 0xef2   :  { %9237 = vrcp.f32 %v1525_v3 }
 0xef5   :  { %v1530_v4 = vpop.permute.xlu1 %1529 }
 0xef6   :  { %v1535_v5 = vsel %vm230_vm3, %v1530_v4, 0 }
 0xef7   :  { %8372 = vmatpush3.bf16.msra.mxu0 %v1535_v5 }
 0xef8   :  { %8377 = vmatprep.subr.bf16.mxu0 %v9510_v0 }
 0xef9   :  { %v1690_v6 = vpop.permute.xlu1 %1689 }
 0xefa   :  { %v1695_v16 = vsel %vm166_vm2, %v1690_v6, 0 }
 0xefd   :  { %v1800_v7 = vpop.permute.xlu1 %1799 }
 0xefe   :  { %v1805_v18 = vsel %vm166_vm2, %v1800_v7, 0 }
 0xeff   :  { %v9238_v8 = vpop.eup %9237 }
 0xf00   :  { %v1527_v9 = vmul.f32 %v9238_v8, %v9236_v1 }
 0xf01   :  { %v1924_v19 = vpop.permute.xlu1 %1923 }
 0xf02   :  { %v1528_v14 = vpack.c.bf16 %v1527_v9, %v1527_v9  ;;  %v1929_v22 = vsel %vm166_vm2, %v1924_v19, 0 }
 0xf04   :  { %8374 = vmatmul.mubr.msk.bf16.vlgmr.msra.gmra.mxu0 %vm166_vm2, %v1528_v14 }
 0xf05   :  { %8378 = vmatpush3.bf16.xpose.msra.mxu0 %v1585_v15  ;;  %8379 = vmatprep.mubr.msk.bf16.mxu0 %vm9511_vm0, %v9510_v0  ;;  %v2032_v26 = vpop.permute.xlu1 %2031 }
 0xf06   :  { %8389 = vmatprep.subr.bf16.mxu0 %v9510_v0 }
 0xf09   :  { %v2142_v30 = vpop.permute.xlu1 %2141 }
 0xf0c   :  { %8380 = vmatmul.mubr.msk.bf16.vlgmr.msra.gmra.mxu0 %vm166_vm2, %v1578_v20 }
 0xf0d   :  { %8390 = vmatpush3.bf16.xpose.msra.mxu0 %v1695_v16  ;;  %8391 = vmatprep.mubr.msk.bf16.mxu0 %vm9511_vm0, %v9510_v0  ;;  %v2252_v35 = vpop.permute.xlu1 %2251 }
 0xf0e   :  { %8401 = vmatprep.subr.bf16.mxu0 %v9510_v0 }
 0xf14   :  { %8392 = vmatmul.mubr.msk.bf16.vlgmr.msra.gmra.mxu0 %vm166_vm2, %v1688_v17 }
 0xf15   :  { %8402 = vmatpush3.bf16.xpose.msra.mxu0 %v1805_v18  ;;  %8403 = vmatprep.mubr.msk.bf16.mxu0 %vm9511_vm0, %v9510_v0 }
 0xf16   :  { %8413 = vmatprep.subr.bf16.mxu0 %v9510_v0 }
 0xf1c   :  { %8404 = vmatmul.mubr.msk.bf16.vlgmr.msra.gmra.mxu0 %vm166_vm2, %v1798_v21 }
 0xf1d   :  { %8414 = vmatpush3.bf16.xpose.msra.mxu0 %v1929_v22  ;;  %8415 = vmatprep.mubr.msk.bf16.mxu0 %vm9511_vm0, %v9510_v0 }
 0xf1e   :  { %8425 = vmatprep.subr.bf16.mxu0 %v9510_v0 }
 0xf24   :  { %8416 = vmatmul.mubr.msk.bf16.vlgmr.msra.gmra.mxu0 %vm166_vm2, %v9979_v51 }
 0xf25   :  { %8426 = vmatpush3.bf16.xpose.msra.mxu0 %v2039_v24  ;;  %8427 = vmatprep.mubr.msk.bf16.mxu0 %vm9511_vm0, %v9510_v0 }
 0xf26   :  { %8437 = vmatprep.subr.bf16.mxu0 %v9510_v0 }
 0xf2c   :  { %8428 = vmatmul.mubr.msk.bf16.vlgmr.msra.gmra.mxu0 %vm166_vm2, %v2032_v26 }
 0xf2d   :  { %8438 = vmatpush3.bf16.xpose.msra.mxu0 %v2149_v27  ;;  %8439 = vmatprep.mubr.msk.bf16.mxu0 %vm9511_vm0, %v9510_v0 }
 0xf2e   :  { %8449 = vmatprep.subr.bf16.mxu0 %v9510_v0 }
 0xf34   :  { %8440 = vmatmul.mubr.msk.bf16.vlgmr.msra.gmra.mxu0 %vm166_vm2, %v2142_v30 }
 0xf35   :  { %8450 = vmatpush3.bf16.xpose.msra.mxu0 %v2259_v32  ;;  %8451 = vmatprep.mubr.msk.bf16.mxu0 %vm9511_vm0, %v9510_v0 }
 0xf36   :  { %8461 = vmatprep.subr.bf16.mxu0 %v9510_v0 }
 0xf3c   :  { %8452 = vmatmul.mubr.msk.bf16.vlgmr.msra.gmra.mxu0 %vm166_vm2, %v2252_v35 }
 0xf3d   :  { %8465 = vmatprep.mubr.msk.bf16.mxu0 %vm9511_vm0, %v9510_v0 }
 0xfc4   :  { %v10050_v36 = vpop.f32.mrf.mxu0 }
 0xfc6   :  { %v8375_v37 = vpop.f32.mrf.mxu0 }
 0xfc8   :  { %v1574_v38 = vpop.f32.mrf.mxu0 }
 0xfca   :  { %v8376_v39 = vpop.f32.mrf.mxu0 }
 0xfcc   :  { %v1621_v42 = vpop.f32.mrf.mxu0 }
 0xfcd   :  { %v1627_v43 = vsel %vm166_vm2, %v1621_v42, -inf }
 0xfce   :  { %1628 = vmax.xlane.f32.xlu0 %v1627_v43  ;;  %v8381_v44 = vpop.f32.mrf.mxu0 }
 0xfd0   :  { %v1624_v12 = vpop.f32.mrf.mxu0 }
 0xfd2   :  { %v8382_v45 = vpop.f32.mrf.mxu0 }
 0xfd4   :  { %v1731_v47 = vpop.f32.mrf.mxu0 }
 0xfd5   :  { %v1737_v48 = vsel %vm166_vm2, %v1731_v47, -inf }
 0xfd6   :  { %1738 = vmax.xlane.f32.xlu1 %v1737_v48  ;;  %v8393_v49 = vpop.f32.mrf.mxu0 }
 0xfd8   :  { %v1734_v52 = vpop.f32.mrf.mxu0 }
 0xfda   :  { %v8394_v53 = vpop.f32.mrf.mxu0 }
 0xfdc   :  { %v1841_v54 = vpop.f32.mrf.mxu0 }
 0xfdd   :  { %v1847_v60 = vsel %vm166_vm2, %v1841_v54, -inf }
 0xfde   :  { %1848 = vmax.xlane.f32.xlu0 %v1847_v60  ;;  %v8405_v56 = vpop.f32.mrf.mxu0 }
 0xfe0   :  { %v1844_v58 = vpop.f32.mrf.mxu0 }
 0xfe2   :  { %v8406_v59 = vpop.f32.mrf.mxu0 }
 0xfe4   :  { %v1965_v61 = vpop.f32.mrf.mxu0 }
 0xfe5   :  { %v1971_v62 = vsel %vm166_vm2, %v1965_v61, -inf }
 0xfe6   :  { %1972 = vmax.xlane.f32.xlu0 %v1971_v62  ;;  %v8417_v63 = vpop.f32.mrf.mxu0 }
 0xfe8   :  { %v1968_v1 = vpop.f32.mrf.mxu0 }
 0xfea   :  { %v8418_v2 = vpop.f32.mrf.mxu0 }
 0xfec   :  { %v2075_v3 = vpop.f32.mrf.mxu0 }
 0xfed   :  { %v2081_v4 = vsel %vm166_vm2, %v2075_v3, -inf }
 0xfee   :  { %2082 = vmax.xlane.f32.xlu1 %v2081_v4  ;;  %v8429_v5 = vpop.f32.mrf.mxu0 }
 0xff0   :  { %v2078_v8 = vpop.f32.mrf.mxu0 }
 0xff2   :  { %v8430_v9 = vpop.f32.mrf.mxu0 }
 0xff4   :  { %v2185_v13 = vpop.f32.mrf.mxu0 }
 0xff5   :  { %v2191_v14 = vsel %vm166_vm2, %v2185_v13, -inf }
 0xff6   :  { %2192 = vmax.xlane.f32.xlu0 %v2191_v14  ;;  %v8441_v15 = vpop.f32.mrf.mxu0 }
 0xff8   :  { %v2188_v6 = vpop.f32.mrf.mxu0 }
 0xffa   :  { %v8442_v20 = vpop.f32.mrf.mxu0 }
 0xffc   :  { %v2295_v16 = vpop.f32.mrf.mxu0 }
 0xffd   :  { %v2301_v19 = vsel %vm166_vm2, %v2295_v16, -inf }
 0xffe   :  { %v8453_v7 = vpop.f32.mrf.mxu0 }
 0xfff   :  { %1749 = vrot.lane.b32.xlu1 %v9966_v50, %s11353_s3 }
0x1000   :  { %v2298_v17 = vpop.f32.mrf.mxu0 }
0x1002   :  { %v8454_v18 = vpop.f32.mrf.mxu0 }
0x100c   :  { %1639 = vrot.lane.b32.xlu0 %v9966_v50, %s11354_s27 }
0x1023   :  { %2302 = vmax.xlane.f32.xlu1 %v2301_v19 }
0x1057   :  { %v1629_v21 = vpop.xlane.xlu0 %1628 }
0x1058   :  { %v1630_v22 = vsub.f32 %v1621_v42, %v1629_v21 }
0x105a   :  { %v1631_v23 = vmul.f32 1.442695, %v1630_v22 }
0x105c   :  { %9239 = vpow2.f32 %v1631_v23 }
0x105f   :  { %v1739_v24 = vpop.xlane.xlu1 %1738 }
0x1060   :  { %v1740_v25 = vsub.f32 %v1731_v47, %v1739_v24 }
0x1062   :  { %v1741_v26 = vmul.f32 1.442695, %v1740_v25 }
0x1064   :  { %9241 = vpow2.f32 %v1741_v26 }
0x1067   :  { %v1849_v27 = vpop.xlane.xlu0 %1848 }
0x1068   :  { %v1850_v29 = vsub.f32 %v1841_v54, %v1849_v27 }
0x1069   :  { %v9240_v30 = vpop.eup %9239 }
0x106a   :  { %v1851_v32 = vmul.f32 1.442695, %v1850_v29  ;;  %v1633_v35 = vsel %vm166_vm2, %v9240_v30, 0.0 }
0x106b   :  { %1634 = vadd.xlane.f32.xlu0 %v1633_v35 }
0x106c   :  { %9243 = vpow2.f32 %v1851_v32 }
0x106f   :  { %v1973_v43 = vpop.xlane.xlu0 %1972 }
0x1070   :  { %v1974_v47 = vsub.f32 %v1965_v61, %v1973_v43 }
0x1071   :  { %v9242_v37 = vpop.eup %9241 }
0x1072   :  { %v1743_v38 = vsel %vm166_vm2, %v9242_v37, 0.0  ;;  %v1975_v49 = vmul.f32 1.442695, %v1974_v47 }
0x1073   :  { %1744 = vadd.xlane.f32.xlu1 %v1743_v38 }
0x1074   :  { %9245 = vpow2.f32 %v1975_v49 }
0x1077   :  { %v2083_v48 = vpop.xlane.xlu1 %2082 }
0x1078   :  { %v2084_v52 = vsub.f32 %v2075_v3, %v2083_v48 }
0x1079   :  { %v10065_v39 = vpop.eup %9243 }
0x107a   :  { %v1853_v42 = vsel %vm166_vm2, %v10065_v39, 0.0  ;;  %v2085_v53 = vmul.f32 1.442695, %v2084_v52 }
0x107b   :  { %1854 = vadd.xlane.f32.xlu0 %v1853_v42  ;;  %v1750_v59 = vpop.permute.xlu1 %1749 }
0x107c   :  { %9247 = vpow2.f32 %v2085_v53  ;;  %v1755_v20 = vsel %vm230_vm3, %v1750_v59, 0 }
0x107f   :  { %v2193_v44 = vpop.xlane.xlu0 %2192 }
0x1080   :  { %v2194_v54 = vsub.f32 %v2185_v13, %v2193_v44 }
0x1081   :  { %v9246_v56 = vpop.eup %9245 }
0x1082   :  { %v2195_v60 = vmul.f32 1.442695, %v2194_v54  ;;  %v1977_v58 = vsel %vm166_vm2, %v9246_v56, 0.0 }
0x1083   :  { %v1640_v12 = vpop.permute.xlu0 %1639 }
0x1084   :  { %v1645_v45 = vsel %vm230_vm3, %v1640_v12, 0  ;;  %1859 = vrot.lane.b32.xlu1 %v9966_v50, %s11355_s30  ;;  %9249 = vpow2.f32 %v2195_v60 }
0x1085   :  { %8384 = vmatpush3.bf16.msra.mxu1 %v1645_v45 }
0x1086   :  { %8395 = vmatprep.subr.bf16.mxu1 %v9510_v0 }
0x1089   :  { %v10076_v50 = vpop.eup %9247 }
0x108a   :  { %v2087_v61 = vsel %vm166_vm2, %v10076_v50, 0.0 }
0x1091   :  { %1983 = vrot.lane.b32.xlu0 %v9979_v51, %s11339_s1  ;;  %v10080_v62 = vpop.eup %9249 }
0x1092   :  { %v2197_v3 = vsel %vm166_vm2, %v10080_v62, 0.0 }
0x10a8   :  { %1978 = vadd.xlane.f32.xlu1 %v1977_v58 }
0x10ac   :  { %2088 = vadd.xlane.f32.xlu1 %v2087_v61  ;;  %v2303_v63 = vpop.xlane.xlu1 %2302 }
0x10ad   :  { %v2304_v1 = vsub.f32 %v2295_v16, %v2303_v63 }
0x10af   :  { %v2305_v2 = vmul.f32 1.442695, %v2304_v1 }
0x10b0   :  { %2198 = vadd.xlane.f32.xlu0 %v2197_v3 }
0x10b1   :  { %9251 = vpow2.f32 %v2305_v2 }
0x10be   :  { %v10084_v4 = vpop.eup %9251 }
0x10bf   :  { %v2307_v5 = vsel %vm166_vm2, %v10084_v4, 0.0 }
0x10c0   :  { %2308 = vadd.xlane.f32.xlu1 %v2307_v5 }
0x10c6   :  { %2203 = vrot.lane.b32.xlu0 %v9979_v51, %s11353_s3 }
0x10ca   :  { %2313 = vrot.lane.b32.xlu0 %v9979_v51, %s11355_s30 }
0x10d1   :  { %2093 = vrot.lane.b32.xlu1 %v9979_v51, %s11354_s27 }
0x10f4   :  { %v1635_v8 = vpop.xlane.xlu0 %1634 }
0x10f5   :  { %9253 = vrcp.f32 %v1635_v8 }
0x10fc   :  { %v1745_v9 = vpop.xlane.xlu1 %1744 }
0x10fd   :  { %9255 = vrcp.f32 %v1745_v9 }
0x1100   :  { %v1860_v7 = vpop.permute.xlu1 %1859 }
0x1101   :  { %v1865_v18 = vsel %vm230_vm3, %v1860_v7, 0 }
0x1102   :  { %v9254_v13 = vpop.eup %9253 }
0x1103   :  { %v1637_v14 = vmul.f32 %v9254_v13, %v9240_v30 }
0x1104   :  { %v1855_v15 = vpop.xlane.xlu0 %1854 }
0x1105   :  { %9257 = vrcp.f32 %v1855_v15  ;;  %v1638_v6 = vpack.c.bf16 %v1637_v14, %v1637_v14 }
0x1107   :  { %8386 = vmatmul.mubr.msk.bf16.vlgmr.msra.gmra.mxu1 %vm166_vm2, %v1638_v6  ;;  %v9143_v6 = vld [vmem:[%s11311_s4 + $0x18] sm:$0xff]  }
0x1108   :  { %8396 = vmatpush3.bf16.msra.mxu1 %v1755_v20  ;;  %8397 = vmatprep.mubr.msk.bf16.mxu1 %vm9511_vm0, %v9510_v0  ;;  %v1984_v22 = vpop.permute.xlu0 %1983 }
0x1109   :  { %8407 = vmatprep.subr.bf16.mxu1 %v9510_v0  ;;  %v1989_v24 = vsel %vm230_vm3, %v1984_v22, 0  ;;  %8462 = vmatpush3.bf16.msra.mxu0 %v9143_v6  ;;  %v9146_v6 = vld [vmem:[%s11312_s5 + $0x10] sm:$0xff]  }
0x110a   :  { %v9256_v51 = vpop.eup %9255  ;;  %8463 = vmatprep.subr.bf16.mxu0 %v9510_v0 }
0x110b   :  { %v1747_v16 = vmul.f32 %v9256_v51, %v9242_v37 }
0x110d   :  { %v1748_v17 = vpack.c.bf16 %v1747_v16, %v1747_v16 }
0x110f   :  { %8398 = vmatmul.mubr.msk.bf16.vlgmr.msra.gmra.mxu1 %vm166_vm2, %v1748_v17  ;;  %v9144_v17 = vld [vmem:[%s11311_s4 + $0x10] sm:$0xff]  }
0x1110   :  { %8408 = vmatpush3.bf16.msra.mxu1 %v1865_v18  ;;  %8409 = vmatprep.mubr.msk.bf16.mxu1 %vm9511_vm0, %v9510_v0 }
0x1111   :  { %8419 = vmatprep.subr.bf16.mxu1 %v9510_v0  ;;  %8464 = vmatpush3.bf16.msra.mxu0 %v9144_v17  ;;  %v9153_v17 = vld [vmem:[%s11313_s6 + $0x58] sm:$0xff]  }
0x1112   :  { %v9258_v19 = vpop.eup %9257  ;;  %8477 = vmatprep.subr.bf16.mxu0 %v9510_v0 }
0x1113   :  { %v1857_v21 = vmul.f32 %v9258_v19, %v10065_v39 }
0x1115   :  { %v1858_v23 = vpack.c.bf16 %v1857_v21, %v1857_v21 }
0x1117   :  { %8410 = vmatmul.mubr.msk.bf16.vlgmr.msra.gmra.mxu1 %vm166_vm2, %v1858_v23 }
0x1118   :  { %8420 = vmatpush3.bf16.msra.mxu1 %v1989_v24  ;;  %8421 = vmatprep.mubr.msk.bf16.mxu1 %vm9511_vm0, %v9510_v0 }
0x1119   :  { %8431 = vmatprep.subr.bf16.mxu1 %v9510_v0 }
0x1131   :  { %v1979_v25 = vpop.xlane.xlu1 %1978 }
0x1132   :  { %9259 = vrcp.f32 %v1979_v25 }
0x1135   :  { %v2089_v26 = vpop.xlane.xlu1 %2088 }
0x1136   :  { %9261 = vrcp.f32 %v2089_v26 }
0x1139   :  { %v2199_v30 = vpop.xlane.xlu0 %2198 }
0x113a   :  { %9263 = vrcp.f32 %v2199_v30 }
0x113d   :  { %v2204_v43 = vpop.permute.xlu0 %2203 }
0x113e   :  { %v2209_v45 = vsel %vm230_vm3, %v2204_v43, 0 }
0x113f   :  { %v9260_v27 = vpop.eup %9259 }
0x1140   :  { %v1981_v29 = vmul.f32 %v9260_v27, %v9246_v56 }
0x1141   :  { %v2314_v48 = vpop.permute.xlu0 %2313 }
0x1142   :  { %v1982_v32 = vpack.c.bf16 %v1981_v29, %v1981_v29  ;;  %v2319_v53 = vsel %vm230_vm3, %v2314_v48, 0 }
0x1143   :  { %v9262_v35 = vpop.eup %9261 }
0x1144   :  { %8422 = vmatmul.mubr.msk.bf16.vlgmr.msra.gmra.mxu1 %vm166_vm2, %v1982_v32  ;;  %v2091_v38 = vmul.f32 %v9262_v35, %v10076_v50 }
0x1145   :  { %8433 = vmatprep.mubr.msk.bf16.mxu1 %vm9511_vm0, %v9510_v0 }
0x1146   :  { %v2092_v44 = vpack.c.bf16 %v2091_v38, %v2091_v38 }
0x1147   :  { %v9264_v12 = vpop.eup %9263 }
0x1148   :  { %v2201_v47 = vmul.f32 %v9264_v12, %v10080_v62 }
0x1149   :  { %v2309_v37 = vpop.xlane.xlu1 %2308 }
0x114a   :  { %9265 = vrcp.f32 %v2309_v37  ;;  %v2202_v49 = vpack.c.bf16 %v2201_v47, %v2201_v47 }
0x114d   :  { %v2094_v39 = vpop.permute.xlu1 %2093 }
0x114e   :  { %v2099_v42 = vsel %vm230_vm3, %v2094_v39, 0 }
0x114f   :  { %8432 = vmatpush3.bf16.msra.mxu1 %v2099_v42 }
0x1150   :  { %8443 = vmatprep.subr.bf16.mxu1 %v9510_v0 }
0x1152   :  { %8434 = vmatmul.mubr.msk.bf16.vlgmr.msra.gmra.mxu1 %vm166_vm2, %v2092_v44 }
0x1153   :  { %8444 = vmatpush3.bf16.msra.mxu1 %v2209_v45  ;;  %8445 = vmatprep.mubr.msk.bf16.mxu1 %vm9511_vm0, %v9510_v0 }
0x1154   :  { %8455 = vmatprep.subr.bf16.mxu1 %v9510_v0 }
0x1157   :  { %v9266_v52 = vpop.eup %9265 }
0x1158   :  { %v2311_v54 = vmul.f32 %v9266_v52, %v10084_v4 }
0x115a   :  { %8446 = vmatmul.mubr.msk.bf16.vlgmr.msra.gmra.mxu1 %vm166_vm2, %v2202_v49  ;;  %v2312_v60 = vpack.c.bf16 %v2311_v54, %v2311_v54  ;;  %v2380_v54 = vrot.slane %v9962_v10, %v9856_v55 }
0x115b   :  { %8456 = vmatpush3.bf16.msra.mxu1 %v2319_v53  ;;  %8457 = vmatprep.mubr.msk.bf16.mxu1 %vm9511_vm0, %v9510_v0 }
0x115c   :  { %8469 = vmatprep.subr.bf16.mxu1 %v9510_v0 }
0x1162   :  { %8458 = vmatmul.mubr.msk.bf16.vlgmr.msra.gmra.mxu1 %vm166_vm2, %v2312_v60 }
0x1163   :  { %8473 = vmatprep.mubr.msk.bf16.mxu1 %vm9511_vm0, %v9510_v0 }
0x11c7   :  { %v1681_v56 = vpop.f32.mrf.mxu1 }
0x11c9   :  { %v8387_v58 = vpop.f32.mrf.mxu1 }
0x11cb   :  { %v1684_v50 = vpop.f32.mrf.mxu1 }
0x11cd   :  { %v8388_v59 = vpop.f32.mrf.mxu1 }
0x11cf   :  { %v1791_v61 = vpop.f32.mrf.mxu1 }
0x11d1   :  { %v8399_v62 = vpop.f32.mrf.mxu1 }
0x11d3   :  { %v1794_v63 = vpop.f32.mrf.mxu1 }
0x11d5   :  { %v8400_v1 = vpop.f32.mrf.mxu1 }
0x11d7   :  { %v1901_v2 = vpop.f32.mrf.mxu1 }
0x11d9   :  { %v8411_v3 = vpop.f32.mrf.mxu1 }
0x11db   :  { %v1904_v5 = vpop.f32.mrf.mxu1 }
0x11dd   :  { %v8412_v4 = vpop.f32.mrf.mxu1 }
0x1204   :  { %v2025_v8 = vpop.f32.mrf.mxu1 }
0x1206   :  { %v8423_v9 = vpop.f32.mrf.mxu1 }
0x1208   :  { %v2028_v13 = vpop.f32.mrf.mxu1 }
0x120a   :  { %v8424_v14 = vpop.f32.mrf.mxu1 }
0x1212   :  { %v2135_v15 = vpop.f32.mrf.mxu1 }
0x1213   :  { %v9052_v20 = vpack.i.bf16 %v2135_v15, %v1681_v56 }
0x1214   :  { %v8435_v51 = vpop.f32.mrf.mxu1 }
0x1215   :  { %9053 = vrot.lane.b32.xlu1 %v9052_v20, %s11356_s28  ;;  %v9149_v20 = vld [vmem:[%s11313_s6 + $0x78] sm:$0xff]   ;;  %v9150_v51 = vld [vmem:[%s11313_s6 + $0x70] sm:$0xff]  }
0x1216   :  { %v2138_v16 = vpop.f32.mrf.mxu1 }
0x1217   :  { %v9151_v16 = vld [vmem:[%s11313_s6 + $0x68] sm:$0xff]  }
0x1218   :  { %v8436_v7 = vpop.f32.mrf.mxu1 }
0x1219   :  { %v9152_v7 = vld [vmem:[%s11313_s6 + $0x60] sm:$0xff]  }
0x121a   :  { %v2245_v18 = vpop.f32.mrf.mxu1 }
0x121b   :  { %v9057_v19 = vpack.i.bf16 %v2245_v18, %v1791_v61 }
0x121c   :  { %v8447_v21 = vpop.f32.mrf.mxu1 }
0x121d   :  { %9058 = vrot.lane.b32.xlu0 %v9057_v19, %s11357_s0 }
0x121e   :  { %v2248_v22 = vpop.f32.mrf.mxu1 }
0x1220   :  { %v8448_v23 = vpop.f32.mrf.mxu1 }
0x1222   :  { %v2355_v24 = vpop.f32.mrf.mxu1 }
0x1223   :  { %v9062_v25 = vpack.i.bf16 %v2355_v24, %v1901_v2 }
0x1224   :  { %v8459_v26 = vpop.f32.mrf.mxu1 }
0x1225   :  { %9063 = vrot.lane.b32.xlu1 %v9062_v25, %s11358_s18 }
0x1226   :  { %v2358_v27 = vpop.f32.mrf.mxu1 }
0x1227   :  { %v2468_v27 = vrot.slane %v9962_v10, %v9895_v31 }
0x1228   :  { %v8460_v29 = vpop.f32.mrf.mxu1 }
0x1287   :  { %v9054_v30 = vpop.permute.xlu1 %9053 }
0x1288   :  { %v9056_v35 = vunpack.i.h.bf16 %v9054_v30  ;;  %v9055_v37 = vunpack.i.l.bf16 %v9054_v30 }
0x128a   :  { %v2373_v43 = vsel %vm166_vm2, %v2025_v8, %v9056_v35  ;;  %v1919_v44 = vsel %vm166_vm2, %v10050_v36, %v9055_v37  ;;  %v2474_v35 = vrot.slane %v9962_v10, %v9900_v34 }
0x128f   :  { %v9059_v32 = vpop.permute.xlu0 %9058 }
0x1290   :  { %v9061_v38 = vunpack.i.h.bf16 %v9059_v32  ;;  %v9060_v39 = vunpack.i.l.bf16 %v9059_v32 }
0x1292   :  { %v2374_v47 = vsel %vm617_vm4, %v2373_v43, %v9061_v38  ;;  %v1920_v48 = vsel %vm617_vm4, %v1919_v44, %v9060_v39  ;;  %v2736_v43 = vld [vmem:[#allocation2] sm:$0xff]  ;;  %v2737_v44 = vld [vmem:[#allocation2 + $0x8] sm:$0xff] }
0x1297   :  { %v9064_v42 = vpop.permute.xlu1 %9063 }
0x1298   :  { %v9066_v12 = vunpack.i.h.bf16 %v9064_v42  ;;  %v9065_v45 = vunpack.i.l.bf16 %v9064_v42  ;;  %v9147_v42 = vld [vmem:[%s11315_s8 + $0x8] sm:$0xff]  }
0x129a   :  { %v2375_v49 = vsel %vm619_vm5, %v2374_v47, %v9066_v12  ;;  %v1921_v52 = vsel %vm619_vm5, %v1920_v48, %v9065_v45  ;;  %v9435_v45 = vld [vmem:[%s11309_s2] sm:$0xff]  ;;  %s11362_s2 = smov 64  }
0x129b   :  { %v2376_v53 = vpack.c.bf16 %v2375_v49, %v1921_v52  ;;  %v10205_v47 = vadd.f32 %v9435_v45, %v2736_v43  ;;  %v10207_v48 = vadd.f32 %v9435_v45, %v2737_v44  ;;  %v9148_v49 = vld [vmem:[%s11315_s8] sm:$0xff]  }
0x129d   :  { %8466 = vmatmul.mubr.msk.bf16.vlgmr.msra.gmra.mxu0 %vm117_vm1, %v2376_v53  ;;  %v2750_v52 = vpack.c.bf16 %v10207_v48, %v10205_v47  ;;  %v9154_v53 = vld [vmem:[%s11313_s6 + $0x50] sm:$0xff]  }
0x129e   :  { %8493 = vmatprep.mubr.msk.bf16.mxu0 %vm9511_vm0, %v9510_v0  ;;  %8478 = vmatpush3.bf16.msra.mxu0 %v9149_v20 }
0x129f   :  { %8479 = vmatprep.subr.bf16.mxu0 %v9510_v0 }
0x12a2   :  { %8480 = vmatpush3.bf16.msra.mxu0 %v9150_v51 }
0x12a3   :  { %8481 = vmatprep.subr.bf16.mxu0 %v9510_v0 }
0x12a6   :  { %8482 = vmatpush3.bf16.msra.mxu0 %v9151_v16 }
0x12a7   :  { %8483 = vmatprep.subr.bf16.mxu0 %v9510_v0 }
0x12aa   :  { %8484 = vmatpush3.bf16.msra.mxu0 %v9152_v7 }
0x12ab   :  { %8485 = vmatprep.subr.bf16.mxu0 %v9510_v0 }
0x12ae   :  { %8486 = vmatpush3.bf16.msra.mxu0 %v9153_v17 }
0x12af   :  { %8487 = vmatprep.subr.bf16.mxu0 %v9510_v0 }
0x12b2   :  { %8488 = vmatpush3.bf16.msra.mxu0 %v9154_v53 }
0x12b3   :  { %8489 = vmatprep.subr.bf16.mxu0 %v9510_v0 }
0x135d   :  { %v2430_v36 = vpop.f32.mrf.mxu0 }
0x135e   :  { %v2431_v60 = vadd.f32 %v2430_v36, %v2380_v54  ;;  %v9156_v36 = vld [vmem:[%s11313_s6 + $0x40] sm:$0xff]  }
0x135f   :  { %v8467_v56 = vpop.f32.mrf.mxu0 }
0x1360   :  { %v2437_v58 = vadd.f32 %v2431_v60, %v9953_v40  ;;  %v2503_v60 = vrot.slane %v9962_v10, %v9920_v46 }
0x1361   :  { %v2433_v50 = vpop.f32.mrf.mxu0 }
0x1362   :  { %v2434_v59 = vadd.f32 %v2433_v50, %v2380_v54  ;;  %v2439_v61 = vsel %vm117_vm1, %v2437_v58, 0.0  ;;  %v9155_v54 = vld [vmem:[%s11313_s6 + $0x48] sm:$0xff]   ;;  %s11359_s6 = smov 112  }
0x1363   :  { %2440 = vadd.xlane.f32.xlu0 %v2439_v61  ;;  %v8468_v62 = vpop.f32.mrf.mxu0  ;;  %8490 = vmatpush3.bf16.msra.mxu0 %v9155_v54 }
0x1364   :  { %v2438_v63 = vadd.f32 %v2434_v59, %v9955_v41  ;;  %v9145_v41 = vld [vmem:[%s11312_s5 + $0x18] sm:$0xff]   ;;  %8491 = vmatprep.subr.bf16.mxu0 %v9510_v0  ;;  %s11361_s5 = smov 72  }
0x1365   :  { %8470 = vmatpush3.bf16.msra.mxu1 %v9145_v41 }
0x1366   :  { %v2442_v1 = vsel %vm117_vm1, %v2438_v63, 0.0  ;;  %8471 = vmatprep.subr.bf16.mxu1 %v9510_v0 }
0x1367   :  { %2443 = vadd.xlane.f32.xlu1 %v2442_v1  ;;  %8492 = vmatpush3.bf16.msra.mxu0 %v9156_v36 }
0x1368   :  { %8523 = vmatprep.subr.bf16.mxu0 %v9510_v0 }
0x1369   :  { %8472 = vmatpush3.bf16.msra.mxu1 %v9146_v6 }
0x136a   :  { %8497 = vmatprep.subr.bf16.mxu1 %v9510_v0 }
0x13ec   :  { %v2441_v2 = vpop.xlane.xlu0 %2440 }
0x13ed   :  { %v2445_v3 = vmul.f32 0.03125, %v2441_v2 }
0x13ef   :  { %v2447_v5 = vsub.f32 %v2437_v58, %v2445_v3 }
0x13f0   :  { %v2444_v4 = vpop.xlane.xlu1 %2443 }
0x13f1   :  { %v2446_v8 = vmul.f32 0.03125, %v2444_v4  ;;  %v2449_v9 = vmul.f32 %v2447_v5, %v2447_v5 }
0x13f3   :  { %v2448_v13 = vsub.f32 %v2438_v63, %v2446_v8  ;;  %v2451_v40 = vsel %vm117_vm1, %v2449_v9, 0.0  ;;  %v10238_v63 = vld [vmem:[%s11322_s15] sm:$0xff] }
0x13f4   :  { %2452 = vadd.xlane.f32.xlu0 %v2451_v40  ;;  %v2754_v4 = vrot.slane %v10238_v63, %v9663_v11 }
0x13f5   :  { %v2450_v14 = vmul.f32 %v2448_v13, %v2448_v13 }
0x13f7   :  { %v2454_v15 = vsel %vm117_vm1, %v2450_v14, 0.0 }
0x13f8   :  { %2455 = vadd.xlane.f32.xlu0 %v2454_v15 }
0x147d   :  { %v2453_v18 = vpop.xlane.xlu0 %2452 }
0x147e   :  { %v2457_v19 = vmul.f32 0.03125, %v2453_v18 }
0x1480   :  { %v2459_v21 = vadd.f32 1e-05, %v2457_v19 }
0x1481   :  { %v2456_v22 = vpop.xlane.xlu0 %2455 }
0x1482   :  { %9267 = vrsqrt.f32 %v2459_v21  ;;  %v2458_v23 = vmul.f32 0.03125, %v2456_v22 }
0x1484   :  { %v2460_v24 = vadd.f32 1e-05, %v2458_v23 }
0x1486   :  { %9269 = vrsqrt.f32 %v2460_v24 }
0x148f   :  { %v9268_v25 = vpop.eup %9267 }
0x1490   :  { %v2463_v26 = vmul.f32 %v9268_v25, %v2447_v5 }
0x1492   :  { %v2469_v32 = vmul.f32 %v2468_v27, %v2463_v26 }
0x1493   :  { %v9270_v29 = vpop.eup %9269 }
0x1494   :  { %v2464_v30 = vmul.f32 %v9270_v29, %v2448_v13  ;;  %v10192_v38 = vadd.f32 %v2474_v35, %v2469_v32 }
0x1496   :  { %v2470_v37 = vmul.f32 %v2468_v27, %v2464_v30 }
0x1498   :  { %v10194_v39 = vadd.f32 %v2474_v35, %v2470_v37 }
0x149a   :  { %v2499_v12 = vpack.c.bf16 %v10194_v39, %v10192_v38 }
0x149c   :  { %8474 = vmatmul.mubr.msk.bf16.vlgmr.msra.gmra.mxu1 %vm117_vm1, %v2499_v12 }
0x149d   :  { %8498 = vmatpush3.bf16.msra.mxu1 %v9147_v42  ;;  %8501 = vmatprep.mubr.msk.bf16.mxu1 %vm9511_vm0, %v9510_v0 }
0x149e   :  { %8499 = vmatprep.subr.bf16.mxu1 %v9510_v0 }
0x14a1   :  { %8500 = vmatpush3.bf16.msra.mxu1 %v9148_v49 }
0x14a2   :  { %8505 = vmatprep.subr.bf16.mxu1 %v9510_v0 }
0x14a4   :  { %8502 = vmatmul.mubr.msk.bf16.vlgmr.msra.gmra.mxu1 %vm117_vm1, %v2750_v52 }
0x14a5   :  { %8507 = vmatprep.mubr.msk.bf16.mxu1 %vm9511_vm0, %v9510_v0 }
0x155c   :  { %v2553_v56 = vpop.f32.mrf.mxu1 }
0x155d   :  { %v2554_v50 = vadd.f32 %v2553_v56, %v2503_v60 }
0x155e   :  { %v8475_v58 = vpop.f32.mrf.mxu1 }
0x155f   :  { %v2560_v1 = vmax.f32 %v2554_v50, 0.0 }
0x1560   :  { %v2556_v59 = vpop.f32.mrf.mxu1 }
0x1561   :  { %v2557_v61 = vadd.f32 %v2556_v59, %v2503_v60 }
0x1562   :  { %v8476_v62 = vpop.f32.mrf.mxu1 }
0x1563   :  { %v2561_v2 = vmax.f32 %v2557_v61, 0.0 }
0x1564   :  { %v2804_v3 = vpop.f32.mrf.mxu1 }
0x1565   :  { %v2562_v5 = vpack.c.bf16 %v2561_v2, %v2560_v1  ;;  %v2805_v9 = vadd.f32 %v2804_v3, %v2754_v4 }
0x1566   :  { %v8503_v8 = vpop.f32.mrf.mxu1 }
0x1567   :  { %8494 = vmatmul.mubr.bf16.vlgmr.msra.gmra.mxu0 %v2562_v5 }
0x1568   :  { %v2807_v10 = vpop.f32.mrf.mxu1  ;;  %8525 = vmatprep.mubr.msk.bf16.mxu0 %vm9511_vm0, %v9510_v0 }
0x1569   :  { %v2808_v13 = vadd.f32 %v2807_v10, %v2754_v4 }
0x156a   :  { %v8504_v40 = vpop.f32.mrf.mxu1 }
0x156b   :  { %v10244_v14 = vpack.c.bf16 %v2808_v13, %v2805_v9 }
0x156d   :  { %2813 = vrot.lane.b32.xlu1 %v10244_v14, %s9513_s20  ;;  %v10259_v15 = vrot.slane %v10244_v14, 4 }
0x1571   :  { %2923 = vrot.lane.b32.xlu1 %v10244_v14, %s9514_s21 }
0x1575   :  { %2921 = vrot.lane.b32.xlu1 %v10244_v14, %s9518_s24 }
0x1579   :  { %3033 = vrot.lane.b32.xlu1 %v10244_v14, %s11347_s25 }
0x157d   :  { %3031 = vrot.lane.b32.xlu1 %v10244_v14, %s11359_s6 }
0x1581   :  { %3141 = vrot.lane.b32.xlu1 %v10244_v14, %s11360_s19 }
0x1585   :  { %3377 = vrot.lane.b32.xlu1 %v10259_v15, %s9514_s21 }
0x1589   :  { %3487 = vrot.lane.b32.xlu1 %v10259_v15, %s11347_s25 }
0x158d   :  { %3597 = vrot.lane.b32.xlu1 %v10259_v15, %s11361_s5 }
0x15df   :  { %v2814_v41 = vpop.permute.xlu1 %2813 }
0x15e0   :  { %v2819_v6 = vsel %vm166_vm2, %v2814_v41, 0 }
0x15e1   :  { %8506 = vmatpush3.bf16.xpose.msra.mxu1 %v2819_v6 }
0x15e2   :  { %8511 = vmatprep.subr.bf16.mxu1 %v9510_v0 }
0x15e3   :  { %v2924_v35 = vpop.permute.xlu1 %2923 }
0x15e4   :  { %v2929_v12 = vsel %vm166_vm2, %v2924_v35, 0 }
0x15e7   :  { %v2922_v44 = vpop.permute.xlu1 %2921 }
0x15e8   :  { %8508 = vmatmul.mubr.msk.bf16.vlgmr.msra.gmra.mxu1 %vm166_vm2, %v10244_v14 }
0x15e9   :  { %8513 = vmatprep.mubr.msk.bf16.mxu1 %vm9511_vm0, %v9510_v0 }
0x15eb   :  { %v3034_v45 = vpop.permute.xlu1 %3033 }
0x15ec   :  { %v3039_v49 = vsel %vm166_vm2, %v3034_v45, 0 }
0x15ef   :  { %v3032_v53 = vpop.permute.xlu1 %3031 }
0x15f3   :  { %v3142_v60 = vpop.permute.xlu1 %3141 }
0x15f7   :  { %v3378_v58 = vpop.permute.xlu1 %3377 }
0x15f8   :  { %v3383_v50 = vsel %vm166_vm2, %v3378_v58, 0 }
0x15fb   :  { %v3488_v59 = vpop.permute.xlu1 %3487 }
0x15fc   :  { %v3493_v62 = vsel %vm166_vm2, %v3488_v59, 0 }
0x15ff   :  { %v3598_v1 = vpop.permute.xlu1 %3597 }
0x1600   :  { %v3603_v3 = vsel %vm166_vm2, %v3598_v1, 0 }
0x1627   :  { %v10273_v20 = vpop.f32.mrf.mxu0 }
0x1629   :  { %v8495_v51 = vpop.f32.mrf.mxu0 }
0x162b   :  { %v10275_v16 = vpop.f32.mrf.mxu0 }
0x162d   :  { %v8496_v7 = vpop.f32.mrf.mxu0 }
0x16a8   :  { %v2855_v17 = vpop.f32.mrf.mxu1 }
0x16a9   :  { %v2861_v18 = vsel %vm166_vm2, %v2855_v17, -inf }
0x16aa   :  { %2862 = vmax.xlane.f32.xlu0 %v2861_v18  ;;  %v8509_v19 = vpop.f32.mrf.mxu1 }
0x16ac   :  { %v2858_v21 = vpop.f32.mrf.mxu1 }
0x16ae   :  { %v8510_v22 = vpop.f32.mrf.mxu1 }
0x1733   :  { %v2863_v23 = vpop.xlane.xlu0 %2862 }
0x1734   :  { %v2864_v24 = vsub.f32 %v2855_v17, %v2863_v23 }
0x1736   :  { %v2865_v25 = vmul.f32 1.442695, %v2864_v24 }
0x1738   :  { %9271 = vpow2.f32 %v2865_v25 }
0x1745   :  { %v9272_v26 = vpop.eup %9271 }
0x1746   :  { %v2867_v27 = vsel %vm166_vm2, %v9272_v26, 0.0 }
0x1747   :  { %2868 = vadd.xlane.f32.xlu0 %v2867_v27 }
0x175d   :  { %2873 = vrot.lane.b32.xlu0 %v10244_v14, %s11362_s2 }
0x1761   :  { %3143 = vrot.lane.b32.xlu0 %v10244_v14, %s11361_s5 }
0x1765   :  { %3267 = vrot.lane.b32.xlu0 %v10259_v15, %s9513_s20 }
0x1769   :  { %3375 = vrot.lane.b32.xlu0 %v10259_v15, %s9518_s24 }
0x176d   :  { %3485 = vrot.lane.b32.xlu0 %v10259_v15, %s11359_s6 }
0x1771   :  { %3595 = vrot.lane.b32.xlu0 %v10259_v15, %s11360_s19 }
0x17d0   :  { %v2869_v29 = vpop.xlane.xlu0 %2868 }
0x17d1   :  { %9273 = vrcp.f32 %v2869_v29 }
0x17d4   :  { %v2874_v30 = vpop.permute.xlu0 %2873 }
0x17d5   :  { %v2879_v32 = vsel %vm230_vm3, %v2874_v30, 0 }
0x17d6   :  { %8512 = vmatpush3.bf16.msra.mxu1 %v2879_v32 }
0x17d7   :  { %8517 = vmatprep.subr.bf16.mxu1 %v9510_v0 }
0x17d8   :  { %v3144_v52 = vpop.permute.xlu0 %3143 }
0x17d9   :  { %v3149_v54 = vsel %vm166_vm2, %v3144_v52, 0 }
0x17dc   :  { %v3268_v36 = vpop.permute.xlu0 %3267 }
0x17dd   :  { %v3273_v56 = vsel %vm166_vm2, %v3268_v36, 0 }
0x17de   :  { %v9274_v37 = vpop.eup %9273 }
0x17df   :  { %v2871_v42 = vmul.f32 %v9274_v37, %v9272_v26 }
0x17e0   :  { %v3376_v61 = vpop.permute.xlu0 %3375 }
0x17e1   :  { %v2872_v43 = vpack.c.bf16 %v2871_v42, %v2871_v42 }
0x17e3   :  { %8514 = vmatmul.mubr.msk.bf16.vlgmr.msra.gmra.mxu1 %vm166_vm2, %v2872_v43 }
0x17e4   :  { %8518 = vmatpush3.bf16.xpose.msra.mxu1 %v2929_v12  ;;  %8519 = vmatprep.mubr.msk.bf16.mxu1 %vm9511_vm0, %v9510_v0  ;;  %v3486_v2 = vpop.permute.xlu0 %3485 }
0x17e5   :  { %8529 = vmatprep.subr.bf16.mxu1 %v9510_v0 }
0x17e8   :  { %v3596_v5 = vpop.permute.xlu0 %3595 }
0x17eb   :  { %8520 = vmatmul.mubr.msk.bf16.vlgmr.msra.gmra.mxu1 %vm166_vm2, %v2922_v44 }
0x17ec   :  { %8530 = vmatpush3.bf16.xpose.msra.mxu1 %v3039_v49  ;;  %8531 = vmatprep.mubr.msk.bf16.mxu1 %vm9511_vm0, %v9510_v0 }
0x17ed   :  { %8541 = vmatprep.subr.bf16.mxu1 %v9510_v0 }
0x17f3   :  { %8532 = vmatmul.mubr.msk.bf16.vlgmr.msra.gmra.mxu1 %vm166_vm2, %v3032_v53 }
0x17f4   :  { %8542 = vmatpush3.bf16.xpose.msra.mxu1 %v3149_v54  ;;  %8543 = vmatprep.mubr.msk.bf16.mxu1 %vm9511_vm0, %v9510_v0 }
0x17f5   :  { %8553 = vmatprep.subr.bf16.mxu1 %v9510_v0 }
0x17fb   :  { %8544 = vmatmul.mubr.msk.bf16.vlgmr.msra.gmra.mxu1 %vm166_vm2, %v3142_v60 }
0x17fc   :  { %8554 = vmatpush3.bf16.xpose.msra.mxu1 %v3273_v56  ;;  %8555 = vmatprep.mubr.msk.bf16.mxu1 %vm9511_vm0, %v9510_v0 }
0x17fd   :  { %8565 = vmatprep.subr.bf16.mxu1 %v9510_v0 }
0x1803   :  { %8556 = vmatmul.mubr.msk.bf16.vlgmr.msra.gmra.mxu1 %vm166_vm2, %v10259_v15 }
0x1804   :  { %8566 = vmatpush3.bf16.xpose.msra.mxu1 %v3383_v50  ;;  %8567 = vmatprep.mubr.msk.bf16.mxu1 %vm9511_vm0, %v9510_v0 }
0x1805   :  { %8577 = vmatprep.subr.bf16.mxu1 %v9510_v0 }
0x180b   :  { %8568 = vmatmul.mubr.msk.bf16.vlgmr.msra.gmra.mxu1 %vm166_vm2, %v3376_v61 }
0x180c   :  { %8578 = vmatpush3.bf16.xpose.msra.mxu1 %v3493_v62  ;;  %8579 = vmatprep.mubr.msk.bf16.mxu1 %vm9511_vm0, %v9510_v0 }
0x180d   :  { %8589 = vmatprep.subr.bf16.mxu1 %v9510_v0 }
0x1813   :  { %8580 = vmatmul.mubr.msk.bf16.vlgmr.msra.gmra.mxu1 %vm166_vm2, %v3486_v2 }
0x1814   :  { %8590 = vmatpush3.bf16.xpose.msra.mxu1 %v3603_v3  ;;  %8591 = vmatprep.mubr.msk.bf16.mxu1 %vm9511_vm0, %v9510_v0 }
0x1815   :  { %8601 = vmatprep.subr.bf16.mxu1 %v9510_v0 }
0x181b   :  { %8592 = vmatmul.mubr.msk.bf16.vlgmr.msra.gmra.mxu1 %vm166_vm2, %v3596_v5 }
0x181c   :  { %8605 = vmatprep.mubr.msk.bf16.mxu1 %vm9511_vm0, %v9510_v0 }
0x18a3   :  { %v10332_v4 = vpop.f32.mrf.mxu1 }
0x18a5   :  { %v8515_v8 = vpop.f32.mrf.mxu1 }
0x18a7   :  { %v2918_v10 = vpop.f32.mrf.mxu1 }
0x18a9   :  { %v8516_v9 = vpop.f32.mrf.mxu1 }
0x18ab   :  { %v2965_v13 = vpop.f32.mrf.mxu1 }
0x18ac   :  { %v2971_v40 = vsel %vm166_vm2, %v2965_v13, -inf }
0x18ad   :  { %2972 = vmax.xlane.f32.xlu1 %v2971_v40  ;;  %v8521_v41 = vpop.f32.mrf.mxu1 }
0x18af   :  { %v2968_v6 = vpop.f32.mrf.mxu1 }
0x18b1   :  { %v8522_v51 = vpop.f32.mrf.mxu1 }
0x18b3   :  { %v3075_v7 = vpop.f32.mrf.mxu1 }
0x18b4   :  { %v3081_v17 = vsel %vm166_vm2, %v3075_v7, -inf }
0x18b5   :  { %3082 = vmax.xlane.f32.xlu0 %v3081_v17  ;;  %v8533_v18 = vpop.f32.mrf.mxu1 }
0x18b7   :  { %v3078_v19 = vpop.f32.mrf.mxu1 }
0x18b9   :  { %v8534_v21 = vpop.f32.mrf.mxu1 }
0x18bb   :  { %v3185_v22 = vpop.f32.mrf.mxu1 }
0x18bc   :  { %v3191_v23 = vsel %vm166_vm2, %v3185_v22, -inf }
0x18bd   :  { %3192 = vmax.xlane.f32.xlu0 %v3191_v23  ;;  %v8545_v24 = vpop.f32.mrf.mxu1 }
0x18bf   :  { %v3188_v25 = vpop.f32.mrf.mxu1 }
0x18c1   :  { %v8546_v26 = vpop.f32.mrf.mxu1 }
0x18c3   :  { %v3309_v27 = vpop.f32.mrf.mxu1 }
0x18c4   :  { %v3315_v29 = vsel %vm166_vm2, %v3309_v27, -inf }
0x18c5   :  { %3316 = vmax.xlane.f32.xlu1 %v3315_v29  ;;  %v8557_v30 = vpop.f32.mrf.mxu1 }
0x18c7   :  { %v3312_v32 = vpop.f32.mrf.mxu1 }
0x18c9   :  { %v8558_v35 = vpop.f32.mrf.mxu1 }
0x18cb   :  { %v3419_v37 = vpop.f32.mrf.mxu1 }
0x18cc   :  { %v3425_v42 = vsel %vm166_vm2, %v3419_v37, -inf }
0x18cd   :  { %3426 = vmax.xlane.f32.xlu0 %v3425_v42  ;;  %v8569_v43 = vpop.f32.mrf.mxu1 }
0x18cf   :  { %v3422_v44 = vpop.f32.mrf.mxu1 }
0x18d1   :  { %v8570_v12 = vpop.f32.mrf.mxu1 }
0x18d3   :  { %v3529_v45 = vpop.f32.mrf.mxu1 }
0x18d4   :  { %v3535_v49 = vsel %vm166_vm2, %v3529_v45, -inf }
0x18d5   :  { %3536 = vmax.xlane.f32.xlu1 %v3535_v49  ;;  %v8581_v52 = vpop.f32.mrf.mxu1 }
0x18d7   :  { %v3532_v53 = vpop.f32.mrf.mxu1 }
0x18d9   :  { %v8582_v54 = vpop.f32.mrf.mxu1 }
0x18db   :  { %v3639_v36 = vpop.f32.mrf.mxu1 }
0x18dc   :  { %v3645_v60 = vsel %vm166_vm2, %v3639_v36, -inf }
0x18dd   :  { %3646 = vmax.xlane.f32.xlu0 %v3645_v60  ;;  %v8593_v56 = vpop.f32.mrf.mxu1 }
0x18df   :  { %v3642_v58 = vpop.f32.mrf.mxu1 }
0x18e1   :  { %v8594_v50 = vpop.f32.mrf.mxu1 }
0x18e6   :  { %2983 = vrot.lane.b32.xlu1 %v10244_v14, %s11354_s27 }
0x18f3   :  { %3093 = vrot.lane.b32.xlu0 %v10244_v14, %s11353_s3 }
0x1936   :  { %v2973_v59 = vpop.xlane.xlu1 %2972 }
0x1937   :  { %v2974_v61 = vsub.f32 %v2965_v13, %v2973_v59 }
0x1939   :  { %v2975_v62 = vmul.f32 1.442695, %v2974_v61 }
0x193b   :  { %9275 = vpow2.f32 %v2975_v62 }
0x193e   :  { %v3083_v1 = vpop.xlane.xlu0 %3082 }
0x193f   :  { %v3084_v2 = vsub.f32 %v3075_v7, %v3083_v1 }
0x1941   :  { %v3085_v3 = vmul.f32 1.442695, %v3084_v2 }
0x1943   :  { %9277 = vpow2.f32 %v3085_v3 }
0x1946   :  { %v3193_v5 = vpop.xlane.xlu0 %3192 }
0x1947   :  { %v3194_v8 = vsub.f32 %v3185_v22, %v3193_v5 }
0x1948   :  { %v9276_v10 = vpop.eup %9275 }
0x1949   :  { %v3195_v9 = vmul.f32 1.442695, %v3194_v8  ;;  %v2977_v40 = vsel %vm166_vm2, %v9276_v10, 0.0 }
0x194a   :  { %2978 = vadd.xlane.f32.xlu1 %v2977_v40 }
0x194b   :  { %9279 = vpow2.f32 %v3195_v9 }
0x194e   :  { %v3317_v7 = vpop.xlane.xlu1 %3316 }
0x194f   :  { %v3318_v21 = vsub.f32 %v3309_v27, %v3317_v7 }
0x1950   :  { %v9278_v41 = vpop.eup %9277 }
0x1951   :  { %v3087_v6 = vsel %vm166_vm2, %v9278_v41, 0.0  ;;  %v3319_v23 = vmul.f32 1.442695, %v3318_v21 }
0x1952   :  { %3088 = vadd.xlane.f32.xlu0 %v3087_v6 }
0x1953   :  { %9281 = vpow2.f32 %v3319_v23 }
0x1956   :  { %v3427_v22 = vpop.xlane.xlu0 %3426 }
0x1957   :  { %v3428_v24 = vsub.f32 %v3419_v37, %v3427_v22 }
0x1958   :  { %v10347_v51 = vpop.eup %9279 }
0x1959   :  { %v3197_v13 = vsel %vm166_vm2, %v10347_v51, 0.0  ;;  %v3429_v29 = vmul.f32 1.442695, %v3428_v24 }
0x195a   :  { %3198 = vadd.xlane.f32.xlu1 %v3197_v13 }
0x195b   :  { %9283 = vpow2.f32 %v3429_v29 }
0x195e   :  { %v3537_v17 = vpop.xlane.xlu1 %3536 }
0x195f   :  { %v3538_v26 = vsub.f32 %v3529_v45, %v3537_v17 }
0x1960   :  { %v9282_v42 = vpop.eup %9281 }
0x1961   :  { %v3539_v32 = vmul.f32 1.442695, %v3538_v26 }
0x1962   :  { %v2984_v18 = vpop.permute.xlu1 %2983 }
0x1963   :  { %v2989_v19 = vsel %vm230_vm3, %v2984_v18, 0  ;;  %9285 = vpow2.f32 %v3539_v32 }
0x1964   :  { %8524 = vmatpush3.bf16.msra.mxu0 %v2989_v19 }
0x1965   :  { %8535 = vmatprep.subr.bf16.mxu0 %v9510_v0 }
0x1966   :  { %v3647_v25 = vpop.xlane.xlu0 %3646 }
0x1967   :  { %v3648_v30 = vsub.f32 %v3639_v36, %v3647_v25 }
0x1968   :  { %3203 = vrot.lane.b32.xlu0 %v10244_v14, %s11355_s30  ;;  %v3321_v14 = vsel %vm166_vm2, %v9282_v42, 0.0  ;;  %v10358_v43 = vpop.eup %9283 }
0x1969   :  { %v3649_v35 = vmul.f32 1.442695, %v3648_v30  ;;  %v3431_v37 = vsel %vm166_vm2, %v10358_v43, 0.0 }
0x196a   :  { %v3094_v52 = vpop.permute.xlu0 %3093 }
0x196b   :  { %3327 = vrot.lane.b32.xlu1 %v10259_v15, %s11362_s2  ;;  %9287 = vpow2.f32 %v3649_v35  ;;  %v3099_v58 = vsel %vm230_vm3, %v3094_v52, 0 }
0x1970   :  { %v10360_v27 = vpop.eup %9285 }
0x1971   :  { %v3541_v12 = vsel %vm166_vm2, %v10360_v27, 0.0 }
0x1978   :  { %v10364_v44 = vpop.eup %9287 }
0x1979   :  { %v3651_v45 = vsel %vm166_vm2, %v10364_v44, 0.0 }
0x1987   :  { %3322 = vadd.xlane.f32.xlu0 %v3321_v14 }
0x198b   :  { %3432 = vadd.xlane.f32.xlu0 %v3431_v37 }
0x198f   :  { %3542 = vadd.xlane.f32.xlu1 %v3541_v12  ;;  %3652 = vadd.xlane.f32.xlu0 %v3651_v45 }
0x19a0   :  { %3547 = vrot.lane.b32.xlu1 %v10259_v15, %s11353_s3 }
0x19a4   :  { %3657 = vrot.lane.b32.xlu1 %v10259_v15, %s11355_s30 }
0x19a5   :  { %3437 = vrot.lane.b32.xlu0 %v10259_v15, %s11354_s27 }
0x19d3   :  { %v2979_v49 = vpop.xlane.xlu1 %2978 }
0x19d4   :  { %9289 = vrcp.f32 %v2979_v49 }
0x19db   :  { %v3089_v53 = vpop.xlane.xlu0 %3088 }
0x19dc   :  { %9291 = vrcp.f32 %v3089_v53 }
0x19df   :  { %v3204_v59 = vpop.permute.xlu0 %3203 }
0x19e0   :  { %v3209_v62 = vsel %vm230_vm3, %v3204_v59, 0  ;;  %v9157_v59 = vld [vmem:[%s11316_s9 + $0x8] sm:$0xff]  }
0x19e1   :  { %v9290_v54 = vpop.eup %9289  ;;  %8602 = vmatpush3.bf16.msra.mxu1 %v9157_v59 }
0x19e2   :  { %v2981_v36 = vmul.f32 %v9290_v54, %v9276_v10  ;;  %8603 = vmatprep.subr.bf16.mxu1 %v9510_v0 }
0x19e3   :  { %v3199_v60 = vpop.xlane.xlu1 %3198 }
0x19e4   :  { %9293 = vrcp.f32 %v3199_v60  ;;  %v2982_v56 = vpack.c.bf16 %v2981_v36, %v2981_v36 }
0x19e6   :  { %8526 = vmatmul.mubr.msk.bf16.vlgmr.msra.gmra.mxu0 %vm166_vm2, %v2982_v56 }
0x19e7   :  { %8536 = vmatpush3.bf16.msra.mxu0 %v3099_v58  ;;  %8537 = vmatprep.mubr.msk.bf16.mxu0 %vm9511_vm0, %v9510_v0  ;;  %v3328_v3 = vpop.permute.xlu1 %3327 }
0x19e8   :  { %8547 = vmatprep.subr.bf16.mxu0 %v9510_v0  ;;  %v3333_v8 = vsel %vm230_vm3, %v3328_v3, 0  ;;  %v9158_v3 = vld [vmem:[%s11316_s9] sm:$0xff]  }
0x19e9   :  { %v9292_v15 = vpop.eup %9291  ;;  %8604 = vmatpush3.bf16.msra.mxu1 %v9158_v3 }
0x19ea   :  { %v3091_v50 = vmul.f32 %v9292_v15, %v9278_v41  ;;  %8617 = vmatprep.subr.bf16.mxu1 %v9510_v0 }
0x19ec   :  { %v3092_v61 = vpack.c.bf16 %v3091_v50, %v3091_v50 }
0x19ee   :  { %8538 = vmatmul.mubr.msk.bf16.vlgmr.msra.gmra.mxu0 %vm166_vm2, %v3092_v61 }
0x19ef   :  { %8548 = vmatpush3.bf16.msra.mxu0 %v3209_v62  ;;  %8549 = vmatprep.mubr.msk.bf16.mxu0 %vm9511_vm0, %v9510_v0 }
0x19f0   :  { %8559 = vmatprep.subr.bf16.mxu0 %v9510_v0 }
0x19f1   :  { %v9294_v1 = vpop.eup %9293 }
0x19f2   :  { %v3201_v2 = vmul.f32 %v9294_v1, %v10347_v51 }
0x19f4   :  { %v3202_v5 = vpack.c.bf16 %v3201_v2, %v3201_v2 }
0x19f6   :  { %8550 = vmatmul.mubr.msk.bf16.vlgmr.msra.gmra.mxu0 %vm166_vm2, %v3202_v5 }
0x19f7   :  { %8560 = vmatpush3.bf16.msra.mxu0 %v3333_v8  ;;  %8561 = vmatprep.mubr.msk.bf16.mxu0 %vm9511_vm0, %v9510_v0 }
0x19f8   :  { %8571 = vmatprep.subr.bf16.mxu0 %v9510_v0 }
0x1a10   :  { %v3323_v10 = vpop.xlane.xlu0 %3322 }
0x1a11   :  { %9295 = vrcp.f32 %v3323_v10 }
0x1a14   :  { %v3433_v9 = vpop.xlane.xlu0 %3432 }
0x1a15   :  { %9297 = vrcp.f32 %v3433_v9 }
0x1a18   :  { %v3543_v40 = vpop.xlane.xlu1 %3542  ;;  %v3653_v41 = vpop.xlane.xlu0 %3652 }
0x1a19   :  { %9299 = vrcp.f32 %v3543_v40 }
0x1a1a   :  { %9301 = vrcp.f32 %v3653_v41 }
0x1a1c   :  { %v3438_v13 = vpop.permute.xlu0 %3437  ;;  %v3548_v21 = vpop.permute.xlu1 %3547 }
0x1a1d   :  { %v3443_v18 = vsel %vm230_vm3, %v3438_v13, 0  ;;  %v3553_v24 = vsel %vm230_vm3, %v3548_v21, 0 }
0x1a1e   :  { %v9296_v6 = vpop.eup %9295 }
0x1a1f   :  { %v3325_v51 = vmul.f32 %v9296_v6, %v9282_v42 }
0x1a20   :  { %v3658_v26 = vpop.permute.xlu1 %3657 }
0x1a21   :  { %v3326_v7 = vpack.c.bf16 %v3325_v51, %v3325_v51  ;;  %v3663_v32 = vsel %vm230_vm3, %v3658_v26, 0 }
0x1a22   :  { %v9298_v17 = vpop.eup %9297 }
0x1a23   :  { %8562 = vmatmul.mubr.msk.bf16.vlgmr.msra.gmra.mxu0 %vm166_vm2, %v3326_v7  ;;  %v3435_v19 = vmul.f32 %v9298_v17, %v10358_v43  ;;  %v9436_v17 = vld [vmem:[#allocation5 + $0x8] sm:$0xff] }
0x1a24   :  { %8572 = vmatpush3.bf16.msra.mxu0 %v3443_v18  ;;  %8573 = vmatprep.mubr.msk.bf16.mxu0 %vm9511_vm0, %v9510_v0  ;;  %v2566_v18 = vrot.slane %v9436_v17, %v9927_v57 }
0x1a25   :  { %8583 = vmatprep.subr.bf16.mxu0 %v9510_v0  ;;  %v3436_v22 = vpack.c.bf16 %v3435_v19, %v3435_v19 }
0x1a26   :  { %v9300_v23 = vpop.eup %9299  ;;  %v2650_v19 = vadd.f32 %v10273_v20, %v2566_v18  ;;  %v2653_v21 = vadd.f32 %v10275_v16, %v2566_v18 }
0x1a27   :  { %v3545_v25 = vmul.f32 %v9300_v23, %v10360_v27  ;;  %v9302_v30 = vpop.eup %9301 }
0x1a28   :  { %v3655_v35 = vmul.f32 %v9302_v30, %v10364_v44  ;;  %v2657_v23 = vadd.f32 %v2653_v21, %v10194_v39 }
0x1a29   :  { %v3546_v29 = vpack.c.bf16 %v3545_v25, %v3545_v25 }
0x1a2a   :  { %v3656_v42 = vpack.c.bf16 %v3655_v35, %v3655_v35  ;;  %v2661_v25 = vsel %vm117_vm1, %v2657_v23, 0.0 }
0x1a2b   :  { %8574 = vmatmul.mubr.msk.bf16.vlgmr.msra.gmra.mxu0 %vm166_vm2, %v3436_v22  ;;  %v2656_v22 = vadd.f32 %v2650_v19, %v10192_v38 }
0x1a2c   :  { %8584 = vmatpush3.bf16.msra.mxu0 %v3553_v24  ;;  %8585 = vmatprep.mubr.msk.bf16.mxu0 %vm9511_vm0, %v9510_v0 }
0x1a2d   :  { %8595 = vmatprep.subr.bf16.mxu0 %v9510_v0  ;;  %v2658_v24 = vsel %vm117_vm1, %v2656_v22, 0.0 }
0x1a33   :  { %8586 = vmatmul.mubr.msk.bf16.vlgmr.msra.gmra.mxu0 %vm166_vm2, %v3546_v29 }
0x1a34   :  { %8596 = vmatpush3.bf16.msra.mxu0 %v3663_v32  ;;  %8597 = vmatprep.mubr.msk.bf16.mxu0 %vm9511_vm0, %v9510_v0 }
0x1a35   :  { %8609 = vmatprep.subr.bf16.mxu0 %v9510_v0 }
0x1a3b   :  { %8598 = vmatmul.mubr.msk.bf16.vlgmr.msra.gmra.mxu0 %vm166_vm2, %v3656_v42 }
0x1a3c   :  { %8613 = vmatprep.mubr.msk.bf16.mxu0 %vm9511_vm0, %v9510_v0 }
0x1aa6   :  { %v3025_v14 = vpop.f32.mrf.mxu0 }
0x1aa8   :  { %v8527_v43 = vpop.f32.mrf.mxu0 }
0x1aaa   :  { %v3028_v27 = vpop.f32.mrf.mxu0 }
0x1aac   :  { %v8528_v37 = vpop.f32.mrf.mxu0 }
0x1aae   :  { %v3135_v12 = vpop.f32.mrf.mxu0 }
0x1ab0   :  { %v8539_v45 = vpop.f32.mrf.mxu0 }
0x1ab2   :  { %v3138_v49 = vpop.f32.mrf.mxu0 }
0x1ab4   :  { %v8540_v52 = vpop.f32.mrf.mxu0 }
0x1ab6   :  { %v3245_v53 = vpop.f32.mrf.mxu0 }
0x1ab8   :  { %v8551_v54 = vpop.f32.mrf.mxu0 }
0x1aba   :  { %v3248_v36 = vpop.f32.mrf.mxu0 }
0x1abc   :  { %v8552_v44 = vpop.f32.mrf.mxu0 }
0x1ae3   :  { %v3369_v60 = vpop.f32.mrf.mxu0 }
0x1ae5   :  { %v8563_v56 = vpop.f32.mrf.mxu0 }
0x1ae7   :  { %v3372_v58 = vpop.f32.mrf.mxu0 }
0x1ae9   :  { %v8564_v15 = vpop.f32.mrf.mxu0 }
0x1aeb   :  { %v3479_v50 = vpop.f32.mrf.mxu0 }
0x1aec   :  { %v9067_v61 = vpack.i.bf16 %v3479_v50, %v3025_v14 }
0x1aed   :  { %v8575_v62 = vpop.f32.mrf.mxu0 }
0x1aee   :  { %9068 = vrot.lane.b32.xlu1 %v9067_v61, %s11356_s28 }
0x1aef   :  { %v3482_v1 = vpop.f32.mrf.mxu0 }
0x1af1   :  { %v8576_v2 = vpop.f32.mrf.mxu0 }
0x1af3   :  { %v3589_v5 = vpop.f32.mrf.mxu0 }
0x1af4   :  { %v9072_v8 = vpack.i.bf16 %v3589_v5, %v3135_v12 }
0x1af5   :  { %v8587_v10 = vpop.f32.mrf.mxu0 }
0x1af6   :  { %9073 = vrot.lane.b32.xlu1 %v9072_v8, %s11357_s0  ;;  %v3724_v10 = vrot.slane %v10238_v63, %v9856_v55 }
0x1af7   :  { %v3592_v9 = vpop.f32.mrf.mxu0 }
0x1af8   :  { %v2687_v9 = vrot.slane %v9436_v17, %v9944_v28 }
0x1af9   :  { %v8588_v40 = vpop.f32.mrf.mxu0 }
0x1afb   :  { %v3699_v41 = vpop.f32.mrf.mxu0 }
0x1afc   :  { %v9077_v6 = vpack.i.bf16 %v3699_v41, %v3245_v53 }
0x1afd   :  { %v8599_v51 = vpop.f32.mrf.mxu0 }
0x1afe   :  { %9078 = vrot.lane.b32.xlu0 %v9077_v6, %s11358_s18  ;;  %v2693_v6 = vrot.slane %v9436_v17, %v9949_v33 }
0x1aff   :  { %v3702_v13 = vpop.f32.mrf.mxu0 }
0x1b01   :  { %v8600_v7 = vpop.f32.mrf.mxu0 }
0x1b1a   :  { %2659 = vadd.xlane.f32.xlu1 %v2658_v24 }
0x1b1d   :  { %2662 = vadd.xlane.f32.xlu0 %v2661_v25 }
0x1b60   :  { %v9069_v26 = vpop.permute.xlu1 %9068 }
0x1b61   :  { %v9071_v30 = vunpack.i.h.bf16 %v9069_v26  ;;  %v9070_v32 = vunpack.i.l.bf16 %v9069_v26 }
0x1b63   :  { %v3717_v20 = vsel %vm166_vm2, %v3369_v60, %v9071_v30  ;;  %v3263_v38 = vsel %vm166_vm2, %v10332_v4, %v9070_v32 }
0x1b68   :  { %v9074_v29 = vpop.permute.xlu1 %9073 }
0x1b69   :  { %v9076_v35 = vunpack.i.h.bf16 %v9074_v29  ;;  %v9075_v42 = vunpack.i.l.bf16 %v9074_v29 }
0x1b6b   :  { %v3718_v43 = vsel %vm617_vm4, %v3717_v20, %v9076_v35  ;;  %v3264_v27 = vsel %vm617_vm4, %v3263_v38, %v9075_v42 }
0x1b70   :  { %v9079_v14 = vpop.permute.xlu0 %9078 }
0x1b71   :  { %v9081_v16 = vunpack.i.h.bf16 %v9079_v14  ;;  %v9080_v39 = vunpack.i.l.bf16 %v9079_v14 }
0x1b73   :  { %v3719_v37 = vsel %vm619_vm5, %v3718_v43, %v9081_v16  ;;  %v3265_v12 = vsel %vm619_vm5, %v3264_v27, %v9080_v39 }
0x1b74   :  { %v3720_v45 = vpack.c.bf16 %v3719_v37, %v3265_v12 }
0x1b76   :  { %8606 = vmatmul.mubr.msk.bf16.vlgmr.msra.gmra.mxu1 %vm117_vm1, %v3720_v45 }
0x1b77   :  { %8621 = vmatprep.mubr.msk.bf16.mxu1 %vm9511_vm0, %v9510_v0 }
0x1ba3   :  { %v2660_v49 = vpop.xlane.xlu1 %2659 }
0x1ba4   :  { %v2664_v52 = vmul.f32 0.03125, %v2660_v49 }
0x1ba6   :  { %v2666_v53 = vsub.f32 %v2656_v22, %v2664_v52  ;;  %v2663_v4 = vpop.xlane.xlu0 %2662 }
0x1ba7   :  { %v2665_v54 = vmul.f32 0.03125, %v2663_v4 }
0x1ba8   :  { %v2668_v36 = vmul.f32 %v2666_v53, %v2666_v53 }
0x1ba9   :  { %v2667_v44 = vsub.f32 %v2657_v23, %v2665_v54 }
0x1baa   :  { %v2670_v60 = vsel %vm117_vm1, %v2668_v36, 0.0  ;;  %v9159_v36 = vld [vmem:[%s11318_s11 + $0x8] sm:$0xff]  }
0x1bab   :  { %2671 = vadd.xlane.f32.xlu0 %v2670_v60  ;;  %v2669_v56 = vmul.f32 %v2667_v44, %v2667_v44  ;;  %8618 = vmatpush3.bf16.msra.mxu1 %v9159_v36  ;;  %v9161_v60 = vld [vmem:[%s11318_s11] sm:$0xff]  }
0x1bac   :  { %8619 = vmatprep.subr.bf16.mxu1 %v9510_v0 }
0x1bad   :  { %v2673_v58 = vsel %vm117_vm1, %v2669_v56, 0.0  ;;  %v9162_v56 = vld [vmem:[%s11317_s10] sm:$0xff]  }
0x1bae   :  { %2674 = vadd.xlane.f32.xlu1 %v2673_v58 }
0x1baf   :  { %8620 = vmatpush3.bf16.msra.mxu1 %v9161_v60 }
0x1bb0   :  { %8631 = vmatprep.subr.bf16.mxu1 %v9510_v0 }
0x1c34   :  { %v2672_v15 = vpop.xlane.xlu0 %2671 }
0x1c35   :  { %v2676_v50 = vmul.f32 0.03125, %v2672_v15 }
0x1c36   :  { %v3774_v59 = vpop.f32.mrf.mxu1 }
0x1c37   :  { %v2678_v61 = vadd.f32 1e-05, %v2676_v50  ;;  %v2675_v62 = vpop.xlane.xlu1 %2674  ;;  %v3775_v13 = vadd.f32 %v3774_v59, %v3724_v10 }
0x1c38   :  { %v2677_v1 = vmul.f32 0.03125, %v2675_v62  ;;  %v8607_v2 = vpop.f32.mrf.mxu1 }
0x1c39   :  { %9303 = vrsqrt.f32 %v2678_v61  ;;  %v3781_v23 = vadd.f32 %v3775_v13, %v10205_v47 }
0x1c3a   :  { %v2679_v3 = vadd.f32 1e-05, %v2677_v1  ;;  %v3777_v5 = vpop.f32.mrf.mxu1 }
0x1c3b   :  { %v3778_v21 = vadd.f32 %v3777_v5, %v3724_v10  ;;  %v3783_v17 = vsel %vm117_vm1, %v3781_v23, 0.0 }
0x1c3c   :  { %9305 = vrsqrt.f32 %v2679_v3  ;;  %v8608_v8 = vpop.f32.mrf.mxu1 }
0x1c3d   :  { %v3782_v26 = vadd.f32 %v3778_v21, %v10207_v48  ;;  %v3812_v21 = vrot.slane %v10238_v63, %v9895_v31 }
0x1c3f   :  { %v3786_v30 = vsel %vm117_vm1, %v3782_v26, 0.0 }
0x1c46   :  { %v9304_v40 = vpop.eup %9303 }
0x1c47   :  { %v2682_v41 = vmul.f32 %v9304_v40, %v2666_v53 }
0x1c49   :  { %v9306_v51 = vpop.eup %9305  ;;  %v2688_v7 = vmul.f32 %v2687_v9, %v2682_v41 }
0x1c4a   :  { %v2683_v18 = vmul.f32 %v9306_v51, %v2667_v44  ;;  %v9160_v44 = vld [vmem:[%s11317_s10 + $0x8] sm:$0xff]  }
0x1c4b   :  { %v2694_v19 = vadd.f32 %v2693_v6, %v2688_v7  ;;  %8610 = vmatpush3.bf16.msra.mxu0 %v9160_v44 }
0x1c4c   :  { %v2689_v22 = vmul.f32 %v2687_v9, %v2683_v18  ;;  %8611 = vmatprep.subr.bf16.mxu0 %v9510_v0  ;;  %v2696_v9 = vld [vmem:[%s11323_s16] sm:$0xf] }
0x1c4d   :  { %v2697_v24 = vsel %vm117_vm1, %v2694_v19, 0.0  ;;  %v2726_v41 = vrot.slane %v2696_v9, %v9663_v11 }
0x1c4e   :  { %2698 = vadd.xlane.f32.xlu0 %v2697_v24  ;;  %v2695_v25 = vadd.f32 %v2693_v6, %v2689_v22 }
0x1c4f   :  { %8612 = vmatpush3.bf16.msra.mxu0 %v9162_v56 }
0x1c50   :  { %v2700_v29 = vsel %vm117_vm1, %v2695_v25, 0.0  ;;  %8625 = vmatprep.subr.bf16.mxu0 %v9510_v0 }
0x1c51   :  { %2701 = vadd.xlane.f32.xlu1 %v2700_v29 }
0x1c52   :  { %3784 = vadd.xlane.f32.xlu0 %v3783_v17 }
0x1c55   :  { %3787 = vadd.xlane.f32.xlu1 %v3786_v30 }
0x1cd7   :  { %v2699_v32 = vpop.xlane.xlu0 %2698 }
0x1cd8   :  { %v2703_v35 = vmul.f32 0.03125, %v2699_v32 }
0x1cda   :  { %v2705_v42 = vsub.f32 %v2694_v19, %v2703_v35  ;;  %v2702_v14 = vpop.xlane.xlu1 %2701  ;;  %v2732_v19 = vrot.slane %v2696_v9, %v9856_v55 }
0x1cdb   :  { %v2704_v47 = vmul.f32 0.03125, %v2702_v14  ;;  %v3785_v20 = vpop.xlane.xlu0 %3784 }
0x1cdc   :  { %v3789_v38 = vmul.f32 0.03125, %v3785_v20  ;;  %v2707_v16 = vmul.f32 %v2705_v42, %v2705_v42 }
0x1cdd   :  { %v2706_v39 = vsub.f32 %v2695_v25, %v2704_v47  ;;  %v3818_v25 = vrot.slane %v10238_v63, %v9900_v34 }
0x1cde   :  { %v3791_v43 = vsub.f32 %v3781_v23, %v3789_v38  ;;  %v3788_v48 = vpop.xlane.xlu1 %3787  ;;  %v2709_v27 = vsel %vm117_vm1, %v2707_v16, 0.0  ;;  %v3897_v38 = vrot.slane %v10238_v63, %v9927_v57 }
0x1cdf   :  { %v3790_v37 = vmul.f32 0.03125, %v3788_v48  ;;  %2710 = vadd.xlane.f32.xlu0 %v2709_v27  ;;  %v2708_v12 = vmul.f32 %v2706_v39, %v2706_v39  ;;  %v3837_v27 = vrot.slane %v10238_v63, %v9920_v46 }
0x1ce0   :  { %v3793_v45 = vmul.f32 %v3791_v43, %v3791_v43 }
0x1ce1   :  { %v3792_v49 = vsub.f32 %v3782_v26, %v3790_v37  ;;  %v2712_v52 = vsel %vm117_vm1, %v2708_v12, 0.0 }
0x1ce2   :  { %2713 = vadd.xlane.f32.xlu1 %v2712_v52  ;;  %v3795_v53 = vsel %vm117_vm1, %v3793_v45, 0.0 }
0x1ce3   :  { %3796 = vadd.xlane.f32.xlu0 %v3795_v53  ;;  %v3794_v4 = vmul.f32 %v3792_v49, %v3792_v49 }
0x1ce5   :  { %v3798_v54 = vsel %vm117_vm1, %v3794_v4, 0.0 }
0x1ce6   :  { %3799 = vadd.xlane.f32.xlu1 %v3798_v54 }
0x1d68   :  { %v2711_v58 = vpop.xlane.xlu0 %2710 }
0x1d69   :  { %v2715_v15 = vmul.f32 0.03125, %v2711_v58 }
0x1d6b   :  { %v2717_v50 = vadd.f32 1e-05, %v2715_v15  ;;  %v2714_v59 = vpop.xlane.xlu1 %2713 }
0x1d6c   :  { %v2716_v61 = vmul.f32 0.03125, %v2714_v59  ;;  %v3797_v62 = vpop.xlane.xlu0 %3796 }
0x1d6d   :  { %9307 = vrsqrt.f32 %v2717_v50  ;;  %v3801_v1 = vmul.f32 0.03125, %v3797_v62 }
0x1d6e   :  { %v2718_v2 = vadd.f32 1e-05, %v2716_v61 }
0x1d6f   :  { %v3803_v3 = vadd.f32 1e-05, %v3801_v1  ;;  %v3800_v5 = vpop.xlane.xlu1 %3799 }
0x1d70   :  { %9309 = vrsqrt.f32 %v2718_v2  ;;  %v3802_v8 = vmul.f32 0.03125, %v3800_v5 }
0x1d71   :  { %9311 = vrsqrt.f32 %v3803_v3 }
0x1d72   :  { %v3804_v10 = vadd.f32 1e-05, %v3802_v8 }
0x1d74   :  { %9313 = vrsqrt.f32 %v3804_v10 }
0x1d7a   :  { %v9308_v40 = vpop.eup %9307 }
0x1d7b   :  { %v2721_v6 = vmul.f32 %v9308_v40, %v2705_v42 }
0x1d7d   :  { %v9310_v51 = vpop.eup %9309  ;;  %v2727_v7 = vmul.f32 %v2726_v41, %v2721_v6 }
0x1d7e   :  { %v9312_v13 = vpop.eup %9311  ;;  %v2722_v18 = vmul.f32 %v9310_v51, %v2706_v39 }
0x1d7f   :  { %v3807_v22 = vmul.f32 %v9312_v13, %v3791_v43  ;;  %v2733_v29 = vadd.f32 %v2732_v19, %v2727_v7 }
0x1d80   :  { %v2728_v23 = vmul.f32 %v2726_v41, %v2722_v18 }
0x1d81   :  { %v9314_v24 = vpop.eup %9313  ;;  %v3813_v30 = vmul.f32 %v3812_v21, %v3807_v22 }
0x1d82   :  { %v3808_v26 = vmul.f32 %v9314_v24, %v3792_v49  ;;  %v2734_v17 = vadd.f32 %v2732_v19, %v2728_v23 }
0x1d83   :  { %v10486_v42 = vadd.f32 %v3818_v25, %v3813_v30 }
0x1d84   :  { %v10482_v32 = vpack.c.bf16 %v2734_v17, %v2733_v29  ;;  %v3814_v35 = vmul.f32 %v3812_v21, %v3808_v26 }
0x1d86   :  { %8622 = vmatmul.mubr.msk.bf16.vlgmr.msra.gmra.mxu1 %vm117_vm1, %v10482_v32  ;;  %v10488_v14 = vadd.f32 %v3818_v25, %v3814_v35 }
0x1d87   :  { %8633 = vmatprep.mubr.msk.bf16.mxu1 %vm9511_vm0, %v9510_v0 }
0x1d88   :  { %v3833_v47 = vpack.c.bf16 %v10488_v14, %v10486_v42 }
0x1d8a   :  { %8614 = vmatmul.mubr.msk.bf16.vlgmr.msra.gmra.mxu0 %vm117_vm1, %v3833_v47 }
0x1d8b   :  { %8627 = vmatprep.mubr.msk.bf16.mxu0 %vm9511_vm0, %v9510_v0 }
0x1e46   :  { %v3947_v20 = vpop.f32.mrf.mxu1 }
0x1e47   :  { %v3948_v48 = vadd.f32 %v3947_v20, %v3897_v38 }
0x1e48   :  { %v8623_v16 = vpop.f32.mrf.mxu1 }
0x1e4a   :  { %v3887_v39 = vpop.f32.mrf.mxu0  ;;  %v3950_v43 = vpop.f32.mrf.mxu1 }
0x1e4b   :  { %v3951_v37 = vadd.f32 %v3950_v43, %v3897_v38  ;;  %v3888_v53 = vadd.f32 %v3887_v39, %v3837_v27 }
0x1e4c   :  { %v8615_v12 = vpop.f32.mrf.mxu0  ;;  %v8624_v45 = vpop.f32.mrf.mxu1 }
0x1e4d   :  { %v10501_v49 = vpack.c.bf16 %v3951_v37, %v3948_v48 }
0x1e4e   :  { %v3890_v52 = vpop.f32.mrf.mxu0 }
0x1e4f   :  { %v3891_v4 = vadd.f32 %v3890_v52, %v3837_v27  ;;  %4066 = vrot.lane.b32.xlu0 %v10501_v49, %s9518_s24  ;;  %v3960_v54 = vsel %vm166_vm2, %v10501_v49, 0  ;;  %v10520_v60 = vrot.slane %v10501_v49, 4 }
0x1e50   :  { %v8616_v36 = vpop.f32.mrf.mxu0  ;;  %8626 = vmatpush3.bf16.xpose.msra.mxu0 %v3960_v54 }
0x1e51   :  { %v3954_v44 = vpack.c.bf16 %v3891_v4, %v3888_v53  ;;  %8637 = vmatprep.subr.bf16.mxu0 %v9510_v0  ;;  %v4415_v3 = vsel %vm166_vm2, %v10520_v60, 0 }
0x1e53   :  { %4064 = vrot.lane.b32.xlu1 %v3954_v44, %s9518_s24  ;;  %4174 = vrot.lane.b32.xlu0 %v3954_v44, %s11359_s6  ;;  %v4409_v63 = vrot.slane %v3954_v44, 4 }
0x1e57   :  { %4176 = vrot.lane.b32.xlu1 %v10501_v49, %s11359_s6  ;;  %4284 = vrot.lane.b32.xlu0 %v3954_v44, %s11360_s19 }
0x1e58   :  { %8628 = vmatmul.mubr.msk.bf16.vlgmr.msra.gmra.mxu0 %vm166_vm2, %v3954_v44 }
0x1e59   :  { %8639 = vmatprep.mubr.msk.bf16.mxu0 %vm9511_vm0, %v9510_v0 }
0x1e5b   :  { %4286 = vrot.lane.b32.xlu1 %v10501_v49, %s11360_s19  ;;  %4517 = vrot.lane.b32.xlu0 %v4409_v63, %s9518_s24 }
0x1e5f   :  { %4627 = vrot.lane.b32.xlu0 %v4409_v63, %s11359_s6  ;;  %4519 = vrot.lane.b32.xlu1 %v10520_v60, %s9518_s24 }
0x1e63   :  { %4737 = vrot.lane.b32.xlu0 %v4409_v63, %s11360_s19  ;;  %4629 = vrot.lane.b32.xlu1 %v10520_v60, %s11359_s6 }
0x1e67   :  { %4739 = vrot.lane.b32.xlu1 %v10520_v60, %s11360_s19 }
0x1ec1   :  { %v4067_v56 = vpop.permute.xlu0 %4066 }
0x1ec2   :  { %v4072_v58 = vsel %vm166_vm2, %v4067_v56, 0 }
0x1ec3   :  { %8638 = vmatpush3.bf16.xpose.msra.mxu0 %v4072_v58 }
0x1ec4   :  { %8649 = vmatprep.subr.bf16.mxu0 %v9510_v0 }
0x1ec5   :  { %v4065_v15 = vpop.permute.xlu1 %4064  ;;  %v4175_v62 = vpop.permute.xlu0 %4174 }
0x1ec9   :  { %v4177_v50 = vpop.permute.xlu1 %4176  ;;  %v4285_v2 = vpop.permute.xlu0 %4284 }
0x1eca   :  { %v4182_v59 = vsel %vm166_vm2, %v4177_v50, 0  ;;  %8640 = vmatmul.mubr.msk.bf16.vlgmr.msra.gmra.mxu0 %vm166_vm2, %v4065_v15 }
0x1ecb   :  { %8650 = vmatpush3.bf16.xpose.msra.mxu0 %v4182_v59  ;;  %8651 = vmatprep.mubr.msk.bf16.mxu0 %vm9511_vm0, %v9510_v0 }
0x1ecc   :  { %8661 = vmatprep.subr.bf16.mxu0 %v9510_v0 }
0x1ecd   :  { %v4287_v61 = vpop.permute.xlu1 %4286  ;;  %v4518_v9 = vpop.permute.xlu0 %4517 }
0x1ece   :  { %v4292_v1 = vsel %vm166_vm2, %v4287_v61, 0 }
0x1ed1   :  { %v4520_v5 = vpop.permute.xlu1 %4519  ;;  %v4628_v6 = vpop.permute.xlu0 %4627 }
0x1ed2   :  { %8652 = vmatmul.mubr.msk.bf16.vlgmr.msra.gmra.mxu0 %vm166_vm2, %v4175_v62  ;;  %v4525_v8 = vsel %vm166_vm2, %v4520_v5, 0 }
0x1ed3   :  { %8662 = vmatpush3.bf16.xpose.msra.mxu0 %v4292_v1  ;;  %8663 = vmatprep.mubr.msk.bf16.mxu0 %vm9511_vm0, %v9510_v0 }
0x1ed4   :  { %8673 = vmatprep.subr.bf16.mxu0 %v9510_v0 }
0x1ed5   :  { %v4630_v10 = vpop.permute.xlu1 %4629  ;;  %v4738_v13 = vpop.permute.xlu0 %4737 }
0x1ed6   :  { %v4635_v40 = vsel %vm166_vm2, %v4630_v10, 0 }
0x1ed9   :  { %v4740_v41 = vpop.permute.xlu1 %4739 }
0x1eda   :  { %8664 = vmatmul.mubr.msk.bf16.vlgmr.msra.gmra.mxu0 %vm166_vm2, %v4285_v2  ;;  %v4745_v51 = vsel %vm166_vm2, %v4740_v41, 0 }
0x1edb   :  { %8674 = vmatpush3.bf16.xpose.msra.mxu0 %v4415_v3  ;;  %8675 = vmatprep.mubr.msk.bf16.mxu0 %vm9511_vm0, %v9510_v0 }
0x1edc   :  { %8685 = vmatprep.subr.bf16.mxu0 %v9510_v0 }
0x1ee2   :  { %8676 = vmatmul.mubr.msk.bf16.vlgmr.msra.gmra.mxu0 %vm166_vm2, %v4409_v63 }
0x1ee3   :  { %8686 = vmatpush3.bf16.xpose.msra.mxu0 %v4525_v8  ;;  %8687 = vmatprep.mubr.msk.bf16.mxu0 %vm9511_vm0, %v9510_v0 }
0x1ee4   :  { %8697 = vmatprep.subr.bf16.mxu0 %v9510_v0 }
0x1eea   :  { %8688 = vmatmul.mubr.msk.bf16.vlgmr.msra.gmra.mxu0 %vm166_vm2, %v4518_v9 }
0x1eeb   :  { %8698 = vmatpush3.bf16.xpose.msra.mxu0 %v4635_v40  ;;  %8699 = vmatprep.mubr.msk.bf16.mxu0 %vm9511_vm0, %v9510_v0 }
0x1eec   :  { %8709 = vmatprep.subr.bf16.mxu0 %v9510_v0 }
0x1ef2   :  { %8700 = vmatmul.mubr.msk.bf16.vlgmr.msra.gmra.mxu0 %vm166_vm2, %v4628_v6 }
0x1ef3   :  { %8710 = vmatpush3.bf16.xpose.msra.mxu0 %v4745_v51  ;;  %8711 = vmatprep.mubr.msk.bf16.mxu0 %vm9511_vm0, %v9510_v0 }
0x1ef4   :  { %8721 = vmatprep.subr.bf16.mxu0 %v9510_v0 }
0x1efa   :  { %8712 = vmatmul.mubr.msk.bf16.vlgmr.msra.gmra.mxu0 %vm166_vm2, %v4738_v13 }
0x1efb   :  { %8725 = vmatprep.mubr.msk.bf16.mxu0 %vm9511_vm0, %v9510_v0 }
0x1f18   :  { %v3996_v7 = vpop.f32.mrf.mxu0 }
0x1f19   :  { %v4002_v18 = vsel %vm166_vm2, %v3996_v7, -inf }
0x1f1a   :  { %4003 = vmax.xlane.f32.xlu1 %v4002_v18  ;;  %v8629_v19 = vpop.f32.mrf.mxu0 }
0x1f1c   :  { %v3999_v21 = vpop.f32.mrf.mxu0 }
0x1f1e   :  { %v8630_v22 = vpop.f32.mrf.mxu0 }
0x1f8a   :  { %v4108_v23 = vpop.f32.mrf.mxu0 }
0x1f8b   :  { %v4114_v24 = vsel %vm166_vm2, %v4108_v23, -inf }
0x1f8c   :  { %4115 = vmax.xlane.f32.xlu0 %v4114_v24  ;;  %v8641_v25 = vpop.f32.mrf.mxu0 }
0x1f8e   :  { %v4111_v26 = vpop.f32.mrf.mxu0 }
0x1f90   :  { %v8642_v29 = vpop.f32.mrf.mxu0 }
0x1f92   :  { %v4218_v17 = vpop.f32.mrf.mxu0 }
0x1f93   :  { %v4224_v30 = vsel %vm166_vm2, %v4218_v17, -inf }
0x1f94   :  { %4225 = vmax.xlane.f32.xlu0 %v4224_v30  ;;  %v8653_v35 = vpop.f32.mrf.mxu0 }
0x1f96   :  { %v4221_v47 = vpop.f32.mrf.mxu0 }
0x1f98   :  { %v8654_v20 = vpop.f32.mrf.mxu0 }
0x1f9a   :  { %v4328_v38 = vpop.f32.mrf.mxu0 }
0x1f9b   :  { %v4334_v16 = vsel %vm166_vm2, %v4328_v38, -inf }
0x1f9c   :  { %4335 = vmax.xlane.f32.xlu1 %v4334_v16  ;;  %v8665_v39 = vpop.f32.mrf.mxu0 }
0x1f9e   :  { %v4331_v43 = vpop.f32.mrf.mxu0 }
0x1fa0   :  { %v8666_v48 = vpop.f32.mrf.mxu0 }
0x1fa2   :  { %v4451_v27 = vpop.f32.mrf.mxu0 }
0x1fa3   :  { %v4457_v37 = vsel %vm166_vm2, %v4451_v27, -inf  ;;  %v4004_v2 = vpop.xlane.xlu1 %4003 }
0x1fa4   :  { %4458 = vmax.xlane.f32.xlu0 %v4457_v37  ;;  %v8677_v12 = vpop.f32.mrf.mxu0  ;;  %v4005_v3 = vsub.f32 %v3996_v7, %v4004_v2 }
0x1fa6   :  { %v4454_v45 = vpop.f32.mrf.mxu0  ;;  %v4006_v5 = vmul.f32 1.442695, %v4005_v3 }
0x1fa8   :  { %v8678_v52 = vpop.f32.mrf.mxu0  ;;  %9315 = vpow2.f32 %v4006_v5 }
0x1faa   :  { %v10571_v53 = vpop.f32.mrf.mxu0 }
0x1fab   :  { %v4567_v4 = vsel %vm166_vm2, %v10571_v53, -inf }
0x1fac   :  { %4568 = vmax.xlane.f32.xlu1 %v4567_v4  ;;  %v8689_v54 = vpop.f32.mrf.mxu0 }
0x1fae   :  { %v4564_v36 = vpop.f32.mrf.mxu0 }
0x1fb0   :  { %v8690_v44 = vpop.f32.mrf.mxu0 }
0x1fb2   :  { %v4671_v63 = vpop.f32.mrf.mxu0 }
0x1fb3   :  { %v4677_v56 = vsel %vm166_vm2, %v4671_v63, -inf }
0x1fb4   :  { %4678 = vmax.xlane.f32.xlu0 %v4677_v56  ;;  %v8701_v58 = vpop.f32.mrf.mxu0 }
0x1fb5   :  { %v10584_v10 = vpop.eup %9315 }
0x1fb6   :  { %v4674_v15 = vpop.f32.mrf.mxu0  ;;  %v4008_v9 = vsel %vm166_vm2, %v10584_v10, 0.0 }
0x1fb8   :  { %v8702_v50 = vpop.f32.mrf.mxu0 }
0x1fba   :  { %v10576_v59 = vpop.f32.mrf.mxu0 }
0x1fbb   :  { %v4787_v8 = vsel %vm166_vm2, %v10576_v59, -inf }
0x1fbc   :  { %v8713_v61 = vpop.f32.mrf.mxu0 }
0x1fbd   :  { %4126 = vrot.lane.b32.xlu1 %v10501_v49, %s9514_s21 }
0x1fbe   :  { %v4784_v62 = vpop.f32.mrf.mxu0 }
0x1fc0   :  { %v8714_v1 = vpop.f32.mrf.mxu0 }
0x1fca   :  { %4015 = vrot.lane.b32.xlu0 %v10501_v49, %s9513_s20 }
0x1fe1   :  { %4788 = vmax.xlane.f32.xlu1 %v4787_v8 }
0x1fe9   :  { %4009 = vadd.xlane.f32.xlu0 %v4008_v9 }
0x1ff2   :  { %4236 = vrot.lane.b32.xlu1 %v10501_v49, %s11347_s25 }
0x2015   :  { %v4116_v40 = vpop.xlane.xlu0 %4115 }
0x2016   :  { %v4117_v41 = vsub.f32 %v4108_v23, %v4116_v40 }
0x2018   :  { %v4118_v6 = vmul.f32 1.442695, %v4117_v41 }
0x201a   :  { %9317 = vpow2.f32 %v4118_v6 }
0x201d   :  { %v4226_v51 = vpop.xlane.xlu0 %4225 }
0x201e   :  { %v4227_v13 = vsub.f32 %v4218_v17, %v4226_v51 }
0x2020   :  { %v4228_v7 = vmul.f32 1.442695, %v4227_v13 }
0x2022   :  { %9319 = vpow2.f32 %v4228_v7 }
0x2025   :  { %v4336_v18 = vpop.xlane.xlu1 %4335 }
0x2026   :  { %v4337_v19 = vsub.f32 %v4328_v38, %v4336_v18 }
0x2027   :  { %v10590_v21 = vpop.eup %9317 }
0x2028   :  { %v4338_v22 = vmul.f32 1.442695, %v4337_v19  ;;  %v4120_v24 = vsel %vm166_vm2, %v10590_v21, 0.0 }
0x2029   :  { %4121 = vadd.xlane.f32.xlu1 %v4120_v24 }
0x202a   :  { %9321 = vpow2.f32 %v4338_v22 }
0x202d   :  { %v4459_v25 = vpop.xlane.xlu0 %4458 }
0x202e   :  { %v4460_v26 = vsub.f32 %v4451_v27, %v4459_v25 }
0x202f   :  { %v10594_v29 = vpop.eup %9319 }
0x2030   :  { %v4461_v23 = vmul.f32 1.442695, %v4460_v26  ;;  %v4230_v17 = vsel %vm166_vm2, %v10594_v29, 0.0 }
0x2031   :  { %4231 = vadd.xlane.f32.xlu0 %v4230_v17 }
0x2032   :  { %9323 = vpow2.f32 %v4461_v23 }
0x2035   :  { %v4569_v27 = vpop.xlane.xlu1 %4568 }
0x2036   :  { %v4570_v37 = vsub.f32 %v10571_v53, %v4569_v27 }
0x2037   :  { %v10598_v30 = vpop.eup %9321 }
0x2038   :  { %v4340_v35 = vsel %vm166_vm2, %v10598_v30, 0.0  ;;  %v4571_v52 = vmul.f32 1.442695, %v4570_v37 }
0x2039   :  { %4341 = vadd.xlane.f32.xlu1 %v4340_v35  ;;  %v4127_v36 = vpop.permute.xlu1 %4126 }
0x203a   :  { %v4132_v61 = vsel %vm230_vm3, %v4127_v36, 0 }
0x203d   :  { %v4679_v47 = vpop.xlane.xlu0 %4678 }
0x203e   :  { %v4680_v20 = vsub.f32 %v4671_v63, %v4679_v47 }
0x203f   :  { %v10602_v38 = vpop.eup %9323 }
0x2040   :  { %v4681_v16 = vmul.f32 1.442695, %v4680_v20  ;;  %v4463_v39 = vsel %vm166_vm2, %v10602_v38, 0.0 }
0x2041   :  { %v4016_v43 = vpop.permute.xlu0 %4015  ;;  %4464 = vadd.xlane.f32.xlu1 %v4463_v39 }
0x2042   :  { %9325 = vpow2.f32 %v4681_v16  ;;  %v4021_v48 = vsel %vm230_vm3, %v4016_v43, 0 }
0x2043   :  { %8632 = vmatpush3.bf16.msra.mxu1 %v4021_v48  ;;  %9327 = vpow2.f32 %v4571_v52 }
0x2044   :  { %8643 = vmatprep.subr.bf16.mxu1 %v9510_v0 }
0x2047   :  { %4346 = vrot.lane.b32.xlu0 %v10501_v49, %s11361_s5 }
0x204f   :  { %v10611_v12 = vpop.eup %9325 }
0x2050   :  { %v4683_v45 = vsel %vm166_vm2, %v10611_v12, 0.0  ;;  %v10615_v4 = vpop.eup %9327 }
0x2051   :  { %4684 = vadd.xlane.f32.xlu1 %v4683_v45  ;;  %v4573_v54 = vsel %vm166_vm2, %v10615_v4, 0.0 }
0x2066   :  { %4574 = vadd.xlane.f32.xlu0 %v4573_v54 }
0x206a   :  { %v4789_v44 = vpop.xlane.xlu1 %4788 }
0x206b   :  { %v4790_v49 = vsub.f32 %v10576_v59, %v4789_v44 }
0x206d   :  { %v4791_v63 = vmul.f32 1.442695, %v4790_v49 }
0x206e   :  { %v4237_v62 = vpop.permute.xlu1 %4236 }
0x206f   :  { %9329 = vpow2.f32 %v4791_v63  ;;  %v4242_v9 = vsel %vm230_vm3, %v4237_v62, 0 }
0x2072   :  { %v4010_v53 = vpop.xlane.xlu0 %4009 }
0x2073   :  { %9331 = vrcp.f32 %v4010_v53 }
0x207c   :  { %v10620_v56 = vpop.eup %9329  ;;  %4579 = vrot.lane.b32.xlu0 %v10520_v60, %s9514_s21 }
0x207d   :  { %v4793_v58 = vsel %vm166_vm2, %v10620_v56, 0.0 }
0x207e   :  { %4794 = vadd.xlane.f32.xlu1 %v4793_v58 }
0x2080   :  { %v9332_v15 = vpop.eup %9331  ;;  %4689 = vrot.lane.b32.xlu0 %v10520_v60, %s11347_s25 }
0x2081   :  { %v4012_v50 = vmul.f32 %v9332_v15, %v10584_v10 }
0x2083   :  { %v4013_v59 = vpack.c.bf16 %v4012_v50, %v4012_v50 }
0x2084   :  { %4799 = vrot.lane.b32.xlu0 %v10520_v60, %s11361_s5 }
0x2085   :  { %8634 = vmatmul.mubr.msk.bf16.vlgmr.msra.gmra.mxu1 %vm166_vm2, %v4013_v59 }
0x2086   :  { %8644 = vmatpush3.bf16.msra.mxu1 %v4132_v61  ;;  %8645 = vmatprep.mubr.msk.bf16.mxu1 %vm9511_vm0, %v9510_v0 }
0x2087   :  { %8655 = vmatprep.subr.bf16.mxu1 %v9510_v0 }
0x208f   :  { %4469 = vrot.lane.b32.xlu1 %v10520_v60, %s9513_s20 }
0x20b2   :  { %v4122_v1 = vpop.xlane.xlu1 %4121 }
0x20b3   :  { %9333 = vrcp.f32 %v4122_v1 }
0x20ba   :  { %v4232_v2 = vpop.xlane.xlu0 %4231 }
0x20bb   :  { %9335 = vrcp.f32 %v4232_v2 }
0x20be   :  { %v4347_v41 = vpop.permute.xlu0 %4346 }
0x20bf   :  { %v4352_v51 = vsel %vm230_vm3, %v4347_v41, 0 }
0x20c0   :  { %v9334_v3 = vpop.eup %9333 }
0x20c1   :  { %v4124_v5 = vmul.f32 %v9334_v3, %v10590_v21 }
0x20c2   :  { %v4342_v8 = vpop.xlane.xlu1 %4341 }
0x20c3   :  { %v4125_v10 = vpack.c.bf16 %v4124_v5, %v4124_v5  ;;  %9337 = vrcp.f32 %v4342_v8 }
0x20c5   :  { %8646 = vmatmul.mubr.msk.bf16.vlgmr.msra.gmra.mxu1 %vm166_vm2, %v4125_v10 }
0x20c6   :  { %8656 = vmatpush3.bf16.msra.mxu1 %v4242_v9  ;;  %8657 = vmatprep.mubr.msk.bf16.mxu1 %vm9511_vm0, %v9510_v0 }
0x20c7   :  { %8667 = vmatprep.subr.bf16.mxu1 %v9510_v0 }
0x20c8   :  { %v9336_v60 = vpop.eup %9335 }
0x20c9   :  { %v4234_v40 = vmul.f32 %v9336_v60, %v10594_v29 }
0x20ca   :  { %v4465_v19 = vpop.xlane.xlu1 %4464 }
0x20cb   :  { %v4235_v6 = vpack.c.bf16 %v4234_v40, %v4234_v40  ;;  %9339 = vrcp.f32 %v4465_v19  ;;  %v9163_v40 = vld [vmem:[%s11319_s12 + $0x8] sm:$0xff]  }
0x20cc   :  { %8722 = vmatpush3.bf16.msra.mxu0 %v9163_v40 }
0x20cd   :  { %8658 = vmatmul.mubr.msk.bf16.vlgmr.msra.gmra.mxu1 %vm166_vm2, %v4235_v6  ;;  %8723 = vmatprep.subr.bf16.mxu0 %v9510_v0 }
0x20ce   :  { %8668 = vmatpush3.bf16.msra.mxu1 %v4352_v51  ;;  %8669 = vmatprep.mubr.msk.bf16.mxu1 %vm9511_vm0, %v9510_v0 }
0x20cf   :  { %8679 = vmatprep.subr.bf16.mxu1 %v9510_v0 }
0x20d0   :  { %v9338_v13 = vpop.eup %9337 }
0x20d1   :  { %v4344_v7 = vmul.f32 %v9338_v13, %v10598_v30 }
0x20d3   :  { %v4345_v18 = vpack.c.bf16 %v4344_v7, %v4344_v7  ;;  %v9164_v7 = vld [vmem:[%s11319_s12] sm:$0xff]  }
0x20d4   :  { %8724 = vmatpush3.bf16.msra.mxu0 %v9164_v7  ;;  %v9170_v7 = vld [vmem:[%s11321_s14 + $0x20] sm:$0xff]  }
0x20d5   :  { %8670 = vmatmul.mubr.msk.bf16.vlgmr.msra.gmra.mxu1 %vm166_vm2, %v4345_v18  ;;  %8737 = vmatprep.subr.bf16.mxu0 %v9510_v0 }
0x20d6   :  { %8681 = vmatprep.mubr.msk.bf16.mxu1 %vm9511_vm0, %v9510_v0 }
0x20d8   :  { %v9340_v24 = vpop.eup %9339 }
0x20d9   :  { %v4467_v26 = vmul.f32 %v9340_v24, %v10602_v38 }
0x20da   :  { %v4685_v22 = vpop.xlane.xlu1 %4684 }
0x20db   :  { %v4468_v30 = vpack.c.bf16 %v4467_v26, %v4467_v26 }
0x20ef   :  { %v4575_v21 = vpop.xlane.xlu0 %4574 }
0x20f0   :  { %9341 = vrcp.f32 %v4575_v21 }
0x20f1   :  { %9343 = vrcp.f32 %v4685_v22 }
0x20f3   :  { %v4580_v17 = vpop.permute.xlu0 %4579 }
0x20f4   :  { %v4585_v47 = vsel %vm230_vm3, %v4580_v17, 0 }
0x20f7   :  { %v4690_v38 = vpop.permute.xlu0 %4689 }
0x20f8   :  { %v4695_v43 = vsel %vm230_vm3, %v4690_v38, 0 }
0x20fb   :  { %v4800_v27 = vpop.permute.xlu0 %4799 }
0x20fc   :  { %v4805_v52 = vsel %vm230_vm3, %v4800_v27, 0 }
0x20fd   :  { %v9342_v35 = vpop.eup %9341 }
0x20fe   :  { %v4577_v20 = vmul.f32 %v9342_v35, %v10615_v4  ;;  %v9344_v39 = vpop.eup %9343 }
0x20ff   :  { %v4687_v48 = vmul.f32 %v9344_v39, %v10611_v12 }
0x2100   :  { %v4578_v16 = vpack.c.bf16 %v4577_v20, %v4577_v20 }
0x2101   :  { %v4688_v37 = vpack.c.bf16 %v4687_v48, %v4687_v48 }
0x2107   :  { %v4795_v25 = vpop.xlane.xlu1 %4794 }
0x2108   :  { %9345 = vrcp.f32 %v4795_v25 }
0x210b   :  { %v4470_v29 = vpop.permute.xlu1 %4469 }
0x210c   :  { %v4475_v23 = vsel %vm230_vm3, %v4470_v29, 0 }
0x210d   :  { %8680 = vmatpush3.bf16.msra.mxu1 %v4475_v23 }
0x210e   :  { %8691 = vmatprep.subr.bf16.mxu1 %v9510_v0 }
0x2110   :  { %8682 = vmatmul.mubr.msk.bf16.vlgmr.msra.gmra.mxu1 %vm166_vm2, %v4468_v30 }
0x2111   :  { %8692 = vmatpush3.bf16.msra.mxu1 %v4585_v47  ;;  %8693 = vmatprep.mubr.msk.bf16.mxu1 %vm9511_vm0, %v9510_v0 }
0x2112   :  { %8703 = vmatprep.subr.bf16.mxu1 %v9510_v0 }
0x2115   :  { %v9346_v45 = vpop.eup %9345 }
0x2116   :  { %v4797_v4 = vmul.f32 %v9346_v45, %v10620_v56 }
0x2118   :  { %8694 = vmatmul.mubr.msk.bf16.vlgmr.msra.gmra.mxu1 %vm166_vm2, %v4578_v16  ;;  %v4798_v54 = vpack.c.bf16 %v4797_v4, %v4797_v4 }
0x2119   :  { %8704 = vmatpush3.bf16.msra.mxu1 %v4695_v43  ;;  %8705 = vmatprep.mubr.msk.bf16.mxu1 %vm9511_vm0, %v9510_v0 }
0x211a   :  { %8715 = vmatprep.subr.bf16.mxu1 %v9510_v0 }
0x2120   :  { %8706 = vmatmul.mubr.msk.bf16.vlgmr.msra.gmra.mxu1 %vm166_vm2, %v4688_v37 }
0x2121   :  { %8716 = vmatpush3.bf16.msra.mxu1 %v4805_v52  ;;  %8717 = vmatprep.mubr.msk.bf16.mxu1 %vm9511_vm0, %v9510_v0 }
0x2122   :  { %8729 = vmatprep.subr.bf16.mxu1 %v9510_v0 }
0x2128   :  { %8718 = vmatmul.mubr.msk.bf16.vlgmr.msra.gmra.mxu1 %vm166_vm2, %v4798_v54 }
0x2129   :  { %8733 = vmatprep.mubr.msk.bf16.mxu1 %vm9511_vm0, %v9510_v0 }
0x2145   :  { %v4057_v12 = vpop.f32.mrf.mxu1 }
0x2147   :  { %v8635_v36 = vpop.f32.mrf.mxu1 }
0x2149   :  { %v4060_v44 = vpop.f32.mrf.mxu1 }
0x214b   :  { %v8636_v49 = vpop.f32.mrf.mxu1 }
0x2185   :  { %v4168_v63 = vpop.f32.mrf.mxu1 }
0x2187   :  { %v8647_v53 = vpop.f32.mrf.mxu1 }
0x2189   :  { %v4171_v58 = vpop.f32.mrf.mxu1 }
0x218b   :  { %v8648_v15 = vpop.f32.mrf.mxu1 }
0x218d   :  { %v4278_v50 = vpop.f32.mrf.mxu1 }
0x218f   :  { %v8659_v59 = vpop.f32.mrf.mxu1 }
0x2191   :  { %v4281_v61 = vpop.f32.mrf.mxu1 }
0x2193   :  { %v8660_v56 = vpop.f32.mrf.mxu1 }
0x2195   :  { %v4388_v62 = vpop.f32.mrf.mxu1 }
0x2197   :  { %v8671_v1 = vpop.f32.mrf.mxu1 }
0x2199   :  { %v4391_v2 = vpop.f32.mrf.mxu1 }
0x219b   :  { %v8672_v3 = vpop.f32.mrf.mxu1 }
0x21d0   :  { %v4511_v5 = vpop.f32.mrf.mxu1 }
0x21d2   :  { %v8683_v8 = vpop.f32.mrf.mxu1 }
0x21d4   :  { %v4514_v10 = vpop.f32.mrf.mxu1 }
0x21d6   :  { %v8684_v9 = vpop.f32.mrf.mxu1 }
0x21d8   :  { %v4621_v60 = vpop.f32.mrf.mxu1 }
0x21d9   :  { %v9082_v41 = vpack.i.bf16 %v4621_v60, %v4168_v63 }
0x21da   :  { %v8695_v6 = vpop.f32.mrf.mxu1 }
0x21db   :  { %9083 = vrot.lane.b32.xlu1 %v9082_v41, %s11356_s28  ;;  %v9166_v41 = vld [vmem:[%s11320_s13] sm:$0xff]   ;;  %v9167_v6 = vld [vmem:[%s11321_s14 + $0x38] sm:$0xff]  }
0x21dc   :  { %v4624_v51 = vpop.f32.mrf.mxu1 }
0x21dd   :  { %v9168_v51 = vld [vmem:[%s11321_s14 + $0x30] sm:$0xff]  }
0x21de   :  { %v8696_v13 = vpop.f32.mrf.mxu1 }
0x21df   :  { %v9169_v13 = vld [vmem:[%s11321_s14 + $0x28] sm:$0xff]  }
0x21e0   :  { %v4731_v18 = vpop.f32.mrf.mxu1 }
0x21e1   :  { %v9087_v19 = vpack.i.bf16 %v4731_v18, %v4278_v50  ;;  %v9171_v18 = vld [vmem:[%s11321_s14 + $0x18] sm:$0xff]  }
0x21e2   :  { %v8707_v21 = vpop.f32.mrf.mxu1 }
0x21e3   :  { %9088 = vrot.lane.b32.xlu0 %v9087_v19, %s11357_s0 }
0x21e4   :  { %v4734_v22 = vpop.f32.mrf.mxu1 }
0x21e6   :  { %v8708_v24 = vpop.f32.mrf.mxu1 }
0x21e8   :  { %v4841_v25 = vpop.f32.mrf.mxu1 }
0x21e9   :  { %v9092_v26 = vpack.i.bf16 %v4841_v25, %v4388_v62 }
0x21ea   :  { %v8719_v29 = vpop.f32.mrf.mxu1 }
0x21eb   :  { %9093 = vrot.lane.b32.xlu1 %v9092_v26, %s11358_s18 }
0x21ec   :  { %v4844_v23 = vpop.f32.mrf.mxu1 }
0x21ee   :  { %v8720_v17 = vpop.f32.mrf.mxu1 }
0x224d   :  { %v9084_v30 = vpop.permute.xlu1 %9083 }
0x224e   :  { %v9086_v47 = vunpack.i.h.bf16 %v9084_v30  ;;  %v9085_v20 = vunpack.i.l.bf16 %v9084_v30  ;;  %v10740_v30 = vld [vmem:[%s11322_s15 + $0x8] sm:$0x1f] }
0x2250   :  { %v4859_v43 = vsel %vm166_vm2, %v4511_v5, %v9086_v47  ;;  %v4406_v48 = vsel %vm166_vm2, %v4057_v12, %v9085_v20  ;;  %v9437_v12 = vld [vmem:[%s11322_s15] sm:$0xff] }
0x2251   :  { %v4866_v44 = vrot.slane %v9437_v12, %v9944_v28  ;;  %v4954_v23 = vrot.slane %v9437_v12, %v9949_v33 }
0x2255   :  { %v9089_v35 = vpop.permute.xlu0 %9088 }
0x2256   :  { %v9091_v38 = vunpack.i.h.bf16 %v9089_v35  ;;  %v9090_v16 = vunpack.i.l.bf16 %v9089_v35 }
0x2258   :  { %v4860_v45 = vsel %vm617_vm4, %v4859_v43, %v9091_v38  ;;  %v4407_v52 = vsel %vm617_vm4, %v4406_v48, %v9090_v16  ;;  %v4960_v38 = vrot.slane %v10740_v30, %v9663_v11 }
0x225d   :  { %v9094_v39 = vpop.permute.xlu1 %9093 }
0x225e   :  { %v9096_v27 = vunpack.i.h.bf16 %v9094_v39  ;;  %v9095_v37 = vunpack.i.l.bf16 %v9094_v39 }
0x2260   :  { %v4861_v4 = vsel %vm619_vm5, %v4860_v45, %v9096_v27  ;;  %v4408_v54 = vsel %vm619_vm5, %v4407_v52, %v9095_v37  ;;  %v9172_v27 = vld [vmem:[%s11321_s14 + $0x10] sm:$0xff]   ;;  %v9173_v37 = vld [vmem:[%s11321_s14 + $0x8] sm:$0xff]   ;;  %v9174_v45 = vld [vmem:[%s11321_s14] sm:$0xff]   ;;  %v4987_v52 = vrot.slane %v10740_v30, %v9856_v55 }
0x2261   :  { %v4862_v36 = vpack.c.bf16 %v4861_v4, %v4408_v54 }
0x2263   :  { %8726 = vmatmul.mubr.msk.bf16.vlgmr.msra.gmra.mxu0 %vm117_vm1, %v4862_v36 }
0x2264   :  { %8753 = vmatprep.mubr.msk.bf16.mxu0 %vm9511_vm0, %v9510_v0  ;;  %8738 = vmatpush3.bf16.msra.mxu0 %v9167_v6 }
0x2265   :  { %8739 = vmatprep.subr.bf16.mxu0 %v9510_v0 }
0x2268   :  { %8740 = vmatpush3.bf16.msra.mxu0 %v9168_v51 }
0x2269   :  { %8741 = vmatprep.subr.bf16.mxu0 %v9510_v0 }
0x226c   :  { %8742 = vmatpush3.bf16.msra.mxu0 %v9169_v13 }
0x226d   :  { %8743 = vmatprep.subr.bf16.mxu0 %v9510_v0 }
0x2270   :  { %8744 = vmatpush3.bf16.msra.mxu0 %v9170_v7  ;;  %v9175_v7 = vld [vmem:[%s11315_s8 + $0x18] sm:$0xff]  }
0x2271   :  { %8745 = vmatprep.subr.bf16.mxu0 %v9510_v0 }
0x2274   :  { %8746 = vmatpush3.bf16.msra.mxu0 %v9171_v18  ;;  %v9176_v18 = vld [vmem:[%s11315_s8 + $0x10] sm:$0xff]  }
0x2275   :  { %8747 = vmatprep.subr.bf16.mxu0 %v9510_v0 }
0x2278   :  { %8748 = vmatpush3.bf16.msra.mxu0 %v9172_v27  ;;  %v10793_v27 = vld [vmem:[%s11322_s15 + $0x10] sm:$0xff] }
0x2279   :  { %8749 = vmatprep.subr.bf16.mxu0 %v9510_v0 }
0x227c   :  { %8750 = vmatpush3.bf16.msra.mxu0 %v9173_v37 }
0x227d   :  { %8751 = vmatprep.subr.bf16.mxu0 %v9510_v0 }
0x2280   :  { %8752 = vmatpush3.bf16.msra.mxu0 %v9174_v45 }
0x2281   :  { %8783 = vmatprep.subr.bf16.mxu0 %v9510_v0 }
0x2323   :  { %v4916_v49 = vpop.f32.mrf.mxu0 }
0x2324   :  { %v4917_v63 = vadd.f32 %v4916_v49, %v4866_v44 }
0x2325   :  { %v8727_v53 = vpop.f32.mrf.mxu0 }
0x2326   :  { %v4923_v58 = vadd.f32 %v4917_v63, %v10486_v42 }
0x2327   :  { %v4919_v15 = vpop.f32.mrf.mxu0 }
0x2328   :  { %v4920_v50 = vadd.f32 %v4919_v15, %v4866_v44  ;;  %v4925_v59 = vsel %vm117_vm1, %v4923_v58, 0.0  ;;  %v5050_v15 = vrot.slane %v10740_v30, %v9895_v31 }
0x2329   :  { %4926 = vadd.xlane.f32.xlu0 %v4925_v59  ;;  %v8728_v61 = vpop.f32.mrf.mxu0 }
0x232a   :  { %v4924_v56 = vadd.f32 %v4920_v50, %v10488_v14  ;;  %v9165_v14 = vld [vmem:[%s11320_s13 + $0x8] sm:$0xff]  }
0x232b   :  { %8730 = vmatpush3.bf16.msra.mxu1 %v9165_v14 }
0x232c   :  { %v4928_v62 = vsel %vm117_vm1, %v4924_v56, 0.0  ;;  %8731 = vmatprep.subr.bf16.mxu1 %v9510_v0 }
0x232d   :  { %4929 = vadd.xlane.f32.xlu1 %v4928_v62 }
0x232f   :  { %8732 = vmatpush3.bf16.msra.mxu1 %v9166_v41 }
0x2330   :  { %8757 = vmatprep.subr.bf16.mxu1 %v9510_v0 }
0x23b2   :  { %v4927_v1 = vpop.xlane.xlu0 %4926 }
0x23b3   :  { %v4931_v2 = vmul.f32 0.03125, %v4927_v1 }
0x23b5   :  { %v4933_v3 = vsub.f32 %v4923_v58, %v4931_v2 }
0x23b6   :  { %v4930_v5 = vpop.xlane.xlu1 %4929 }
0x23b7   :  { %v4932_v8 = vmul.f32 0.03125, %v4930_v5  ;;  %v4935_v10 = vmul.f32 %v4933_v3, %v4933_v3 }
0x23b9   :  { %v4934_v9 = vsub.f32 %v4924_v56, %v4932_v8  ;;  %v4937_v42 = vsel %vm117_vm1, %v4935_v10, 0.0 }
0x23ba   :  { %4938 = vadd.xlane.f32.xlu0 %v4937_v42 }
0x23bb   :  { %v4936_v60 = vmul.f32 %v4934_v9, %v4934_v9 }
0x23bd   :  { %v4940_v40 = vsel %vm117_vm1, %v4936_v60, 0.0 }
0x23be   :  { %4941 = vadd.xlane.f32.xlu0 %v4940_v40 }
0x2443   :  { %v4939_v19 = vpop.xlane.xlu0 %4938 }
0x2444   :  { %v4943_v21 = vmul.f32 0.03125, %v4939_v19 }
0x2446   :  { %v4945_v22 = vadd.f32 1e-05, %v4943_v21 }
0x2447   :  { %v4942_v24 = vpop.xlane.xlu0 %4941 }
0x2448   :  { %9347 = vrsqrt.f32 %v4945_v22  ;;  %v4944_v25 = vmul.f32 0.03125, %v4942_v24 }
0x244a   :  { %v4946_v26 = vadd.f32 1e-05, %v4944_v25 }
0x244c   :  { %9349 = vrsqrt.f32 %v4946_v26 }
0x2455   :  { %v9348_v29 = vpop.eup %9347 }
0x2456   :  { %v4949_v17 = vmul.f32 %v9348_v29, %v4933_v3 }
0x2458   :  { %v4955_v47 = vmul.f32 %v4954_v23, %v4949_v17 }
0x2459   :  { %v9350_v35 = vpop.eup %9349 }
0x245a   :  { %v4950_v20 = vmul.f32 %v9350_v35, %v4934_v9  ;;  %v4961_v39 = vadd.f32 %v4960_v38, %v4955_v47 }
0x245c   :  { %v4956_v16 = vmul.f32 %v4954_v23, %v4950_v20  ;;  %v5171_v23 = vrot.slane %v10740_v30, %v9900_v34 }
0x245e   :  { %v4962_v43 = vadd.f32 %v4960_v38, %v4956_v16  ;;  %v5177_v38 = vrot.slane %v10740_v30, %v9920_v46  ;;  %v5197_v30 = vrot.slane %v10793_v27, %v9663_v11 }
0x2460   :  { %v4983_v48 = vpack.c.bf16 %v4962_v43, %v4961_v39 }
0x2462   :  { %8734 = vmatmul.mubr.msk.bf16.vlgmr.msra.gmra.mxu1 %vm117_vm1, %v4983_v48 }
0x2463   :  { %8761 = vmatprep.mubr.msk.bf16.mxu1 %vm9511_vm0, %v9510_v0  ;;  %8758 = vmatpush3.bf16.msra.mxu1 %v9175_v7 }
0x2464   :  { %8759 = vmatprep.subr.bf16.mxu1 %v9510_v0 }
0x2467   :  { %8760 = vmatpush3.bf16.msra.mxu1 %v9176_v18 }
0x2468   :  { %8765 = vmatprep.subr.bf16.mxu1 %v9510_v0 }
0x2522   :  { %v5037_v4 = vpop.f32.mrf.mxu1 }
0x2523   :  { %v5038_v36 = vadd.f32 %v5037_v4, %v4987_v52 }
0x2524   :  { %v8735_v54 = vpop.f32.mrf.mxu1 }
0x2525   :  { %v5044_v63 = vmax.f32 %v5038_v36, 0.0 }
0x2526   :  { %v5040_v12 = vpop.f32.mrf.mxu1 }
0x2527   :  { %v5041_v44 = vadd.f32 %v5040_v12, %v4987_v52 }
0x2528   :  { %v8736_v49 = vpop.f32.mrf.mxu1 }
0x2529   :  { %v5045_v53 = vmax.f32 %v5041_v44, 0.0 }
0x252b   :  { %v5046_v58 = vpack.c.bf16 %v5045_v53, %v5044_v63 }
0x252d   :  { %8754 = vmatmul.mubr.bf16.vlgmr.msra.gmra.mxu0 %v5046_v58 }
0x252e   :  { %8785 = vmatprep.mubr.msk.bf16.mxu0 %vm9511_vm0, %v9510_v0 }
0x25ed   :  { %v5133_v50 = vpop.f32.mrf.mxu0 }
0x25ee   :  { %v5134_v59 = vadd.f32 %v5133_v50, %v5050_v15 }
0x25ef   :  { %v8755_v61 = vpop.f32.mrf.mxu0 }
0x25f0   :  { %v5140_v56 = vadd.f32 %v5134_v59, %v4961_v39 }
0x25f1   :  { %v5136_v62 = vpop.f32.mrf.mxu0 }
0x25f2   :  { %v5137_v1 = vadd.f32 %v5136_v62, %v5050_v15  ;;  %v5142_v2 = vsel %vm117_vm1, %v5140_v56, 0.0 }
0x25f3   :  { %5143 = vadd.xlane.f32.xlu1 %v5142_v2  ;;  %v8756_v3 = vpop.f32.mrf.mxu0 }
0x25f4   :  { %v5141_v5 = vadd.f32 %v5137_v1, %v4962_v43 }
0x25f6   :  { %v5145_v8 = vsel %vm117_vm1, %v5141_v5, 0.0 }
0x25f7   :  { %5146 = vadd.xlane.f32.xlu0 %v5145_v8 }
0x267c   :  { %v5144_v10 = vpop.xlane.xlu1 %5143 }
0x267d   :  { %v5148_v9 = vmul.f32 0.03125, %v5144_v10 }
0x267f   :  { %v5150_v42 = vsub.f32 %v5140_v56, %v5148_v9 }
0x2680   :  { %v5147_v60 = vpop.xlane.xlu0 %5146 }
0x2681   :  { %v5149_v40 = vmul.f32 0.03125, %v5147_v60  ;;  %v5152_v14 = vmul.f32 %v5150_v42, %v5150_v42 }
0x2683   :  { %v5151_v41 = vsub.f32 %v5141_v5, %v5149_v40  ;;  %v5154_v6 = vsel %vm117_vm1, %v5152_v14, 0.0 }
0x2684   :  { %5155 = vadd.xlane.f32.xlu1 %v5154_v6 }
0x2685   :  { %v5153_v51 = vmul.f32 %v5151_v41, %v5151_v41 }
0x2687   :  { %v5157_v13 = vsel %vm117_vm1, %v5153_v51, 0.0 }
0x2688   :  { %5158 = vadd.xlane.f32.xlu0 %v5157_v13 }
0x270d   :  { %v5156_v19 = vpop.xlane.xlu1 %5155 }
0x270e   :  { %v5160_v21 = vmul.f32 0.03125, %v5156_v19 }
0x2710   :  { %v5162_v22 = vadd.f32 1e-05, %v5160_v21 }
0x2711   :  { %v5159_v24 = vpop.xlane.xlu0 %5158 }
0x2712   :  { %9351 = vrsqrt.f32 %v5162_v22  ;;  %v5161_v25 = vmul.f32 0.03125, %v5159_v24 }
0x2714   :  { %v5163_v26 = vadd.f32 1e-05, %v5161_v25 }
0x2716   :  { %9353 = vrsqrt.f32 %v5163_v26 }
0x271f   :  { %v9352_v29 = vpop.eup %9351 }
0x2720   :  { %v5166_v17 = vmul.f32 %v9352_v29, %v5150_v42 }
0x2722   :  { %v5172_v47 = vmul.f32 %v5171_v23, %v5166_v17 }
0x2723   :  { %v9354_v35 = vpop.eup %9353 }
0x2724   :  { %v5167_v20 = vmul.f32 %v9354_v35, %v5151_v41  ;;  %v10781_v39 = vadd.f32 %v5177_v38, %v5172_v47 }
0x2726   :  { %v5173_v16 = vmul.f32 %v5171_v23, %v5167_v20 }
0x2728   :  { %v10783_v43 = vadd.f32 %v5177_v38, %v5173_v16 }
0x272a   :  { %v5193_v48 = vpack.c.bf16 %v10783_v43, %v10781_v39 }
0x272c   :  { %8762 = vmatmul.mubr.msk.bf16.vlgmr.msra.gmra.mxu1 %vm117_vm1, %v5193_v48 }
0x272d   :  { %8767 = vmatprep.mubr.msk.bf16.mxu1 %vm9511_vm0, %v9510_v0 }
0x27ec   :  { %v5247_v37 = vpop.f32.mrf.mxu1 }
0x27ed   :  { %v5248_v4 = vadd.f32 %v5247_v37, %v5197_v30 }
0x27ee   :  { %v8763_v45 = vpop.f32.mrf.mxu1 }
0x27f0   :  { %v5250_v52 = vpop.f32.mrf.mxu1 }
0x27f1   :  { %v5251_v54 = vadd.f32 %v5250_v52, %v5197_v30 }
0x27f2   :  { %v8764_v36 = vpop.f32.mrf.mxu1 }
0x27f3   :  { %v10797_v12 = vpack.c.bf16 %v5251_v54, %v5248_v4 }
0x27f5   :  { %5256 = vrot.lane.b32.xlu1 %v10797_v12, %s9513_s20  ;;  %v10812_v44 = vrot.slane %v10797_v12, 4 }
0x27f9   :  { %5366 = vrot.lane.b32.xlu1 %v10797_v12, %s9514_s21 }
0x27fd   :  { %5364 = vrot.lane.b32.xlu1 %v10797_v12, %s9518_s24 }
0x2801   :  { %5476 = vrot.lane.b32.xlu1 %v10797_v12, %s11363_s22 }
0x2805   :  { %5474 = vrot.lane.b32.xlu1 %v10797_v12, %s11359_s6 }
0x2809   :  { %5584 = vrot.lane.b32.xlu1 %v10797_v12, %s11360_s19 }
0x280d   :  { %5820 = vrot.lane.b32.xlu1 %v10812_v44, %s9514_s21 }
0x2811   :  { %5930 = vrot.lane.b32.xlu1 %v10812_v44, %s11363_s22 }
0x2815   :  { %6040 = vrot.lane.b32.xlu1 %v10812_v44, %s11361_s5 }
0x2867   :  { %v5257_v49 = vpop.permute.xlu1 %5256 }
0x2868   :  { %v5262_v63 = vsel %vm166_vm2, %v5257_v49, 0 }
0x2869   :  { %8766 = vmatpush3.bf16.xpose.msra.mxu1 %v5262_v63 }
0x286a   :  { %8771 = vmatprep.subr.bf16.mxu1 %v9510_v0 }
0x286b   :  { %v5367_v10 = vpop.permute.xlu1 %5366 }
0x286c   :  { %v5372_v14 = vsel %vm166_vm2, %v5367_v10, 0 }
0x286f   :  { %v5365_v40 = vpop.permute.xlu1 %5364 }
0x2870   :  { %8768 = vmatmul.mubr.msk.bf16.vlgmr.msra.gmra.mxu1 %vm166_vm2, %v10797_v12 }
0x2871   :  { %8773 = vmatprep.mubr.msk.bf16.mxu1 %vm9511_vm0, %v9510_v0 }
0x2873   :  { %v5477_v41 = vpop.permute.xlu1 %5476 }
0x2874   :  { %v5482_v6 = vsel %vm166_vm2, %v5477_v41, 0 }
0x2877   :  { %v5475_v13 = vpop.permute.xlu1 %5474 }
0x287b   :  { %v5585_v19 = vpop.permute.xlu1 %5584 }
0x287f   :  { %v5821_v22 = vpop.permute.xlu1 %5820 }
0x2880   :  { %v5826_v24 = vsel %vm166_vm2, %v5821_v22, 0 }
0x2883   :  { %v5931_v25 = vpop.permute.xlu1 %5930 }
0x2884   :  { %v5936_v29 = vsel %vm166_vm2, %v5931_v25, 0 }
0x2887   :  { %v6041_v23 = vpop.permute.xlu1 %6040 }
0x2888   :  { %v6046_v35 = vsel %vm166_vm2, %v6041_v23, 0 }
0x2930   :  { %v5298_v53 = vpop.f32.mrf.mxu1 }
0x2931   :  { %v5304_v58 = vsel %vm166_vm2, %v5298_v53, -inf }
0x2932   :  { %5305 = vmax.xlane.f32.xlu0 %v5304_v58  ;;  %v8769_v15 = vpop.f32.mrf.mxu1 }
0x2934   :  { %v5301_v50 = vpop.f32.mrf.mxu1 }
0x2936   :  { %v8770_v59 = vpop.f32.mrf.mxu1 }
0x29bb   :  { %v5306_v61 = vpop.xlane.xlu0 %5305 }
0x29bc   :  { %v5307_v56 = vsub.f32 %v5298_v53, %v5306_v61 }
0x29be   :  { %v5308_v62 = vmul.f32 1.442695, %v5307_v56 }
0x29c0   :  { %9355 = vpow2.f32 %v5308_v62 }
0x29cd   :  { %v9356_v1 = vpop.eup %9355 }
0x29ce   :  { %v5310_v2 = vsel %vm166_vm2, %v9356_v1, 0.0 }
0x29cf   :  { %5311 = vadd.xlane.f32.xlu0 %v5310_v2 }
0x29e5   :  { %5316 = vrot.lane.b32.xlu0 %v10797_v12, %s11362_s2 }
0x29e9   :  { %5586 = vrot.lane.b32.xlu0 %v10797_v12, %s11361_s5 }
0x29ed   :  { %5710 = vrot.lane.b32.xlu0 %v10812_v44, %s9513_s20 }
0x29f1   :  { %5818 = vrot.lane.b32.xlu0 %v10812_v44, %s9518_s24 }
0x29f5   :  { %5928 = vrot.lane.b32.xlu0 %v10812_v44, %s11359_s6 }
0x29f9   :  { %6038 = vrot.lane.b32.xlu0 %v10812_v44, %s11360_s19 }
0x2a58   :  { %v5312_v3 = vpop.xlane.xlu0 %5311 }
0x2a59   :  { %9357 = vrcp.f32 %v5312_v3 }
0x2a5c   :  { %v5317_v5 = vpop.permute.xlu0 %5316 }
0x2a5d   :  { %v5322_v8 = vsel %vm230_vm3, %v5317_v5, 0 }
0x2a5e   :  { %8772 = vmatpush3.bf16.msra.mxu1 %v5322_v8 }
0x2a5f   :  { %8777 = vmatprep.subr.bf16.mxu1 %v9510_v0 }
0x2a60   :  { %v5587_v51 = vpop.permute.xlu0 %5586 }
0x2a61   :  { %v5592_v7 = vsel %vm166_vm2, %v5587_v51, 0 }
0x2a64   :  { %v5711_v18 = vpop.permute.xlu0 %5710 }
0x2a65   :  { %v5716_v21 = vsel %vm166_vm2, %v5711_v18, 0 }
0x2a66   :  { %v9358_v9 = vpop.eup %9357 }
0x2a67   :  { %v5314_v42 = vmul.f32 %v9358_v9, %v9356_v1 }
0x2a68   :  { %v5819_v26 = vpop.permute.xlu0 %5818 }
0x2a69   :  { %v5315_v60 = vpack.c.bf16 %v5314_v42, %v5314_v42 }
0x2a6b   :  { %8774 = vmatmul.mubr.msk.bf16.vlgmr.msra.gmra.mxu1 %vm166_vm2, %v5315_v60 }
0x2a6c   :  { %8778 = vmatpush3.bf16.xpose.msra.mxu1 %v5372_v14  ;;  %8779 = vmatprep.mubr.msk.bf16.mxu1 %vm9511_vm0, %v9510_v0  ;;  %v5929_v17 = vpop.permute.xlu0 %5928 }
0x2a6d   :  { %8789 = vmatprep.subr.bf16.mxu1 %v9510_v0 }
0x2a70   :  { %v6039_v47 = vpop.permute.xlu0 %6038 }
0x2a73   :  { %8780 = vmatmul.mubr.msk.bf16.vlgmr.msra.gmra.mxu1 %vm166_vm2, %v5365_v40 }
0x2a74   :  { %8790 = vmatpush3.bf16.xpose.msra.mxu1 %v5482_v6  ;;  %8791 = vmatprep.mubr.msk.bf16.mxu1 %vm9511_vm0, %v9510_v0 }
0x2a75   :  { %8801 = vmatprep.subr.bf16.mxu1 %v9510_v0 }
0x2a7b   :  { %8792 = vmatmul.mubr.msk.bf16.vlgmr.msra.gmra.mxu1 %vm166_vm2, %v5475_v13 }
0x2a7c   :  { %8802 = vmatpush3.bf16.xpose.msra.mxu1 %v5592_v7  ;;  %8803 = vmatprep.mubr.msk.bf16.mxu1 %vm9511_vm0, %v9510_v0 }
0x2a7d   :  { %8813 = vmatprep.subr.bf16.mxu1 %v9510_v0 }
0x2a83   :  { %8804 = vmatmul.mubr.msk.bf16.vlgmr.msra.gmra.mxu1 %vm166_vm2, %v5585_v19 }
0x2a84   :  { %8814 = vmatpush3.bf16.xpose.msra.mxu1 %v5716_v21  ;;  %8815 = vmatprep.mubr.msk.bf16.mxu1 %vm9511_vm0, %v9510_v0 }
0x2a85   :  { %8825 = vmatprep.subr.bf16.mxu1 %v9510_v0 }
0x2a8b   :  { %8816 = vmatmul.mubr.msk.bf16.vlgmr.msra.gmra.mxu1 %vm166_vm2, %v10812_v44 }
0x2a8c   :  { %8826 = vmatpush3.bf16.xpose.msra.mxu1 %v5826_v24  ;;  %8827 = vmatprep.mubr.msk.bf16.mxu1 %vm9511_vm0, %v9510_v0 }
0x2a8d   :  { %8837 = vmatprep.subr.bf16.mxu1 %v9510_v0 }
0x2a93   :  { %8828 = vmatmul.mubr.msk.bf16.vlgmr.msra.gmra.mxu1 %vm166_vm2, %v5819_v26 }
0x2a94   :  { %8838 = vmatpush3.bf16.xpose.msra.mxu1 %v5936_v29  ;;  %8839 = vmatprep.mubr.msk.bf16.mxu1 %vm9511_vm0, %v9510_v0 }
0x2a95   :  { %8849 = vmatprep.subr.bf16.mxu1 %v9510_v0 }
0x2a9b   :  { %8840 = vmatmul.mubr.msk.bf16.vlgmr.msra.gmra.mxu1 %vm166_vm2, %v5929_v17 }
0x2a9c   :  { %8850 = vmatpush3.bf16.xpose.msra.mxu1 %v6046_v35  ;;  %8851 = vmatprep.mubr.msk.bf16.mxu1 %vm9511_vm0, %v9510_v0 }
0x2a9d   :  { %8861 = vmatprep.subr.bf16.mxu1 %v9510_v0 }
0x2aa3   :  { %8852 = vmatmul.mubr.msk.bf16.vlgmr.msra.gmra.mxu1 %vm166_vm2, %v6039_v47 }
0x2aa4   :  { %8865 = vmatprep.mubr.msk.bf16.mxu1 %vm9511_vm0, %v9510_v0 }
0x2b2b   :  { %v10881_v20 = vpop.f32.mrf.mxu1 }
0x2b2d   :  { %v8775_v38 = vpop.f32.mrf.mxu1 }
0x2b2f   :  { %v5361_v16 = vpop.f32.mrf.mxu1 }
0x2b31   :  { %v8776_v48 = vpop.f32.mrf.mxu1 }
0x2b33   :  { %v5408_v37 = vpop.f32.mrf.mxu1 }
0x2b34   :  { %v5414_v30 = vsel %vm166_vm2, %v5408_v37, -inf }
0x2b35   :  { %5415 = vmax.xlane.f32.xlu1 %v5414_v30  ;;  %v8781_v45 = vpop.f32.mrf.mxu1 }
0x2b37   :  { %v5411_v52 = vpop.f32.mrf.mxu1 }
0x2b39   :  { %v8782_v4 = vpop.f32.mrf.mxu1 }
0x2b3b   :  { %v5518_v54 = vpop.f32.mrf.mxu1 }
0x2b3c   :  { %v5524_v36 = vsel %vm166_vm2, %v5518_v54, -inf }
0x2b3d   :  { %5525 = vmax.xlane.f32.xlu0 %v5524_v36  ;;  %v8793_v49 = vpop.f32.mrf.mxu1 }
0x2b3f   :  { %v5521_v63 = vpop.f32.mrf.mxu1 }
0x2b41   :  { %v8794_v53 = vpop.f32.mrf.mxu1 }
0x2b43   :  { %v5628_v58 = vpop.f32.mrf.mxu1 }
0x2b44   :  { %v5634_v15 = vsel %vm166_vm2, %v5628_v58, -inf }
0x2b45   :  { %5635 = vmax.xlane.f32.xlu0 %v5634_v15  ;;  %v8805_v50 = vpop.f32.mrf.mxu1 }
0x2b47   :  { %v5631_v59 = vpop.f32.mrf.mxu1 }
0x2b49   :  { %v8806_v61 = vpop.f32.mrf.mxu1 }
0x2b4b   :  { %v5752_v56 = vpop.f32.mrf.mxu1 }
0x2b4c   :  { %v5758_v62 = vsel %vm166_vm2, %v5752_v56, -inf }
0x2b4d   :  { %5759 = vmax.xlane.f32.xlu1 %v5758_v62  ;;  %v8817_v1 = vpop.f32.mrf.mxu1 }
0x2b4f   :  { %v5755_v2 = vpop.f32.mrf.mxu1 }
0x2b51   :  { %v8818_v3 = vpop.f32.mrf.mxu1 }
0x2b53   :  { %v5862_v5 = vpop.f32.mrf.mxu1 }
0x2b54   :  { %v5868_v8 = vsel %vm166_vm2, %v5862_v5, -inf }
0x2b55   :  { %5869 = vmax.xlane.f32.xlu0 %v5868_v8  ;;  %v8829_v10 = vpop.f32.mrf.mxu1 }
0x2b57   :  { %v5865_v9 = vpop.f32.mrf.mxu1 }
0x2b59   :  { %v8830_v42 = vpop.f32.mrf.mxu1 }
0x2b5b   :  { %v5972_v60 = vpop.f32.mrf.mxu1 }
0x2b5c   :  { %v5978_v40 = vsel %vm166_vm2, %v5972_v60, -inf }
0x2b5d   :  { %5979 = vmax.xlane.f32.xlu1 %v5978_v40  ;;  %v8841_v14 = vpop.f32.mrf.mxu1 }
0x2b5f   :  { %v5975_v41 = vpop.f32.mrf.mxu1 }
0x2b61   :  { %v8842_v6 = vpop.f32.mrf.mxu1 }
0x2b63   :  { %v6082_v51 = vpop.f32.mrf.mxu1 }
0x2b64   :  { %v6088_v13 = vsel %vm166_vm2, %v6082_v51, -inf }
0x2b65   :  { %6089 = vmax.xlane.f32.xlu0 %v6088_v13  ;;  %v8853_v7 = vpop.f32.mrf.mxu1 }
0x2b67   :  { %v6085_v18 = vpop.f32.mrf.mxu1 }
0x2b69   :  { %v8854_v19 = vpop.f32.mrf.mxu1 }
0x2b6e   :  { %5426 = vrot.lane.b32.xlu1 %v10797_v12, %s11354_s27 }
0x2b7b   :  { %5536 = vrot.lane.b32.xlu0 %v10797_v12, %s11353_s3 }
0x2bbe   :  { %v5416_v21 = vpop.xlane.xlu1 %5415 }
0x2bbf   :  { %v5417_v22 = vsub.f32 %v5408_v37, %v5416_v21 }
0x2bc1   :  { %v5418_v24 = vmul.f32 1.442695, %v5417_v22 }
0x2bc3   :  { %9359 = vpow2.f32 %v5418_v24 }
0x2bc6   :  { %v5526_v25 = vpop.xlane.xlu0 %5525 }
0x2bc7   :  { %v5527_v26 = vsub.f32 %v5518_v54, %v5526_v25 }
0x2bc9   :  { %v5528_v29 = vmul.f32 1.442695, %v5527_v26 }
0x2bcb   :  { %9361 = vpow2.f32 %v5528_v29 }
0x2bce   :  { %v5636_v23 = vpop.xlane.xlu0 %5635 }
0x2bcf   :  { %v5637_v17 = vsub.f32 %v5628_v58, %v5636_v23 }
0x2bd0   :  { %v9360_v35 = vpop.eup %9359 }
0x2bd1   :  { %v5638_v47 = vmul.f32 1.442695, %v5637_v17  ;;  %v5420_v38 = vsel %vm166_vm2, %v9360_v35, 0.0 }
0x2bd2   :  { %5421 = vadd.xlane.f32.xlu1 %v5420_v38 }
0x2bd3   :  { %9363 = vpow2.f32 %v5638_v47 }
0x2bd6   :  { %v5760_v45 = vpop.xlane.xlu1 %5759 }
0x2bd7   :  { %v5761_v36 = vsub.f32 %v5752_v56, %v5760_v45 }
0x2bd8   :  { %v9362_v16 = vpop.eup %9361 }
0x2bd9   :  { %v5530_v48 = vsel %vm166_vm2, %v9362_v16, 0.0  ;;  %v5762_v63 = vmul.f32 1.442695, %v5761_v36 }
0x2bda   :  { %5531 = vadd.xlane.f32.xlu0 %v5530_v48 }
0x2bdb   :  { %9365 = vpow2.f32 %v5762_v63 }
0x2bde   :  { %v5870_v49 = vpop.xlane.xlu0 %5869 }
0x2bdf   :  { %v5871_v53 = vsub.f32 %v5862_v5, %v5870_v49 }
0x2be0   :  { %v10896_v30 = vpop.eup %9363 }
0x2be1   :  { %v5640_v37 = vsel %vm166_vm2, %v10896_v30, 0.0  ;;  %v5872_v50 = vmul.f32 1.442695, %v5871_v53 }
0x2be2   :  { %5641 = vadd.xlane.f32.xlu1 %v5640_v37 }
0x2be3   :  { %9367 = vpow2.f32 %v5872_v50 }
0x2be6   :  { %v5980_v52 = vpop.xlane.xlu1 %5979 }
0x2be7   :  { %v5981_v15 = vsub.f32 %v5972_v60, %v5980_v52 }
0x2be8   :  { %v9366_v1 = vpop.eup %9365 }
0x2be9   :  { %v5982_v61 = vmul.f32 1.442695, %v5981_v15 }
0x2bea   :  { %v5427_v4 = vpop.permute.xlu1 %5426 }
0x2beb   :  { %v5432_v54 = vsel %vm230_vm3, %v5427_v4, 0  ;;  %9369 = vpow2.f32 %v5982_v61 }
0x2bec   :  { %8784 = vmatpush3.bf16.msra.mxu0 %v5432_v54 }
0x2bed   :  { %8795 = vmatprep.subr.bf16.mxu0 %v9510_v0 }
0x2bee   :  { %v6090_v58 = vpop.xlane.xlu0 %6089 }
0x2bef   :  { %v6091_v59 = vsub.f32 %v6082_v51, %v6090_v58 }
0x2bf0   :  { %5646 = vrot.lane.b32.xlu0 %v10797_v12, %s11355_s30  ;;  %v5764_v12 = vsel %vm166_vm2, %v9366_v1, 0.0  ;;  %v9368_v2 = vpop.eup %9367 }
0x2bf1   :  { %v6092_v62 = vmul.f32 1.442695, %v6091_v59  ;;  %v5874_v56 = vsel %vm166_vm2, %v9368_v2, 0.0 }
0x2bf2   :  { %v5537_v42 = vpop.permute.xlu0 %5536 }
0x2bf3   :  { %5770 = vrot.lane.b32.xlu1 %v10812_v44, %s11362_s2  ;;  %9371 = vpow2.f32 %v6092_v62  ;;  %v5542_v51 = vsel %vm230_vm3, %v5537_v42, 0 }
0x2bf8   :  { %v10907_v3 = vpop.eup %9369 }
0x2bf9   :  { %v5984_v8 = vsel %vm166_vm2, %v10907_v3, 0.0 }
0x2c00   :  { %v10910_v5 = vpop.eup %9371 }
0x2c01   :  { %v6094_v10 = vsel %vm166_vm2, %v10910_v5, 0.0 }
0x2c0f   :  { %5765 = vadd.xlane.f32.xlu0 %v5764_v12 }
0x2c13   :  { %5875 = vadd.xlane.f32.xlu0 %v5874_v56 }
0x2c17   :  { %5985 = vadd.xlane.f32.xlu1 %v5984_v8  ;;  %6095 = vadd.xlane.f32.xlu0 %v6094_v10 }
0x2c28   :  { %5990 = vrot.lane.b32.xlu1 %v10812_v44, %s11353_s3 }
0x2c2c   :  { %6100 = vrot.lane.b32.xlu1 %v10812_v44, %s11355_s30 }
0x2c2d   :  { %5880 = vrot.lane.b32.xlu0 %v10812_v44, %s11354_s27 }
0x2c5b   :  { %v5422_v9 = vpop.xlane.xlu1 %5421 }
0x2c5c   :  { %9373 = vrcp.f32 %v5422_v9 }
0x2c63   :  { %v5532_v60 = vpop.xlane.xlu0 %5531 }
0x2c64   :  { %9375 = vrcp.f32 %v5532_v60 }
0x2c67   :  { %v5647_v7 = vpop.permute.xlu0 %5646 }
0x2c68   :  { %v5652_v19 = vsel %vm230_vm3, %v5647_v7, 0 }
0x2c69   :  { %v9374_v40 = vpop.eup %9373 }
0x2c6a   :  { %v5424_v14 = vmul.f32 %v9374_v40, %v9360_v35 }
0x2c6b   :  { %v5642_v41 = vpop.xlane.xlu1 %5641 }
0x2c6c   :  { %v5425_v6 = vpack.c.bf16 %v5424_v14, %v5424_v14  ;;  %9377 = vrcp.f32 %v5642_v41 }
0x2c6e   :  { %8786 = vmatmul.mubr.msk.bf16.vlgmr.msra.gmra.mxu0 %vm166_vm2, %v5425_v6 }
0x2c6f   :  { %8796 = vmatpush3.bf16.msra.mxu0 %v5542_v51  ;;  %8797 = vmatprep.mubr.msk.bf16.mxu0 %vm9511_vm0, %v9510_v0  ;;  %v5771_v24 = vpop.permute.xlu1 %5770  ;;  %v9177_v51 = vld [vmem:[%s11316_s9 + $0x18] sm:$0xff]  }
0x2c70   :  { %8807 = vmatprep.subr.bf16.mxu0 %v9510_v0  ;;  %v5776_v26 = vsel %vm230_vm3, %v5771_v24, 0  ;;  %8862 = vmatpush3.bf16.msra.mxu1 %v9177_v51 }
0x2c71   :  { %v9376_v44 = vpop.eup %9375  ;;  %8863 = vmatprep.subr.bf16.mxu1 %v9510_v0 }
0x2c72   :  { %v5534_v13 = vmul.f32 %v9376_v44, %v9362_v16 }
0x2c74   :  { %v5535_v18 = vpack.c.bf16 %v5534_v13, %v5534_v13 }
0x2c76   :  { %8798 = vmatmul.mubr.msk.bf16.vlgmr.msra.gmra.mxu0 %vm166_vm2, %v5535_v18 }
0x2c77   :  { %8808 = vmatpush3.bf16.msra.mxu0 %v5652_v19  ;;  %8809 = vmatprep.mubr.msk.bf16.mxu0 %vm9511_vm0, %v9510_v0  ;;  %v9178_v19 = vld [vmem:[%s11316_s9 + $0x10] sm:$0xff]  }
0x2c78   :  { %8819 = vmatprep.subr.bf16.mxu0 %v9510_v0  ;;  %8864 = vmatpush3.bf16.msra.mxu1 %v9178_v19 }
0x2c79   :  { %v9378_v21 = vpop.eup %9377  ;;  %8877 = vmatprep.subr.bf16.mxu1 %v9510_v0 }
0x2c7a   :  { %v5644_v22 = vmul.f32 %v9378_v21, %v10896_v30 }
0x2c7c   :  { %v5645_v25 = vpack.c.bf16 %v5644_v22, %v5644_v22 }
0x2c7e   :  { %8810 = vmatmul.mubr.msk.bf16.vlgmr.msra.gmra.mxu0 %vm166_vm2, %v5645_v25 }
0x2c7f   :  { %8820 = vmatpush3.bf16.msra.mxu0 %v5776_v26  ;;  %8821 = vmatprep.mubr.msk.bf16.mxu0 %vm9511_vm0, %v9510_v0 }
0x2c80   :  { %8831 = vmatprep.subr.bf16.mxu0 %v9510_v0 }
0x2c98   :  { %v5766_v29 = vpop.xlane.xlu0 %5765 }
0x2c99   :  { %9379 = vrcp.f32 %v5766_v29 }
0x2c9c   :  { %v5876_v23 = vpop.xlane.xlu0 %5875 }
0x2c9d   :  { %9381 = vrcp.f32 %v5876_v23 }
0x2ca0   :  { %v5986_v17 = vpop.xlane.xlu1 %5985  ;;  %v6096_v35 = vpop.xlane.xlu0 %6095 }
0x2ca1   :  { %9383 = vrcp.f32 %v5986_v17 }
0x2ca2   :  { %9385 = vrcp.f32 %v6096_v35 }
0x2ca4   :  { %v5881_v16 = vpop.permute.xlu0 %5880  ;;  %v5991_v52 = vpop.permute.xlu1 %5990 }
0x2ca5   :  { %v5886_v37 = vsel %vm230_vm3, %v5881_v16, 0  ;;  %v5996_v36 = vsel %vm230_vm3, %v5991_v52, 0 }
0x2ca6   :  { %v9380_v47 = vpop.eup %9379 }
0x2ca7   :  { %v5768_v38 = vmul.f32 %v9380_v47, %v9366_v1 }
0x2ca8   :  { %v6101_v63 = vpop.permute.xlu1 %6100 }
0x2ca9   :  { %v5769_v48 = vpack.c.bf16 %v5768_v38, %v5768_v38  ;;  %v6106_v15 = vsel %vm230_vm3, %v6101_v63, 0 }
0x2caa   :  { %v9382_v30 = vpop.eup %9381 }
0x2cab   :  { %8822 = vmatmul.mubr.msk.bf16.vlgmr.msra.gmra.mxu0 %vm166_vm2, %v5769_v48  ;;  %v5878_v45 = vmul.f32 %v9382_v30, %v9368_v2 }
0x2cac   :  { %8832 = vmatpush3.bf16.msra.mxu0 %v5886_v37  ;;  %8833 = vmatprep.mubr.msk.bf16.mxu0 %vm9511_vm0, %v9510_v0 }
0x2cad   :  { %8843 = vmatprep.subr.bf16.mxu0 %v9510_v0  ;;  %v5879_v4 = vpack.c.bf16 %v5878_v45, %v5878_v45 }
0x2cae   :  { %v9384_v54 = vpop.eup %9383 }
0x2caf   :  { %v5988_v49 = vmul.f32 %v9384_v54, %v10907_v3  ;;  %v9386_v58 = vpop.eup %9385 }
0x2cb0   :  { %v6098_v50 = vmul.f32 %v9386_v58, %v10910_v5 }
0x2cb1   :  { %v5989_v53 = vpack.c.bf16 %v5988_v49, %v5988_v49 }
0x2cb2   :  { %v6099_v59 = vpack.c.bf16 %v6098_v50, %v6098_v50  ;;  %v9179_v50 = vld [vmem:[%s11318_s11 + $0x18] sm:$0xff]  }
0x2cb3   :  { %8834 = vmatmul.mubr.msk.bf16.vlgmr.msra.gmra.mxu0 %vm166_vm2, %v5879_v4 }
0x2cb4   :  { %8844 = vmatpush3.bf16.msra.mxu0 %v5996_v36  ;;  %8845 = vmatprep.mubr.msk.bf16.mxu0 %vm9511_vm0, %v9510_v0 }
0x2cb5   :  { %8855 = vmatprep.subr.bf16.mxu0 %v9510_v0 }
0x2cbb   :  { %8846 = vmatmul.mubr.msk.bf16.vlgmr.msra.gmra.mxu0 %vm166_vm2, %v5989_v53 }
0x2cbc   :  { %8856 = vmatpush3.bf16.msra.mxu0 %v6106_v15  ;;  %8857 = vmatprep.mubr.msk.bf16.mxu0 %vm9511_vm0, %v9510_v0 }
0x2cbd   :  { %8869 = vmatprep.subr.bf16.mxu0 %v9510_v0 }
0x2cc3   :  { %8858 = vmatmul.mubr.msk.bf16.vlgmr.msra.gmra.mxu0 %vm166_vm2, %v6099_v59 }
0x2cc4   :  { %8873 = vmatprep.mubr.msk.bf16.mxu0 %vm9511_vm0, %v9510_v0 }
0x2d2e   :  { %v5468_v61 = vpop.f32.mrf.mxu0 }
0x2d30   :  { %v8787_v62 = vpop.f32.mrf.mxu0 }
0x2d32   :  { %v5471_v1 = vpop.f32.mrf.mxu0 }
0x2d34   :  { %v8788_v12 = vpop.f32.mrf.mxu0 }
0x2d36   :  { %v5578_v2 = vpop.f32.mrf.mxu0 }
0x2d38   :  { %v8799_v3 = vpop.f32.mrf.mxu0 }
0x2d3a   :  { %v5581_v56 = vpop.f32.mrf.mxu0 }
0x2d3c   :  { %v8800_v8 = vpop.f32.mrf.mxu0 }
0x2d3e   :  { %v5688_v10 = vpop.f32.mrf.mxu0 }
0x2d40   :  { %v8811_v9 = vpop.f32.mrf.mxu0 }
0x2d42   :  { %v5691_v42 = vpop.f32.mrf.mxu0 }
0x2d43   :  { %v6343_v42 = vrot.slane %v10793_v27, %v9927_v57 }
0x2d44   :  { %v8812_v5 = vpop.f32.mrf.mxu0 }
0x2d6b   :  { %v5812_v60 = vpop.f32.mrf.mxu0 }
0x2d6d   :  { %v8823_v40 = vpop.f32.mrf.mxu0 }
0x2d6f   :  { %v5815_v14 = vpop.f32.mrf.mxu0 }
0x2d71   :  { %v8824_v41 = vpop.f32.mrf.mxu0 }
0x2d73   :  { %v5922_v6 = vpop.f32.mrf.mxu0 }
0x2d74   :  { %v9097_v44 = vpack.i.bf16 %v5922_v6, %v5468_v61  ;;  %v6167_v61 = vrot.slane %v10793_v27, %v9856_v55 }
0x2d75   :  { %v8835_v13 = vpop.f32.mrf.mxu0 }
0x2d76   :  { %9098 = vrot.lane.b32.xlu1 %v9097_v44, %s11356_s28 }
0x2d77   :  { %v5925_v7 = vpop.f32.mrf.mxu0 }
0x2d79   :  { %v8836_v18 = vpop.f32.mrf.mxu0 }
0x2d7b   :  { %v6032_v21 = vpop.f32.mrf.mxu0 }
0x2d7c   :  { %v9102_v22 = vpack.i.bf16 %v6032_v21, %v5578_v2 }
0x2d7d   :  { %v8847_v24 = vpop.f32.mrf.mxu0 }
0x2d7e   :  { %9103 = vrot.lane.b32.xlu1 %v9102_v22, %s11357_s0  ;;  %v9181_v24 = vld [vmem:[%s11317_s10 + $0x18] sm:$0xff]  }
0x2d7f   :  { %v6035_v25 = vpop.f32.mrf.mxu0  ;;  %8870 = vmatpush3.bf16.msra.mxu0 %v9181_v24 }
0x2d80   :  { %8871 = vmatprep.subr.bf16.mxu0 %v9510_v0  ;;  %v9182_v25 = vld [vmem:[%s11317_s10 + $0x10] sm:$0xff]  }
0x2d81   :  { %v8848_v26 = vpop.f32.mrf.mxu0 }
0x2d83   :  { %v6142_v29 = vpop.f32.mrf.mxu0  ;;  %8872 = vmatpush3.bf16.msra.mxu0 %v9182_v25 }
0x2d84   :  { %v9107_v23 = vpack.i.bf16 %v6142_v29, %v5688_v10  ;;  %8885 = vmatprep.subr.bf16.mxu0 %v9510_v0 }
0x2d85   :  { %v8859_v17 = vpop.f32.mrf.mxu0 }
0x2d86   :  { %9108 = vrot.lane.b32.xlu0 %v9107_v23, %s11358_s18 }
0x2d87   :  { %v6145_v35 = vpop.f32.mrf.mxu0 }
0x2d89   :  { %v8860_v47 = vpop.f32.mrf.mxu0 }
0x2de8   :  { %v9099_v38 = vpop.permute.xlu1 %9098 }
0x2de9   :  { %v9101_v48 = vunpack.i.h.bf16 %v9099_v38  ;;  %v9100_v30 = vunpack.i.l.bf16 %v9099_v38 }
0x2deb   :  { %v6160_v4 = vsel %vm166_vm2, %v5812_v60, %v9101_v48  ;;  %v5706_v54 = vsel %vm166_vm2, %v10881_v20, %v9100_v30  ;;  %v9180_v20 = vld [vmem:[%s11318_s11 + $0x10] sm:$0xff]  }
0x2df0   :  { %v9104_v16 = vpop.permute.xlu1 %9103 }
0x2df1   :  { %v9106_v37 = vunpack.i.h.bf16 %v9104_v16  ;;  %v9105_v45 = vunpack.i.l.bf16 %v9104_v16  ;;  %v6255_v16 = vrot.slane %v10793_v27, %v9895_v31 }
0x2df3   :  { %v6161_v63 = vsel %vm617_vm4, %v6160_v4, %v9106_v37  ;;  %v5707_v53 = vsel %vm617_vm4, %v5706_v54, %v9105_v45 }
0x2df8   :  { %v9109_v52 = vpop.permute.xlu0 %9108 }
0x2df9   :  { %v9111_v36 = vunpack.i.h.bf16 %v9109_v52  ;;  %v9110_v49 = vunpack.i.l.bf16 %v9109_v52  ;;  %v6261_v52 = vrot.slane %v10793_v27, %v9900_v34 }
0x2dfb   :  { %v6162_v58 = vsel %vm619_vm5, %v6161_v63, %v9111_v36  ;;  %v5708_v15 = vsel %vm619_vm5, %v5707_v53, %v9110_v49 }
0x2dfc   :  { %v6163_v59 = vpack.c.bf16 %v6162_v58, %v5708_v15  ;;  %v6283_v58 = vrot.slane %v10793_v27, %v9920_v46 }
0x2dfe   :  { %8866 = vmatmul.mubr.msk.bf16.vlgmr.msra.gmra.mxu1 %vm117_vm1, %v6163_v59 }
0x2dff   :  { %8878 = vmatpush3.bf16.msra.mxu1 %v9179_v50  ;;  %8881 = vmatprep.mubr.msk.bf16.mxu1 %vm9511_vm0, %v9510_v0 }
0x2e00   :  { %8879 = vmatprep.subr.bf16.mxu1 %v9510_v0 }
0x2e03   :  { %8880 = vmatpush3.bf16.msra.mxu1 %v9180_v20 }
0x2e04   :  { %8891 = vmatprep.subr.bf16.mxu1 %v9510_v0 }
0x2e06   :  { %8882 = vmatmul.mubr.msk.bf16.vlgmr.msra.gmra.mxu1 %vm117_vm1, %v10482_v32 }
0x2e07   :  { %8893 = vmatprep.mubr.msk.bf16.mxu1 %vm9511_vm0, %v9510_v0 }
0x2ebe   :  { %v6217_v62 = vpop.f32.mrf.mxu1 }
0x2ebf   :  { %v6218_v1 = vadd.f32 %v6217_v62, %v6167_v61 }
0x2ec0   :  { %v8867_v12 = vpop.f32.mrf.mxu1 }
0x2ec1   :  { %v6224_v2 = vadd.f32 %v6218_v1, %v10781_v39 }
0x2ec2   :  { %v6220_v3 = vpop.f32.mrf.mxu1 }
0x2ec3   :  { %v6221_v56 = vadd.f32 %v6220_v3, %v6167_v61  ;;  %v6226_v8 = vsel %vm117_vm1, %v6224_v2, 0.0 }
0x2ec4   :  { %6227 = vadd.xlane.f32.xlu1 %v6226_v8  ;;  %v8868_v10 = vpop.f32.mrf.mxu1 }
0x2ec5   :  { %v6225_v9 = vadd.f32 %v6221_v56, %v10783_v43 }
0x2ec6   :  { %v6390_v32 = vpop.f32.mrf.mxu1 }
0x2ec7   :  { %v6229_v5 = vsel %vm117_vm1, %v6225_v9, 0.0  ;;  %v6391_v14 = vadd.f32 %v6390_v32, %v6343_v42 }
0x2ec8   :  { %6230 = vadd.xlane.f32.xlu0 %v6229_v5  ;;  %v8883_v60 = vpop.f32.mrf.mxu1 }
0x2eca   :  { %v6393_v40 = vpop.f32.mrf.mxu1 }
0x2ecb   :  { %v6394_v41 = vadd.f32 %v6393_v40, %v6343_v42 }
0x2ecc   :  { %v8884_v39 = vpop.f32.mrf.mxu1 }
0x2ecd   :  { %v10999_v6 = vpack.c.bf16 %v6394_v41, %v6391_v14 }
0x2ecf   :  { %v6403_v63 = vsel %vm166_vm2, %v10999_v6, 0 }
0x2f4d   :  { %v6228_v51 = vpop.xlane.xlu1 %6227 }
0x2f4e   :  { %v6232_v44 = vmul.f32 0.03125, %v6228_v51 }
0x2f50   :  { %v6234_v13 = vsub.f32 %v6224_v2, %v6232_v44  ;;  %v11045_v2 = vrot.slane %v10999_v6, 4 }
0x2f51   :  { %v6231_v7 = vpop.xlane.xlu0 %6230 }
0x2f52   :  { %v6233_v18 = vmul.f32 0.03125, %v6231_v7  ;;  %v6236_v43 = vmul.f32 %v6234_v13, %v6234_v13  ;;  %v6858_v5 = vsel %vm166_vm2, %v11045_v2, 0 }
0x2f54   :  { %v6235_v19 = vsub.f32 %v6225_v9, %v6233_v18  ;;  %v6238_v21 = vsel %vm117_vm1, %v6236_v43, 0.0 }
0x2f55   :  { %6239 = vadd.xlane.f32.xlu0 %v6238_v21 }
0x2f56   :  { %v6237_v57 = vmul.f32 %v6235_v19, %v6235_v19 }
0x2f58   :  { %v6241_v22 = vsel %vm117_vm1, %v6237_v57, 0.0 }
0x2f59   :  { %6242 = vadd.xlane.f32.xlu1 %v6241_v22 }
0x2f6b   :  { %6509 = vrot.lane.b32.xlu0 %v10999_v6, %s9518_s24 }
0x2fde   :  { %v6240_v26 = vpop.xlane.xlu0 %6239 }
0x2fdf   :  { %v6244_v29 = vmul.f32 0.03125, %v6240_v26 }
0x2fe1   :  { %v6246_v23 = vadd.f32 1e-05, %v6244_v29 }
0x2fe2   :  { %v6243_v17 = vpop.xlane.xlu1 %6242  ;;  %v6510_v62 = vpop.permute.xlu0 %6509 }
0x2fe3   :  { %9387 = vrsqrt.f32 %v6246_v23  ;;  %v6245_v35 = vmul.f32 0.03125, %v6243_v17  ;;  %v6515_v12 = vsel %vm166_vm2, %v6510_v62, 0 }
0x2fe5   :  { %v6247_v47 = vadd.f32 1e-05, %v6245_v35 }
0x2fe7   :  { %9389 = vrsqrt.f32 %v6247_v47 }
0x2ff0   :  { %v9388_v38 = vpop.eup %9387 }
0x2ff1   :  { %v6250_v48 = vmul.f32 %v9388_v38, %v6234_v13 }
0x2ff3   :  { %v6256_v37 = vmul.f32 %v6255_v16, %v6250_v48 }
0x2ff4   :  { %v9390_v30 = vpop.eup %9389 }
0x2ff5   :  { %v6251_v45 = vmul.f32 %v9390_v30, %v6235_v19  ;;  %v11017_v54 = vadd.f32 %v6261_v52, %v6256_v37 }
0x2ff7   :  { %v6257_v4 = vmul.f32 %v6255_v16, %v6251_v45 }
0x2ff9   :  { %v11019_v36 = vadd.f32 %v6261_v52, %v6257_v4 }
0x2ffb   :  { %v6279_v49 = vpack.c.bf16 %v11019_v36, %v11017_v54 }
0x2ffd   :  { %8874 = vmatmul.mubr.msk.bf16.vlgmr.msra.gmra.mxu0 %vm117_vm1, %v6279_v49 }
0x2ffe   :  { %8886 = vmatpush3.bf16.xpose.msra.mxu0 %v6403_v63  ;;  %8887 = vmatprep.mubr.msk.bf16.mxu0 %vm9511_vm0, %v9510_v0 }
0x2fff   :  { %8897 = vmatprep.subr.bf16.mxu0 %v9510_v0 }
0x30bd   :  { %v6333_v53 = vpop.f32.mrf.mxu0 }
0x30be   :  { %v6334_v59 = vadd.f32 %v6333_v53, %v6283_v58 }
0x30bf   :  { %v8875_v15 = vpop.f32.mrf.mxu0 }
0x30c1   :  { %v6336_v50 = vpop.f32.mrf.mxu0 }
0x30c2   :  { %v6337_v20 = vadd.f32 %v6336_v50, %v6283_v58 }
0x30c3   :  { %v8876_v61 = vpop.f32.mrf.mxu0 }
0x30c4   :  { %v6397_v1 = vpack.c.bf16 %v6337_v20, %v6334_v59 }
0x30c6   :  { %6507 = vrot.lane.b32.xlu1 %v6397_v1, %s9518_s24  ;;  %6617 = vrot.lane.b32.xlu0 %v6397_v1, %s11359_s6  ;;  %v6852_v27 = vrot.slane %v6397_v1, 4 }
0x30c7   :  { %8888 = vmatmul.mubr.msk.bf16.vlgmr.msra.gmra.mxu0 %vm166_vm2, %v6397_v1 }
0x30c8   :  { %8898 = vmatpush3.bf16.xpose.msra.mxu0 %v6515_v12  ;;  %8899 = vmatprep.mubr.msk.bf16.mxu0 %vm9511_vm0, %v9510_v0 }
0x30c9   :  { %8909 = vmatprep.subr.bf16.mxu0 %v9510_v0 }
0x30ca   :  { %6619 = vrot.lane.b32.xlu1 %v10999_v6, %s11359_s6  ;;  %6727 = vrot.lane.b32.xlu0 %v6397_v1, %s11360_s19 }
0x30ce   :  { %6729 = vrot.lane.b32.xlu1 %v10999_v6, %s11360_s19  ;;  %6960 = vrot.lane.b32.xlu0 %v6852_v27, %s9518_s24 }
0x30d2   :  { %7070 = vrot.lane.b32.xlu0 %v6852_v27, %s11359_s6  ;;  %6962 = vrot.lane.b32.xlu1 %v11045_v2, %s9518_s24 }
0x30d6   :  { %7180 = vrot.lane.b32.xlu0 %v6852_v27, %s11360_s19  ;;  %7072 = vrot.lane.b32.xlu1 %v11045_v2, %s11359_s6 }
0x30da   :  { %7182 = vrot.lane.b32.xlu1 %v11045_v2, %s11360_s19 }
0x3138   :  { %v6508_v3 = vpop.permute.xlu1 %6507  ;;  %v6618_v9 = vpop.permute.xlu0 %6617 }
0x3139   :  { %8900 = vmatmul.mubr.msk.bf16.vlgmr.msra.gmra.mxu0 %vm166_vm2, %v6508_v3 }
0x313a   :  { %8911 = vmatprep.mubr.msk.bf16.mxu0 %vm9511_vm0, %v9510_v0 }
0x313c   :  { %v6620_v56 = vpop.permute.xlu1 %6619  ;;  %v6728_v42 = vpop.permute.xlu0 %6727 }
0x313d   :  { %v6625_v8 = vsel %vm166_vm2, %v6620_v56, 0 }
0x313e   :  { %8910 = vmatpush3.bf16.xpose.msra.mxu0 %v6625_v8 }
0x313f   :  { %8921 = vmatprep.subr.bf16.mxu0 %v9510_v0 }
0x3140   :  { %v6730_v10 = vpop.permute.xlu1 %6729  ;;  %v6961_v41 = vpop.permute.xlu0 %6960 }
0x3141   :  { %v6735_v32 = vsel %vm166_vm2, %v6730_v10, 0 }
0x3144   :  { %v6963_v60 = vpop.permute.xlu1 %6962  ;;  %v7071_v44 = vpop.permute.xlu0 %7070 }
0x3145   :  { %8912 = vmatmul.mubr.msk.bf16.vlgmr.msra.gmra.mxu0 %vm166_vm2, %v6618_v9  ;;  %v6968_v40 = vsel %vm166_vm2, %v6963_v60, 0 }
0x3146   :  { %8922 = vmatpush3.bf16.xpose.msra.mxu0 %v6735_v32  ;;  %8923 = vmatprep.mubr.msk.bf16.mxu0 %vm9511_vm0, %v9510_v0 }
0x3147   :  { %8933 = vmatprep.subr.bf16.mxu0 %v9510_v0 }
0x3148   :  { %v7073_v14 = vpop.permute.xlu1 %7072  ;;  %v7181_v7 = vpop.permute.xlu0 %7180 }
0x3149   :  { %v7078_v39 = vsel %vm166_vm2, %v7073_v14, 0 }
0x314c   :  { %v7183_v51 = vpop.permute.xlu1 %7182 }
0x314d   :  { %8924 = vmatmul.mubr.msk.bf16.vlgmr.msra.gmra.mxu0 %vm166_vm2, %v6728_v42  ;;  %v7188_v13 = vsel %vm166_vm2, %v7183_v51, 0 }
0x314e   :  { %8934 = vmatpush3.bf16.xpose.msra.mxu0 %v6858_v5  ;;  %8935 = vmatprep.mubr.msk.bf16.mxu0 %vm9511_vm0, %v9510_v0 }
0x314f   :  { %8945 = vmatprep.subr.bf16.mxu0 %v9510_v0 }
0x3155   :  { %8936 = vmatmul.mubr.msk.bf16.vlgmr.msra.gmra.mxu0 %vm166_vm2, %v6852_v27 }
0x3156   :  { %8946 = vmatpush3.bf16.xpose.msra.mxu0 %v6968_v40  ;;  %8947 = vmatprep.mubr.msk.bf16.mxu0 %vm9511_vm0, %v9510_v0 }
0x3157   :  { %8957 = vmatprep.subr.bf16.mxu0 %v9510_v0 }
0x315d   :  { %8948 = vmatmul.mubr.msk.bf16.vlgmr.msra.gmra.mxu0 %vm166_vm2, %v6961_v41 }
0x315e   :  { %8958 = vmatpush3.bf16.xpose.msra.mxu0 %v7078_v39  ;;  %8959 = vmatprep.mubr.msk.bf16.mxu0 %vm9511_vm0, %v9510_v0 }
0x315f   :  { %8969 = vmatprep.subr.bf16.mxu0 %v9510_v0 }
0x3165   :  { %8960 = vmatmul.mubr.msk.bf16.vlgmr.msra.gmra.mxu0 %vm166_vm2, %v7071_v44 }
0x3166   :  { %8970 = vmatpush3.bf16.xpose.msra.mxu0 %v7188_v13  ;;  %8971 = vmatprep.mubr.msk.bf16.mxu0 %vm9511_vm0, %v9510_v0 }
0x3167   :  { %8981 = vmatprep.subr.bf16.mxu0 %v9510_v0 }
0x316d   :  { %8972 = vmatmul.mubr.msk.bf16.vlgmr.msra.gmra.mxu0 %vm166_vm2, %v7181_v7 }
0x316e   :  { %8985 = vmatprep.mubr.msk.bf16.mxu0 %vm9511_vm0, %v9510_v0 }
0x3187   :  { %v6439_v18 = vpop.f32.mrf.mxu0 }
0x3188   :  { %v6445_v43 = vsel %vm166_vm2, %v6439_v18, -inf }
0x3189   :  { %6446 = vmax.xlane.f32.xlu1 %v6445_v43  ;;  %v8889_v19 = vpop.f32.mrf.mxu0 }
0x318b   :  { %v6442_v21 = vpop.f32.mrf.mxu0 }
0x318d   :  { %v8890_v57 = vpop.f32.mrf.mxu0 }
0x31f9   :  { %v6551_v22 = vpop.f32.mrf.mxu0 }
0x31fa   :  { %v6557_v24 = vsel %vm166_vm2, %v6551_v22, -inf }
0x31fb   :  { %6558 = vmax.xlane.f32.xlu0 %v6557_v24  ;;  %v8901_v25 = vpop.f32.mrf.mxu0 }
0x31fd   :  { %v6554_v26 = vpop.f32.mrf.mxu0 }
0x31ff   :  { %v8902_v29 = vpop.f32.mrf.mxu0 }
0x3205   :  { %v6661_v23 = vpop.f32.mrf.mxu0 }
0x3206   :  { %v6667_v17 = vsel %vm166_vm2, %v6661_v23, -inf }
0x3207   :  { %6668 = vmax.xlane.f32.xlu0 %v6667_v17  ;;  %v8913_v35 = vpop.f32.mrf.mxu0 }
0x3209   :  { %v6664_v47 = vpop.f32.mrf.mxu0 }
0x320b   :  { %v8914_v38 = vpop.f32.mrf.mxu0 }
0x320d   :  { %v6771_v16 = vpop.f32.mrf.mxu0 }
0x320e   :  { %v6777_v48 = vsel %vm166_vm2, %v6771_v16, -inf }
0x320f   :  { %6778 = vmax.xlane.f32.xlu1 %v6777_v48  ;;  %v8925_v30 = vpop.f32.mrf.mxu0 }
0x3211   :  { %v6774_v37 = vpop.f32.mrf.mxu0 }
0x3212   :  { %v6447_v9 = vpop.xlane.xlu1 %6446 }
0x3213   :  { %v8926_v45 = vpop.f32.mrf.mxu0  ;;  %v6448_v32 = vsub.f32 %v6439_v18, %v6447_v9 }
0x3215   :  { %v6894_v52 = vpop.f32.mrf.mxu0  ;;  %v6449_v42 = vmul.f32 1.442695, %v6448_v32 }
0x3216   :  { %v6900_v4 = vsel %vm166_vm2, %v6894_v52, -inf }
0x3217   :  { %6901 = vmax.xlane.f32.xlu0 %v6900_v4  ;;  %v8937_v49 = vpop.f32.mrf.mxu0  ;;  %9391 = vpow2.f32 %v6449_v42 }
0x3219   :  { %v6897_v63 = vpop.f32.mrf.mxu0 }
0x321b   :  { %v8938_v53 = vpop.f32.mrf.mxu0 }
0x321d   :  { %v11094_v58 = vpop.f32.mrf.mxu0 }
0x321e   :  { %v7010_v15 = vsel %vm166_vm2, %v11094_v58, -inf }
0x321f   :  { %7011 = vmax.xlane.f32.xlu1 %v7010_v15  ;;  %v8949_v50 = vpop.f32.mrf.mxu0 }
0x3221   :  { %v7007_v59 = vpop.f32.mrf.mxu0 }
0x3223   :  { %v8950_v20 = vpop.f32.mrf.mxu0 }
0x3224   :  { %v11107_v60 = vpop.eup %9391 }
0x3225   :  { %v7114_v61 = vpop.f32.mrf.mxu0  ;;  %v6451_v40 = vsel %vm166_vm2, %v11107_v60, 0.0 }
0x3226   :  { %v7120_v62 = vsel %vm166_vm2, %v7114_v61, -inf }
0x3227   :  { %7121 = vmax.xlane.f32.xlu0 %v7120_v62  ;;  %v8961_v1 = vpop.f32.mrf.mxu0 }
0x3229   :  { %v7117_v12 = vpop.f32.mrf.mxu0 }
0x322b   :  { %v8962_v27 = vpop.f32.mrf.mxu0 }
0x322d   :  { %v11099_v3 = vpop.f32.mrf.mxu0 }
0x322e   :  { %v7230_v5 = vsel %vm166_vm2, %v11099_v3, -inf }
0x322f   :  { %v8973_v56 = vpop.f32.mrf.mxu0 }
0x3230   :  { %6569 = vrot.lane.b32.xlu1 %v10999_v6, %s9514_s21 }
0x3231   :  { %v7227_v8 = vpop.f32.mrf.mxu0 }
0x3233   :  { %v8974_v10 = vpop.f32.mrf.mxu0 }
0x323d   :  { %6458 = vrot.lane.b32.xlu0 %v10999_v6, %s9513_s20 }
0x3254   :  { %7231 = vmax.xlane.f32.xlu1 %v7230_v5 }
0x325c   :  { %6452 = vadd.xlane.f32.xlu0 %v6451_v40 }
0x3265   :  { %6679 = vrot.lane.b32.xlu1 %v10999_v6, %s11363_s22 }
0x3284   :  { %v6559_v14 = vpop.xlane.xlu0 %6558 }
0x3285   :  { %v6560_v41 = vsub.f32 %v6551_v22, %v6559_v14 }
0x3287   :  { %v6561_v39 = vmul.f32 1.442695, %v6560_v41 }
0x3289   :  { %9393 = vpow2.f32 %v6561_v39 }
0x3290   :  { %v6669_v51 = vpop.xlane.xlu0 %6668 }
0x3291   :  { %v6670_v44 = vsub.f32 %v6661_v23, %v6669_v51 }
0x3293   :  { %v6671_v13 = vmul.f32 1.442695, %v6670_v44 }
0x3295   :  { %9395 = vpow2.f32 %v6671_v13 }
0x3296   :  { %v11113_v7 = vpop.eup %9393 }
0x3297   :  { %v6563_v18 = vsel %vm166_vm2, %v11113_v7, 0.0 }
0x3298   :  { %v6779_v43 = vpop.xlane.xlu1 %6778  ;;  %6564 = vadd.xlane.f32.xlu1 %v6563_v18 }
0x3299   :  { %v6780_v19 = vsub.f32 %v6771_v16, %v6779_v43 }
0x329b   :  { %v6781_v21 = vmul.f32 1.442695, %v6780_v19 }
0x329d   :  { %9397 = vpow2.f32 %v6781_v21 }
0x32a0   :  { %v6902_v57 = vpop.xlane.xlu0 %6901 }
0x32a1   :  { %v6903_v24 = vsub.f32 %v6894_v52, %v6902_v57 }
0x32a2   :  { %v11117_v25 = vpop.eup %9395 }
0x32a3   :  { %v6904_v22 = vmul.f32 1.442695, %v6903_v24  ;;  %v6673_v26 = vsel %vm166_vm2, %v11117_v25, 0.0 }
0x32a4   :  { %6674 = vadd.xlane.f32.xlu0 %v6673_v26 }
0x32a5   :  { %9399 = vpow2.f32 %v6904_v22 }
0x32a8   :  { %v7012_v37 = vpop.xlane.xlu1 %7011 }
0x32a9   :  { %v7013_v45 = vsub.f32 %v11094_v58, %v7012_v37 }
0x32aa   :  { %v11121_v29 = vpop.eup %9397 }
0x32ab   :  { %v6783_v23 = vsel %vm166_vm2, %v11121_v29, 0.0  ;;  %v7014_v49 = vmul.f32 1.442695, %v7013_v45 }
0x32ac   :  { %6784 = vadd.xlane.f32.xlu1 %v6783_v23  ;;  %v6570_v15 = vpop.permute.xlu1 %6569 }
0x32ad   :  { %v6575_v27 = vsel %vm230_vm3, %v6570_v15, 0 }
0x32b0   :  { %v7122_v17 = vpop.xlane.xlu0 %7121 }
0x32b1   :  { %v7123_v35 = vsub.f32 %v7114_v61, %v7122_v17 }
0x32b2   :  { %v11125_v47 = vpop.eup %9399 }
0x32b3   :  { %v7124_v38 = vmul.f32 1.442695, %v7123_v35  ;;  %v6906_v16 = vsel %vm166_vm2, %v11125_v47, 0.0 }
0x32b4   :  { %v6459_v48 = vpop.permute.xlu0 %6458  ;;  %6907 = vadd.xlane.f32.xlu1 %v6906_v16 }
0x32b5   :  { %9401 = vpow2.f32 %v7124_v38  ;;  %v6464_v30 = vsel %vm230_vm3, %v6459_v48, 0 }
0x32b6   :  { %8892 = vmatpush3.bf16.msra.mxu1 %v6464_v30  ;;  %9403 = vpow2.f32 %v7014_v49 }
0x32b7   :  { %8903 = vmatprep.subr.bf16.mxu1 %v9510_v0 }
0x32ba   :  { %6789 = vrot.lane.b32.xlu0 %v10999_v6, %s11361_s5 }
0x32c2   :  { %v11134_v52 = vpop.eup %9401 }
0x32c3   :  { %v7126_v4 = vsel %vm166_vm2, %v11134_v52, 0.0  ;;  %v11138_v63 = vpop.eup %9403 }
0x32c4   :  { %7127 = vadd.xlane.f32.xlu1 %v7126_v4  ;;  %v7016_v53 = vsel %vm166_vm2, %v11138_v63, 0.0 }
0x32d9   :  { %7017 = vadd.xlane.f32.xlu0 %v7016_v53 }
0x32dd   :  { %v7232_v50 = vpop.xlane.xlu1 %7231 }
0x32de   :  { %v7233_v6 = vsub.f32 %v11099_v3, %v7232_v50 }
0x32e0   :  { %v7234_v59 = vmul.f32 1.442695, %v7233_v6 }
0x32e1   :  { %v6680_v3 = vpop.permute.xlu1 %6679 }
0x32e2   :  { %9405 = vpow2.f32 %v7234_v59  ;;  %v6685_v42 = vsel %vm230_vm3, %v6680_v3, 0 }
0x32e5   :  { %v6453_v58 = vpop.xlane.xlu0 %6452 }
0x32e6   :  { %9407 = vrcp.f32 %v6453_v58 }
0x32ef   :  { %v11143_v20 = vpop.eup %9405  ;;  %7022 = vrot.lane.b32.xlu0 %v11045_v2, %s9514_s21  ;;  %s9525_s21 = smov [#allocation7]  }
0x32f0   :  { %v7236_v61 = vsel %vm166_vm2, %v11143_v20, 0.0  ;;  %s7670_s24 = sshll.u32 %s9525_s21, 4  ;;  %s7671_s24 = int_to_ptr.vmem [resolvable:$true] %s7670_s24 }
0x32f1   :  { %7237 = vadd.xlane.f32.xlu1 %v7236_v61  ;;  %p9485_p11 = scmp.lt.s32.totalorder %s7671_s24, %s7671_s24 }
0x32f3   :  { %v9408_v62 = vpop.eup %9407  ;;  %7132 = vrot.lane.b32.xlu0 %v11045_v2, %s11363_s22 }
0x32f4   :  { %v6455_v1 = vmul.f32 %v9408_v62, %v11107_v60 }
0x32f6   :  { %v6456_v12 = vpack.c.bf16 %v6455_v1, %v6455_v1 }
0x32f7   :  { %7242 = vrot.lane.b32.xlu0 %v11045_v2, %s11361_s5 }
0x32f8   :  { %8894 = vmatmul.mubr.msk.bf16.vlgmr.msra.gmra.mxu1 %vm166_vm2, %v6456_v12 }
0x32f9   :  { %8904 = vmatpush3.bf16.msra.mxu1 %v6575_v27  ;;  %8905 = vmatprep.mubr.msk.bf16.mxu1 %vm9511_vm0, %v9510_v0 }
0x32fa   :  { %8915 = vmatprep.subr.bf16.mxu1 %v9510_v0 }
0x3302   :  { %6912 = vrot.lane.b32.xlu1 %v11045_v2, %s9513_s20 }
0x3321   :  { %v6565_v56 = vpop.xlane.xlu1 %6564 }
0x3322   :  { %9409 = vrcp.f32 %v6565_v56 }
0x332d   :  { %v6675_v8 = vpop.xlane.xlu0 %6674 }
0x332e   :  { %9411 = vrcp.f32 %v6675_v8 }
0x332f   :  { %v9410_v10 = vpop.eup %9409 }
0x3330   :  { %v6567_v9 = vmul.f32 %v9410_v10, %v11113_v7 }
0x3331   :  { %v6790_v40 = vpop.permute.xlu0 %6789 }
0x3332   :  { %v6568_v32 = vpack.c.bf16 %v6567_v9, %v6567_v9  ;;  %v6795_v41 = vsel %vm230_vm3, %v6790_v40, 0 }
0x3334   :  { %8906 = vmatmul.mubr.msk.bf16.vlgmr.msra.gmra.mxu1 %vm166_vm2, %v6568_v32 }
0x3335   :  { %8916 = vmatpush3.bf16.msra.mxu1 %v6685_v42  ;;  %v6785_v5 = vpop.xlane.xlu1 %6784  ;;  %8917 = vmatprep.mubr.msk.bf16.mxu1 %vm9511_vm0, %v9510_v0 }
0x3336   :  { %9413 = vrcp.f32 %v6785_v5  ;;  %8927 = vmatprep.subr.bf16.mxu1 %v9510_v0  ;;  %v9183_v5 = vld [vmem:[%s11319_s12 + $0x18] sm:$0xff]  }
0x3337   :  { %8982 = vmatpush3.bf16.msra.mxu0 %v9183_v5  ;;  %v9188_v5 = vld [vmem:[%s11321_s14 + $0x70] sm:$0xff]  }
0x3338   :  { %8983 = vmatprep.subr.bf16.mxu0 %v9510_v0 }
0x333b   :  { %v9412_v2 = vpop.eup %9411 }
0x333c   :  { %v6677_v60 = vmul.f32 %v9412_v2, %v11117_v25 }
0x333d   :  { %v6908_v13 = vpop.xlane.xlu1 %6907 }
0x333e   :  { %v6678_v14 = vpack.c.bf16 %v6677_v60, %v6677_v60  ;;  %9415 = vrcp.f32 %v6908_v13 }
0x3340   :  { %8918 = vmatmul.mubr.msk.bf16.vlgmr.msra.gmra.mxu1 %vm166_vm2, %v6678_v14 }
0x3341   :  { %8928 = vmatpush3.bf16.msra.mxu1 %v6795_v41  ;;  %8929 = vmatprep.mubr.msk.bf16.mxu1 %vm9511_vm0, %v9510_v0 }
0x3342   :  { %8939 = vmatprep.subr.bf16.mxu1 %v9510_v0 }
0x3343   :  { %v9414_v39 = vpop.eup %9413 }
0x3344   :  { %v6787_v51 = vmul.f32 %v9414_v39, %v11121_v29  ;;  %v9184_v39 = vld [vmem:[%s11319_s12 + $0x10] sm:$0xff]  }
0x3345   :  { %8984 = vmatpush3.bf16.msra.mxu0 %v9184_v39 }
0x3346   :  { %v6788_v44 = vpack.c.bf16 %v6787_v51, %v6787_v51  ;;  %8997 = vmatprep.subr.bf16.mxu0 %v9510_v0 }
0x3348   :  { %8930 = vmatmul.mubr.msk.bf16.vlgmr.msra.gmra.mxu1 %vm166_vm2, %v6788_v44 }
0x3349   :  { %8941 = vmatprep.mubr.msk.bf16.mxu1 %vm9511_vm0, %v9510_v0 }
0x334b   :  { %v9416_v43 = vpop.eup %9415 }
0x334c   :  { %v6910_v21 = vmul.f32 %v9416_v43, %v11125_v47 }
0x334d   :  { %v7128_v18 = vpop.xlane.xlu1 %7127 }
0x334e   :  { %v6911_v22 = vpack.c.bf16 %v6910_v21, %v6910_v21 }
0x3362   :  { %v7018_v7 = vpop.xlane.xlu0 %7017 }
0x3363   :  { %9417 = vrcp.f32 %v7018_v7 }
0x3364   :  { %9419 = vrcp.f32 %v7128_v18 }
0x3366   :  { %v7023_v25 = vpop.permute.xlu0 %7022 }
0x3367   :  { %v7028_v29 = vsel %vm230_vm3, %v7023_v25, 0 }
0x336a   :  { %v7133_v17 = vpop.permute.xlu0 %7132 }
0x336b   :  { %v7138_v38 = vsel %vm230_vm3, %v7133_v17, 0 }
0x336e   :  { %v7243_v48 = vpop.permute.xlu0 %7242 }
0x336f   :  { %v7248_v45 = vsel %vm230_vm3, %v7243_v48, 0 }
0x3370   :  { %v9418_v26 = vpop.eup %9417 }
0x3371   :  { %v7020_v23 = vmul.f32 %v9418_v26, %v11138_v63  ;;  %v9420_v47 = vpop.eup %9419 }
0x3372   :  { %v7130_v16 = vmul.f32 %v9420_v47, %v11134_v52 }
0x3373   :  { %v7021_v35 = vpack.c.bf16 %v7020_v23, %v7020_v23 }
0x3374   :  { %v7131_v30 = vpack.c.bf16 %v7130_v16, %v7130_v16 }
0x337a   :  { %v7238_v19 = vpop.xlane.xlu1 %7237 }
0x337b   :  { %9421 = vrcp.f32 %v7238_v19 }
0x337e   :  { %v6913_v57 = vpop.permute.xlu1 %6912 }
0x337f   :  { %v6918_v24 = vsel %vm230_vm3, %v6913_v57, 0 }
0x3380   :  { %8940 = vmatpush3.bf16.msra.mxu1 %v6918_v24 }
0x3381   :  { %8951 = vmatprep.subr.bf16.mxu1 %v9510_v0 }
0x3383   :  { %8942 = vmatmul.mubr.msk.bf16.vlgmr.msra.gmra.mxu1 %vm166_vm2, %v6911_v22 }
0x3384   :  { %8952 = vmatpush3.bf16.msra.mxu1 %v7028_v29  ;;  %8953 = vmatprep.mubr.msk.bf16.mxu1 %vm9511_vm0, %v9510_v0 }
0x3385   :  { %8963 = vmatprep.subr.bf16.mxu1 %v9510_v0 }
0x3388   :  { %v9422_v37 = vpop.eup %9421 }
0x3389   :  { %v7240_v4 = vmul.f32 %v9422_v37, %v11143_v20 }
0x338b   :  { %8954 = vmatmul.mubr.msk.bf16.vlgmr.msra.gmra.mxu1 %vm166_vm2, %v7021_v35  ;;  %v7241_v49 = vpack.c.bf16 %v7240_v4, %v7240_v4 }
0x338c   :  { %8964 = vmatpush3.bf16.msra.mxu1 %v7138_v38  ;;  %8965 = vmatprep.mubr.msk.bf16.mxu1 %vm9511_vm0, %v9510_v0 }
0x338d   :  { %8975 = vmatprep.subr.bf16.mxu1 %v9510_v0 }
0x3393   :  { %8966 = vmatmul.mubr.msk.bf16.vlgmr.msra.gmra.mxu1 %vm166_vm2, %v7131_v30 }
0x3394   :  { %8976 = vmatpush3.bf16.msra.mxu1 %v7248_v45  ;;  %8977 = vmatprep.mubr.msk.bf16.mxu1 %vm9511_vm0, %v9510_v0 }
0x3395   :  { %8989 = vmatprep.subr.bf16.mxu1 %v9510_v0 }
0x339b   :  { %8978 = vmatmul.mubr.msk.bf16.vlgmr.msra.gmra.mxu1 %vm166_vm2, %v7241_v49  ;;  %v9438_v49 = vld [vmem:[%s11322_s15 + $0x10] sm:$0xff] }
0x339c   :  { %8993 = vmatprep.mubr.msk.bf16.mxu1 %vm9511_vm0, %v9510_v0 }
0x33b8   :  { %v6500_v52 = vpop.f32.mrf.mxu1 }
0x33ba   :  { %v8895_v63 = vpop.f32.mrf.mxu1 }
0x33bc   :  { %v6503_v53 = vpop.f32.mrf.mxu1 }
0x33be   :  { %v8896_v15 = vpop.f32.mrf.mxu1 }
0x33f4   :  { %v6611_v50 = vpop.f32.mrf.mxu1 }
0x33f6   :  { %v8907_v6 = vpop.f32.mrf.mxu1 }
0x33f8   :  { %v6614_v59 = vpop.f32.mrf.mxu1 }
0x33fa   :  { %v8908_v58 = vpop.f32.mrf.mxu1 }
0x3400   :  { %v6721_v61 = vpop.f32.mrf.mxu1 }
0x3402   :  { %v8919_v62 = vpop.f32.mrf.mxu1 }
0x3404   :  { %v6724_v1 = vpop.f32.mrf.mxu1 }
0x3406   :  { %v8920_v20 = vpop.f32.mrf.mxu1 }
0x3408   :  { %v6831_v12 = vpop.f32.mrf.mxu1 }
0x340a   :  { %v8931_v27 = vpop.f32.mrf.mxu1 }
0x340c   :  { %v6834_v3 = vpop.f32.mrf.mxu1 }
0x340e   :  { %v8932_v56 = vpop.f32.mrf.mxu1 }
0x3443   :  { %v6954_v8 = vpop.f32.mrf.mxu1 }
0x3445   :  { %v8943_v10 = vpop.f32.mrf.mxu1 }
0x3447   :  { %v6957_v9 = vpop.f32.mrf.mxu1 }
0x3449   :  { %v8944_v32 = vpop.f32.mrf.mxu1 }
0x344a   :  { %v9186_v32 = vld [vmem:[%s11320_s13 + $0x10] sm:$0xff]  }
0x344b   :  { %v7064_v42 = vpop.f32.mrf.mxu1 }
0x344c   :  { %v9112_v2 = vpack.i.bf16 %v7064_v42, %v6611_v50  ;;  %v9187_v42 = vld [vmem:[%s11321_s14 + $0x78] sm:$0xff]  }
0x344d   :  { %v8955_v60 = vpop.f32.mrf.mxu1 }
0x344e   :  { %9113 = vrot.lane.b32.xlu1 %v9112_v2, %s11356_s28  ;;  %v9189_v2 = vld [vmem:[%s11321_s14 + $0x68] sm:$0xff]   ;;  %v9190_v60 = vld [vmem:[%s11321_s14 + $0x60] sm:$0xff]  }
0x344f   :  { %v7067_v40 = vpop.f32.mrf.mxu1 }
0x3450   :  { %v9191_v40 = vld [vmem:[%s11321_s14 + $0x58] sm:$0xff]  }
0x3451   :  { %v8956_v14 = vpop.f32.mrf.mxu1 }
0x3453   :  { %v7174_v41 = vpop.f32.mrf.mxu1 }
0x3454   :  { %v9117_v51 = vpack.i.bf16 %v7174_v41, %v6721_v61 }
0x3455   :  { %v8967_v44 = vpop.f32.mrf.mxu1 }
0x3456   :  { %9118 = vrot.lane.b32.xlu0 %v9117_v51, %s11357_s0 }
0x3457   :  { %v7177_v13 = vpop.f32.mrf.mxu1 }
0x3459   :  { %v8968_v7 = vpop.f32.mrf.mxu1 }
0x345b   :  { %v7284_v18 = vpop.f32.mrf.mxu1 }
0x345c   :  { %v9122_v43 = vpack.i.bf16 %v7284_v18, %v6831_v12  ;;  %v7397_v18 = vrot.slane %v9438_v49, %v9949_v33  ;;  %v9192_v33 = vld [vmem:[%s11321_s14 + $0x50] sm:$0xff]  }
0x345d   :  { %v8979_v19 = vpop.f32.mrf.mxu1 }
0x345e   :  { %9123 = vrot.lane.b32.xlu1 %v9122_v43, %s11358_s18  ;;  %v11262_v19 = vld [vmem:[%s11322_s15 + $0x18] sm:$0x1f] }
0x345f   :  { %v7287_v21 = vpop.f32.mrf.mxu1 }
0x3461   :  { %v8980_v57 = vpop.f32.mrf.mxu1 }
0x34c0   :  { %v9114_v24 = vpop.permute.xlu1 %9113 }
0x34c1   :  { %v9116_v22 = vunpack.i.h.bf16 %v9114_v24  ;;  %v9115_v26 = vunpack.i.l.bf16 %v9114_v24 }
0x34c3   :  { %v7302_v35 = vsel %vm166_vm2, %v6954_v8, %v9116_v22  ;;  %v6849_v47 = vsel %vm166_vm2, %v6500_v52, %v9115_v26  ;;  %v7309_v52 = vrot.slane %v9438_v49, %v9944_v28 }
0x34c8   :  { %v9119_v25 = vpop.permute.xlu0 %9118 }
0x34c9   :  { %v9121_v29 = vunpack.i.h.bf16 %v9119_v25  ;;  %v9120_v23 = vunpack.i.l.bf16 %v9119_v25  ;;  %v7403_v25 = vrot.slane %v11262_v19, %v9663_v11  ;;  %v9194_v11 = vld [vmem:[%s11321_s14 + $0x40] sm:$0xff]  }
0x34cb   :  { %v7303_v48 = vsel %vm617_vm4, %v7302_v35, %v9121_v29  ;;  %v6850_v30 = vsel %vm617_vm4, %v6849_v47, %v9120_v23  ;;  %v7432_v35 = vrot.slane %v11262_v19, %v9856_v55 }
0x34d0   :  { %v9124_v17 = vpop.permute.xlu1 %9123 }
0x34d1   :  { %v9126_v38 = vunpack.i.h.bf16 %v9124_v17  ;;  %v9125_v16 = vunpack.i.l.bf16 %v9124_v17  ;;  %v9193_v17 = vld [vmem:[%s11321_s14 + $0x48] sm:$0xff]  }
0x34d3   :  { %v7304_v37 = vsel %vm619_vm5, %v7303_v48, %v9126_v38  ;;  %v6851_v45 = vsel %vm619_vm5, %v6850_v30, %v9125_v16 }
0x34d4   :  { %v7305_v4 = vpack.c.bf16 %v7304_v37, %v6851_v45 }
0x34d6   :  { %8986 = vmatmul.mubr.msk.bf16.vlgmr.msra.gmra.mxu0 %vm117_vm1, %v7305_v4 }
0x34d7   :  { %9013 = vmatprep.mubr.msk.bf16.mxu0 %vm9511_vm0, %v9510_v0  ;;  %8998 = vmatpush3.bf16.msra.mxu0 %v9187_v42 }
0x34d8   :  { %8999 = vmatprep.subr.bf16.mxu0 %v9510_v0 }
0x34db   :  { %9000 = vmatpush3.bf16.msra.mxu0 %v9188_v5 }
0x34dc   :  { %9001 = vmatprep.subr.bf16.mxu0 %v9510_v0 }
0x34df   :  { %9002 = vmatpush3.bf16.msra.mxu0 %v9189_v2  ;;  %v7616_v2 = vrot.slane %v11262_v19, %v9900_v34 }
0x34e0   :  { %9003 = vmatprep.subr.bf16.mxu0 %v9510_v0 }
0x34e3   :  { %9004 = vmatpush3.bf16.msra.mxu0 %v9190_v60 }
0x34e4   :  { %9005 = vmatprep.subr.bf16.mxu0 %v9510_v0 }
0x34e7   :  { %9006 = vmatpush3.bf16.msra.mxu0 %v9191_v40 }
0x34e8   :  { %9007 = vmatprep.subr.bf16.mxu0 %v9510_v0 }
0x34eb   :  { %9008 = vmatpush3.bf16.msra.mxu0 %v9192_v33 }
0x34ec   :  { %9009 = vmatprep.subr.bf16.mxu0 %v9510_v0 }
0x34ef   :  { %9010 = vmatpush3.bf16.msra.mxu0 %v9193_v17 }
0x34f0   :  { %9011 = vmatprep.subr.bf16.mxu0 %v9510_v0 }
0x34f3   :  { %9012 = vmatpush3.bf16.msra.mxu0 %v9194_v11 }
0x3596   :  { %v7359_v63 = vpop.f32.mrf.mxu0 }
0x3597   :  { %v7360_v53 = vadd.f32 %v7359_v63, %v7309_v52 }
0x3598   :  { %v8987_v15 = vpop.f32.mrf.mxu0 }
0x3599   :  { %v7366_v50 = vadd.f32 %v7360_v53, %v11017_v54 }
0x359a   :  { %v7362_v6 = vpop.f32.mrf.mxu0 }
0x359b   :  { %v7363_v59 = vadd.f32 %v7362_v6, %v7309_v52  ;;  %v7368_v58 = vsel %vm117_vm1, %v7366_v50, 0.0 }
0x359c   :  { %7369 = vadd.xlane.f32.xlu0 %v7368_v58  ;;  %v8988_v61 = vpop.f32.mrf.mxu0 }
0x359d   :  { %v7367_v62 = vadd.f32 %v7363_v59, %v11019_v36  ;;  %v9185_v36 = vld [vmem:[%s11320_s13 + $0x18] sm:$0xff]  }
0x359e   :  { %8990 = vmatpush3.bf16.msra.mxu1 %v9185_v36 }
0x359f   :  { %v7371_v1 = vsel %vm117_vm1, %v7367_v62, 0.0  ;;  %8991 = vmatprep.subr.bf16.mxu1 %v9510_v0  ;;  %v7495_v0 = vrot.slane %v11262_v19, %v9895_v31 }
0x35a0   :  { %7372 = vadd.xlane.f32.xlu1 %v7371_v1 }
0x35a2   :  { %8992 = vmatpush3.bf16.msra.mxu1 %v9186_v32 }
0x3625   :  { %v7370_v20 = vpop.xlane.xlu0 %7369 }
0x3626   :  { %v7374_v12 = vmul.f32 0.03125, %v7370_v20 }
0x3628   :  { %v7376_v27 = vsub.f32 %v7366_v50, %v7374_v12 }
0x3629   :  { %v7373_v28 = vpop.xlane.xlu1 %7372 }
0x362a   :  { %v7375_v3 = vmul.f32 0.03125, %v7373_v28  ;;  %v7378_v56 = vmul.f32 %v7376_v27, %v7376_v27 }
0x362c   :  { %v7377_v8 = vsub.f32 %v7367_v62, %v7375_v3  ;;  %v7380_v54 = vsel %vm117_vm1, %v7378_v56, 0.0 }
0x362d   :  { %7381 = vadd.xlane.f32.xlu0 %v7380_v54 }
0x362e   :  { %v7379_v10 = vmul.f32 %v7377_v8, %v7377_v8 }
0x3630   :  { %v7383_v9 = vsel %vm117_vm1, %v7379_v10, 0.0 }
0x3631   :  { %7384 = vadd.xlane.f32.xlu0 %v7383_v9 }
0x36b6   :  { %v7382_v14 = vpop.xlane.xlu0 %7381 }
0x36b7   :  { %v7386_v41 = vmul.f32 0.03125, %v7382_v14  ;;  %v7622_v14 = vrot.slane %v11262_v19, %v9920_v46 }
0x36b9   :  { %v7388_v39 = vadd.f32 1e-05, %v7386_v41 }
0x36ba   :  { %v7385_v51 = vpop.xlane.xlu0 %7384 }
0x36bb   :  { %9423 = vrsqrt.f32 %v7388_v39  ;;  %v7387_v44 = vmul.f32 0.03125, %v7385_v51 }
0x36bd   :  { %v7389_v13 = vadd.f32 1e-05, %v7387_v44 }
0x36bf   :  { %9425 = vrsqrt.f32 %v7389_v13 }
0x36c8   :  { %v9424_v7 = vpop.eup %9423 }
0x36c9   :  { %v7392_v43 = vmul.f32 %v9424_v7, %v7376_v27 }
0x36cb   :  { %v7398_v57 = vmul.f32 %v7397_v18, %v7392_v43 }
0x36cc   :  { %v9426_v21 = vpop.eup %9425 }
0x36cd   :  { %v7393_v24 = vmul.f32 %v9426_v21, %v7377_v8  ;;  %v7404_v26 = vadd.f32 %v7403_v25, %v7398_v57 }
0x36cf   :  { %v7399_v22 = vmul.f32 %v7397_v18, %v7393_v24 }
0x36d1   :  { %v7405_v29 = vadd.f32 %v7403_v25, %v7399_v22 }
0x36d3   :  { %v7428_v23 = vpack.c.bf16 %v7405_v29, %v7404_v26 }
0x36d5   :  { %8994 = vmatmul.mubr.msk.bf16.vlgmr.msra.gmra.mxu1 %vm117_vm1, %v7428_v23 }
0x3795   :  { %v7482_v47 = vpop.f32.mrf.mxu1 }
0x3796   :  { %v7483_v16 = vadd.f32 %v7482_v47, %v7432_v35 }
0x3797   :  { %v8995_v38 = vpop.f32.mrf.mxu1 }
0x3798   :  { %v7489_v45 = vmax.f32 %v7483_v16, 0.0  ;;  %v9439_v16 = vld [vmem:[%s11323_s16] sm:$0xf]  ;;  %s9480_s16 = scalar_lea.vmem %s7671_s24, 256 }
0x3799   :  { %v7485_v48 = vpop.f32.mrf.mxu1  ;;  %p9481_p10 = scmp.ne.s32.totalorder %s7671_s24, %s9480_s16  ;;  %p9486_p12 = scmp.lt.s32.totalorder %s9480_s16, %s9480_s16 }
0x379a   :  { %v7486_v30 = vadd.f32 %v7485_v48, %v7432_v35  ;;  %v7654_v48 = vrot.slane %v9439_v16, %v9895_v31 }
0x379b   :  { %v8996_v37 = vpop.f32.mrf.mxu1  ;;  %p9487_p13 = por %p9486_p12, %p9485_p11 }
0x379c   :  { %v7490_v4 = vmax.f32 %v7486_v30, 0.0 }
0x379d   :  { %p9488_p0 = pnand %p9487_p13, %p9481_p10 }
0x379e   :  { %v7491_v49 = vpack.c.bf16 %v7490_v4, %v7489_v45  ;;  %v7660_v45 = vrot.slane %v9439_v16, %v9900_v34 }
0x37a0   :  { %9014 = vmatmul.mubr.bf16.vlgmr.msra.gmra.mxu0 %v7491_v49 }
0x3860   :  { %v7578_v52 = vpop.f32.mrf.mxu0 }
0x3861   :  { %v7579_v63 = vadd.f32 %v7578_v52, %v7495_v0 }
0x3862   :  { %v9015_v53 = vpop.f32.mrf.mxu0 }
0x3863   :  { %v7585_v15 = vadd.f32 %v7579_v63, %v7404_v26 }
0x3864   :  { %v7581_v50 = vpop.f32.mrf.mxu0 }
0x3865   :  { %v7582_v6 = vadd.f32 %v7581_v50, %v7495_v0  ;;  %v7587_v55 = vsel %vm117_vm1, %v7585_v15, 0.0 }
0x3866   :  { %7588 = vadd.xlane.f32.xlu1 %v7587_v55  ;;  %v9016_v59 = vpop.f32.mrf.mxu0 }
0x3867   :  { %v7586_v58 = vadd.f32 %v7582_v6, %v7405_v29 }
0x3869   :  { %v7590_v61 = vsel %vm117_vm1, %v7586_v58, 0.0 }
0x386a   :  { %7591 = vadd.xlane.f32.xlu0 %v7590_v61 }
0x38ef   :  { %v7589_v62 = vpop.xlane.xlu1 %7588 }
0x38f0   :  { %v7593_v1 = vmul.f32 0.03125, %v7589_v62 }
0x38f2   :  { %v7595_v20 = vsub.f32 %v7585_v15, %v7593_v1 }
0x38f3   :  { %v7592_v12 = vpop.xlane.xlu0 %7591 }
0x38f4   :  { %v7594_v27 = vmul.f32 0.03125, %v7592_v12  ;;  %v7597_v28 = vmul.f32 %v7595_v20, %v7595_v20 }
0x38f6   :  { %v7596_v3 = vsub.f32 %v7586_v58, %v7594_v27  ;;  %v7599_v56 = vsel %vm117_vm1, %v7597_v28, 0.0 }
0x38f7   :  { %7600 = vadd.xlane.f32.xlu1 %v7599_v56 }
0x38f8   :  { %v7598_v8 = vmul.f32 %v7596_v3, %v7596_v3 }
0x38fa   :  { %v7602_v54 = vsel %vm117_vm1, %v7598_v8, 0.0 }
0x38fb   :  { %7603 = vadd.xlane.f32.xlu0 %v7602_v54 }
0x3980   :  { %v7601_v10 = vpop.xlane.xlu1 %7600 }
0x3981   :  { %v7605_v9 = vmul.f32 0.03125, %v7601_v10 }
0x3983   :  { %v7607_v36 = vadd.f32 1e-05, %v7605_v9 }
0x3984   :  { %v7604_v32 = vpop.xlane.xlu0 %7603 }
0x3985   :  { %9427 = vrsqrt.f32 %v7607_v36  ;;  %v7606_v42 = vmul.f32 0.03125, %v7604_v32 }
0x3987   :  { %v7608_v5 = vadd.f32 1e-05, %v7606_v42 }
0x3989   :  { %9429 = vrsqrt.f32 %v7608_v5 }
0x3992   :  { %v9428_v60 = vpop.eup %9427 }
0x3993   :  { %v7611_v40 = vmul.f32 %v9428_v60, %v7595_v20 }
0x3995   :  { %v7617_v41 = vmul.f32 %v7616_v2, %v7611_v40 }
0x3996   :  { %v9430_v39 = vpop.eup %9429 }
0x3997   :  { %v7623_v51 = vadd.f32 %v7622_v14, %v7617_v41  ;;  %v7612_v44 = vmul.f32 %v9430_v39, %v7596_v3 }
0x3999   :  { %v7625_v13 = vsel %vm117_vm1, %v7623_v51, 0.0  ;;  %v7618_v7 = vmul.f32 %v7616_v2, %v7612_v44 }
0x399a   :  { %7626 = vadd.xlane.f32.xlu1 %v7625_v13 }
0x399b   :  { %v7624_v18 = vadd.f32 %v7622_v14, %v7618_v7 }
0x399d   :  { %v7628_v43 = vsel %vm117_vm1, %v7624_v18, 0.0 }
0x399e   :  { %7629 = vadd.xlane.f32.xlu0 %v7628_v43 }
0x3a23   :  { %v7627_v21 = vpop.xlane.xlu1 %7626 }
0x3a24   :  { %v7631_v57 = vmul.f32 0.03125, %v7627_v21 }
0x3a26   :  { %v7633_v24 = vsub.f32 %v7623_v51, %v7631_v57 }
0x3a27   :  { %v7630_v25 = vpop.xlane.xlu0 %7629 }
0x3a28   :  { %v7632_v22 = vmul.f32 0.03125, %v7630_v25  ;;  %v7635_v26 = vmul.f32 %v7633_v24, %v7633_v24 }
0x3a2a   :  { %v7634_v29 = vsub.f32 %v7624_v18, %v7632_v22  ;;  %v7637_v46 = vsel %vm117_vm1, %v7635_v26, 0.0 }
0x3a2b   :  { %7638 = vadd.xlane.f32.xlu1 %v7637_v46 }
0x3a2c   :  { %v7636_v19 = vmul.f32 %v7634_v29, %v7634_v29 }
0x3a2e   :  { %v7640_v23 = vsel %vm117_vm1, %v7636_v19, 0.0 }
0x3a2f   :  { %7641 = vadd.xlane.f32.xlu0 %v7640_v23 }
0x3ab4   :  { %v7639_v33 = vpop.xlane.xlu1 %7638 }
0x3ab5   :  { %v7643_v17 = vmul.f32 0.03125, %v7639_v33 }
0x3ab7   :  { %v7645_v11 = vadd.f32 1e-05, %v7643_v17 }
0x3ab8   :  { %v7642_v35 = vpop.xlane.xlu0 %7641 }
0x3ab9   :  { %9431 = vrsqrt.f32 %v7645_v11  ;;  %v7644_v47 = vmul.f32 0.03125, %v7642_v35 }
0x3abb   :  { %v7646_v38 = vadd.f32 1e-05, %v7644_v47 }
0x3abd   :  { %9433 = vrsqrt.f32 %v7646_v38 }
0x3ac6   :  { %v9432_v30 = vpop.eup %9431 }
0x3ac7   :  { %v7649_v37 = vmul.f32 %v9432_v30, %v7633_v24 }
0x3ac9   :  { %v7655_v4 = vmul.f32 %v7654_v48, %v7649_v37 }
0x3aca   :  { %v9434_v49 = vpop.eup %9433 }
0x3acb   :  { %v7650_v0 = vmul.f32 %v9434_v49, %v7634_v29  ;;  %v7661_v52 = vadd.f32 %v7660_v45, %v7655_v4 }
0x3acd   :  { %v7656_v63 = vmul.f32 %v7654_v48, %v7650_v0  ;;  %7663 = vst.msk [vmem:[#allocation7] sm:$0xff] %vm117_vm1, %v7661_v52 }
0x3acf   :  { %v7662_v53 = vadd.f32 %v7660_v45, %v7656_v63 }
0x3ad1   :  { %7664 = vst.msk [vmem:[#allocation7 + $0x8] sm:$0xff] %vm117_vm1, %v7662_v53 }
0x3ad2   :  { %9491 = shalt.err (!%p9488_p0)
}
0x3ad3   :  { %s11364_s12 = smov 128  }
0x3ad4   :  { %7676 = dma.vmem_to_hbm [thread:$0]  %s7671_s24, 256, %s11324_s17, [#allocation4], %s11364_s12, %s11364_s12, %s11356_s28  }
0x3ad5   :  { %9504 = dma.done.wait [#allocation4], 256  }
0x3ad6   :  { %9505 = vsyncadd [#allocation4], 4294967040 }
0x3ad7   :  { %7680 = vsyncpa [#allocation3], 1 }
0x3ad8   :  { %7681 = vsyncpa [#allocation6], 1 }
0x3ad9   :  { %7682 = vsyncpa [#allocation4], 1 }

</bundles_post_ra>
